<compile_context>
chip_gen: v7x
topology: tpu7x:2x2x1
jax: 0.10.0
libtpu: 0.0.40
codegen_flags: <defaults>
</compile_context>

<pallas_src>
import functools

import jax
import jax.numpy as jnp
from jax.experimental import pallas as pl
from jax.experimental.pallas import tpu as pltpu


# ------------------------------ kernel helpers ------------------------------ #

def _masked_shift(x, s, t_lane, L, NL, fill):
    """y[c, p] = x[c, p + s] if 0 <= (p % L) + s < L else fill.

    x is lane-dense (C, N*L) with lane index p = n*L + t.  pltpu.roll wraps
    around, but every wrapped / cross-batch lane is masked to `fill`, so the
    shift never mixes batch elements and reproduces 'same' zero padding."""
    shifted = x if s == 0 else pltpu.roll(x, shift=(-s) % NL, axis=1)
    valid = jnp.logical_and(t_lane + s >= 0, t_lane + s < L)   # (1, NL) bool
    return jnp.where(valid, shifted, fill)


def _batchnorm_rows(z, g, b, nl, eps):
    """Training-mode BatchNorm1d: per-channel biased stats over the NL lanes
    (= all (batch, time) positions).  rsqrt goes to the EUP slot."""
    inv_n = 1.0 / nl
    mean = jnp.sum(z, axis=1, keepdims=True) * inv_n
    zc = z - mean
    var = jnp.sum(zc * zc, axis=1, keepdims=True) * inv_n
    return zc * jax.lax.rsqrt(var + eps) * g + b


def _inception_module(a, wb_ref, wall_ref, g_ref, b_ref,
                      rhs_ref, t_lane, *, L, Cb, Kmax, eps):
    Cm, NL = a.shape
    pad_l = (Kmax - 1) // 2
    neg_inf = jnp.float32(-jnp.inf)

    # bottleneck 1x1 conv: (Cb, Cm) @ (Cm, NL)
    zb = jnp.dot(wb_ref[...], a, preferred_element_type=jnp.float32)

    # im2col of zb for the three branch convs (all padded to Kmax taps)
    for jm in range(Kmax):                       # static, unrolled; XLU rolls
        s = jm - pad_l
        rhs_ref[jm * Cb:(jm + 1) * Cb, :] = _masked_shift(zb, s, t_lane, L, NL, 0.0)

    # MaxPool1d(3, stride=1, padding=1) of the module input -> maxpool slab
    left = _masked_shift(a, -1, t_lane, L, NL, neg_inf)
    right = _masked_shift(a, 1, t_lane, L, NL, neg_inf)
    rhs_ref[Kmax * Cb:Kmax * Cb + Cm, :] = jnp.maximum(jnp.maximum(left, a), right)

    # one MXU matmul -> cat([Z1, Z2, Z3, Z4]) directly, then BN + ReLU epilogue
    z = jnp.dot(wall_ref[...], rhs_ref[...], preferred_element_type=jnp.float32)
    y = _batchnorm_rows(z, g_ref[...], b_ref[...], NL, eps)
    return jnp.maximum(y, 0.0)


def _inception_block_kernel(
        x_ref,
        wb1, wall1, g1, b1,
        wb2, wall2, g2, b2,
        wb3, wall3, g3, b3,
        wres, bres, gres, bbn,
        o_ref, rhs_ref,
        *, L, Cb, Kmax, Cmax, eps):
    x = x_ref[...]
    NL = x.shape[1]

    # lane-position row, computed once for the whole kernel
    t_lane = jax.lax.broadcasted_iota(jnp.int32, (1, NL), 1) % L

    # zero the maxpool slab once: module 1 has fewer input channels than 4F,
    # so its unused pad rows must contribute exactly 0 to the fused matmul.
    rhs_ref[Kmax * Cb:, :] = jnp.zeros((Cmax, NL), jnp.float32)

    mod = functools.partial(_inception_module, rhs_ref=rhs_ref, t_lane=t_lane,
                            L=L, Cb=Cb, Kmax=Kmax, eps=eps)
    y = mod(x, wb1, wall1, g1, b1)
    y = mod(y, wb2, wall2, g2, b2)
    y = mod(y, wb3, wall3, g3, b3)

    # residual branch: Conv1d(k=1, bias=True) + BatchNorm1d, then add + ReLU
    res = jnp.dot(wres[...], x, preferred_element_type=jnp.float32) + bres[...]
    res = _batchnorm_rows(res, gres[...], bbn[...], NL, eps)
    o_ref[...] = jnp.maximum(y + res, 0.0)


# ------------------------------ host wrapper -------------------------------- #

def inception_block_forward(x, params, *, n_filters, bottleneck_channels, kernel_sizes):
    N, Cin, L = x.shape
    NL = N * L
    F, Cb = n_filters, bottleneck_channels
    Kmax = max(kernel_sizes)
    C4 = 4 * F
    Cmax = max(Cin, C4)

    # lane-dense layout: (C, N*L) so the 128-lane axis is fully populated
    x_ld = jnp.transpose(x, (1, 0, 2)).reshape(Cin, NL).astype(jnp.float32)

    args = [x_ld]
    for name in ("inc1", "inc2", "inc3"):
        p = params[name]
        args += [p["wb"], p["wall"], p["g"], p["b"]]
    args += [params["res_w"], params["res_b"], params["res_g"], params["res_bb"]]

    out_ld = pl.pallas_call(
        functools.partial(_inception_block_kernel,
                          L=L, Cb=Cb, Kmax=Kmax, Cmax=Cmax, eps=1e-5),
        out_shape=jax.ShapeDtypeStruct((C4, NL), jnp.float32),
        grid=(1,),
        in_specs=[pl.BlockSpec(a.shape, lambda i: (0, 0)) for a in args],
        out_specs=pl.BlockSpec((C4, NL), lambda i: (0, 0)),
        scratch_shapes=[
            pltpu.VMEM((Kmax * Cb + Cmax, NL), jnp.float32),   # [im2col ; maxpool] RHS
        ],
        compiler_params=pltpu.CompilerParams(dimension_semantics=("arbitrary",)),
    )(*args)

    return jnp.transpose(out_ld.reshape(C4, N, L), (1, 0, 2))


# --------------------------- parameter construction ------------------------- #

def _pack_module_weights(w_branches, wmp, n_filters, Kmax, Cm, Cmax):
    """Pack the 3 branch convs (F, Cb, K_i) and the maxpool 1x1 conv (F, Cm)
    into one (4F, Kmax*Cb + Cmax) matrix so a single matmul against the
    [im2col ; maxpool] RHS yields cat([Z1, Z2, Z3, Z4]).  Each kernel is placed
    (tap-major) so the shared Kmax-wide im2col window reproduces its own
    asymmetric 'same' padding exactly."""
    F = n_filters
    Cb = w_branches[0].shape[1]
    pad_l_max = (Kmax - 1) // 2
    packed = jnp.zeros((3 * F, Kmax, Cb), jnp.float32)
    for i, w in enumerate(w_branches):
        K = w.shape[2]
        off = pad_l_max - (K - 1) // 2
        packed = packed.at[i * F:(i + 1) * F, off:off + K, :].set(
            jnp.transpose(w, (0, 2, 1)))
    wall = jnp.zeros((4 * F, Kmax * Cb + Cmax), jnp.float32)
    wall = wall.at[0:3 * F, 0:Kmax * Cb].set(packed.reshape(3 * F, Kmax * Cb))
    wall = wall.at[3 * F:, Kmax * Cb:Kmax * Cb + Cm].set(wmp)
    return wall


def init_inception_params(key, in_channels, n_filters, bottleneck_channels,
                          kernel_sizes, out_channels_max):
    F, Cb = n_filters, bottleneck_channels
    Kmax = max(kernel_sizes)
    ks = jax.random.split(key, 5)
    s = 0.1
    wb = s * jax.random.normal(ks[0], (Cb, in_channels), jnp.float32)      # 1x1 bottleneck
    w1 = s * jax.random.normal(ks[1], (F, Cb, kernel_sizes[0]), jnp.float32)
    w2 = s * jax.random.normal(ks[2], (F, Cb, kernel_sizes[1]), jnp.float32)
    w3 = s * jax.random.normal(ks[3], (F, Cb, kernel_sizes[2]), jnp.float32)
    wmp = s * jax.random.normal(ks[4], (F, in_channels), jnp.float32)      # 1x1 maxpool conv
    return {
        "wb": wb,
        "wall": _pack_module_weights([w1, w2, w3], wmp, F, Kmax,
                                     in_channels, out_channels_max),
        "g": jnp.ones((4 * F, 1), jnp.float32),
        "b": jnp.zeros((4 * F, 1), jnp.float32),
    }


def init_block_params(key, in_channels, n_filters, bottleneck_channels, kernel_sizes):
    F = n_filters
    C4 = 4 * F
    Cmax = max(in_channels, C4)
    k1, k2, k3, k4, k5 = jax.random.split(key, 5)
    return {
        "inc1": init_inception_params(k1, in_channels, F, bottleneck_channels,
                                      kernel_sizes, Cmax),
        "inc2": init_inception_params(k2, C4, F, bottleneck_channels,
                                      kernel_sizes, Cmax),
        "inc3": init_inception_params(k3, C4, F, bottleneck_channels,
                                      kernel_sizes, Cmax),
        "res_w": 0.1 * jax.random.normal(k4, (C4, in_channels), jnp.float32),
        "res_b": 0.1 * jax.random.normal(k5, (C4, 1), jnp.float32),
        "res_g": jnp.ones((C4, 1), jnp.float32),
        "res_bb": jnp.zeros((C4, 1), jnp.float32),
    }


# ---------------------------------- main ------------------------------------ #

if __name__ == "__main__":
    in_channels, n_filters, bottleneck_channels = 4, 8, 8
    kernel_sizes = (10, 20, 40)
    N, L = 2, 64   # N * L = 128 -> fully lane-dense activations

    key = jax.random.PRNGKey(0)
    kx, kp = jax.random.split(key)
    x = jax.random.normal(kx, (N, in_channels, L), jnp.float32)
    params = init_block_params(kp, in_channels, n_filters, bottleneck_channels, kernel_sizes)

    fwd = jax.jit(functools.partial(
        inception_block_forward,
        n_filters=n_filters,
        bottleneck_channels=bottleneck_channels,
        kernel_sizes=kernel_sizes))

    out = jax.block_until_ready(fwd(x, params))
    assert out.shape == (N, 4 * n_filters, L)
    assert bool(jnp.all(jnp.isfinite(out)))
    print("KERNEL_OK")
</pallas_src>

<mosaic_0001>
module attributes {stable_mosaic.version = 11 : i64} {
  func.func @_inception_block_kernel(%arg0: i32, %arg1: memref<4x128xf32, #tpu.memory_space<vmem>>, %arg2: memref<8x4xf32, #tpu.memory_space<vmem>>, %arg3: memref<32x352xf32, #tpu.memory_space<vmem>>, %arg4: memref<32x1xf32, #tpu.memory_space<vmem>>, %arg5: memref<32x1xf32, #tpu.memory_space<vmem>>, %arg6: memref<8x32xf32, #tpu.memory_space<vmem>>, %arg7: memref<32x352xf32, #tpu.memory_space<vmem>>, %arg8: memref<32x1xf32, #tpu.memory_space<vmem>>, %arg9: memref<32x1xf32, #tpu.memory_space<vmem>>, %arg10: memref<8x32xf32, #tpu.memory_space<vmem>>, %arg11: memref<32x352xf32, #tpu.memory_space<vmem>>, %arg12: memref<32x1xf32, #tpu.memory_space<vmem>>, %arg13: memref<32x1xf32, #tpu.memory_space<vmem>>, %arg14: memref<32x4xf32, #tpu.memory_space<vmem>>, %arg15: memref<32x1xf32, #tpu.memory_space<vmem>>, %arg16: memref<32x1xf32, #tpu.memory_space<vmem>>, %arg17: memref<32x1xf32, #tpu.memory_space<vmem>>, %arg18: memref<32x128xf32, #tpu.memory_space<vmem>>, %arg19: memref<352x128xf32, #tpu.memory_space<vmem>>) attributes {dimension_semantics = [#tpu.dimension_semantics<arbitrary>], iteration_bounds = array<i64: 1>, scalar_prefetch = 0 : i64, scratch_operands = 1 : i64, tpu.core_type = #tpu.core_type<tc>, window_params = [{pipeline_mode = #tpu.pipeline_mode<synchronous>, transform_indices = @transform_0, window_bounds = array<i64: 4, 128>}, {pipeline_mode = #tpu.pipeline_mode<synchronous>, transform_indices = @transform_1, window_bounds = array<i64: 8, 4>}, {pipeline_mode = #tpu.pipeline_mode<synchronous>, transform_indices = @transform_2, window_bounds = array<i64: 32, 352>}, {pipeline_mode = #tpu.pipeline_mode<synchronous>, transform_indices = @transform_3, window_bounds = array<i64: 32, 1>}, {pipeline_mode = #tpu.pipeline_mode<synchronous>, transform_indices = @transform_4, window_bounds = array<i64: 32, 1>}, {pipeline_mode = #tpu.pipeline_mode<synchronous>, transform_indices = @transform_5, window_bounds = array<i64: 8, 32>}, {pipeline_mode = #tpu.pipeline_mode<synchronous>, transform_indices = @transform_6, window_bounds = array<i64: 32, 352>}, {pipeline_mode = #tpu.pipeline_mode<synchronous>, transform_indices = @transform_7, window_bounds = array<i64: 32, 1>}, {pipeline_mode = #tpu.pipeline_mode<synchronous>, transform_indices = @transform_8, window_bounds = array<i64: 32, 1>}, {pipeline_mode = #tpu.pipeline_mode<synchronous>, transform_indices = @transform_9, window_bounds = array<i64: 8, 32>}, {pipeline_mode = #tpu.pipeline_mode<synchronous>, transform_indices = @transform_10, window_bounds = array<i64: 32, 352>}, {pipeline_mode = #tpu.pipeline_mode<synchronous>, transform_indices = @transform_11, window_bounds = array<i64: 32, 1>}, {pipeline_mode = #tpu.pipeline_mode<synchronous>, transform_indices = @transform_12, window_bounds = array<i64: 32, 1>}, {pipeline_mode = #tpu.pipeline_mode<synchronous>, transform_indices = @transform_13, window_bounds = array<i64: 32, 4>}, {pipeline_mode = #tpu.pipeline_mode<synchronous>, transform_indices = @transform_14, window_bounds = array<i64: 32, 1>}, {pipeline_mode = #tpu.pipeline_mode<synchronous>, transform_indices = @transform_15, window_bounds = array<i64: 32, 1>}, {pipeline_mode = #tpu.pipeline_mode<synchronous>, transform_indices = @transform_16, window_bounds = array<i64: 32, 1>}, {pipeline_mode = #tpu.pipeline_mode<synchronous>, transform_indices = @transform_17, window_bounds = array<i64: 32, 128>}]} {
    %c0 = arith.constant 0 : index
    %c0_0 = arith.constant 0 : index
    %0 = vector.load %arg1[%c0, %c0_0] : memref<4x128xf32, #tpu.memory_space<vmem>>, vector<4x128xf32>
    %1 = tpu.iota {dimensions = array<i32: 1>} : vector<1x128xi32>
    %c64_i32 = arith.constant 64 : i32
    %c0_i32 = arith.constant 0 : i32
    %2 = arith.cmpi eq, %c64_i32, %c0_i32 : i32
    %c1_i32 = arith.constant 1 : i32
    %3 = arith.select %2, %c1_i32, %c64_i32 : i32
    %4 = vector.broadcast %3 : i32 to vector<1x128xi32>
    %5 = arith.remsi %1, %4 : vector<1x128xi32>
    %c0_i32_1 = arith.constant 0 : i32
    %6 = vector.broadcast %c0_i32_1 : i32 to vector<1x128xi32>
    %7 = arith.cmpi ne, %5, %6 : vector<1x128xi32>
    %c0_i32_2 = arith.constant 0 : i32
    %8 = vector.broadcast %c0_i32_2 : i32 to vector<1x128xi32>
    %9 = arith.cmpi slt, %5, %8 : vector<1x128xi32>
    %c0_i32_3 = arith.constant 0 : i32
    %10 = arith.cmpi slt, %3, %c0_i32_3 : i32
    %11 = vector.broadcast %10 : i1 to vector<1x128xi1>
    %12 = vector.broadcast %11 : vector<1x128xi1> to vector<1x128xi1>
    %13 = arith.xori %9, %12 : vector<1x128xi1>
    %14 = arith.andi %13, %7 : vector<1x128xi1>
    %15 = vector.broadcast %3 : i32 to vector<1x128xi32>
    %16 = arith.addi %5, %15 : vector<1x128xi32>
    %17 = arith.select %14, %16, %5 : vector<1x128xi1>, vector<1x128xi32>
    %cst = arith.constant 0.000000e+00 : f32
    %18 = vector.broadcast %cst : f32 to vector<32x128xf32>
    %c320 = arith.constant 320 : index
    %c0_4 = arith.constant 0 : index
    %19 = vector.load %arg19[%c320, %c0_4] : memref<352x128xf32, #tpu.memory_space<vmem>>, vector<32x128xf32>
    tpu.vector_store %arg19[%c320, %c0_4], %18 {strides = array<i32>} : memref<352x128xf32, #tpu.memory_space<vmem>>, vector<32x128xf32>,
    %c0_5 = arith.constant 0 : index
    %c0_6 = arith.constant 0 : index
    %20 = vector.load %arg2[%c0_5, %c0_6] : memref<8x4xf32, #tpu.memory_space<vmem>>, vector<8x4xf32>
    %cst_7 = arith.constant dense<0.000000e+00> : vector<8x128xf32>
    %21 = tpu.matmul %20, %0, %cst_7 {dimension_numbers = #tpu.dot_dimension_numbers<[1], [0], [0], [1], [0, 0, 1, 1], [], []>} : vector<8x4xf32>, vector<4x128xf32>, vector<8x128xf32> -> vector<8x128xf32>
    %c19_i32 = arith.constant 19 : i32
    %22 = tpu.dynamic_rotate %21 by %c19_i32 dim 1 : vector<8x128xf32>, i32 -> vector<8x128xf32>
    %c-19_i32 = arith.constant -19 : i32
    %23 = vector.broadcast %c-19_i32 : i32 to vector<1x128xi32>
    %24 = arith.addi %17, %23 : vector<1x128xi32>
    %c0_i32_8 = arith.constant 0 : i32
    %25 = vector.broadcast %c0_i32_8 : i32 to vector<1x128xi32>
    %26 = arith.cmpi sge, %24, %25 : vector<1x128xi32>
    %c-19_i32_9 = arith.constant -19 : i32
    %27 = vector.broadcast %c-19_i32_9 : i32 to vector<1x128xi32>
    %28 = arith.addi %17, %27 : vector<1x128xi32>
    %c64_i32_10 = arith.constant 64 : i32
    %29 = vector.broadcast %c64_i32_10 : i32 to vector<1x128xi32>
    %30 = arith.cmpi slt, %28, %29 : vector<1x128xi32>
    %31 = arith.andi %26, %30 : vector<1x128xi1>
    %cst_11 = arith.constant 0.000000e+00 : f32
    %32 = vector.shape_cast %31 : vector<1x128xi1> to vector<1x128xi1>
    %33 = vector.broadcast %32 : vector<1x128xi1> to vector<8x128xi1>
    %34 = vector.broadcast %cst_11 : f32 to vector<8x128xf32>
    %35 = arith.select %33, %22, %34 : vector<8x128xi1>, vector<8x128xf32>
    %c0_12 = arith.constant 0 : index
    %c0_13 = arith.constant 0 : index
    %36 = vector.load %arg19[%c0_12, %c0_13] : memref<352x128xf32, #tpu.memory_space<vmem>>, vector<8x128xf32>
    tpu.vector_store %arg19[%c0_12, %c0_13], %35 {strides = array<i32>} : memref<352x128xf32, #tpu.memory_space<vmem>>, vector<8x128xf32>,
    %c18_i32 = arith.constant 18 : i32
    %37 = tpu.dynamic_rotate %21 by %c18_i32 dim 1 : vector<8x128xf32>, i32 -> vector<8x128xf32>
    %c-18_i32 = arith.constant -18 : i32
    %38 = vector.broadcast %c-18_i32 : i32 to vector<1x128xi32>
    %39 = arith.addi %17, %38 : vector<1x128xi32>
    %c0_i32_14 = arith.constant 0 : i32
    %40 = vector.broadcast %c0_i32_14 : i32 to vector<1x128xi32>
    %41 = arith.cmpi sge, %39, %40 : vector<1x128xi32>
    %c-18_i32_15 = arith.constant -18 : i32
    %42 = vector.broadcast %c-18_i32_15 : i32 to vector<1x128xi32>
    %43 = arith.addi %17, %42 : vector<1x128xi32>
    %c64_i32_16 = arith.constant 64 : i32
    %44 = vector.broadcast %c64_i32_16 : i32 to vector<1x128xi32>
    %45 = arith.cmpi slt, %43, %44 : vector<1x128xi32>
    %46 = arith.andi %41, %45 : vector<1x128xi1>
    %cst_17 = arith.constant 0.000000e+00 : f32
    %47 = vector.shape_cast %46 : vector<1x128xi1> to vector<1x128xi1>
    %48 = vector.broadcast %47 : vector<1x128xi1> to vector<8x128xi1>
    %49 = vector.broadcast %cst_17 : f32 to vector<8x128xf32>
    %50 = arith.select %48, %37, %49 : vector<8x128xi1>, vector<8x128xf32>
    %c8 = arith.constant 8 : index
    %c0_18 = arith.constant 0 : index
    %51 = vector.load %arg19[%c8, %c0_18] : memref<352x128xf32, #tpu.memory_space<vmem>>, vector<8x128xf32>
    tpu.vector_store %arg19[%c8, %c0_18], %50 {strides = array<i32>} : memref<352x128xf32, #tpu.memory_space<vmem>>, vector<8x128xf32>,
    %c17_i32 = arith.constant 17 : i32
    %52 = tpu.dynamic_rotate %21 by %c17_i32 dim 1 : vector<8x128xf32>, i32 -> vector<8x128xf32>
    %c-17_i32 = arith.constant -17 : i32
    %53 = vector.broadcast %c-17_i32 : i32 to vector<1x128xi32>
    %54 = arith.addi %17, %53 : vector<1x128xi32>
    %c0_i32_19 = arith.constant 0 : i32
    %55 = vector.broadcast %c0_i32_19 : i32 to vector<1x128xi32>
    %56 = arith.cmpi sge, %54, %55 : vector<1x128xi32>
    %c-17_i32_20 = arith.constant -17 : i32
    %57 = vector.broadcast %c-17_i32_20 : i32 to vector<1x128xi32>
    %58 = arith.addi %17, %57 : vector<1x128xi32>
    %c64_i32_21 = arith.constant 64 : i32
    %59 = vector.broadcast %c64_i32_21 : i32 to vector<1x128xi32>
    %60 = arith.cmpi slt, %58, %59 : vector<1x128xi32>
    %61 = arith.andi %56, %60 : vector<1x128xi1>
    %cst_22 = arith.constant 0.000000e+00 : f32
    %62 = vector.shape_cast %61 : vector<1x128xi1> to vector<1x128xi1>
    %63 = vector.broadcast %62 : vector<1x128xi1> to vector<8x128xi1>
    %64 = vector.broadcast %cst_22 : f32 to vector<8x128xf32>
    %65 = arith.select %63, %52, %64 : vector<8x128xi1>, vector<8x128xf32>
    %c16 = arith.constant 16 : index
    %c0_23 = arith.constant 0 : index
    %66 = vector.load %arg19[%c16, %c0_23] : memref<352x128xf32, #tpu.memory_space<vmem>>, vector<8x128xf32>
    tpu.vector_store %arg19[%c16, %c0_23], %65 {strides = array<i32>} : memref<352x128xf32, #tpu.memory_space<vmem>>, vector<8x128xf32>,
    %c16_i32 = arith.constant 16 : i32
    %67 = tpu.dynamic_rotate %21 by %c16_i32 dim 1 : vector<8x128xf32>, i32 -> vector<8x128xf32>
    %c-16_i32 = arith.constant -16 : i32
    %68 = vector.broadcast %c-16_i32 : i32 to vector<1x128xi32>
    %69 = arith.addi %17, %68 : vector<1x128xi32>
    %c0_i32_24 = arith.constant 0 : i32
    %70 = vector.broadcast %c0_i32_24 : i32 to vector<1x128xi32>
    %71 = arith.cmpi sge, %69, %70 : vector<1x128xi32>
    %c-16_i32_25 = arith.constant -16 : i32
    %72 = vector.broadcast %c-16_i32_25 : i32 to vector<1x128xi32>
    %73 = arith.addi %17, %72 : vector<1x128xi32>
    %c64_i32_26 = arith.constant 64 : i32
    %74 = vector.broadcast %c64_i32_26 : i32 to vector<1x128xi32>
    %75 = arith.cmpi slt, %73, %74 : vector<1x128xi32>
    %76 = arith.andi %71, %75 : vector<1x128xi1>
    %cst_27 = arith.constant 0.000000e+00 : f32
    %77 = vector.shape_cast %76 : vector<1x128xi1> to vector<1x128xi1>
    %78 = vector.broadcast %77 : vector<1x128xi1> to vector<8x128xi1>
    %79 = vector.broadcast %cst_27 : f32 to vector<8x128xf32>
    %80 = arith.select %78, %67, %79 : vector<8x128xi1>, vector<8x128xf32>
    %c24 = arith.constant 24 : index
    %c0_28 = arith.constant 0 : index
    %81 = vector.load %arg19[%c24, %c0_28] : memref<352x128xf32, #tpu.memory_space<vmem>>, vector<8x128xf32>
    tpu.vector_store %arg19[%c24, %c0_28], %80 {strides = array<i32>} : memref<352x128xf32, #tpu.memory_space<vmem>>, vector<8x128xf32>,
    %c15_i32 = arith.constant 15 : i32
    %82 = tpu.dynamic_rotate %21 by %c15_i32 dim 1 : vector<8x128xf32>, i32 -> vector<8x128xf32>
    %c-15_i32 = arith.constant -15 : i32
    %83 = vector.broadcast %c-15_i32 : i32 to vector<1x128xi32>
    %84 = arith.addi %17, %83 : vector<1x128xi32>
    %c0_i32_29 = arith.constant 0 : i32
    %85 = vector.broadcast %c0_i32_29 : i32 to vector<1x128xi32>
    %86 = arith.cmpi sge, %84, %85 : vector<1x128xi32>
    %c-15_i32_30 = arith.constant -15 : i32
    %87 = vector.broadcast %c-15_i32_30 : i32 to vector<1x128xi32>
    %88 = arith.addi %17, %87 : vector<1x128xi32>
    %c64_i32_31 = arith.constant 64 : i32
    %89 = vector.broadcast %c64_i32_31 : i32 to vector<1x128xi32>
    %90 = arith.cmpi slt, %88, %89 : vector<1x128xi32>
    %91 = arith.andi %86, %90 : vector<1x128xi1>
    %cst_32 = arith.constant 0.000000e+00 : f32
    %92 = vector.shape_cast %91 : vector<1x128xi1> to vector<1x128xi1>
    %93 = vector.broadcast %92 : vector<1x128xi1> to vector<8x128xi1>
    %94 = vector.broadcast %cst_32 : f32 to vector<8x128xf32>
    %95 = arith.select %93, %82, %94 : vector<8x128xi1>, vector<8x128xf32>
    %c32 = arith.constant 32 : index
    %c0_33 = arith.constant 0 : index
    %96 = vector.load %arg19[%c32, %c0_33] : memref<352x128xf32, #tpu.memory_space<vmem>>, vector<8x128xf32>
    tpu.vector_store %arg19[%c32, %c0_33], %95 {strides = array<i32>} : memref<352x128xf32, #tpu.memory_space<vmem>>, vector<8x128xf32>,
    %c14_i32 = arith.constant 14 : i32
    %97 = tpu.dynamic_rotate %21 by %c14_i32 dim 1 : vector<8x128xf32>, i32 -> vector<8x128xf32>
    %c-14_i32 = arith.constant -14 : i32
    %98 = vector.broadcast %c-14_i32 : i32 to vector<1x128xi32>
    %99 = arith.addi %17, %98 : vector<1x128xi32>
    %c0_i32_34 = arith.constant 0 : i32
    %100 = vector.broadcast %c0_i32_34 : i32 to vector<1x128xi32>
    %101 = arith.cmpi sge, %99, %100 : vector<1x128xi32>
    %c-14_i32_35 = arith.constant -14 : i32
    %102 = vector.broadcast %c-14_i32_35 : i32 to vector<1x128xi32>
    %103 = arith.addi %17, %102 : vector<1x128xi32>
    %c64_i32_36 = arith.constant 64 : i32
    %104 = vector.broadcast %c64_i32_36 : i32 to vector<1x128xi32>
    %105 = arith.cmpi slt, %103, %104 : vector<1x128xi32>
    %106 = arith.andi %101, %105 : vector<1x128xi1>
    %cst_37 = arith.constant 0.000000e+00 : f32
    %107 = vector.shape_cast %106 : vector<1x128xi1> to vector<1x128xi1>
    %108 = vector.broadcast %107 : vector<1x128xi1> to vector<8x128xi1>
    %109 = vector.broadcast %cst_37 : f32 to vector<8x128xf32>
    %110 = arith.select %108, %97, %109 : vector<8x128xi1>, vector<8x128xf32>
    %c40 = arith.constant 40 : index
    %c0_38 = arith.constant 0 : index
    %111 = vector.load %arg19[%c40, %c0_38] : memref<352x128xf32, #tpu.memory_space<vmem>>, vector<8x128xf32>
    tpu.vector_store %arg19[%c40, %c0_38], %110 {strides = array<i32>} : memref<352x128xf32, #tpu.memory_space<vmem>>, vector<8x128xf32>,
    %c13_i32 = arith.constant 13 : i32
    %112 = tpu.dynamic_rotate %21 by %c13_i32 dim 1 : vector<8x128xf32>, i32 -> vector<8x128xf32>
    %c-13_i32 = arith.constant -13 : i32
    %113 = vector.broadcast %c-13_i32 : i32 to vector<1x128xi32>
    %114 = arith.addi %17, %113 : vector<1x128xi32>
    %c0_i32_39 = arith.constant 0 : i32
    %115 = vector.broadcast %c0_i32_39 : i32 to vector<1x128xi32>
    %116 = arith.cmpi sge, %114, %115 : vector<1x128xi32>
    %c-13_i32_40 = arith.constant -13 : i32
    %117 = vector.broadcast %c-13_i32_40 : i32 to vector<1x128xi32>
    %118 = arith.addi %17, %117 : vector<1x128xi32>
    %c64_i32_41 = arith.constant 64 : i32
    %119 = vector.broadcast %c64_i32_41 : i32 to vector<1x128xi32>
    %120 = arith.cmpi slt, %118, %119 : vector<1x128xi32>
    %121 = arith.andi %116, %120 : vector<1x128xi1>
    %cst_42 = arith.constant 0.000000e+00 : f32
    %122 = vector.shape_cast %121 : vector<1x128xi1> to vector<1x128xi1>
    %123 = vector.broadcast %122 : vector<1x128xi1> to vector<8x128xi1>
    %124 = vector.broadcast %cst_42 : f32 to vector<8x128xf32>
    %125 = arith.select %123, %112, %124 : vector<8x128xi1>, vector<8x128xf32>
    %c48 = arith.constant 48 : index
    %c0_43 = arith.constant 0 : index
    %126 = vector.load %arg19[%c48, %c0_43] : memref<352x128xf32, #tpu.memory_space<vmem>>, vector<8x128xf32>
    tpu.vector_store %arg19[%c48, %c0_43], %125 {strides = array<i32>} : memref<352x128xf32, #tpu.memory_space<vmem>>, vector<8x128xf32>,
    %c12_i32 = arith.constant 12 : i32
    %127 = tpu.dynamic_rotate %21 by %c12_i32 dim 1 : vector<8x128xf32>, i32 -> vector<8x128xf32>
    %c-12_i32 = arith.constant -12 : i32
    %128 = vector.broadcast %c-12_i32 : i32 to vector<1x128xi32>
    %129 = arith.addi %17, %128 : vector<1x128xi32>
    %c0_i32_44 = arith.constant 0 : i32
    %130 = vector.broadcast %c0_i32_44 : i32 to vector<1x128xi32>
    %131 = arith.cmpi sge, %129, %130 : vector<1x128xi32>
    %c-12_i32_45 = arith.constant -12 : i32
    %132 = vector.broadcast %c-12_i32_45 : i32 to vector<1x128xi32>
    %133 = arith.addi %17, %132 : vector<1x128xi32>
    %c64_i32_46 = arith.constant 64 : i32
    %134 = vector.broadcast %c64_i32_46 : i32 to vector<1x128xi32>
    %135 = arith.cmpi slt, %133, %134 : vector<1x128xi32>
    %136 = arith.andi %131, %135 : vector<1x128xi1>
    %cst_47 = arith.constant 0.000000e+00 : f32
    %137 = vector.shape_cast %136 : vector<1x128xi1> to vector<1x128xi1>
    %138 = vector.broadcast %137 : vector<1x128xi1> to vector<8x128xi1>
    %139 = vector.broadcast %cst_47 : f32 to vector<8x128xf32>
    %140 = arith.select %138, %127, %139 : vector<8x128xi1>, vector<8x128xf32>
    %c56 = arith.constant 56 : index
    %c0_48 = arith.constant 0 : index
    %141 = vector.load %arg19[%c56, %c0_48] : memref<352x128xf32, #tpu.memory_space<vmem>>, vector<8x128xf32>
    tpu.vector_store %arg19[%c56, %c0_48], %140 {strides = array<i32>} : memref<352x128xf32, #tpu.memory_space<vmem>>, vector<8x128xf32>,
    %c11_i32 = arith.constant 11 : i32
    %142 = tpu.dynamic_rotate %21 by %c11_i32 dim 1 : vector<8x128xf32>, i32 -> vector<8x128xf32>
    %c-11_i32 = arith.constant -11 : i32
    %143 = vector.broadcast %c-11_i32 : i32 to vector<1x128xi32>
    %144 = arith.addi %17, %143 : vector<1x128xi32>
    %c0_i32_49 = arith.constant 0 : i32
    %145 = vector.broadcast %c0_i32_49 : i32 to vector<1x128xi32>
    %146 = arith.cmpi sge, %144, %145 : vector<1x128xi32>
    %c-11_i32_50 = arith.constant -11 : i32
    %147 = vector.broadcast %c-11_i32_50 : i32 to vector<1x128xi32>
    %148 = arith.addi %17, %147 : vector<1x128xi32>
    %c64_i32_51 = arith.constant 64 : i32
    %149 = vector.broadcast %c64_i32_51 : i32 to vector<1x128xi32>
    %150 = arith.cmpi slt, %148, %149 : vector<1x128xi32>
    %151 = arith.andi %146, %150 : vector<1x128xi1>
    %cst_52 = arith.constant 0.000000e+00 : f32
    %152 = vector.shape_cast %151 : vector<1x128xi1> to vector<1x128xi1>
    %153 = vector.broadcast %152 : vector<1x128xi1> to vector<8x128xi1>
    %154 = vector.broadcast %cst_52 : f32 to vector<8x128xf32>
    %155 = arith.select %153, %142, %154 : vector<8x128xi1>, vector<8x128xf32>
    %c64 = arith.constant 64 : index
    %c0_53 = arith.constant 0 : index
    %156 = vector.load %arg19[%c64, %c0_53] : memref<352x128xf32, #tpu.memory_space<vmem>>, vector<8x128xf32>
    tpu.vector_store %arg19[%c64, %c0_53], %155 {strides = array<i32>} : memref<352x128xf32, #tpu.memory_space<vmem>>, vector<8x128xf32>,
    %c10_i32 = arith.constant 10 : i32
    %157 = tpu.dynamic_rotate %21 by %c10_i32 dim 1 : vector<8x128xf32>, i32 -> vector<8x128xf32>
    %c-10_i32 = arith.constant -10 : i32
    %158 = vector.broadcast %c-10_i32 : i32 to vector<1x128xi32>
    %159 = arith.addi %17, %158 : vector<1x128xi32>
    %c0_i32_54 = arith.constant 0 : i32
    %160 = vector.broadcast %c0_i32_54 : i32 to vector<1x128xi32>
    %161 = arith.cmpi sge, %159, %160 : vector<1x128xi32>
    %c-10_i32_55 = arith.constant -10 : i32
    %162 = vector.broadcast %c-10_i32_55 : i32 to vector<1x128xi32>
    %163 = arith.addi %17, %162 : vector<1x128xi32>
    %c64_i32_56 = arith.constant 64 : i32
    %164 = vector.broadcast %c64_i32_56 : i32 to vector<1x128xi32>
    %165 = arith.cmpi slt, %163, %164 : vector<1x128xi32>
    %166 = arith.andi %161, %165 : vector<1x128xi1>
    %cst_57 = arith.constant 0.000000e+00 : f32
    %167 = vector.shape_cast %166 : vector<1x128xi1> to vector<1x128xi1>
    %168 = vector.broadcast %167 : vector<1x128xi1> to vector<8x128xi1>
    %169 = vector.broadcast %cst_57 : f32 to vector<8x128xf32>
    %170 = arith.select %168, %157, %169 : vector<8x128xi1>, vector<8x128xf32>
    %c72 = arith.constant 72 : index
    %c0_58 = arith.constant 0 : index
    %171 = vector.load %arg19[%c72, %c0_58] : memref<352x128xf32, #tpu.memory_space<vmem>>, vector<8x128xf32>
    tpu.vector_store %arg19[%c72, %c0_58], %170 {strides = array<i32>} : memref<352x128xf32, #tpu.memory_space<vmem>>, vector<8x128xf32>,
    %c9_i32 = arith.constant 9 : i32
    %172 = tpu.dynamic_rotate %21 by %c9_i32 dim 1 : vector<8x128xf32>, i32 -> vector<8x128xf32>
    %c-9_i32 = arith.constant -9 : i32
    %173 = vector.broadcast %c-9_i32 : i32 to vector<1x128xi32>
    %174 = arith.addi %17, %173 : vector<1x128xi32>
    %c0_i32_59 = arith.constant 0 : i32
    %175 = vector.broadcast %c0_i32_59 : i32 to vector<1x128xi32>
    %176 = arith.cmpi sge, %174, %175 : vector<1x128xi32>
    %c-9_i32_60 = arith.constant -9 : i32
    %177 = vector.broadcast %c-9_i32_60 : i32 to vector<1x128xi32>
    %178 = arith.addi %17, %177 : vector<1x128xi32>
    %c64_i32_61 = arith.constant 64 : i32
    %179 = vector.broadcast %c64_i32_61 : i32 to vector<1x128xi32>
    %180 = arith.cmpi slt, %178, %179 : vector<1x128xi32>
    %181 = arith.andi %176, %180 : vector<1x128xi1>
    %cst_62 = arith.constant 0.000000e+00 : f32
    %182 = vector.shape_cast %181 : vector<1x128xi1> to vector<1x128xi1>
    %183 = vector.broadcast %182 : vector<1x128xi1> to vector<8x128xi1>
    %184 = vector.broadcast %cst_62 : f32 to vector<8x128xf32>
    %185 = arith.select %183, %172, %184 : vector<8x128xi1>, vector<8x128xf32>
    %c80 = arith.constant 80 : index
    %c0_63 = arith.constant 0 : index
    %186 = vector.load %arg19[%c80, %c0_63] : memref<352x128xf32, #tpu.memory_space<vmem>>, vector<8x128xf32>
    tpu.vector_store %arg19[%c80, %c0_63], %185 {strides = array<i32>} : memref<352x128xf32, #tpu.memory_space<vmem>>, vector<8x128xf32>,
    %c8_i32 = arith.constant 8 : i32
    %187 = tpu.dynamic_rotate %21 by %c8_i32 dim 1 : vector<8x128xf32>, i32 -> vector<8x128xf32>
    %c-8_i32 = arith.constant -8 : i32
    %188 = vector.broadcast %c-8_i32 : i32 to vector<1x128xi32>
    %189 = arith.addi %17, %188 : vector<1x128xi32>
    %c0_i32_64 = arith.constant 0 : i32
    %190 = vector.broadcast %c0_i32_64 : i32 to vector<1x128xi32>
    %191 = arith.cmpi sge, %189, %190 : vector<1x128xi32>
    %c-8_i32_65 = arith.constant -8 : i32
    %192 = vector.broadcast %c-8_i32_65 : i32 to vector<1x128xi32>
    %193 = arith.addi %17, %192 : vector<1x128xi32>
    %c64_i32_66 = arith.constant 64 : i32
    %194 = vector.broadcast %c64_i32_66 : i32 to vector<1x128xi32>
    %195 = arith.cmpi slt, %193, %194 : vector<1x128xi32>
    %196 = arith.andi %191, %195 : vector<1x128xi1>
    %cst_67 = arith.constant 0.000000e+00 : f32
    %197 = vector.shape_cast %196 : vector<1x128xi1> to vector<1x128xi1>
    %198 = vector.broadcast %197 : vector<1x128xi1> to vector<8x128xi1>
    %199 = vector.broadcast %cst_67 : f32 to vector<8x128xf32>
    %200 = arith.select %198, %187, %199 : vector<8x128xi1>, vector<8x128xf32>
    %c88 = arith.constant 88 : index
    %c0_68 = arith.constant 0 : index
    %201 = vector.load %arg19[%c88, %c0_68] : memref<352x128xf32, #tpu.memory_space<vmem>>, vector<8x128xf32>
    tpu.vector_store %arg19[%c88, %c0_68], %200 {strides = array<i32>} : memref<352x128xf32, #tpu.memory_space<vmem>>, vector<8x128xf32>,
    %c7_i32 = arith.constant 7 : i32
    %202 = tpu.dynamic_rotate %21 by %c7_i32 dim 1 : vector<8x128xf32>, i32 -> vector<8x128xf32>
    %c-7_i32 = arith.constant -7 : i32
    %203 = vector.broadcast %c-7_i32 : i32 to vector<1x128xi32>
    %204 = arith.addi %17, %203 : vector<1x128xi32>
    %c0_i32_69 = arith.constant 0 : i32
    %205 = vector.broadcast %c0_i32_69 : i32 to vector<1x128xi32>
    %206 = arith.cmpi sge, %204, %205 : vector<1x128xi32>
    %c-7_i32_70 = arith.constant -7 : i32
    %207 = vector.broadcast %c-7_i32_70 : i32 to vector<1x128xi32>
    %208 = arith.addi %17, %207 : vector<1x128xi32>
    %c64_i32_71 = arith.constant 64 : i32
    %209 = vector.broadcast %c64_i32_71 : i32 to vector<1x128xi32>
    %210 = arith.cmpi slt, %208, %209 : vector<1x128xi32>
    %211 = arith.andi %206, %210 : vector<1x128xi1>
    %cst_72 = arith.constant 0.000000e+00 : f32
    %212 = vector.shape_cast %211 : vector<1x128xi1> to vector<1x128xi1>
    %213 = vector.broadcast %212 : vector<1x128xi1> to vector<8x128xi1>
    %214 = vector.broadcast %cst_72 : f32 to vector<8x128xf32>
    %215 = arith.select %213, %202, %214 : vector<8x128xi1>, vector<8x128xf32>
    %c96 = arith.constant 96 : index
    %c0_73 = arith.constant 0 : index
    %216 = vector.load %arg19[%c96, %c0_73] : memref<352x128xf32, #tpu.memory_space<vmem>>, vector<8x128xf32>
    tpu.vector_store %arg19[%c96, %c0_73], %215 {strides = array<i32>} : memref<352x128xf32, #tpu.memory_space<vmem>>, vector<8x128xf32>,
    %c6_i32 = arith.constant 6 : i32
    %217 = tpu.dynamic_rotate %21 by %c6_i32 dim 1 : vector<8x128xf32>, i32 -> vector<8x128xf32>
    %c-6_i32 = arith.constant -6 : i32
    %218 = vector.broadcast %c-6_i32 : i32 to vector<1x128xi32>
    %219 = arith.addi %17, %218 : vector<1x128xi32>
    %c0_i32_74 = arith.constant 0 : i32
    %220 = vector.broadcast %c0_i32_74 : i32 to vector<1x128xi32>
    %221 = arith.cmpi sge, %219, %220 : vector<1x128xi32>
    %c-6_i32_75 = arith.constant -6 : i32
    %222 = vector.broadcast %c-6_i32_75 : i32 to vector<1x128xi32>
    %223 = arith.addi %17, %222 : vector<1x128xi32>
    %c64_i32_76 = arith.constant 64 : i32
    %224 = vector.broadcast %c64_i32_76 : i32 to vector<1x128xi32>
    %225 = arith.cmpi slt, %223, %224 : vector<1x128xi32>
    %226 = arith.andi %221, %225 : vector<1x128xi1>
    %cst_77 = arith.constant 0.000000e+00 : f32
    %227 = vector.shape_cast %226 : vector<1x128xi1> to vector<1x128xi1>
    %228 = vector.broadcast %227 : vector<1x128xi1> to vector<8x128xi1>
    %229 = vector.broadcast %cst_77 : f32 to vector<8x128xf32>
    %230 = arith.select %228, %217, %229 : vector<8x128xi1>, vector<8x128xf32>
    %c104 = arith.constant 104 : index
    %c0_78 = arith.constant 0 : index
    %231 = vector.load %arg19[%c104, %c0_78] : memref<352x128xf32, #tpu.memory_space<vmem>>, vector<8x128xf32>
    tpu.vector_store %arg19[%c104, %c0_78], %230 {strides = array<i32>} : memref<352x128xf32, #tpu.memory_space<vmem>>, vector<8x128xf32>,
    %c5_i32 = arith.constant 5 : i32
    %232 = tpu.dynamic_rotate %21 by %c5_i32 dim 1 : vector<8x128xf32>, i32 -> vector<8x128xf32>
    %c-5_i32 = arith.constant -5 : i32
    %233 = vector.broadcast %c-5_i32 : i32 to vector<1x128xi32>
    %234 = arith.addi %17, %233 : vector<1x128xi32>
    %c0_i32_79 = arith.constant 0 : i32
    %235 = vector.broadcast %c0_i32_79 : i32 to vector<1x128xi32>
    %236 = arith.cmpi sge, %234, %235 : vector<1x128xi32>
    %c-5_i32_80 = arith.constant -5 : i32
    %237 = vector.broadcast %c-5_i32_80 : i32 to vector<1x128xi32>
    %238 = arith.addi %17, %237 : vector<1x128xi32>
    %c64_i32_81 = arith.constant 64 : i32
    %239 = vector.broadcast %c64_i32_81 : i32 to vector<1x128xi32>
    %240 = arith.cmpi slt, %238, %239 : vector<1x128xi32>
    %241 = arith.andi %236, %240 : vector<1x128xi1>
    %cst_82 = arith.constant 0.000000e+00 : f32
    %242 = vector.shape_cast %241 : vector<1x128xi1> to vector<1x128xi1>
    %243 = vector.broadcast %242 : vector<1x128xi1> to vector<8x128xi1>
    %244 = vector.broadcast %cst_82 : f32 to vector<8x128xf32>
    %245 = arith.select %243, %232, %244 : vector<8x128xi1>, vector<8x128xf32>
    %c112 = arith.constant 112 : index
    %c0_83 = arith.constant 0 : index
    %246 = vector.load %arg19[%c112, %c0_83] : memref<352x128xf32, #tpu.memory_space<vmem>>, vector<8x128xf32>
    tpu.vector_store %arg19[%c112, %c0_83], %245 {strides = array<i32>} : memref<352x128xf32, #tpu.memory_space<vmem>>, vector<8x128xf32>,
    %c4_i32 = arith.constant 4 : i32
    %247 = tpu.dynamic_rotate %21 by %c4_i32 dim 1 : vector<8x128xf32>, i32 -> vector<8x128xf32>
    %c-4_i32 = arith.constant -4 : i32
    %248 = vector.broadcast %c-4_i32 : i32 to vector<1x128xi32>
    %249 = arith.addi %17, %248 : vector<1x128xi32>
    %c0_i32_84 = arith.constant 0 : i32
    %250 = vector.broadcast %c0_i32_84 : i32 to vector<1x128xi32>
    %251 = arith.cmpi sge, %249, %250 : vector<1x128xi32>
    %c-4_i32_85 = arith.constant -4 : i32
    %252 = vector.broadcast %c-4_i32_85 : i32 to vector<1x128xi32>
    %253 = arith.addi %17, %252 : vector<1x128xi32>
    %c64_i32_86 = arith.constant 64 : i32
    %254 = vector.broadcast %c64_i32_86 : i32 to vector<1x128xi32>
    %255 = arith.cmpi slt, %253, %254 : vector<1x128xi32>
    %256 = arith.andi %251, %255 : vector<1x128xi1>
    %cst_87 = arith.constant 0.000000e+00 : f32
    %257 = vector.shape_cast %256 : vector<1x128xi1> to vector<1x128xi1>
    %258 = vector.broadcast %257 : vector<1x128xi1> to vector<8x128xi1>
    %259 = vector.broadcast %cst_87 : f32 to vector<8x128xf32>
    %260 = arith.select %258, %247, %259 : vector<8x128xi1>, vector<8x128xf32>
    %c120 = arith.constant 120 : index
    %c0_88 = arith.constant 0 : index
    %261 = vector.load %arg19[%c120, %c0_88] : memref<352x128xf32, #tpu.memory_space<vmem>>, vector<8x128xf32>
    tpu.vector_store %arg19[%c120, %c0_88], %260 {strides = array<i32>} : memref<352x128xf32, #tpu.memory_space<vmem>>, vector<8x128xf32>,
    %c3_i32 = arith.constant 3 : i32
    %262 = tpu.dynamic_rotate %21 by %c3_i32 dim 1 : vector<8x128xf32>, i32 -> vector<8x128xf32>
    %c-3_i32 = arith.constant -3 : i32
    %263 = vector.broadcast %c-3_i32 : i32 to vector<1x128xi32>
    %264 = arith.addi %17, %263 : vector<1x128xi32>
    %c0_i32_89 = arith.constant 0 : i32
    %265 = vector.broadcast %c0_i32_89 : i32 to vector<1x128xi32>
    %266 = arith.cmpi sge, %264, %265 : vector<1x128xi32>
    %c-3_i32_90 = arith.constant -3 : i32
    %267 = vector.broadcast %c-3_i32_90 : i32 to vector<1x128xi32>
    %268 = arith.addi %17, %267 : vector<1x128xi32>
    %c64_i32_91 = arith.constant 64 : i32
    %269 = vector.broadcast %c64_i32_91 : i32 to vector<1x128xi32>
    %270 = arith.cmpi slt, %268, %269 : vector<1x128xi32>
    %271 = arith.andi %266, %270 : vector<1x128xi1>
    %cst_92 = arith.constant 0.000000e+00 : f32
    %272 = vector.shape_cast %271 : vector<1x128xi1> to vector<1x128xi1>
    %273 = vector.broadcast %272 : vector<1x128xi1> to vector<8x128xi1>
    %274 = vector.broadcast %cst_92 : f32 to vector<8x128xf32>
    %275 = arith.select %273, %262, %274 : vector<8x128xi1>, vector<8x128xf32>
    %c128 = arith.constant 128 : index
    %c0_93 = arith.constant 0 : index
    %276 = vector.load %arg19[%c128, %c0_93] : memref<352x128xf32, #tpu.memory_space<vmem>>, vector<8x128xf32>
    tpu.vector_store %arg19[%c128, %c0_93], %275 {strides = array<i32>} : memref<352x128xf32, #tpu.memory_space<vmem>>, vector<8x128xf32>,
    %c2_i32 = arith.constant 2 : i32
    %277 = tpu.dynamic_rotate %21 by %c2_i32 dim 1 : vector<8x128xf32>, i32 -> vector<8x128xf32>
    %c-2_i32 = arith.constant -2 : i32
    %278 = vector.broadcast %c-2_i32 : i32 to vector<1x128xi32>
    %279 = arith.addi %17, %278 : vector<1x128xi32>
    %c0_i32_94 = arith.constant 0 : i32
    %280 = vector.broadcast %c0_i32_94 : i32 to vector<1x128xi32>
    %281 = arith.cmpi sge, %279, %280 : vector<1x128xi32>
    %c-2_i32_95 = arith.constant -2 : i32
    %282 = vector.broadcast %c-2_i32_95 : i32 to vector<1x128xi32>
    %283 = arith.addi %17, %282 : vector<1x128xi32>
    %c64_i32_96 = arith.constant 64 : i32
    %284 = vector.broadcast %c64_i32_96 : i32 to vector<1x128xi32>
    %285 = arith.cmpi slt, %283, %284 : vector<1x128xi32>
    %286 = arith.andi %281, %285 : vector<1x128xi1>
    %cst_97 = arith.constant 0.000000e+00 : f32
    %287 = vector.shape_cast %286 : vector<1x128xi1> to vector<1x128xi1>
    %288 = vector.broadcast %287 : vector<1x128xi1> to vector<8x128xi1>
    %289 = vector.broadcast %cst_97 : f32 to vector<8x128xf32>
    %290 = arith.select %288, %277, %289 : vector<8x128xi1>, vector<8x128xf32>
    %c136 = arith.constant 136 : index
    %c0_98 = arith.constant 0 : index
    %291 = vector.load %arg19[%c136, %c0_98] : memref<352x128xf32, #tpu.memory_space<vmem>>, vector<8x128xf32>
    tpu.vector_store %arg19[%c136, %c0_98], %290 {strides = array<i32>} : memref<352x128xf32, #tpu.memory_space<vmem>>, vector<8x128xf32>,
    %c1_i32_99 = arith.constant 1 : i32
    %292 = tpu.dynamic_rotate %21 by %c1_i32_99 dim 1 : vector<8x128xf32>, i32 -> vector<8x128xf32>
    %c-1_i32 = arith.constant -1 : i32
    %293 = vector.broadcast %c-1_i32 : i32 to vector<1x128xi32>
    %294 = arith.addi %17, %293 : vector<1x128xi32>
    %c0_i32_100 = arith.constant 0 : i32
    %295 = vector.broadcast %c0_i32_100 : i32 to vector<1x128xi32>
    %296 = arith.cmpi sge, %294, %295 : vector<1x128xi32>
    %c-1_i32_101 = arith.constant -1 : i32
    %297 = vector.broadcast %c-1_i32_101 : i32 to vector<1x128xi32>
    %298 = arith.addi %17, %297 : vector<1x128xi32>
    %c64_i32_102 = arith.constant 64 : i32
    %299 = vector.broadcast %c64_i32_102 : i32 to vector<1x128xi32>
    %300 = arith.cmpi slt, %298, %299 : vector<1x128xi32>
    %301 = arith.andi %296, %300 : vector<1x128xi1>
    %cst_103 = arith.constant 0.000000e+00 : f32
    %302 = vector.shape_cast %301 : vector<1x128xi1> to vector<1x128xi1>
    %303 = vector.broadcast %302 : vector<1x128xi1> to vector<8x128xi1>
    %304 = vector.broadcast %cst_103 : f32 to vector<8x128xf32>
    %305 = arith.select %303, %292, %304 : vector<8x128xi1>, vector<8x128xf32>
    %c144 = arith.constant 144 : index
    %c0_104 = arith.constant 0 : index
    %306 = vector.load %arg19[%c144, %c0_104] : memref<352x128xf32, #tpu.memory_space<vmem>>, vector<8x128xf32>
    tpu.vector_store %arg19[%c144, %c0_104], %305 {strides = array<i32>} : memref<352x128xf32, #tpu.memory_space<vmem>>, vector<8x128xf32>,
    %c0_i32_105 = arith.constant 0 : i32
    %307 = vector.broadcast %c0_i32_105 : i32 to vector<1x128xi32>
    %308 = arith.addi %17, %307 : vector<1x128xi32>
    %c0_i32_106 = arith.constant 0 : i32
    %309 = vector.broadcast %c0_i32_106 : i32 to vector<1x128xi32>
    %310 = arith.cmpi sge, %308, %309 : vector<1x128xi32>
    %c0_i32_107 = arith.constant 0 : i32
    %311 = vector.broadcast %c0_i32_107 : i32 to vector<1x128xi32>
    %312 = arith.addi %17, %311 : vector<1x128xi32>
    %c64_i32_108 = arith.constant 64 : i32
    %313 = vector.broadcast %c64_i32_108 : i32 to vector<1x128xi32>
    %314 = arith.cmpi slt, %312, %313 : vector<1x128xi32>
    %315 = arith.andi %310, %314 : vector<1x128xi1>
    %cst_109 = arith.constant 0.000000e+00 : f32
    %316 = vector.shape_cast %315 : vector<1x128xi1> to vector<1x128xi1>
    %317 = vector.broadcast %316 : vector<1x128xi1> to vector<8x128xi1>
    %318 = vector.broadcast %cst_109 : f32 to vector<8x128xf32>
    %319 = arith.select %317, %21, %318 : vector<8x128xi1>, vector<8x128xf32>
    %c152 = arith.constant 152 : index
    %c0_110 = arith.constant 0 : index
    %320 = vector.load %arg19[%c152, %c0_110] : memref<352x128xf32, #tpu.memory_space<vmem>>, vector<8x128xf32>
    tpu.vector_store %arg19[%c152, %c0_110], %319 {strides = array<i32>} : memref<352x128xf32, #tpu.memory_space<vmem>>, vector<8x128xf32>,
    %c127_i32 = arith.constant 127 : i32
    %321 = tpu.dynamic_rotate %21 by %c127_i32 dim 1 : vector<8x128xf32>, i32 -> vector<8x128xf32>
    %c1_i32_111 = arith.constant 1 : i32
    %322 = vector.broadcast %c1_i32_111 : i32 to vector<1x128xi32>
    %323 = arith.addi %17, %322 : vector<1x128xi32>
    %c0_i32_112 = arith.constant 0 : i32
    %324 = vector.broadcast %c0_i32_112 : i32 to vector<1x128xi32>
    %325 = arith.cmpi sge, %323, %324 : vector<1x128xi32>
    %c1_i32_113 = arith.constant 1 : i32
    %326 = vector.broadcast %c1_i32_113 : i32 to vector<1x128xi32>
    %327 = arith.addi %17, %326 : vector<1x128xi32>
    %c64_i32_114 = arith.constant 64 : i32
    %328 = vector.broadcast %c64_i32_114 : i32 to vector<1x128xi32>
    %329 = arith.cmpi slt, %327, %328 : vector<1x128xi32>
    %330 = arith.andi %325, %329 : vector<1x128xi1>
    %cst_115 = arith.constant 0.000000e+00 : f32
    %331 = vector.shape_cast %330 : vector<1x128xi1> to vector<1x128xi1>
    %332 = vector.broadcast %331 : vector<1x128xi1> to vector<8x128xi1>
    %333 = vector.broadcast %cst_115 : f32 to vector<8x128xf32>
    %334 = arith.select %332, %321, %333 : vector<8x128xi1>, vector<8x128xf32>
    %c160 = arith.constant 160 : index
    %c0_116 = arith.constant 0 : index
    %335 = vector.load %arg19[%c160, %c0_116] : memref<352x128xf32, #tpu.memory_space<vmem>>, vector<8x128xf32>
    tpu.vector_store %arg19[%c160, %c0_116], %334 {strides = array<i32>} : memref<352x128xf32, #tpu.memory_space<vmem>>, vector<8x128xf32>,
    %c126_i32 = arith.constant 126 : i32
    %336 = tpu.dynamic_rotate %21 by %c126_i32 dim 1 : vector<8x128xf32>, i32 -> vector<8x128xf32>
    %c2_i32_117 = arith.constant 2 : i32
    %337 = vector.broadcast %c2_i32_117 : i32 to vector<1x128xi32>
    %338 = arith.addi %17, %337 : vector<1x128xi32>
    %c0_i32_118 = arith.constant 0 : i32
    %339 = vector.broadcast %c0_i32_118 : i32 to vector<1x128xi32>
    %340 = arith.cmpi sge, %338, %339 : vector<1x128xi32>
    %c2_i32_119 = arith.constant 2 : i32
    %341 = vector.broadcast %c2_i32_119 : i32 to vector<1x128xi32>
    %342 = arith.addi %17, %341 : vector<1x128xi32>
    %c64_i32_120 = arith.constant 64 : i32
    %343 = vector.broadcast %c64_i32_120 : i32 to vector<1x128xi32>
    %344 = arith.cmpi slt, %342, %343 : vector<1x128xi32>
    %345 = arith.andi %340, %344 : vector<1x128xi1>
    %cst_121 = arith.constant 0.000000e+00 : f32
    %346 = vector.shape_cast %345 : vector<1x128xi1> to vector<1x128xi1>
    %347 = vector.broadcast %346 : vector<1x128xi1> to vector<8x128xi1>
    %348 = vector.broadcast %cst_121 : f32 to vector<8x128xf32>
    %349 = arith.select %347, %336, %348 : vector<8x128xi1>, vector<8x128xf32>
    %c168 = arith.constant 168 : index
    %c0_122 = arith.constant 0 : index
    %350 = vector.load %arg19[%c168, %c0_122] : memref<352x128xf32, #tpu.memory_space<vmem>>, vector<8x128xf32>
    tpu.vector_store %arg19[%c168, %c0_122], %349 {strides = array<i32>} : memref<352x128xf32, #tpu.memory_space<vmem>>, vector<8x128xf32>,
    %c125_i32 = arith.constant 125 : i32
    %351 = tpu.dynamic_rotate %21 by %c125_i32 dim 1 : vector<8x128xf32>, i32 -> vector<8x128xf32>
    %c3_i32_123 = arith.constant 3 : i32
    %352 = vector.broadcast %c3_i32_123 : i32 to vector<1x128xi32>
    %353 = arith.addi %17, %352 : vector<1x128xi32>
    %c0_i32_124 = arith.constant 0 : i32
    %354 = vector.broadcast %c0_i32_124 : i32 to vector<1x128xi32>
    %355 = arith.cmpi sge, %353, %354 : vector<1x128xi32>
    %c3_i32_125 = arith.constant 3 : i32
    %356 = vector.broadcast %c3_i32_125 : i32 to vector<1x128xi32>
    %357 = arith.addi %17, %356 : vector<1x128xi32>
    %c64_i32_126 = arith.constant 64 : i32
    %358 = vector.broadcast %c64_i32_126 : i32 to vector<1x128xi32>
    %359 = arith.cmpi slt, %357, %358 : vector<1x128xi32>
    %360 = arith.andi %355, %359 : vector<1x128xi1>
    %cst_127 = arith.constant 0.000000e+00 : f32
    %361 = vector.shape_cast %360 : vector<1x128xi1> to vector<1x128xi1>
    %362 = vector.broadcast %361 : vector<1x128xi1> to vector<8x128xi1>
    %363 = vector.broadcast %cst_127 : f32 to vector<8x128xf32>
    %364 = arith.select %362, %351, %363 : vector<8x128xi1>, vector<8x128xf32>
    %c176 = arith.constant 176 : index
    %c0_128 = arith.constant 0 : index
    %365 = vector.load %arg19[%c176, %c0_128] : memref<352x128xf32, #tpu.memory_space<vmem>>, vector<8x128xf32>
    tpu.vector_store %arg19[%c176, %c0_128], %364 {strides = array<i32>} : memref<352x128xf32, #tpu.memory_space<vmem>>, vector<8x128xf32>,
    %c124_i32 = arith.constant 124 : i32
    %366 = tpu.dynamic_rotate %21 by %c124_i32 dim 1 : vector<8x128xf32>, i32 -> vector<8x128xf32>
    %c4_i32_129 = arith.constant 4 : i32
    %367 = vector.broadcast %c4_i32_129 : i32 to vector<1x128xi32>
    %368 = arith.addi %17, %367 : vector<1x128xi32>
    %c0_i32_130 = arith.constant 0 : i32
    %369 = vector.broadcast %c0_i32_130 : i32 to vector<1x128xi32>
    %370 = arith.cmpi sge, %368, %369 : vector<1x128xi32>
    %c4_i32_131 = arith.constant 4 : i32
    %371 = vector.broadcast %c4_i32_131 : i32 to vector<1x128xi32>
    %372 = arith.addi %17, %371 : vector<1x128xi32>
    %c64_i32_132 = arith.constant 64 : i32
    %373 = vector.broadcast %c64_i32_132 : i32 to vector<1x128xi32>
    %374 = arith.cmpi slt, %372, %373 : vector<1x128xi32>
    %375 = arith.andi %370, %374 : vector<1x128xi1>
    %cst_133 = arith.constant 0.000000e+00 : f32
    %376 = vector.shape_cast %375 : vector<1x128xi1> to vector<1x128xi1>
    %377 = vector.broadcast %376 : vector<1x128xi1> to vector<8x128xi1>
    %378 = vector.broadcast %cst_133 : f32 to vector<8x128xf32>
    %379 = arith.select %377, %366, %378 : vector<8x128xi1>, vector<8x128xf32>
    %c184 = arith.constant 184 : index
    %c0_134 = arith.constant 0 : index
    %380 = vector.load %arg19[%c184, %c0_134] : memref<352x128xf32, #tpu.memory_space<vmem>>, vector<8x128xf32>
    tpu.vector_store %arg19[%c184, %c0_134], %379 {strides = array<i32>} : memref<352x128xf32, #tpu.memory_space<vmem>>, vector<8x128xf32>,
    %c123_i32 = arith.constant 123 : i32
    %381 = tpu.dynamic_rotate %21 by %c123_i32 dim 1 : vector<8x128xf32>, i32 -> vector<8x128xf32>
    %c5_i32_135 = arith.constant 5 : i32
    %382 = vector.broadcast %c5_i32_135 : i32 to vector<1x128xi32>
    %383 = arith.addi %17, %382 : vector<1x128xi32>
    %c0_i32_136 = arith.constant 0 : i32
    %384 = vector.broadcast %c0_i32_136 : i32 to vector<1x128xi32>
    %385 = arith.cmpi sge, %383, %384 : vector<1x128xi32>
    %c5_i32_137 = arith.constant 5 : i32
    %386 = vector.broadcast %c5_i32_137 : i32 to vector<1x128xi32>
    %387 = arith.addi %17, %386 : vector<1x128xi32>
    %c64_i32_138 = arith.constant 64 : i32
    %388 = vector.broadcast %c64_i32_138 : i32 to vector<1x128xi32>
    %389 = arith.cmpi slt, %387, %388 : vector<1x128xi32>
    %390 = arith.andi %385, %389 : vector<1x128xi1>
    %cst_139 = arith.constant 0.000000e+00 : f32
    %391 = vector.shape_cast %390 : vector<1x128xi1> to vector<1x128xi1>
    %392 = vector.broadcast %391 : vector<1x128xi1> to vector<8x128xi1>
    %393 = vector.broadcast %cst_139 : f32 to vector<8x128xf32>
    %394 = arith.select %392, %381, %393 : vector<8x128xi1>, vector<8x128xf32>
    %c192 = arith.constant 192 : index
    %c0_140 = arith.constant 0 : index
    %395 = vector.load %arg19[%c192, %c0_140] : memref<352x128xf32, #tpu.memory_space<vmem>>, vector<8x128xf32>
    tpu.vector_store %arg19[%c192, %c0_140], %394 {strides = array<i32>} : memref<352x128xf32, #tpu.memory_space<vmem>>, vector<8x128xf32>,
    %c122_i32 = arith.constant 122 : i32
    %396 = tpu.dynamic_rotate %21 by %c122_i32 dim 1 : vector<8x128xf32>, i32 -> vector<8x128xf32>
    %c6_i32_141 = arith.constant 6 : i32
    %397 = vector.broadcast %c6_i32_141 : i32 to vector<1x128xi32>
    %398 = arith.addi %17, %397 : vector<1x128xi32>
    %c0_i32_142 = arith.constant 0 : i32
    %399 = vector.broadcast %c0_i32_142 : i32 to vector<1x128xi32>
    %400 = arith.cmpi sge, %398, %399 : vector<1x128xi32>
    %c6_i32_143 = arith.constant 6 : i32
    %401 = vector.broadcast %c6_i32_143 : i32 to vector<1x128xi32>
    %402 = arith.addi %17, %401 : vector<1x128xi32>
    %c64_i32_144 = arith.constant 64 : i32
    %403 = vector.broadcast %c64_i32_144 : i32 to vector<1x128xi32>
    %404 = arith.cmpi slt, %402, %403 : vector<1x128xi32>
    %405 = arith.andi %400, %404 : vector<1x128xi1>
    %cst_145 = arith.constant 0.000000e+00 : f32
    %406 = vector.shape_cast %405 : vector<1x128xi1> to vector<1x128xi1>
    %407 = vector.broadcast %406 : vector<1x128xi1> to vector<8x128xi1>
    %408 = vector.broadcast %cst_145 : f32 to vector<8x128xf32>
    %409 = arith.select %407, %396, %408 : vector<8x128xi1>, vector<8x128xf32>
    %c200 = arith.constant 200 : index
    %c0_146 = arith.constant 0 : index
    %410 = vector.load %arg19[%c200, %c0_146] : memref<352x128xf32, #tpu.memory_space<vmem>>, vector<8x128xf32>
    tpu.vector_store %arg19[%c200, %c0_146], %409 {strides = array<i32>} : memref<352x128xf32, #tpu.memory_space<vmem>>, vector<8x128xf32>,
    %c121_i32 = arith.constant 121 : i32
    %411 = tpu.dynamic_rotate %21 by %c121_i32 dim 1 : vector<8x128xf32>, i32 -> vector<8x128xf32>
    %c7_i32_147 = arith.constant 7 : i32
    %412 = vector.broadcast %c7_i32_147 : i32 to vector<1x128xi32>
    %413 = arith.addi %17, %412 : vector<1x128xi32>
    %c0_i32_148 = arith.constant 0 : i32
    %414 = vector.broadcast %c0_i32_148 : i32 to vector<1x128xi32>
    %415 = arith.cmpi sge, %413, %414 : vector<1x128xi32>
    %c7_i32_149 = arith.constant 7 : i32
    %416 = vector.broadcast %c7_i32_149 : i32 to vector<1x128xi32>
    %417 = arith.addi %17, %416 : vector<1x128xi32>
    %c64_i32_150 = arith.constant 64 : i32
    %418 = vector.broadcast %c64_i32_150 : i32 to vector<1x128xi32>
    %419 = arith.cmpi slt, %417, %418 : vector<1x128xi32>
    %420 = arith.andi %415, %419 : vector<1x128xi1>
    %cst_151 = arith.constant 0.000000e+00 : f32
    %421 = vector.shape_cast %420 : vector<1x128xi1> to vector<1x128xi1>
    %422 = vector.broadcast %421 : vector<1x128xi1> to vector<8x128xi1>
    %423 = vector.broadcast %cst_151 : f32 to vector<8x128xf32>
    %424 = arith.select %422, %411, %423 : vector<8x128xi1>, vector<8x128xf32>
    %c208 = arith.constant 208 : index
    %c0_152 = arith.constant 0 : index
    %425 = vector.load %arg19[%c208, %c0_152] : memref<352x128xf32, #tpu.memory_space<vmem>>, vector<8x128xf32>
    tpu.vector_store %arg19[%c208, %c0_152], %424 {strides = array<i32>} : memref<352x128xf32, #tpu.memory_space<vmem>>, vector<8x128xf32>,
    %c120_i32 = arith.constant 120 : i32
    %426 = tpu.dynamic_rotate %21 by %c120_i32 dim 1 : vector<8x128xf32>, i32 -> vector<8x128xf32>
    %c8_i32_153 = arith.constant 8 : i32
    %427 = vector.broadcast %c8_i32_153 : i32 to vector<1x128xi32>
    %428 = arith.addi %17, %427 : vector<1x128xi32>
    %c0_i32_154 = arith.constant 0 : i32
    %429 = vector.broadcast %c0_i32_154 : i32 to vector<1x128xi32>
    %430 = arith.cmpi sge, %428, %429 : vector<1x128xi32>
    %c8_i32_155 = arith.constant 8 : i32
    %431 = vector.broadcast %c8_i32_155 : i32 to vector<1x128xi32>
    %432 = arith.addi %17, %431 : vector<1x128xi32>
    %c64_i32_156 = arith.constant 64 : i32
    %433 = vector.broadcast %c64_i32_156 : i32 to vector<1x128xi32>
    %434 = arith.cmpi slt, %432, %433 : vector<1x128xi32>
    %435 = arith.andi %430, %434 : vector<1x128xi1>
    %cst_157 = arith.constant 0.000000e+00 : f32
    %436 = vector.shape_cast %435 : vector<1x128xi1> to vector<1x128xi1>
    %437 = vector.broadcast %436 : vector<1x128xi1> to vector<8x128xi1>
    %438 = vector.broadcast %cst_157 : f32 to vector<8x128xf32>
    %439 = arith.select %437, %426, %438 : vector<8x128xi1>, vector<8x128xf32>
    %c216 = arith.constant 216 : index
    %c0_158 = arith.constant 0 : index
    %440 = vector.load %arg19[%c216, %c0_158] : memref<352x128xf32, #tpu.memory_space<vmem>>, vector<8x128xf32>
    tpu.vector_store %arg19[%c216, %c0_158], %439 {strides = array<i32>} : memref<352x128xf32, #tpu.memory_space<vmem>>, vector<8x128xf32>,
    %c119_i32 = arith.constant 119 : i32
    %441 = tpu.dynamic_rotate %21 by %c119_i32 dim 1 : vector<8x128xf32>, i32 -> vector<8x128xf32>
    %c9_i32_159 = arith.constant 9 : i32
    %442 = vector.broadcast %c9_i32_159 : i32 to vector<1x128xi32>
    %443 = arith.addi %17, %442 : vector<1x128xi32>
    %c0_i32_160 = arith.constant 0 : i32
    %444 = vector.broadcast %c0_i32_160 : i32 to vector<1x128xi32>
    %445 = arith.cmpi sge, %443, %444 : vector<1x128xi32>
    %c9_i32_161 = arith.constant 9 : i32
    %446 = vector.broadcast %c9_i32_161 : i32 to vector<1x128xi32>
    %447 = arith.addi %17, %446 : vector<1x128xi32>
    %c64_i32_162 = arith.constant 64 : i32
    %448 = vector.broadcast %c64_i32_162 : i32 to vector<1x128xi32>
    %449 = arith.cmpi slt, %447, %448 : vector<1x128xi32>
    %450 = arith.andi %445, %449 : vector<1x128xi1>
    %cst_163 = arith.constant 0.000000e+00 : f32
    %451 = vector.shape_cast %450 : vector<1x128xi1> to vector<1x128xi1>
    %452 = vector.broadcast %451 : vector<1x128xi1> to vector<8x128xi1>
    %453 = vector.broadcast %cst_163 : f32 to vector<8x128xf32>
    %454 = arith.select %452, %441, %453 : vector<8x128xi1>, vector<8x128xf32>
    %c224 = arith.constant 224 : index
    %c0_164 = arith.constant 0 : index
    %455 = vector.load %arg19[%c224, %c0_164] : memref<352x128xf32, #tpu.memory_space<vmem>>, vector<8x128xf32>
    tpu.vector_store %arg19[%c224, %c0_164], %454 {strides = array<i32>} : memref<352x128xf32, #tpu.memory_space<vmem>>, vector<8x128xf32>,
    %c118_i32 = arith.constant 118 : i32
    %456 = tpu.dynamic_rotate %21 by %c118_i32 dim 1 : vector<8x128xf32>, i32 -> vector<8x128xf32>
    %c10_i32_165 = arith.constant 10 : i32
    %457 = vector.broadcast %c10_i32_165 : i32 to vector<1x128xi32>
    %458 = arith.addi %17, %457 : vector<1x128xi32>
    %c0_i32_166 = arith.constant 0 : i32
    %459 = vector.broadcast %c0_i32_166 : i32 to vector<1x128xi32>
    %460 = arith.cmpi sge, %458, %459 : vector<1x128xi32>
    %c10_i32_167 = arith.constant 10 : i32
    %461 = vector.broadcast %c10_i32_167 : i32 to vector<1x128xi32>
    %462 = arith.addi %17, %461 : vector<1x128xi32>
    %c64_i32_168 = arith.constant 64 : i32
    %463 = vector.broadcast %c64_i32_168 : i32 to vector<1x128xi32>
    %464 = arith.cmpi slt, %462, %463 : vector<1x128xi32>
    %465 = arith.andi %460, %464 : vector<1x128xi1>
    %cst_169 = arith.constant 0.000000e+00 : f32
    %466 = vector.shape_cast %465 : vector<1x128xi1> to vector<1x128xi1>
    %467 = vector.broadcast %466 : vector<1x128xi1> to vector<8x128xi1>
    %468 = vector.broadcast %cst_169 : f32 to vector<8x128xf32>
    %469 = arith.select %467, %456, %468 : vector<8x128xi1>, vector<8x128xf32>
    %c232 = arith.constant 232 : index
    %c0_170 = arith.constant 0 : index
    %470 = vector.load %arg19[%c232, %c0_170] : memref<352x128xf32, #tpu.memory_space<vmem>>, vector<8x128xf32>
    tpu.vector_store %arg19[%c232, %c0_170], %469 {strides = array<i32>} : memref<352x128xf32, #tpu.memory_space<vmem>>, vector<8x128xf32>,
    %c117_i32 = arith.constant 117 : i32
    %471 = tpu.dynamic_rotate %21 by %c117_i32 dim 1 : vector<8x128xf32>, i32 -> vector<8x128xf32>
    %c11_i32_171 = arith.constant 11 : i32
    %472 = vector.broadcast %c11_i32_171 : i32 to vector<1x128xi32>
    %473 = arith.addi %17, %472 : vector<1x128xi32>
    %c0_i32_172 = arith.constant 0 : i32
    %474 = vector.broadcast %c0_i32_172 : i32 to vector<1x128xi32>
    %475 = arith.cmpi sge, %473, %474 : vector<1x128xi32>
    %c11_i32_173 = arith.constant 11 : i32
    %476 = vector.broadcast %c11_i32_173 : i32 to vector<1x128xi32>
    %477 = arith.addi %17, %476 : vector<1x128xi32>
    %c64_i32_174 = arith.constant 64 : i32
    %478 = vector.broadcast %c64_i32_174 : i32 to vector<1x128xi32>
    %479 = arith.cmpi slt, %477, %478 : vector<1x128xi32>
    %480 = arith.andi %475, %479 : vector<1x128xi1>
    %cst_175 = arith.constant 0.000000e+00 : f32
    %481 = vector.shape_cast %480 : vector<1x128xi1> to vector<1x128xi1>
    %482 = vector.broadcast %481 : vector<1x128xi1> to vector<8x128xi1>
    %483 = vector.broadcast %cst_175 : f32 to vector<8x128xf32>
    %484 = arith.select %482, %471, %483 : vector<8x128xi1>, vector<8x128xf32>
    %c240 = arith.constant 240 : index
    %c0_176 = arith.constant 0 : index
    %485 = vector.load %arg19[%c240, %c0_176] : memref<352x128xf32, #tpu.memory_space<vmem>>, vector<8x128xf32>
    tpu.vector_store %arg19[%c240, %c0_176], %484 {strides = array<i32>} : memref<352x128xf32, #tpu.memory_space<vmem>>, vector<8x128xf32>,
    %c116_i32 = arith.constant 116 : i32
    %486 = tpu.dynamic_rotate %21 by %c116_i32 dim 1 : vector<8x128xf32>, i32 -> vector<8x128xf32>
    %c12_i32_177 = arith.constant 12 : i32
    %487 = vector.broadcast %c12_i32_177 : i32 to vector<1x128xi32>
    %488 = arith.addi %17, %487 : vector<1x128xi32>
    %c0_i32_178 = arith.constant 0 : i32
    %489 = vector.broadcast %c0_i32_178 : i32 to vector<1x128xi32>
    %490 = arith.cmpi sge, %488, %489 : vector<1x128xi32>
    %c12_i32_179 = arith.constant 12 : i32
    %491 = vector.broadcast %c12_i32_179 : i32 to vector<1x128xi32>
    %492 = arith.addi %17, %491 : vector<1x128xi32>
    %c64_i32_180 = arith.constant 64 : i32
    %493 = vector.broadcast %c64_i32_180 : i32 to vector<1x128xi32>
    %494 = arith.cmpi slt, %492, %493 : vector<1x128xi32>
    %495 = arith.andi %490, %494 : vector<1x128xi1>
    %cst_181 = arith.constant 0.000000e+00 : f32
    %496 = vector.shape_cast %495 : vector<1x128xi1> to vector<1x128xi1>
    %497 = vector.broadcast %496 : vector<1x128xi1> to vector<8x128xi1>
    %498 = vector.broadcast %cst_181 : f32 to vector<8x128xf32>
    %499 = arith.select %497, %486, %498 : vector<8x128xi1>, vector<8x128xf32>
    %c248 = arith.constant 248 : index
    %c0_182 = arith.constant 0 : index
    %500 = vector.load %arg19[%c248, %c0_182] : memref<352x128xf32, #tpu.memory_space<vmem>>, vector<8x128xf32>
    tpu.vector_store %arg19[%c248, %c0_182], %499 {strides = array<i32>} : memref<352x128xf32, #tpu.memory_space<vmem>>, vector<8x128xf32>,
    %c115_i32 = arith.constant 115 : i32
    %501 = tpu.dynamic_rotate %21 by %c115_i32 dim 1 : vector<8x128xf32>, i32 -> vector<8x128xf32>
    %c13_i32_183 = arith.constant 13 : i32
    %502 = vector.broadcast %c13_i32_183 : i32 to vector<1x128xi32>
    %503 = arith.addi %17, %502 : vector<1x128xi32>
    %c0_i32_184 = arith.constant 0 : i32
    %504 = vector.broadcast %c0_i32_184 : i32 to vector<1x128xi32>
    %505 = arith.cmpi sge, %503, %504 : vector<1x128xi32>
    %c13_i32_185 = arith.constant 13 : i32
    %506 = vector.broadcast %c13_i32_185 : i32 to vector<1x128xi32>
    %507 = arith.addi %17, %506 : vector<1x128xi32>
    %c64_i32_186 = arith.constant 64 : i32
    %508 = vector.broadcast %c64_i32_186 : i32 to vector<1x128xi32>
    %509 = arith.cmpi slt, %507, %508 : vector<1x128xi32>
    %510 = arith.andi %505, %509 : vector<1x128xi1>
    %cst_187 = arith.constant 0.000000e+00 : f32
    %511 = vector.shape_cast %510 : vector<1x128xi1> to vector<1x128xi1>
    %512 = vector.broadcast %511 : vector<1x128xi1> to vector<8x128xi1>
    %513 = vector.broadcast %cst_187 : f32 to vector<8x128xf32>
    %514 = arith.select %512, %501, %513 : vector<8x128xi1>, vector<8x128xf32>
    %c256 = arith.constant 256 : index
    %c0_188 = arith.constant 0 : index
    %515 = vector.load %arg19[%c256, %c0_188] : memref<352x128xf32, #tpu.memory_space<vmem>>, vector<8x128xf32>
    tpu.vector_store %arg19[%c256, %c0_188], %514 {strides = array<i32>} : memref<352x128xf32, #tpu.memory_space<vmem>>, vector<8x128xf32>,
    %c114_i32 = arith.constant 114 : i32
    %516 = tpu.dynamic_rotate %21 by %c114_i32 dim 1 : vector<8x128xf32>, i32 -> vector<8x128xf32>
    %c14_i32_189 = arith.constant 14 : i32
    %517 = vector.broadcast %c14_i32_189 : i32 to vector<1x128xi32>
    %518 = arith.addi %17, %517 : vector<1x128xi32>
    %c0_i32_190 = arith.constant 0 : i32
    %519 = vector.broadcast %c0_i32_190 : i32 to vector<1x128xi32>
    %520 = arith.cmpi sge, %518, %519 : vector<1x128xi32>
    %c14_i32_191 = arith.constant 14 : i32
    %521 = vector.broadcast %c14_i32_191 : i32 to vector<1x128xi32>
    %522 = arith.addi %17, %521 : vector<1x128xi32>
    %c64_i32_192 = arith.constant 64 : i32
    %523 = vector.broadcast %c64_i32_192 : i32 to vector<1x128xi32>
    %524 = arith.cmpi slt, %522, %523 : vector<1x128xi32>
    %525 = arith.andi %520, %524 : vector<1x128xi1>
    %cst_193 = arith.constant 0.000000e+00 : f32
    %526 = vector.shape_cast %525 : vector<1x128xi1> to vector<1x128xi1>
    %527 = vector.broadcast %526 : vector<1x128xi1> to vector<8x128xi1>
    %528 = vector.broadcast %cst_193 : f32 to vector<8x128xf32>
    %529 = arith.select %527, %516, %528 : vector<8x128xi1>, vector<8x128xf32>
    %c264 = arith.constant 264 : index
    %c0_194 = arith.constant 0 : index
    %530 = vector.load %arg19[%c264, %c0_194] : memref<352x128xf32, #tpu.memory_space<vmem>>, vector<8x128xf32>
    tpu.vector_store %arg19[%c264, %c0_194], %529 {strides = array<i32>} : memref<352x128xf32, #tpu.memory_space<vmem>>, vector<8x128xf32>,
    %c113_i32 = arith.constant 113 : i32
    %531 = tpu.dynamic_rotate %21 by %c113_i32 dim 1 : vector<8x128xf32>, i32 -> vector<8x128xf32>
    %c15_i32_195 = arith.constant 15 : i32
    %532 = vector.broadcast %c15_i32_195 : i32 to vector<1x128xi32>
    %533 = arith.addi %17, %532 : vector<1x128xi32>
    %c0_i32_196 = arith.constant 0 : i32
    %534 = vector.broadcast %c0_i32_196 : i32 to vector<1x128xi32>
    %535 = arith.cmpi sge, %533, %534 : vector<1x128xi32>
    %c15_i32_197 = arith.constant 15 : i32
    %536 = vector.broadcast %c15_i32_197 : i32 to vector<1x128xi32>
    %537 = arith.addi %17, %536 : vector<1x128xi32>
    %c64_i32_198 = arith.constant 64 : i32
    %538 = vector.broadcast %c64_i32_198 : i32 to vector<1x128xi32>
    %539 = arith.cmpi slt, %537, %538 : vector<1x128xi32>
    %540 = arith.andi %535, %539 : vector<1x128xi1>
    %cst_199 = arith.constant 0.000000e+00 : f32
    %541 = vector.shape_cast %540 : vector<1x128xi1> to vector<1x128xi1>
    %542 = vector.broadcast %541 : vector<1x128xi1> to vector<8x128xi1>
    %543 = vector.broadcast %cst_199 : f32 to vector<8x128xf32>
    %544 = arith.select %542, %531, %543 : vector<8x128xi1>, vector<8x128xf32>
    %c272 = arith.constant 272 : index
    %c0_200 = arith.constant 0 : index
    %545 = vector.load %arg19[%c272, %c0_200] : memref<352x128xf32, #tpu.memory_space<vmem>>, vector<8x128xf32>
    tpu.vector_store %arg19[%c272, %c0_200], %544 {strides = array<i32>} : memref<352x128xf32, #tpu.memory_space<vmem>>, vector<8x128xf32>,
    %c112_i32 = arith.constant 112 : i32
    %546 = tpu.dynamic_rotate %21 by %c112_i32 dim 1 : vector<8x128xf32>, i32 -> vector<8x128xf32>
    %c16_i32_201 = arith.constant 16 : i32
    %547 = vector.broadcast %c16_i32_201 : i32 to vector<1x128xi32>
    %548 = arith.addi %17, %547 : vector<1x128xi32>
    %c0_i32_202 = arith.constant 0 : i32
    %549 = vector.broadcast %c0_i32_202 : i32 to vector<1x128xi32>
    %550 = arith.cmpi sge, %548, %549 : vector<1x128xi32>
    %c16_i32_203 = arith.constant 16 : i32
    %551 = vector.broadcast %c16_i32_203 : i32 to vector<1x128xi32>
    %552 = arith.addi %17, %551 : vector<1x128xi32>
    %c64_i32_204 = arith.constant 64 : i32
    %553 = vector.broadcast %c64_i32_204 : i32 to vector<1x128xi32>
    %554 = arith.cmpi slt, %552, %553 : vector<1x128xi32>
    %555 = arith.andi %550, %554 : vector<1x128xi1>
    %cst_205 = arith.constant 0.000000e+00 : f32
    %556 = vector.shape_cast %555 : vector<1x128xi1> to vector<1x128xi1>
    %557 = vector.broadcast %556 : vector<1x128xi1> to vector<8x128xi1>
    %558 = vector.broadcast %cst_205 : f32 to vector<8x128xf32>
    %559 = arith.select %557, %546, %558 : vector<8x128xi1>, vector<8x128xf32>
    %c280 = arith.constant 280 : index
    %c0_206 = arith.constant 0 : index
    %560 = vector.load %arg19[%c280, %c0_206] : memref<352x128xf32, #tpu.memory_space<vmem>>, vector<8x128xf32>
    tpu.vector_store %arg19[%c280, %c0_206], %559 {strides = array<i32>} : memref<352x128xf32, #tpu.memory_space<vmem>>, vector<8x128xf32>,
    %c111_i32 = arith.constant 111 : i32
    %561 = tpu.dynamic_rotate %21 by %c111_i32 dim 1 : vector<8x128xf32>, i32 -> vector<8x128xf32>
    %c17_i32_207 = arith.constant 17 : i32
    %562 = vector.broadcast %c17_i32_207 : i32 to vector<1x128xi32>
    %563 = arith.addi %17, %562 : vector<1x128xi32>
    %c0_i32_208 = arith.constant 0 : i32
    %564 = vector.broadcast %c0_i32_208 : i32 to vector<1x128xi32>
    %565 = arith.cmpi sge, %563, %564 : vector<1x128xi32>
    %c17_i32_209 = arith.constant 17 : i32
    %566 = vector.broadcast %c17_i32_209 : i32 to vector<1x128xi32>
    %567 = arith.addi %17, %566 : vector<1x128xi32>
    %c64_i32_210 = arith.constant 64 : i32
    %568 = vector.broadcast %c64_i32_210 : i32 to vector<1x128xi32>
    %569 = arith.cmpi slt, %567, %568 : vector<1x128xi32>
    %570 = arith.andi %565, %569 : vector<1x128xi1>
    %cst_211 = arith.constant 0.000000e+00 : f32
    %571 = vector.shape_cast %570 : vector<1x128xi1> to vector<1x128xi1>
    %572 = vector.broadcast %571 : vector<1x128xi1> to vector<8x128xi1>
    %573 = vector.broadcast %cst_211 : f32 to vector<8x128xf32>
    %574 = arith.select %572, %561, %573 : vector<8x128xi1>, vector<8x128xf32>
    %c288 = arith.constant 288 : index
    %c0_212 = arith.constant 0 : index
    %575 = vector.load %arg19[%c288, %c0_212] : memref<352x128xf32, #tpu.memory_space<vmem>>, vector<8x128xf32>
    tpu.vector_store %arg19[%c288, %c0_212], %574 {strides = array<i32>} : memref<352x128xf32, #tpu.memory_space<vmem>>, vector<8x128xf32>,
    %c110_i32 = arith.constant 110 : i32
    %576 = tpu.dynamic_rotate %21 by %c110_i32 dim 1 : vector<8x128xf32>, i32 -> vector<8x128xf32>
    %c18_i32_213 = arith.constant 18 : i32
    %577 = vector.broadcast %c18_i32_213 : i32 to vector<1x128xi32>
    %578 = arith.addi %17, %577 : vector<1x128xi32>
    %c0_i32_214 = arith.constant 0 : i32
    %579 = vector.broadcast %c0_i32_214 : i32 to vector<1x128xi32>
    %580 = arith.cmpi sge, %578, %579 : vector<1x128xi32>
    %c18_i32_215 = arith.constant 18 : i32
    %581 = vector.broadcast %c18_i32_215 : i32 to vector<1x128xi32>
    %582 = arith.addi %17, %581 : vector<1x128xi32>
    %c64_i32_216 = arith.constant 64 : i32
    %583 = vector.broadcast %c64_i32_216 : i32 to vector<1x128xi32>
    %584 = arith.cmpi slt, %582, %583 : vector<1x128xi32>
    %585 = arith.andi %580, %584 : vector<1x128xi1>
    %cst_217 = arith.constant 0.000000e+00 : f32
    %586 = vector.shape_cast %585 : vector<1x128xi1> to vector<1x128xi1>
    %587 = vector.broadcast %586 : vector<1x128xi1> to vector<8x128xi1>
    %588 = vector.broadcast %cst_217 : f32 to vector<8x128xf32>
    %589 = arith.select %587, %576, %588 : vector<8x128xi1>, vector<8x128xf32>
    %c296 = arith.constant 296 : index
    %c0_218 = arith.constant 0 : index
    %590 = vector.load %arg19[%c296, %c0_218] : memref<352x128xf32, #tpu.memory_space<vmem>>, vector<8x128xf32>
    tpu.vector_store %arg19[%c296, %c0_218], %589 {strides = array<i32>} : memref<352x128xf32, #tpu.memory_space<vmem>>, vector<8x128xf32>,
    %c109_i32 = arith.constant 109 : i32
    %591 = tpu.dynamic_rotate %21 by %c109_i32 dim 1 : vector<8x128xf32>, i32 -> vector<8x128xf32>
    %c19_i32_219 = arith.constant 19 : i32
    %592 = vector.broadcast %c19_i32_219 : i32 to vector<1x128xi32>
    %593 = arith.addi %17, %592 : vector<1x128xi32>
    %c0_i32_220 = arith.constant 0 : i32
    %594 = vector.broadcast %c0_i32_220 : i32 to vector<1x128xi32>
    %595 = arith.cmpi sge, %593, %594 : vector<1x128xi32>
    %c19_i32_221 = arith.constant 19 : i32
    %596 = vector.broadcast %c19_i32_221 : i32 to vector<1x128xi32>
    %597 = arith.addi %17, %596 : vector<1x128xi32>
    %c64_i32_222 = arith.constant 64 : i32
    %598 = vector.broadcast %c64_i32_222 : i32 to vector<1x128xi32>
    %599 = arith.cmpi slt, %597, %598 : vector<1x128xi32>
    %600 = arith.andi %595, %599 : vector<1x128xi1>
    %cst_223 = arith.constant 0.000000e+00 : f32
    %601 = vector.shape_cast %600 : vector<1x128xi1> to vector<1x128xi1>
    %602 = vector.broadcast %601 : vector<1x128xi1> to vector<8x128xi1>
    %603 = vector.broadcast %cst_223 : f32 to vector<8x128xf32>
    %604 = arith.select %602, %591, %603 : vector<8x128xi1>, vector<8x128xf32>
    %c304 = arith.constant 304 : index
    %c0_224 = arith.constant 0 : index
    %605 = vector.load %arg19[%c304, %c0_224] : memref<352x128xf32, #tpu.memory_space<vmem>>, vector<8x128xf32>
    tpu.vector_store %arg19[%c304, %c0_224], %604 {strides = array<i32>} : memref<352x128xf32, #tpu.memory_space<vmem>>, vector<8x128xf32>,
    %c108_i32 = arith.constant 108 : i32
    %606 = tpu.dynamic_rotate %21 by %c108_i32 dim 1 : vector<8x128xf32>, i32 -> vector<8x128xf32>
    %c20_i32 = arith.constant 20 : i32
    %607 = vector.broadcast %c20_i32 : i32 to vector<1x128xi32>
    %608 = arith.addi %17, %607 : vector<1x128xi32>
    %c0_i32_225 = arith.constant 0 : i32
    %609 = vector.broadcast %c0_i32_225 : i32 to vector<1x128xi32>
    %610 = arith.cmpi sge, %608, %609 : vector<1x128xi32>
    %c20_i32_226 = arith.constant 20 : i32
    %611 = vector.broadcast %c20_i32_226 : i32 to vector<1x128xi32>
    %612 = arith.addi %17, %611 : vector<1x128xi32>
    %c64_i32_227 = arith.constant 64 : i32
    %613 = vector.broadcast %c64_i32_227 : i32 to vector<1x128xi32>
    %614 = arith.cmpi slt, %612, %613 : vector<1x128xi32>
    %615 = arith.andi %610, %614 : vector<1x128xi1>
    %cst_228 = arith.constant 0.000000e+00 : f32
    %616 = vector.shape_cast %615 : vector<1x128xi1> to vector<1x128xi1>
    %617 = vector.broadcast %616 : vector<1x128xi1> to vector<8x128xi1>
    %618 = vector.broadcast %cst_228 : f32 to vector<8x128xf32>
    %619 = arith.select %617, %606, %618 : vector<8x128xi1>, vector<8x128xf32>
    %c312 = arith.constant 312 : index
    %c0_229 = arith.constant 0 : index
    %620 = vector.load %arg19[%c312, %c0_229] : memref<352x128xf32, #tpu.memory_space<vmem>>, vector<8x128xf32>
    tpu.vector_store %arg19[%c312, %c0_229], %619 {strides = array<i32>} : memref<352x128xf32, #tpu.memory_space<vmem>>, vector<8x128xf32>,
    %c1_i32_230 = arith.constant 1 : i32
    %621 = tpu.dynamic_rotate %0 by %c1_i32_230 dim 1 : vector<4x128xf32>, i32 -> vector<4x128xf32>
    %c-1_i32_231 = arith.constant -1 : i32
    %622 = vector.broadcast %c-1_i32_231 : i32 to vector<1x128xi32>
    %623 = arith.addi %17, %622 : vector<1x128xi32>
    %c0_i32_232 = arith.constant 0 : i32
    %624 = vector.broadcast %c0_i32_232 : i32 to vector<1x128xi32>
    %625 = arith.cmpi sge, %623, %624 : vector<1x128xi32>
    %c-1_i32_233 = arith.constant -1 : i32
    %626 = vector.broadcast %c-1_i32_233 : i32 to vector<1x128xi32>
    %627 = arith.addi %17, %626 : vector<1x128xi32>
    %c64_i32_234 = arith.constant 64 : i32
    %628 = vector.broadcast %c64_i32_234 : i32 to vector<1x128xi32>
    %629 = arith.cmpi slt, %627, %628 : vector<1x128xi32>
    %630 = arith.andi %625, %629 : vector<1x128xi1>
    %cst_235 = arith.constant 0xFF800000 : f32
    %631 = vector.shape_cast %630 : vector<1x128xi1> to vector<1x128xi1>
    %632 = vector.broadcast %631 : vector<1x128xi1> to vector<4x128xi1>
    %633 = vector.broadcast %cst_235 : f32 to vector<4x128xf32>
    %634 = arith.select %632, %621, %633 : vector<4x128xi1>, vector<4x128xf32>
    %c127_i32_236 = arith.constant 127 : i32
    %635 = tpu.dynamic_rotate %0 by %c127_i32_236 dim 1 : vector<4x128xf32>, i32 -> vector<4x128xf32>
    %c1_i32_237 = arith.constant 1 : i32
    %636 = vector.broadcast %c1_i32_237 : i32 to vector<1x128xi32>
    %637 = arith.addi %17, %636 : vector<1x128xi32>
    %c0_i32_238 = arith.constant 0 : i32
    %638 = vector.broadcast %c0_i32_238 : i32 to vector<1x128xi32>
    %639 = arith.cmpi sge, %637, %638 : vector<1x128xi32>
    %c1_i32_239 = arith.constant 1 : i32
    %640 = vector.broadcast %c1_i32_239 : i32 to vector<1x128xi32>
    %641 = arith.addi %17, %640 : vector<1x128xi32>
    %c64_i32_240 = arith.constant 64 : i32
    %642 = vector.broadcast %c64_i32_240 : i32 to vector<1x128xi32>
    %643 = arith.cmpi slt, %641, %642 : vector<1x128xi32>
    %644 = arith.andi %639, %643 : vector<1x128xi1>
    %cst_241 = arith.constant 0xFF800000 : f32
    %645 = vector.shape_cast %644 : vector<1x128xi1> to vector<1x128xi1>
    %646 = vector.broadcast %645 : vector<1x128xi1> to vector<4x128xi1>
    %647 = vector.broadcast %cst_241 : f32 to vector<4x128xf32>
    %648 = arith.select %646, %635, %647 : vector<4x128xi1>, vector<4x128xf32>
    %649 = arith.maximumf %634, %0 : vector<4x128xf32>
    %650 = arith.maximumf %649, %648 : vector<4x128xf32>
    %c320_242 = arith.constant 320 : index
    %c0_243 = arith.constant 0 : index
    %651 = vector.load %arg19[%c320_242, %c0_243] : memref<352x128xf32, #tpu.memory_space<vmem>>, vector<4x128xf32>
    tpu.vector_store %arg19[%c320_242, %c0_243], %650 {strides = array<i32>} : memref<352x128xf32, #tpu.memory_space<vmem>>, vector<4x128xf32>,
    %c0_244 = arith.constant 0 : index
    %c0_245 = arith.constant 0 : index
    %652 = vector.load %arg3[%c0_244, %c0_245] : memref<32x352xf32, #tpu.memory_space<vmem>>, vector<32x352xf32>
    %c0_246 = arith.constant 0 : index
    %c0_247 = arith.constant 0 : index
    %653 = vector.load %arg19[%c0_246, %c0_247] : memref<352x128xf32, #tpu.memory_space<vmem>>, vector<352x128xf32>
    %cst_248 = arith.constant dense<0.000000e+00> : vector<32x128xf32>
    %654 = tpu.matmul %652, %653, %cst_248 {dimension_numbers = #tpu.dot_dimension_numbers<[1], [0], [0], [1], [0, 0, 1, 1], [], []>} : vector<32x352xf32>, vector<352x128xf32>, vector<32x128xf32> -> vector<32x128xf32>
    %c0_249 = arith.constant 0 : index
    %c0_250 = arith.constant 0 : index
    %655 = vector.load %arg4[%c0_249, %c0_250] : memref<32x1xf32, #tpu.memory_space<vmem>>, vector<32x1xf32>
    %c0_251 = arith.constant 0 : index
    %c0_252 = arith.constant 0 : index
    %656 = vector.load %arg5[%c0_251, %c0_252] : memref<32x1xf32, #tpu.memory_space<vmem>>, vector<32x1xf32>
    %cst_253 = arith.constant dense<0.000000e+00> : vector<32xf32>
    %657 = vector.multi_reduction <add>, %654, %cst_253 [1] : vector<32x128xf32> to vector<32xf32>
    %658 = vector.shape_cast %657 : vector<32xf32> to vector<32x1xf32>
    %cst_254 = arith.constant 7.812500e-03 : f32
    %659 = vector.broadcast %cst_254 : f32 to vector<32x1xf32>
    %660 = arith.mulf %658, %659 : vector<32x1xf32>
    %661 = vector.broadcast %660 : vector<32x1xf32> to vector<32x128xf32>
    %662 = arith.subf %654, %661 : vector<32x128xf32>
    %663 = arith.mulf %662, %662 : vector<32x128xf32>
    %cst_255 = arith.constant dense<0.000000e+00> : vector<32xf32>
    %664 = vector.multi_reduction <add>, %663, %cst_255 [1] : vector<32x128xf32> to vector<32xf32>
    %665 = vector.shape_cast %664 : vector<32xf32> to vector<32x1xf32>
    %cst_256 = arith.constant 7.812500e-03 : f32
    %666 = vector.broadcast %cst_256 : f32 to vector<32x1xf32>
    %667 = arith.mulf %665, %666 : vector<32x1xf32>
    %cst_257 = arith.constant 9.99999974E-6 : f32
    %668 = vector.broadcast %cst_257 : f32 to vector<32x1xf32>
    %669 = arith.addf %667, %668 : vector<32x1xf32>
    %670 = math.rsqrt %669 : vector<32x1xf32>
    %671 = vector.broadcast %670 : vector<32x1xf32> to vector<32x128xf32>
    %672 = arith.mulf %662, %671 : vector<32x128xf32>
    %673 = vector.broadcast %655 : vector<32x1xf32> to vector<32x128xf32>
    %674 = arith.mulf %672, %673 : vector<32x128xf32>
    %675 = vector.broadcast %656 : vector<32x1xf32> to vector<32x128xf32>
    %676 = arith.addf %674, %675 : vector<32x128xf32>
    %cst_258 = arith.constant 0.000000e+00 : f32
    %677 = vector.broadcast %cst_258 : f32 to vector<32x128xf32>
    %678 = arith.maximumf %676, %677 : vector<32x128xf32>
    %c0_259 = arith.constant 0 : index
    %c0_260 = arith.constant 0 : index
    %679 = vector.load %arg6[%c0_259, %c0_260] : memref<8x32xf32, #tpu.memory_space<vmem>>, vector<8x32xf32>
    %cst_261 = arith.constant dense<0.000000e+00> : vector<8x128xf32>
    %680 = tpu.matmul %679, %678, %cst_261 {dimension_numbers = #tpu.dot_dimension_numbers<[1], [0], [0], [1], [0, 0, 1, 1], [], []>} : vector<8x32xf32>, vector<32x128xf32>, vector<8x128xf32> -> vector<8x128xf32>
    %c19_i32_262 = arith.constant 19 : i32
    %681 = tpu.dynamic_rotate %680 by %c19_i32_262 dim 1 : vector<8x128xf32>, i32 -> vector<8x128xf32>
    %c-19_i32_263 = arith.constant -19 : i32
    %682 = vector.broadcast %c-19_i32_263 : i32 to vector<1x128xi32>
    %683 = arith.addi %17, %682 : vector<1x128xi32>
    %c0_i32_264 = arith.constant 0 : i32
    %684 = vector.broadcast %c0_i32_264 : i32 to vector<1x128xi32>
    %685 = arith.cmpi sge, %683, %684 : vector<1x128xi32>
    %c-19_i32_265 = arith.constant -19 : i32
    %686 = vector.broadcast %c-19_i32_265 : i32 to vector<1x128xi32>
    %687 = arith.addi %17, %686 : vector<1x128xi32>
    %c64_i32_266 = arith.constant 64 : i32
    %688 = vector.broadcast %c64_i32_266 : i32 to vector<1x128xi32>
    %689 = arith.cmpi slt, %687, %688 : vector<1x128xi32>
    %690 = arith.andi %685, %689 : vector<1x128xi1>
    %cst_267 = arith.constant 0.000000e+00 : f32
    %691 = vector.shape_cast %690 : vector<1x128xi1> to vector<1x128xi1>
    %692 = vector.broadcast %691 : vector<1x128xi1> to vector<8x128xi1>
    %693 = vector.broadcast %cst_267 : f32 to vector<8x128xf32>
    %694 = arith.select %692, %681, %693 : vector<8x128xi1>, vector<8x128xf32>
    %c0_268 = arith.constant 0 : index
    %c0_269 = arith.constant 0 : index
    %695 = vector.load %arg19[%c0_268, %c0_269] : memref<352x128xf32, #tpu.memory_space<vmem>>, vector<8x128xf32>
    tpu.vector_store %arg19[%c0_268, %c0_269], %694 {strides = array<i32>} : memref<352x128xf32, #tpu.memory_space<vmem>>, vector<8x128xf32>,
    %c18_i32_270 = arith.constant 18 : i32
    %696 = tpu.dynamic_rotate %680 by %c18_i32_270 dim 1 : vector<8x128xf32>, i32 -> vector<8x128xf32>
    %c-18_i32_271 = arith.constant -18 : i32
    %697 = vector.broadcast %c-18_i32_271 : i32 to vector<1x128xi32>
    %698 = arith.addi %17, %697 : vector<1x128xi32>
    %c0_i32_272 = arith.constant 0 : i32
    %699 = vector.broadcast %c0_i32_272 : i32 to vector<1x128xi32>
    %700 = arith.cmpi sge, %698, %699 : vector<1x128xi32>
    %c-18_i32_273 = arith.constant -18 : i32
    %701 = vector.broadcast %c-18_i32_273 : i32 to vector<1x128xi32>
    %702 = arith.addi %17, %701 : vector<1x128xi32>
    %c64_i32_274 = arith.constant 64 : i32
    %703 = vector.broadcast %c64_i32_274 : i32 to vector<1x128xi32>
    %704 = arith.cmpi slt, %702, %703 : vector<1x128xi32>
    %705 = arith.andi %700, %704 : vector<1x128xi1>
    %cst_275 = arith.constant 0.000000e+00 : f32
    %706 = vector.shape_cast %705 : vector<1x128xi1> to vector<1x128xi1>
    %707 = vector.broadcast %706 : vector<1x128xi1> to vector<8x128xi1>
    %708 = vector.broadcast %cst_275 : f32 to vector<8x128xf32>
    %709 = arith.select %707, %696, %708 : vector<8x128xi1>, vector<8x128xf32>
    %c8_276 = arith.constant 8 : index
    %c0_277 = arith.constant 0 : index
    %710 = vector.load %arg19[%c8_276, %c0_277] : memref<352x128xf32, #tpu.memory_space<vmem>>, vector<8x128xf32>
    tpu.vector_store %arg19[%c8_276, %c0_277], %709 {strides = array<i32>} : memref<352x128xf32, #tpu.memory_space<vmem>>, vector<8x128xf32>,
    %c17_i32_278 = arith.constant 17 : i32
    %711 = tpu.dynamic_rotate %680 by %c17_i32_278 dim 1 : vector<8x128xf32>, i32 -> vector<8x128xf32>
    %c-17_i32_279 = arith.constant -17 : i32
    %712 = vector.broadcast %c-17_i32_279 : i32 to vector<1x128xi32>
    %713 = arith.addi %17, %712 : vector<1x128xi32>
    %c0_i32_280 = arith.constant 0 : i32
    %714 = vector.broadcast %c0_i32_280 : i32 to vector<1x128xi32>
    %715 = arith.cmpi sge, %713, %714 : vector<1x128xi32>
    %c-17_i32_281 = arith.constant -17 : i32
    %716 = vector.broadcast %c-17_i32_281 : i32 to vector<1x128xi32>
    %717 = arith.addi %17, %716 : vector<1x128xi32>
    %c64_i32_282 = arith.constant 64 : i32
    %718 = vector.broadcast %c64_i32_282 : i32 to vector<1x128xi32>
    %719 = arith.cmpi slt, %717, %718 : vector<1x128xi32>
    %720 = arith.andi %715, %719 : vector<1x128xi1>
    %cst_283 = arith.constant 0.000000e+00 : f32
    %721 = vector.shape_cast %720 : vector<1x128xi1> to vector<1x128xi1>
    %722 = vector.broadcast %721 : vector<1x128xi1> to vector<8x128xi1>
    %723 = vector.broadcast %cst_283 : f32 to vector<8x128xf32>
    %724 = arith.select %722, %711, %723 : vector<8x128xi1>, vector<8x128xf32>
    %c16_284 = arith.constant 16 : index
    %c0_285 = arith.constant 0 : index
    %725 = vector.load %arg19[%c16_284, %c0_285] : memref<352x128xf32, #tpu.memory_space<vmem>>, vector<8x128xf32>
    tpu.vector_store %arg19[%c16_284, %c0_285], %724 {strides = array<i32>} : memref<352x128xf32, #tpu.memory_space<vmem>>, vector<8x128xf32>,
    %c16_i32_286 = arith.constant 16 : i32
    %726 = tpu.dynamic_rotate %680 by %c16_i32_286 dim 1 : vector<8x128xf32>, i32 -> vector<8x128xf32>
    %c-16_i32_287 = arith.constant -16 : i32
    %727 = vector.broadcast %c-16_i32_287 : i32 to vector<1x128xi32>
    %728 = arith.addi %17, %727 : vector<1x128xi32>
    %c0_i32_288 = arith.constant 0 : i32
    %729 = vector.broadcast %c0_i32_288 : i32 to vector<1x128xi32>
    %730 = arith.cmpi sge, %728, %729 : vector<1x128xi32>
    %c-16_i32_289 = arith.constant -16 : i32
    %731 = vector.broadcast %c-16_i32_289 : i32 to vector<1x128xi32>
    %732 = arith.addi %17, %731 : vector<1x128xi32>
    %c64_i32_290 = arith.constant 64 : i32
    %733 = vector.broadcast %c64_i32_290 : i32 to vector<1x128xi32>
    %734 = arith.cmpi slt, %732, %733 : vector<1x128xi32>
    %735 = arith.andi %730, %734 : vector<1x128xi1>
    %cst_291 = arith.constant 0.000000e+00 : f32
    %736 = vector.shape_cast %735 : vector<1x128xi1> to vector<1x128xi1>
    %737 = vector.broadcast %736 : vector<1x128xi1> to vector<8x128xi1>
    %738 = vector.broadcast %cst_291 : f32 to vector<8x128xf32>
    %739 = arith.select %737, %726, %738 : vector<8x128xi1>, vector<8x128xf32>
    %c24_292 = arith.constant 24 : index
    %c0_293 = arith.constant 0 : index
    %740 = vector.load %arg19[%c24_292, %c0_293] : memref<352x128xf32, #tpu.memory_space<vmem>>, vector<8x128xf32>
    tpu.vector_store %arg19[%c24_292, %c0_293], %739 {strides = array<i32>} : memref<352x128xf32, #tpu.memory_space<vmem>>, vector<8x128xf32>,
    %c15_i32_294 = arith.constant 15 : i32
    %741 = tpu.dynamic_rotate %680 by %c15_i32_294 dim 1 : vector<8x128xf32>, i32 -> vector<8x128xf32>
    %c-15_i32_295 = arith.constant -15 : i32
    %742 = vector.broadcast %c-15_i32_295 : i32 to vector<1x128xi32>
    %743 = arith.addi %17, %742 : vector<1x128xi32>
    %c0_i32_296 = arith.constant 0 : i32
    %744 = vector.broadcast %c0_i32_296 : i32 to vector<1x128xi32>
    %745 = arith.cmpi sge, %743, %744 : vector<1x128xi32>
    %c-15_i32_297 = arith.constant -15 : i32
    %746 = vector.broadcast %c-15_i32_297 : i32 to vector<1x128xi32>
    %747 = arith.addi %17, %746 : vector<1x128xi32>
    %c64_i32_298 = arith.constant 64 : i32
    %748 = vector.broadcast %c64_i32_298 : i32 to vector<1x128xi32>
    %749 = arith.cmpi slt, %747, %748 : vector<1x128xi32>
    %750 = arith.andi %745, %749 : vector<1x128xi1>
    %cst_299 = arith.constant 0.000000e+00 : f32
    %751 = vector.shape_cast %750 : vector<1x128xi1> to vector<1x128xi1>
    %752 = vector.broadcast %751 : vector<1x128xi1> to vector<8x128xi1>
    %753 = vector.broadcast %cst_299 : f32 to vector<8x128xf32>
    %754 = arith.select %752, %741, %753 : vector<8x128xi1>, vector<8x128xf32>
    %c32_300 = arith.constant 32 : index
    %c0_301 = arith.constant 0 : index
    %755 = vector.load %arg19[%c32_300, %c0_301] : memref<352x128xf32, #tpu.memory_space<vmem>>, vector<8x128xf32>
    tpu.vector_store %arg19[%c32_300, %c0_301], %754 {strides = array<i32>} : memref<352x128xf32, #tpu.memory_space<vmem>>, vector<8x128xf32>,
    %c14_i32_302 = arith.constant 14 : i32
    %756 = tpu.dynamic_rotate %680 by %c14_i32_302 dim 1 : vector<8x128xf32>, i32 -> vector<8x128xf32>
    %c-14_i32_303 = arith.constant -14 : i32
    %757 = vector.broadcast %c-14_i32_303 : i32 to vector<1x128xi32>
    %758 = arith.addi %17, %757 : vector<1x128xi32>
    %c0_i32_304 = arith.constant 0 : i32
    %759 = vector.broadcast %c0_i32_304 : i32 to vector<1x128xi32>
    %760 = arith.cmpi sge, %758, %759 : vector<1x128xi32>
    %c-14_i32_305 = arith.constant -14 : i32
    %761 = vector.broadcast %c-14_i32_305 : i32 to vector<1x128xi32>
    %762 = arith.addi %17, %761 : vector<1x128xi32>
    %c64_i32_306 = arith.constant 64 : i32
    %763 = vector.broadcast %c64_i32_306 : i32 to vector<1x128xi32>
    %764 = arith.cmpi slt, %762, %763 : vector<1x128xi32>
    %765 = arith.andi %760, %764 : vector<1x128xi1>
    %cst_307 = arith.constant 0.000000e+00 : f32
    %766 = vector.shape_cast %765 : vector<1x128xi1> to vector<1x128xi1>
    %767 = vector.broadcast %766 : vector<1x128xi1> to vector<8x128xi1>
    %768 = vector.broadcast %cst_307 : f32 to vector<8x128xf32>
    %769 = arith.select %767, %756, %768 : vector<8x128xi1>, vector<8x128xf32>
    %c40_308 = arith.constant 40 : index
    %c0_309 = arith.constant 0 : index
    %770 = vector.load %arg19[%c40_308, %c0_309] : memref<352x128xf32, #tpu.memory_space<vmem>>, vector<8x128xf32>
    tpu.vector_store %arg19[%c40_308, %c0_309], %769 {strides = array<i32>} : memref<352x128xf32, #tpu.memory_space<vmem>>, vector<8x128xf32>,
    %c13_i32_310 = arith.constant 13 : i32
    %771 = tpu.dynamic_rotate %680 by %c13_i32_310 dim 1 : vector<8x128xf32>, i32 -> vector<8x128xf32>
    %c-13_i32_311 = arith.constant -13 : i32
    %772 = vector.broadcast %c-13_i32_311 : i32 to vector<1x128xi32>
    %773 = arith.addi %17, %772 : vector<1x128xi32>
    %c0_i32_312 = arith.constant 0 : i32
    %774 = vector.broadcast %c0_i32_312 : i32 to vector<1x128xi32>
    %775 = arith.cmpi sge, %773, %774 : vector<1x128xi32>
    %c-13_i32_313 = arith.constant -13 : i32
    %776 = vector.broadcast %c-13_i32_313 : i32 to vector<1x128xi32>
    %777 = arith.addi %17, %776 : vector<1x128xi32>
    %c64_i32_314 = arith.constant 64 : i32
    %778 = vector.broadcast %c64_i32_314 : i32 to vector<1x128xi32>
    %779 = arith.cmpi slt, %777, %778 : vector<1x128xi32>
    %780 = arith.andi %775, %779 : vector<1x128xi1>
    %cst_315 = arith.constant 0.000000e+00 : f32
    %781 = vector.shape_cast %780 : vector<1x128xi1> to vector<1x128xi1>
    %782 = vector.broadcast %781 : vector<1x128xi1> to vector<8x128xi1>
    %783 = vector.broadcast %cst_315 : f32 to vector<8x128xf32>
    %784 = arith.select %782, %771, %783 : vector<8x128xi1>, vector<8x128xf32>
    %c48_316 = arith.constant 48 : index
    %c0_317 = arith.constant 0 : index
    %785 = vector.load %arg19[%c48_316, %c0_317] : memref<352x128xf32, #tpu.memory_space<vmem>>, vector<8x128xf32>
    tpu.vector_store %arg19[%c48_316, %c0_317], %784 {strides = array<i32>} : memref<352x128xf32, #tpu.memory_space<vmem>>, vector<8x128xf32>,
    %c12_i32_318 = arith.constant 12 : i32
    %786 = tpu.dynamic_rotate %680 by %c12_i32_318 dim 1 : vector<8x128xf32>, i32 -> vector<8x128xf32>
    %c-12_i32_319 = arith.constant -12 : i32
    %787 = vector.broadcast %c-12_i32_319 : i32 to vector<1x128xi32>
    %788 = arith.addi %17, %787 : vector<1x128xi32>
    %c0_i32_320 = arith.constant 0 : i32
    %789 = vector.broadcast %c0_i32_320 : i32 to vector<1x128xi32>
    %790 = arith.cmpi sge, %788, %789 : vector<1x128xi32>
    %c-12_i32_321 = arith.constant -12 : i32
    %791 = vector.broadcast %c-12_i32_321 : i32 to vector<1x128xi32>
    %792 = arith.addi %17, %791 : vector<1x128xi32>
    %c64_i32_322 = arith.constant 64 : i32
    %793 = vector.broadcast %c64_i32_322 : i32 to vector<1x128xi32>
    %794 = arith.cmpi slt, %792, %793 : vector<1x128xi32>
    %795 = arith.andi %790, %794 : vector<1x128xi1>
    %cst_323 = arith.constant 0.000000e+00 : f32
    %796 = vector.shape_cast %795 : vector<1x128xi1> to vector<1x128xi1>
    %797 = vector.broadcast %796 : vector<1x128xi1> to vector<8x128xi1>
    %798 = vector.broadcast %cst_323 : f32 to vector<8x128xf32>
    %799 = arith.select %797, %786, %798 : vector<8x128xi1>, vector<8x128xf32>
    %c56_324 = arith.constant 56 : index
    %c0_325 = arith.constant 0 : index
    %800 = vector.load %arg19[%c56_324, %c0_325] : memref<352x128xf32, #tpu.memory_space<vmem>>, vector<8x128xf32>
    tpu.vector_store %arg19[%c56_324, %c0_325], %799 {strides = array<i32>} : memref<352x128xf32, #tpu.memory_space<vmem>>, vector<8x128xf32>,
    %c11_i32_326 = arith.constant 11 : i32
    %801 = tpu.dynamic_rotate %680 by %c11_i32_326 dim 1 : vector<8x128xf32>, i32 -> vector<8x128xf32>
    %c-11_i32_327 = arith.constant -11 : i32
    %802 = vector.broadcast %c-11_i32_327 : i32 to vector<1x128xi32>
    %803 = arith.addi %17, %802 : vector<1x128xi32>
    %c0_i32_328 = arith.constant 0 : i32
    %804 = vector.broadcast %c0_i32_328 : i32 to vector<1x128xi32>
    %805 = arith.cmpi sge, %803, %804 : vector<1x128xi32>
    %c-11_i32_329 = arith.constant -11 : i32
    %806 = vector.broadcast %c-11_i32_329 : i32 to vector<1x128xi32>
    %807 = arith.addi %17, %806 : vector<1x128xi32>
    %c64_i32_330 = arith.constant 64 : i32
    %808 = vector.broadcast %c64_i32_330 : i32 to vector<1x128xi32>
    %809 = arith.cmpi slt, %807, %808 : vector<1x128xi32>
    %810 = arith.andi %805, %809 : vector<1x128xi1>
    %cst_331 = arith.constant 0.000000e+00 : f32
    %811 = vector.shape_cast %810 : vector<1x128xi1> to vector<1x128xi1>
    %812 = vector.broadcast %811 : vector<1x128xi1> to vector<8x128xi1>
    %813 = vector.broadcast %cst_331 : f32 to vector<8x128xf32>
    %814 = arith.select %812, %801, %813 : vector<8x128xi1>, vector<8x128xf32>
    %c64_332 = arith.constant 64 : index
    %c0_333 = arith.constant 0 : index
    %815 = vector.load %arg19[%c64_332, %c0_333] : memref<352x128xf32, #tpu.memory_space<vmem>>, vector<8x128xf32>
    tpu.vector_store %arg19[%c64_332, %c0_333], %814 {strides = array<i32>} : memref<352x128xf32, #tpu.memory_space<vmem>>, vector<8x128xf32>,
    %c10_i32_334 = arith.constant 10 : i32
    %816 = tpu.dynamic_rotate %680 by %c10_i32_334 dim 1 : vector<8x128xf32>, i32 -> vector<8x128xf32>
    %c-10_i32_335 = arith.constant -10 : i32
    %817 = vector.broadcast %c-10_i32_335 : i32 to vector<1x128xi32>
    %818 = arith.addi %17, %817 : vector<1x128xi32>
    %c0_i32_336 = arith.constant 0 : i32
    %819 = vector.broadcast %c0_i32_336 : i32 to vector<1x128xi32>
    %820 = arith.cmpi sge, %818, %819 : vector<1x128xi32>
    %c-10_i32_337 = arith.constant -10 : i32
    %821 = vector.broadcast %c-10_i32_337 : i32 to vector<1x128xi32>
    %822 = arith.addi %17, %821 : vector<1x128xi32>
    %c64_i32_338 = arith.constant 64 : i32
    %823 = vector.broadcast %c64_i32_338 : i32 to vector<1x128xi32>
    %824 = arith.cmpi slt, %822, %823 : vector<1x128xi32>
    %825 = arith.andi %820, %824 : vector<1x128xi1>
    %cst_339 = arith.constant 0.000000e+00 : f32
    %826 = vector.shape_cast %825 : vector<1x128xi1> to vector<1x128xi1>
    %827 = vector.broadcast %826 : vector<1x128xi1> to vector<8x128xi1>
    %828 = vector.broadcast %cst_339 : f32 to vector<8x128xf32>
    %829 = arith.select %827, %816, %828 : vector<8x128xi1>, vector<8x128xf32>
    %c72_340 = arith.constant 72 : index
    %c0_341 = arith.constant 0 : index
    %830 = vector.load %arg19[%c72_340, %c0_341] : memref<352x128xf32, #tpu.memory_space<vmem>>, vector<8x128xf32>
    tpu.vector_store %arg19[%c72_340, %c0_341], %829 {strides = array<i32>} : memref<352x128xf32, #tpu.memory_space<vmem>>, vector<8x128xf32>,
    %c9_i32_342 = arith.constant 9 : i32
    %831 = tpu.dynamic_rotate %680 by %c9_i32_342 dim 1 : vector<8x128xf32>, i32 -> vector<8x128xf32>
    %c-9_i32_343 = arith.constant -9 : i32
    %832 = vector.broadcast %c-9_i32_343 : i32 to vector<1x128xi32>
    %833 = arith.addi %17, %832 : vector<1x128xi32>
    %c0_i32_344 = arith.constant 0 : i32
    %834 = vector.broadcast %c0_i32_344 : i32 to vector<1x128xi32>
    %835 = arith.cmpi sge, %833, %834 : vector<1x128xi32>
    %c-9_i32_345 = arith.constant -9 : i32
    %836 = vector.broadcast %c-9_i32_345 : i32 to vector<1x128xi32>
    %837 = arith.addi %17, %836 : vector<1x128xi32>
    %c64_i32_346 = arith.constant 64 : i32
    %838 = vector.broadcast %c64_i32_346 : i32 to vector<1x128xi32>
    %839 = arith.cmpi slt, %837, %838 : vector<1x128xi32>
    %840 = arith.andi %835, %839 : vector<1x128xi1>
    %cst_347 = arith.constant 0.000000e+00 : f32
    %841 = vector.shape_cast %840 : vector<1x128xi1> to vector<1x128xi1>
    %842 = vector.broadcast %841 : vector<1x128xi1> to vector<8x128xi1>
    %843 = vector.broadcast %cst_347 : f32 to vector<8x128xf32>
    %844 = arith.select %842, %831, %843 : vector<8x128xi1>, vector<8x128xf32>
    %c80_348 = arith.constant 80 : index
    %c0_349 = arith.constant 0 : index
    %845 = vector.load %arg19[%c80_348, %c0_349] : memref<352x128xf32, #tpu.memory_space<vmem>>, vector<8x128xf32>
    tpu.vector_store %arg19[%c80_348, %c0_349], %844 {strides = array<i32>} : memref<352x128xf32, #tpu.memory_space<vmem>>, vector<8x128xf32>,
    %c8_i32_350 = arith.constant 8 : i32
    %846 = tpu.dynamic_rotate %680 by %c8_i32_350 dim 1 : vector<8x128xf32>, i32 -> vector<8x128xf32>
    %c-8_i32_351 = arith.constant -8 : i32
    %847 = vector.broadcast %c-8_i32_351 : i32 to vector<1x128xi32>
    %848 = arith.addi %17, %847 : vector<1x128xi32>
    %c0_i32_352 = arith.constant 0 : i32
    %849 = vector.broadcast %c0_i32_352 : i32 to vector<1x128xi32>
    %850 = arith.cmpi sge, %848, %849 : vector<1x128xi32>
    %c-8_i32_353 = arith.constant -8 : i32
    %851 = vector.broadcast %c-8_i32_353 : i32 to vector<1x128xi32>
    %852 = arith.addi %17, %851 : vector<1x128xi32>
    %c64_i32_354 = arith.constant 64 : i32
    %853 = vector.broadcast %c64_i32_354 : i32 to vector<1x128xi32>
    %854 = arith.cmpi slt, %852, %853 : vector<1x128xi32>
    %855 = arith.andi %850, %854 : vector<1x128xi1>
    %cst_355 = arith.constant 0.000000e+00 : f32
    %856 = vector.shape_cast %855 : vector<1x128xi1> to vector<1x128xi1>
    %857 = vector.broadcast %856 : vector<1x128xi1> to vector<8x128xi1>
    %858 = vector.broadcast %cst_355 : f32 to vector<8x128xf32>
    %859 = arith.select %857, %846, %858 : vector<8x128xi1>, vector<8x128xf32>
    %c88_356 = arith.constant 88 : index
    %c0_357 = arith.constant 0 : index
    %860 = vector.load %arg19[%c88_356, %c0_357] : memref<352x128xf32, #tpu.memory_space<vmem>>, vector<8x128xf32>
    tpu.vector_store %arg19[%c88_356, %c0_357], %859 {strides = array<i32>} : memref<352x128xf32, #tpu.memory_space<vmem>>, vector<8x128xf32>,
    %c7_i32_358 = arith.constant 7 : i32
    %861 = tpu.dynamic_rotate %680 by %c7_i32_358 dim 1 : vector<8x128xf32>, i32 -> vector<8x128xf32>
    %c-7_i32_359 = arith.constant -7 : i32
    %862 = vector.broadcast %c-7_i32_359 : i32 to vector<1x128xi32>
    %863 = arith.addi %17, %862 : vector<1x128xi32>
    %c0_i32_360 = arith.constant 0 : i32
    %864 = vector.broadcast %c0_i32_360 : i32 to vector<1x128xi32>
    %865 = arith.cmpi sge, %863, %864 : vector<1x128xi32>
    %c-7_i32_361 = arith.constant -7 : i32
    %866 = vector.broadcast %c-7_i32_361 : i32 to vector<1x128xi32>
    %867 = arith.addi %17, %866 : vector<1x128xi32>
    %c64_i32_362 = arith.constant 64 : i32
    %868 = vector.broadcast %c64_i32_362 : i32 to vector<1x128xi32>
    %869 = arith.cmpi slt, %867, %868 : vector<1x128xi32>
    %870 = arith.andi %865, %869 : vector<1x128xi1>
    %cst_363 = arith.constant 0.000000e+00 : f32
    %871 = vector.shape_cast %870 : vector<1x128xi1> to vector<1x128xi1>
    %872 = vector.broadcast %871 : vector<1x128xi1> to vector<8x128xi1>
    %873 = vector.broadcast %cst_363 : f32 to vector<8x128xf32>
    %874 = arith.select %872, %861, %873 : vector<8x128xi1>, vector<8x128xf32>
    %c96_364 = arith.constant 96 : index
    %c0_365 = arith.constant 0 : index
    %875 = vector.load %arg19[%c96_364, %c0_365] : memref<352x128xf32, #tpu.memory_space<vmem>>, vector<8x128xf32>
    tpu.vector_store %arg19[%c96_364, %c0_365], %874 {strides = array<i32>} : memref<352x128xf32, #tpu.memory_space<vmem>>, vector<8x128xf32>,
    %c6_i32_366 = arith.constant 6 : i32
    %876 = tpu.dynamic_rotate %680 by %c6_i32_366 dim 1 : vector<8x128xf32>, i32 -> vector<8x128xf32>
    %c-6_i32_367 = arith.constant -6 : i32
    %877 = vector.broadcast %c-6_i32_367 : i32 to vector<1x128xi32>
    %878 = arith.addi %17, %877 : vector<1x128xi32>
    %c0_i32_368 = arith.constant 0 : i32
    %879 = vector.broadcast %c0_i32_368 : i32 to vector<1x128xi32>
    %880 = arith.cmpi sge, %878, %879 : vector<1x128xi32>
    %c-6_i32_369 = arith.constant -6 : i32
    %881 = vector.broadcast %c-6_i32_369 : i32 to vector<1x128xi32>
    %882 = arith.addi %17, %881 : vector<1x128xi32>
    %c64_i32_370 = arith.constant 64 : i32
    %883 = vector.broadcast %c64_i32_370 : i32 to vector<1x128xi32>
    %884 = arith.cmpi slt, %882, %883 : vector<1x128xi32>
    %885 = arith.andi %880, %884 : vector<1x128xi1>
    %cst_371 = arith.constant 0.000000e+00 : f32
    %886 = vector.shape_cast %885 : vector<1x128xi1> to vector<1x128xi1>
    %887 = vector.broadcast %886 : vector<1x128xi1> to vector<8x128xi1>
    %888 = vector.broadcast %cst_371 : f32 to vector<8x128xf32>
    %889 = arith.select %887, %876, %888 : vector<8x128xi1>, vector<8x128xf32>
    %c104_372 = arith.constant 104 : index
    %c0_373 = arith.constant 0 : index
    %890 = vector.load %arg19[%c104_372, %c0_373] : memref<352x128xf32, #tpu.memory_space<vmem>>, vector<8x128xf32>
    tpu.vector_store %arg19[%c104_372, %c0_373], %889 {strides = array<i32>} : memref<352x128xf32, #tpu.memory_space<vmem>>, vector<8x128xf32>,
    %c5_i32_374 = arith.constant 5 : i32
    %891 = tpu.dynamic_rotate %680 by %c5_i32_374 dim 1 : vector<8x128xf32>, i32 -> vector<8x128xf32>
    %c-5_i32_375 = arith.constant -5 : i32
    %892 = vector.broadcast %c-5_i32_375 : i32 to vector<1x128xi32>
    %893 = arith.addi %17, %892 : vector<1x128xi32>
    %c0_i32_376 = arith.constant 0 : i32
    %894 = vector.broadcast %c0_i32_376 : i32 to vector<1x128xi32>
    %895 = arith.cmpi sge, %893, %894 : vector<1x128xi32>
    %c-5_i32_377 = arith.constant -5 : i32
    %896 = vector.broadcast %c-5_i32_377 : i32 to vector<1x128xi32>
    %897 = arith.addi %17, %896 : vector<1x128xi32>
    %c64_i32_378 = arith.constant 64 : i32
    %898 = vector.broadcast %c64_i32_378 : i32 to vector<1x128xi32>
    %899 = arith.cmpi slt, %897, %898 : vector<1x128xi32>
    %900 = arith.andi %895, %899 : vector<1x128xi1>
    %cst_379 = arith.constant 0.000000e+00 : f32
    %901 = vector.shape_cast %900 : vector<1x128xi1> to vector<1x128xi1>
    %902 = vector.broadcast %901 : vector<1x128xi1> to vector<8x128xi1>
    %903 = vector.broadcast %cst_379 : f32 to vector<8x128xf32>
    %904 = arith.select %902, %891, %903 : vector<8x128xi1>, vector<8x128xf32>
    %c112_380 = arith.constant 112 : index
    %c0_381 = arith.constant 0 : index
    %905 = vector.load %arg19[%c112_380, %c0_381] : memref<352x128xf32, #tpu.memory_space<vmem>>, vector<8x128xf32>
    tpu.vector_store %arg19[%c112_380, %c0_381], %904 {strides = array<i32>} : memref<352x128xf32, #tpu.memory_space<vmem>>, vector<8x128xf32>,
    %c4_i32_382 = arith.constant 4 : i32
    %906 = tpu.dynamic_rotate %680 by %c4_i32_382 dim 1 : vector<8x128xf32>, i32 -> vector<8x128xf32>
    %c-4_i32_383 = arith.constant -4 : i32
    %907 = vector.broadcast %c-4_i32_383 : i32 to vector<1x128xi32>
    %908 = arith.addi %17, %907 : vector<1x128xi32>
    %c0_i32_384 = arith.constant 0 : i32
    %909 = vector.broadcast %c0_i32_384 : i32 to vector<1x128xi32>
    %910 = arith.cmpi sge, %908, %909 : vector<1x128xi32>
    %c-4_i32_385 = arith.constant -4 : i32
    %911 = vector.broadcast %c-4_i32_385 : i32 to vector<1x128xi32>
    %912 = arith.addi %17, %911 : vector<1x128xi32>
    %c64_i32_386 = arith.constant 64 : i32
    %913 = vector.broadcast %c64_i32_386 : i32 to vector<1x128xi32>
    %914 = arith.cmpi slt, %912, %913 : vector<1x128xi32>
    %915 = arith.andi %910, %914 : vector<1x128xi1>
    %cst_387 = arith.constant 0.000000e+00 : f32
    %916 = vector.shape_cast %915 : vector<1x128xi1> to vector<1x128xi1>
    %917 = vector.broadcast %916 : vector<1x128xi1> to vector<8x128xi1>
    %918 = vector.broadcast %cst_387 : f32 to vector<8x128xf32>
    %919 = arith.select %917, %906, %918 : vector<8x128xi1>, vector<8x128xf32>
    %c120_388 = arith.constant 120 : index
    %c0_389 = arith.constant 0 : index
    %920 = vector.load %arg19[%c120_388, %c0_389] : memref<352x128xf32, #tpu.memory_space<vmem>>, vector<8x128xf32>
    tpu.vector_store %arg19[%c120_388, %c0_389], %919 {strides = array<i32>} : memref<352x128xf32, #tpu.memory_space<vmem>>, vector<8x128xf32>,
    %c3_i32_390 = arith.constant 3 : i32
    %921 = tpu.dynamic_rotate %680 by %c3_i32_390 dim 1 : vector<8x128xf32>, i32 -> vector<8x128xf32>
    %c-3_i32_391 = arith.constant -3 : i32
    %922 = vector.broadcast %c-3_i32_391 : i32 to vector<1x128xi32>
    %923 = arith.addi %17, %922 : vector<1x128xi32>
    %c0_i32_392 = arith.constant 0 : i32
    %924 = vector.broadcast %c0_i32_392 : i32 to vector<1x128xi32>
    %925 = arith.cmpi sge, %923, %924 : vector<1x128xi32>
    %c-3_i32_393 = arith.constant -3 : i32
    %926 = vector.broadcast %c-3_i32_393 : i32 to vector<1x128xi32>
    %927 = arith.addi %17, %926 : vector<1x128xi32>
    %c64_i32_394 = arith.constant 64 : i32
    %928 = vector.broadcast %c64_i32_394 : i32 to vector<1x128xi32>
    %929 = arith.cmpi slt, %927, %928 : vector<1x128xi32>
    %930 = arith.andi %925, %929 : vector<1x128xi1>
    %cst_395 = arith.constant 0.000000e+00 : f32
    %931 = vector.shape_cast %930 : vector<1x128xi1> to vector<1x128xi1>
    %932 = vector.broadcast %931 : vector<1x128xi1> to vector<8x128xi1>
    %933 = vector.broadcast %cst_395 : f32 to vector<8x128xf32>
    %934 = arith.select %932, %921, %933 : vector<8x128xi1>, vector<8x128xf32>
    %c128_396 = arith.constant 128 : index
    %c0_397 = arith.constant 0 : index
    %935 = vector.load %arg19[%c128_396, %c0_397] : memref<352x128xf32, #tpu.memory_space<vmem>>, vector<8x128xf32>
    tpu.vector_store %arg19[%c128_396, %c0_397], %934 {strides = array<i32>} : memref<352x128xf32, #tpu.memory_space<vmem>>, vector<8x128xf32>,
    %c2_i32_398 = arith.constant 2 : i32
    %936 = tpu.dynamic_rotate %680 by %c2_i32_398 dim 1 : vector<8x128xf32>, i32 -> vector<8x128xf32>
    %c-2_i32_399 = arith.constant -2 : i32
    %937 = vector.broadcast %c-2_i32_399 : i32 to vector<1x128xi32>
    %938 = arith.addi %17, %937 : vector<1x128xi32>
    %c0_i32_400 = arith.constant 0 : i32
    %939 = vector.broadcast %c0_i32_400 : i32 to vector<1x128xi32>
    %940 = arith.cmpi sge, %938, %939 : vector<1x128xi32>
    %c-2_i32_401 = arith.constant -2 : i32
    %941 = vector.broadcast %c-2_i32_401 : i32 to vector<1x128xi32>
    %942 = arith.addi %17, %941 : vector<1x128xi32>
    %c64_i32_402 = arith.constant 64 : i32
    %943 = vector.broadcast %c64_i32_402 : i32 to vector<1x128xi32>
    %944 = arith.cmpi slt, %942, %943 : vector<1x128xi32>
    %945 = arith.andi %940, %944 : vector<1x128xi1>
    %cst_403 = arith.constant 0.000000e+00 : f32
    %946 = vector.shape_cast %945 : vector<1x128xi1> to vector<1x128xi1>
    %947 = vector.broadcast %946 : vector<1x128xi1> to vector<8x128xi1>
    %948 = vector.broadcast %cst_403 : f32 to vector<8x128xf32>
    %949 = arith.select %947, %936, %948 : vector<8x128xi1>, vector<8x128xf32>
    %c136_404 = arith.constant 136 : index
    %c0_405 = arith.constant 0 : index
    %950 = vector.load %arg19[%c136_404, %c0_405] : memref<352x128xf32, #tpu.memory_space<vmem>>, vector<8x128xf32>
    tpu.vector_store %arg19[%c136_404, %c0_405], %949 {strides = array<i32>} : memref<352x128xf32, #tpu.memory_space<vmem>>, vector<8x128xf32>,
    %c1_i32_406 = arith.constant 1 : i32
    %951 = tpu.dynamic_rotate %680 by %c1_i32_406 dim 1 : vector<8x128xf32>, i32 -> vector<8x128xf32>
    %c-1_i32_407 = arith.constant -1 : i32
    %952 = vector.broadcast %c-1_i32_407 : i32 to vector<1x128xi32>
    %953 = arith.addi %17, %952 : vector<1x128xi32>
    %c0_i32_408 = arith.constant 0 : i32
    %954 = vector.broadcast %c0_i32_408 : i32 to vector<1x128xi32>
    %955 = arith.cmpi sge, %953, %954 : vector<1x128xi32>
    %c-1_i32_409 = arith.constant -1 : i32
    %956 = vector.broadcast %c-1_i32_409 : i32 to vector<1x128xi32>
    %957 = arith.addi %17, %956 : vector<1x128xi32>
    %c64_i32_410 = arith.constant 64 : i32
    %958 = vector.broadcast %c64_i32_410 : i32 to vector<1x128xi32>
    %959 = arith.cmpi slt, %957, %958 : vector<1x128xi32>
    %960 = arith.andi %955, %959 : vector<1x128xi1>
    %cst_411 = arith.constant 0.000000e+00 : f32
    %961 = vector.shape_cast %960 : vector<1x128xi1> to vector<1x128xi1>
    %962 = vector.broadcast %961 : vector<1x128xi1> to vector<8x128xi1>
    %963 = vector.broadcast %cst_411 : f32 to vector<8x128xf32>
    %964 = arith.select %962, %951, %963 : vector<8x128xi1>, vector<8x128xf32>
    %c144_412 = arith.constant 144 : index
    %c0_413 = arith.constant 0 : index
    %965 = vector.load %arg19[%c144_412, %c0_413] : memref<352x128xf32, #tpu.memory_space<vmem>>, vector<8x128xf32>
    tpu.vector_store %arg19[%c144_412, %c0_413], %964 {strides = array<i32>} : memref<352x128xf32, #tpu.memory_space<vmem>>, vector<8x128xf32>,
    %c0_i32_414 = arith.constant 0 : i32
    %966 = vector.broadcast %c0_i32_414 : i32 to vector<1x128xi32>
    %967 = arith.addi %17, %966 : vector<1x128xi32>
    %c0_i32_415 = arith.constant 0 : i32
    %968 = vector.broadcast %c0_i32_415 : i32 to vector<1x128xi32>
    %969 = arith.cmpi sge, %967, %968 : vector<1x128xi32>
    %c0_i32_416 = arith.constant 0 : i32
    %970 = vector.broadcast %c0_i32_416 : i32 to vector<1x128xi32>
    %971 = arith.addi %17, %970 : vector<1x128xi32>
    %c64_i32_417 = arith.constant 64 : i32
    %972 = vector.broadcast %c64_i32_417 : i32 to vector<1x128xi32>
    %973 = arith.cmpi slt, %971, %972 : vector<1x128xi32>
    %974 = arith.andi %969, %973 : vector<1x128xi1>
    %cst_418 = arith.constant 0.000000e+00 : f32
    %975 = vector.shape_cast %974 : vector<1x128xi1> to vector<1x128xi1>
    %976 = vector.broadcast %975 : vector<1x128xi1> to vector<8x128xi1>
    %977 = vector.broadcast %cst_418 : f32 to vector<8x128xf32>
    %978 = arith.select %976, %680, %977 : vector<8x128xi1>, vector<8x128xf32>
    %c152_419 = arith.constant 152 : index
    %c0_420 = arith.constant 0 : index
    %979 = vector.load %arg19[%c152_419, %c0_420] : memref<352x128xf32, #tpu.memory_space<vmem>>, vector<8x128xf32>
    tpu.vector_store %arg19[%c152_419, %c0_420], %978 {strides = array<i32>} : memref<352x128xf32, #tpu.memory_space<vmem>>, vector<8x128xf32>,
    %c127_i32_421 = arith.constant 127 : i32
    %980 = tpu.dynamic_rotate %680 by %c127_i32_421 dim 1 : vector<8x128xf32>, i32 -> vector<8x128xf32>
    %c1_i32_422 = arith.constant 1 : i32
    %981 = vector.broadcast %c1_i32_422 : i32 to vector<1x128xi32>
    %982 = arith.addi %17, %981 : vector<1x128xi32>
    %c0_i32_423 = arith.constant 0 : i32
    %983 = vector.broadcast %c0_i32_423 : i32 to vector<1x128xi32>
    %984 = arith.cmpi sge, %982, %983 : vector<1x128xi32>
    %c1_i32_424 = arith.constant 1 : i32
    %985 = vector.broadcast %c1_i32_424 : i32 to vector<1x128xi32>
    %986 = arith.addi %17, %985 : vector<1x128xi32>
    %c64_i32_425 = arith.constant 64 : i32
    %987 = vector.broadcast %c64_i32_425 : i32 to vector<1x128xi32>
    %988 = arith.cmpi slt, %986, %987 : vector<1x128xi32>
    %989 = arith.andi %984, %988 : vector<1x128xi1>
    %cst_426 = arith.constant 0.000000e+00 : f32
    %990 = vector.shape_cast %989 : vector<1x128xi1> to vector<1x128xi1>
    %991 = vector.broadcast %990 : vector<1x128xi1> to vector<8x128xi1>
    %992 = vector.broadcast %cst_426 : f32 to vector<8x128xf32>
    %993 = arith.select %991, %980, %992 : vector<8x128xi1>, vector<8x128xf32>
    %c160_427 = arith.constant 160 : index
    %c0_428 = arith.constant 0 : index
    %994 = vector.load %arg19[%c160_427, %c0_428] : memref<352x128xf32, #tpu.memory_space<vmem>>, vector<8x128xf32>
    tpu.vector_store %arg19[%c160_427, %c0_428], %993 {strides = array<i32>} : memref<352x128xf32, #tpu.memory_space<vmem>>, vector<8x128xf32>,
    %c126_i32_429 = arith.constant 126 : i32
    %995 = tpu.dynamic_rotate %680 by %c126_i32_429 dim 1 : vector<8x128xf32>, i32 -> vector<8x128xf32>
    %c2_i32_430 = arith.constant 2 : i32
    %996 = vector.broadcast %c2_i32_430 : i32 to vector<1x128xi32>
    %997 = arith.addi %17, %996 : vector<1x128xi32>
    %c0_i32_431 = arith.constant 0 : i32
    %998 = vector.broadcast %c0_i32_431 : i32 to vector<1x128xi32>
    %999 = arith.cmpi sge, %997, %998 : vector<1x128xi32>
    %c2_i32_432 = arith.constant 2 : i32
    %1000 = vector.broadcast %c2_i32_432 : i32 to vector<1x128xi32>
    %1001 = arith.addi %17, %1000 : vector<1x128xi32>
    %c64_i32_433 = arith.constant 64 : i32
    %1002 = vector.broadcast %c64_i32_433 : i32 to vector<1x128xi32>
    %1003 = arith.cmpi slt, %1001, %1002 : vector<1x128xi32>
    %1004 = arith.andi %999, %1003 : vector<1x128xi1>
    %cst_434 = arith.constant 0.000000e+00 : f32
    %1005 = vector.shape_cast %1004 : vector<1x128xi1> to vector<1x128xi1>
    %1006 = vector.broadcast %1005 : vector<1x128xi1> to vector<8x128xi1>
    %1007 = vector.broadcast %cst_434 : f32 to vector<8x128xf32>
    %1008 = arith.select %1006, %995, %1007 : vector<8x128xi1>, vector<8x128xf32>
    %c168_435 = arith.constant 168 : index
    %c0_436 = arith.constant 0 : index
    %1009 = vector.load %arg19[%c168_435, %c0_436] : memref<352x128xf32, #tpu.memory_space<vmem>>, vector<8x128xf32>
    tpu.vector_store %arg19[%c168_435, %c0_436], %1008 {strides = array<i32>} : memref<352x128xf32, #tpu.memory_space<vmem>>, vector<8x128xf32>,
    %c125_i32_437 = arith.constant 125 : i32
    %1010 = tpu.dynamic_rotate %680 by %c125_i32_437 dim 1 : vector<8x128xf32>, i32 -> vector<8x128xf32>
    %c3_i32_438 = arith.constant 3 : i32
    %1011 = vector.broadcast %c3_i32_438 : i32 to vector<1x128xi32>
    %1012 = arith.addi %17, %1011 : vector<1x128xi32>
    %c0_i32_439 = arith.constant 0 : i32
    %1013 = vector.broadcast %c0_i32_439 : i32 to vector<1x128xi32>
    %1014 = arith.cmpi sge, %1012, %1013 : vector<1x128xi32>
    %c3_i32_440 = arith.constant 3 : i32
    %1015 = vector.broadcast %c3_i32_440 : i32 to vector<1x128xi32>
    %1016 = arith.addi %17, %1015 : vector<1x128xi32>
    %c64_i32_441 = arith.constant 64 : i32
    %1017 = vector.broadcast %c64_i32_441 : i32 to vector<1x128xi32>
    %1018 = arith.cmpi slt, %1016, %1017 : vector<1x128xi32>
    %1019 = arith.andi %1014, %1018 : vector<1x128xi1>
    %cst_442 = arith.constant 0.000000e+00 : f32
    %1020 = vector.shape_cast %1019 : vector<1x128xi1> to vector<1x128xi1>
    %1021 = vector.broadcast %1020 : vector<1x128xi1> to vector<8x128xi1>
    %1022 = vector.broadcast %cst_442 : f32 to vector<8x128xf32>
    %1023 = arith.select %1021, %1010, %1022 : vector<8x128xi1>, vector<8x128xf32>
    %c176_443 = arith.constant 176 : index
    %c0_444 = arith.constant 0 : index
    %1024 = vector.load %arg19[%c176_443, %c0_444] : memref<352x128xf32, #tpu.memory_space<vmem>>, vector<8x128xf32>
    tpu.vector_store %arg19[%c176_443, %c0_444], %1023 {strides = array<i32>} : memref<352x128xf32, #tpu.memory_space<vmem>>, vector<8x128xf32>,
    %c124_i32_445 = arith.constant 124 : i32
    %1025 = tpu.dynamic_rotate %680 by %c124_i32_445 dim 1 : vector<8x128xf32>, i32 -> vector<8x128xf32>
    %c4_i32_446 = arith.constant 4 : i32
    %1026 = vector.broadcast %c4_i32_446 : i32 to vector<1x128xi32>
    %1027 = arith.addi %17, %1026 : vector<1x128xi32>
    %c0_i32_447 = arith.constant 0 : i32
    %1028 = vector.broadcast %c0_i32_447 : i32 to vector<1x128xi32>
    %1029 = arith.cmpi sge, %1027, %1028 : vector<1x128xi32>
    %c4_i32_448 = arith.constant 4 : i32
    %1030 = vector.broadcast %c4_i32_448 : i32 to vector<1x128xi32>
    %1031 = arith.addi %17, %1030 : vector<1x128xi32>
    %c64_i32_449 = arith.constant 64 : i32
    %1032 = vector.broadcast %c64_i32_449 : i32 to vector<1x128xi32>
    %1033 = arith.cmpi slt, %1031, %1032 : vector<1x128xi32>
    %1034 = arith.andi %1029, %1033 : vector<1x128xi1>
    %cst_450 = arith.constant 0.000000e+00 : f32
    %1035 = vector.shape_cast %1034 : vector<1x128xi1> to vector<1x128xi1>
    %1036 = vector.broadcast %1035 : vector<1x128xi1> to vector<8x128xi1>
    %1037 = vector.broadcast %cst_450 : f32 to vector<8x128xf32>
    %1038 = arith.select %1036, %1025, %1037 : vector<8x128xi1>, vector<8x128xf32>
    %c184_451 = arith.constant 184 : index
    %c0_452 = arith.constant 0 : index
    %1039 = vector.load %arg19[%c184_451, %c0_452] : memref<352x128xf32, #tpu.memory_space<vmem>>, vector<8x128xf32>
    tpu.vector_store %arg19[%c184_451, %c0_452], %1038 {strides = array<i32>} : memref<352x128xf32, #tpu.memory_space<vmem>>, vector<8x128xf32>,
    %c123_i32_453 = arith.constant 123 : i32
    %1040 = tpu.dynamic_rotate %680 by %c123_i32_453 dim 1 : vector<8x128xf32>, i32 -> vector<8x128xf32>
    %c5_i32_454 = arith.constant 5 : i32
    %1041 = vector.broadcast %c5_i32_454 : i32 to vector<1x128xi32>
    %1042 = arith.addi %17, %1041 : vector<1x128xi32>
    %c0_i32_455 = arith.constant 0 : i32
    %1043 = vector.broadcast %c0_i32_455 : i32 to vector<1x128xi32>
    %1044 = arith.cmpi sge, %1042, %1043 : vector<1x128xi32>
    %c5_i32_456 = arith.constant 5 : i32
    %1045 = vector.broadcast %c5_i32_456 : i32 to vector<1x128xi32>
    %1046 = arith.addi %17, %1045 : vector<1x128xi32>
    %c64_i32_457 = arith.constant 64 : i32
    %1047 = vector.broadcast %c64_i32_457 : i32 to vector<1x128xi32>
    %1048 = arith.cmpi slt, %1046, %1047 : vector<1x128xi32>
    %1049 = arith.andi %1044, %1048 : vector<1x128xi1>
    %cst_458 = arith.constant 0.000000e+00 : f32
    %1050 = vector.shape_cast %1049 : vector<1x128xi1> to vector<1x128xi1>
    %1051 = vector.broadcast %1050 : vector<1x128xi1> to vector<8x128xi1>
    %1052 = vector.broadcast %cst_458 : f32 to vector<8x128xf32>
    %1053 = arith.select %1051, %1040, %1052 : vector<8x128xi1>, vector<8x128xf32>
    %c192_459 = arith.constant 192 : index
    %c0_460 = arith.constant 0 : index
    %1054 = vector.load %arg19[%c192_459, %c0_460] : memref<352x128xf32, #tpu.memory_space<vmem>>, vector<8x128xf32>
    tpu.vector_store %arg19[%c192_459, %c0_460], %1053 {strides = array<i32>} : memref<352x128xf32, #tpu.memory_space<vmem>>, vector<8x128xf32>,
    %c122_i32_461 = arith.constant 122 : i32
    %1055 = tpu.dynamic_rotate %680 by %c122_i32_461 dim 1 : vector<8x128xf32>, i32 -> vector<8x128xf32>
    %c6_i32_462 = arith.constant 6 : i32
    %1056 = vector.broadcast %c6_i32_462 : i32 to vector<1x128xi32>
    %1057 = arith.addi %17, %1056 : vector<1x128xi32>
    %c0_i32_463 = arith.constant 0 : i32
    %1058 = vector.broadcast %c0_i32_463 : i32 to vector<1x128xi32>
    %1059 = arith.cmpi sge, %1057, %1058 : vector<1x128xi32>
    %c6_i32_464 = arith.constant 6 : i32
    %1060 = vector.broadcast %c6_i32_464 : i32 to vector<1x128xi32>
    %1061 = arith.addi %17, %1060 : vector<1x128xi32>
    %c64_i32_465 = arith.constant 64 : i32
    %1062 = vector.broadcast %c64_i32_465 : i32 to vector<1x128xi32>
    %1063 = arith.cmpi slt, %1061, %1062 : vector<1x128xi32>
    %1064 = arith.andi %1059, %1063 : vector<1x128xi1>
    %cst_466 = arith.constant 0.000000e+00 : f32
    %1065 = vector.shape_cast %1064 : vector<1x128xi1> to vector<1x128xi1>
    %1066 = vector.broadcast %1065 : vector<1x128xi1> to vector<8x128xi1>
    %1067 = vector.broadcast %cst_466 : f32 to vector<8x128xf32>
    %1068 = arith.select %1066, %1055, %1067 : vector<8x128xi1>, vector<8x128xf32>
    %c200_467 = arith.constant 200 : index
    %c0_468 = arith.constant 0 : index
    %1069 = vector.load %arg19[%c200_467, %c0_468] : memref<352x128xf32, #tpu.memory_space<vmem>>, vector<8x128xf32>
    tpu.vector_store %arg19[%c200_467, %c0_468], %1068 {strides = array<i32>} : memref<352x128xf32, #tpu.memory_space<vmem>>, vector<8x128xf32>,
    %c121_i32_469 = arith.constant 121 : i32
    %1070 = tpu.dynamic_rotate %680 by %c121_i32_469 dim 1 : vector<8x128xf32>, i32 -> vector<8x128xf32>
    %c7_i32_470 = arith.constant 7 : i32
    %1071 = vector.broadcast %c7_i32_470 : i32 to vector<1x128xi32>
    %1072 = arith.addi %17, %1071 : vector<1x128xi32>
    %c0_i32_471 = arith.constant 0 : i32
    %1073 = vector.broadcast %c0_i32_471 : i32 to vector<1x128xi32>
    %1074 = arith.cmpi sge, %1072, %1073 : vector<1x128xi32>
    %c7_i32_472 = arith.constant 7 : i32
    %1075 = vector.broadcast %c7_i32_472 : i32 to vector<1x128xi32>
    %1076 = arith.addi %17, %1075 : vector<1x128xi32>
    %c64_i32_473 = arith.constant 64 : i32
    %1077 = vector.broadcast %c64_i32_473 : i32 to vector<1x128xi32>
    %1078 = arith.cmpi slt, %1076, %1077 : vector<1x128xi32>
    %1079 = arith.andi %1074, %1078 : vector<1x128xi1>
    %cst_474 = arith.constant 0.000000e+00 : f32
    %1080 = vector.shape_cast %1079 : vector<1x128xi1> to vector<1x128xi1>
    %1081 = vector.broadcast %1080 : vector<1x128xi1> to vector<8x128xi1>
    %1082 = vector.broadcast %cst_474 : f32 to vector<8x128xf32>
    %1083 = arith.select %1081, %1070, %1082 : vector<8x128xi1>, vector<8x128xf32>
    %c208_475 = arith.constant 208 : index
    %c0_476 = arith.constant 0 : index
    %1084 = vector.load %arg19[%c208_475, %c0_476] : memref<352x128xf32, #tpu.memory_space<vmem>>, vector<8x128xf32>
    tpu.vector_store %arg19[%c208_475, %c0_476], %1083 {strides = array<i32>} : memref<352x128xf32, #tpu.memory_space<vmem>>, vector<8x128xf32>,
    %c120_i32_477 = arith.constant 120 : i32
    %1085 = tpu.dynamic_rotate %680 by %c120_i32_477 dim 1 : vector<8x128xf32>, i32 -> vector<8x128xf32>
    %c8_i32_478 = arith.constant 8 : i32
    %1086 = vector.broadcast %c8_i32_478 : i32 to vector<1x128xi32>
    %1087 = arith.addi %17, %1086 : vector<1x128xi32>
    %c0_i32_479 = arith.constant 0 : i32
    %1088 = vector.broadcast %c0_i32_479 : i32 to vector<1x128xi32>
    %1089 = arith.cmpi sge, %1087, %1088 : vector<1x128xi32>
    %c8_i32_480 = arith.constant 8 : i32
    %1090 = vector.broadcast %c8_i32_480 : i32 to vector<1x128xi32>
    %1091 = arith.addi %17, %1090 : vector<1x128xi32>
    %c64_i32_481 = arith.constant 64 : i32
    %1092 = vector.broadcast %c64_i32_481 : i32 to vector<1x128xi32>
    %1093 = arith.cmpi slt, %1091, %1092 : vector<1x128xi32>
    %1094 = arith.andi %1089, %1093 : vector<1x128xi1>
    %cst_482 = arith.constant 0.000000e+00 : f32
    %1095 = vector.shape_cast %1094 : vector<1x128xi1> to vector<1x128xi1>
    %1096 = vector.broadcast %1095 : vector<1x128xi1> to vector<8x128xi1>
    %1097 = vector.broadcast %cst_482 : f32 to vector<8x128xf32>
    %1098 = arith.select %1096, %1085, %1097 : vector<8x128xi1>, vector<8x128xf32>
    %c216_483 = arith.constant 216 : index
    %c0_484 = arith.constant 0 : index
    %1099 = vector.load %arg19[%c216_483, %c0_484] : memref<352x128xf32, #tpu.memory_space<vmem>>, vector<8x128xf32>
    tpu.vector_store %arg19[%c216_483, %c0_484], %1098 {strides = array<i32>} : memref<352x128xf32, #tpu.memory_space<vmem>>, vector<8x128xf32>,
    %c119_i32_485 = arith.constant 119 : i32
    %1100 = tpu.dynamic_rotate %680 by %c119_i32_485 dim 1 : vector<8x128xf32>, i32 -> vector<8x128xf32>
    %c9_i32_486 = arith.constant 9 : i32
    %1101 = vector.broadcast %c9_i32_486 : i32 to vector<1x128xi32>
    %1102 = arith.addi %17, %1101 : vector<1x128xi32>
    %c0_i32_487 = arith.constant 0 : i32
    %1103 = vector.broadcast %c0_i32_487 : i32 to vector<1x128xi32>
    %1104 = arith.cmpi sge, %1102, %1103 : vector<1x128xi32>
    %c9_i32_488 = arith.constant 9 : i32
    %1105 = vector.broadcast %c9_i32_488 : i32 to vector<1x128xi32>
    %1106 = arith.addi %17, %1105 : vector<1x128xi32>
    %c64_i32_489 = arith.constant 64 : i32
    %1107 = vector.broadcast %c64_i32_489 : i32 to vector<1x128xi32>
    %1108 = arith.cmpi slt, %1106, %1107 : vector<1x128xi32>
    %1109 = arith.andi %1104, %1108 : vector<1x128xi1>
    %cst_490 = arith.constant 0.000000e+00 : f32
    %1110 = vector.shape_cast %1109 : vector<1x128xi1> to vector<1x128xi1>
    %1111 = vector.broadcast %1110 : vector<1x128xi1> to vector<8x128xi1>
    %1112 = vector.broadcast %cst_490 : f32 to vector<8x128xf32>
    %1113 = arith.select %1111, %1100, %1112 : vector<8x128xi1>, vector<8x128xf32>
    %c224_491 = arith.constant 224 : index
    %c0_492 = arith.constant 0 : index
    %1114 = vector.load %arg19[%c224_491, %c0_492] : memref<352x128xf32, #tpu.memory_space<vmem>>, vector<8x128xf32>
    tpu.vector_store %arg19[%c224_491, %c0_492], %1113 {strides = array<i32>} : memref<352x128xf32, #tpu.memory_space<vmem>>, vector<8x128xf32>,
    %c118_i32_493 = arith.constant 118 : i32
    %1115 = tpu.dynamic_rotate %680 by %c118_i32_493 dim 1 : vector<8x128xf32>, i32 -> vector<8x128xf32>
    %c10_i32_494 = arith.constant 10 : i32
    %1116 = vector.broadcast %c10_i32_494 : i32 to vector<1x128xi32>
    %1117 = arith.addi %17, %1116 : vector<1x128xi32>
    %c0_i32_495 = arith.constant 0 : i32
    %1118 = vector.broadcast %c0_i32_495 : i32 to vector<1x128xi32>
    %1119 = arith.cmpi sge, %1117, %1118 : vector<1x128xi32>
    %c10_i32_496 = arith.constant 10 : i32
    %1120 = vector.broadcast %c10_i32_496 : i32 to vector<1x128xi32>
    %1121 = arith.addi %17, %1120 : vector<1x128xi32>
    %c64_i32_497 = arith.constant 64 : i32
    %1122 = vector.broadcast %c64_i32_497 : i32 to vector<1x128xi32>
    %1123 = arith.cmpi slt, %1121, %1122 : vector<1x128xi32>
    %1124 = arith.andi %1119, %1123 : vector<1x128xi1>
    %cst_498 = arith.constant 0.000000e+00 : f32
    %1125 = vector.shape_cast %1124 : vector<1x128xi1> to vector<1x128xi1>
    %1126 = vector.broadcast %1125 : vector<1x128xi1> to vector<8x128xi1>
    %1127 = vector.broadcast %cst_498 : f32 to vector<8x128xf32>
    %1128 = arith.select %1126, %1115, %1127 : vector<8x128xi1>, vector<8x128xf32>
    %c232_499 = arith.constant 232 : index
    %c0_500 = arith.constant 0 : index
    %1129 = vector.load %arg19[%c232_499, %c0_500] : memref<352x128xf32, #tpu.memory_space<vmem>>, vector<8x128xf32>
    tpu.vector_store %arg19[%c232_499, %c0_500], %1128 {strides = array<i32>} : memref<352x128xf32, #tpu.memory_space<vmem>>, vector<8x128xf32>,
    %c117_i32_501 = arith.constant 117 : i32
    %1130 = tpu.dynamic_rotate %680 by %c117_i32_501 dim 1 : vector<8x128xf32>, i32 -> vector<8x128xf32>
    %c11_i32_502 = arith.constant 11 : i32
    %1131 = vector.broadcast %c11_i32_502 : i32 to vector<1x128xi32>
    %1132 = arith.addi %17, %1131 : vector<1x128xi32>
    %c0_i32_503 = arith.constant 0 : i32
    %1133 = vector.broadcast %c0_i32_503 : i32 to vector<1x128xi32>
    %1134 = arith.cmpi sge, %1132, %1133 : vector<1x128xi32>
    %c11_i32_504 = arith.constant 11 : i32
    %1135 = vector.broadcast %c11_i32_504 : i32 to vector<1x128xi32>
    %1136 = arith.addi %17, %1135 : vector<1x128xi32>
    %c64_i32_505 = arith.constant 64 : i32
    %1137 = vector.broadcast %c64_i32_505 : i32 to vector<1x128xi32>
    %1138 = arith.cmpi slt, %1136, %1137 : vector<1x128xi32>
    %1139 = arith.andi %1134, %1138 : vector<1x128xi1>
    %cst_506 = arith.constant 0.000000e+00 : f32
    %1140 = vector.shape_cast %1139 : vector<1x128xi1> to vector<1x128xi1>
    %1141 = vector.broadcast %1140 : vector<1x128xi1> to vector<8x128xi1>
    %1142 = vector.broadcast %cst_506 : f32 to vector<8x128xf32>
    %1143 = arith.select %1141, %1130, %1142 : vector<8x128xi1>, vector<8x128xf32>
    %c240_507 = arith.constant 240 : index
    %c0_508 = arith.constant 0 : index
    %1144 = vector.load %arg19[%c240_507, %c0_508] : memref<352x128xf32, #tpu.memory_space<vmem>>, vector<8x128xf32>
    tpu.vector_store %arg19[%c240_507, %c0_508], %1143 {strides = array<i32>} : memref<352x128xf32, #tpu.memory_space<vmem>>, vector<8x128xf32>,
    %c116_i32_509 = arith.constant 116 : i32
    %1145 = tpu.dynamic_rotate %680 by %c116_i32_509 dim 1 : vector<8x128xf32>, i32 -> vector<8x128xf32>
    %c12_i32_510 = arith.constant 12 : i32
    %1146 = vector.broadcast %c12_i32_510 : i32 to vector<1x128xi32>
    %1147 = arith.addi %17, %1146 : vector<1x128xi32>
    %c0_i32_511 = arith.constant 0 : i32
    %1148 = vector.broadcast %c0_i32_511 : i32 to vector<1x128xi32>
    %1149 = arith.cmpi sge, %1147, %1148 : vector<1x128xi32>
    %c12_i32_512 = arith.constant 12 : i32
    %1150 = vector.broadcast %c12_i32_512 : i32 to vector<1x128xi32>
    %1151 = arith.addi %17, %1150 : vector<1x128xi32>
    %c64_i32_513 = arith.constant 64 : i32
    %1152 = vector.broadcast %c64_i32_513 : i32 to vector<1x128xi32>
    %1153 = arith.cmpi slt, %1151, %1152 : vector<1x128xi32>
    %1154 = arith.andi %1149, %1153 : vector<1x128xi1>
    %cst_514 = arith.constant 0.000000e+00 : f32
    %1155 = vector.shape_cast %1154 : vector<1x128xi1> to vector<1x128xi1>
    %1156 = vector.broadcast %1155 : vector<1x128xi1> to vector<8x128xi1>
    %1157 = vector.broadcast %cst_514 : f32 to vector<8x128xf32>
    %1158 = arith.select %1156, %1145, %1157 : vector<8x128xi1>, vector<8x128xf32>
    %c248_515 = arith.constant 248 : index
    %c0_516 = arith.constant 0 : index
    %1159 = vector.load %arg19[%c248_515, %c0_516] : memref<352x128xf32, #tpu.memory_space<vmem>>, vector<8x128xf32>
    tpu.vector_store %arg19[%c248_515, %c0_516], %1158 {strides = array<i32>} : memref<352x128xf32, #tpu.memory_space<vmem>>, vector<8x128xf32>,
    %c115_i32_517 = arith.constant 115 : i32
    %1160 = tpu.dynamic_rotate %680 by %c115_i32_517 dim 1 : vector<8x128xf32>, i32 -> vector<8x128xf32>
    %c13_i32_518 = arith.constant 13 : i32
    %1161 = vector.broadcast %c13_i32_518 : i32 to vector<1x128xi32>
    %1162 = arith.addi %17, %1161 : vector<1x128xi32>
    %c0_i32_519 = arith.constant 0 : i32
    %1163 = vector.broadcast %c0_i32_519 : i32 to vector<1x128xi32>
    %1164 = arith.cmpi sge, %1162, %1163 : vector<1x128xi32>
    %c13_i32_520 = arith.constant 13 : i32
    %1165 = vector.broadcast %c13_i32_520 : i32 to vector<1x128xi32>
    %1166 = arith.addi %17, %1165 : vector<1x128xi32>
    %c64_i32_521 = arith.constant 64 : i32
    %1167 = vector.broadcast %c64_i32_521 : i32 to vector<1x128xi32>
    %1168 = arith.cmpi slt, %1166, %1167 : vector<1x128xi32>
    %1169 = arith.andi %1164, %1168 : vector<1x128xi1>
    %cst_522 = arith.constant 0.000000e+00 : f32
    %1170 = vector.shape_cast %1169 : vector<1x128xi1> to vector<1x128xi1>
    %1171 = vector.broadcast %1170 : vector<1x128xi1> to vector<8x128xi1>
    %1172 = vector.broadcast %cst_522 : f32 to vector<8x128xf32>
    %1173 = arith.select %1171, %1160, %1172 : vector<8x128xi1>, vector<8x128xf32>
    %c256_523 = arith.constant 256 : index
    %c0_524 = arith.constant 0 : index
    %1174 = vector.load %arg19[%c256_523, %c0_524] : memref<352x128xf32, #tpu.memory_space<vmem>>, vector<8x128xf32>
    tpu.vector_store %arg19[%c256_523, %c0_524], %1173 {strides = array<i32>} : memref<352x128xf32, #tpu.memory_space<vmem>>, vector<8x128xf32>,
    %c114_i32_525 = arith.constant 114 : i32
    %1175 = tpu.dynamic_rotate %680 by %c114_i32_525 dim 1 : vector<8x128xf32>, i32 -> vector<8x128xf32>
    %c14_i32_526 = arith.constant 14 : i32
    %1176 = vector.broadcast %c14_i32_526 : i32 to vector<1x128xi32>
    %1177 = arith.addi %17, %1176 : vector<1x128xi32>
    %c0_i32_527 = arith.constant 0 : i32
    %1178 = vector.broadcast %c0_i32_527 : i32 to vector<1x128xi32>
    %1179 = arith.cmpi sge, %1177, %1178 : vector<1x128xi32>
    %c14_i32_528 = arith.constant 14 : i32
    %1180 = vector.broadcast %c14_i32_528 : i32 to vector<1x128xi32>
    %1181 = arith.addi %17, %1180 : vector<1x128xi32>
    %c64_i32_529 = arith.constant 64 : i32
    %1182 = vector.broadcast %c64_i32_529 : i32 to vector<1x128xi32>
    %1183 = arith.cmpi slt, %1181, %1182 : vector<1x128xi32>
    %1184 = arith.andi %1179, %1183 : vector<1x128xi1>
    %cst_530 = arith.constant 0.000000e+00 : f32
    %1185 = vector.shape_cast %1184 : vector<1x128xi1> to vector<1x128xi1>
    %1186 = vector.broadcast %1185 : vector<1x128xi1> to vector<8x128xi1>
    %1187 = vector.broadcast %cst_530 : f32 to vector<8x128xf32>
    %1188 = arith.select %1186, %1175, %1187 : vector<8x128xi1>, vector<8x128xf32>
    %c264_531 = arith.constant 264 : index
    %c0_532 = arith.constant 0 : index
    %1189 = vector.load %arg19[%c264_531, %c0_532] : memref<352x128xf32, #tpu.memory_space<vmem>>, vector<8x128xf32>
    tpu.vector_store %arg19[%c264_531, %c0_532], %1188 {strides = array<i32>} : memref<352x128xf32, #tpu.memory_space<vmem>>, vector<8x128xf32>,
    %c113_i32_533 = arith.constant 113 : i32
    %1190 = tpu.dynamic_rotate %680 by %c113_i32_533 dim 1 : vector<8x128xf32>, i32 -> vector<8x128xf32>
    %c15_i32_534 = arith.constant 15 : i32
    %1191 = vector.broadcast %c15_i32_534 : i32 to vector<1x128xi32>
    %1192 = arith.addi %17, %1191 : vector<1x128xi32>
    %c0_i32_535 = arith.constant 0 : i32
    %1193 = vector.broadcast %c0_i32_535 : i32 to vector<1x128xi32>
    %1194 = arith.cmpi sge, %1192, %1193 : vector<1x128xi32>
    %c15_i32_536 = arith.constant 15 : i32
    %1195 = vector.broadcast %c15_i32_536 : i32 to vector<1x128xi32>
    %1196 = arith.addi %17, %1195 : vector<1x128xi32>
    %c64_i32_537 = arith.constant 64 : i32
    %1197 = vector.broadcast %c64_i32_537 : i32 to vector<1x128xi32>
    %1198 = arith.cmpi slt, %1196, %1197 : vector<1x128xi32>
    %1199 = arith.andi %1194, %1198 : vector<1x128xi1>
    %cst_538 = arith.constant 0.000000e+00 : f32
    %1200 = vector.shape_cast %1199 : vector<1x128xi1> to vector<1x128xi1>
    %1201 = vector.broadcast %1200 : vector<1x128xi1> to vector<8x128xi1>
    %1202 = vector.broadcast %cst_538 : f32 to vector<8x128xf32>
    %1203 = arith.select %1201, %1190, %1202 : vector<8x128xi1>, vector<8x128xf32>
    %c272_539 = arith.constant 272 : index
    %c0_540 = arith.constant 0 : index
    %1204 = vector.load %arg19[%c272_539, %c0_540] : memref<352x128xf32, #tpu.memory_space<vmem>>, vector<8x128xf32>
    tpu.vector_store %arg19[%c272_539, %c0_540], %1203 {strides = array<i32>} : memref<352x128xf32, #tpu.memory_space<vmem>>, vector<8x128xf32>,
    %c112_i32_541 = arith.constant 112 : i32
    %1205 = tpu.dynamic_rotate %680 by %c112_i32_541 dim 1 : vector<8x128xf32>, i32 -> vector<8x128xf32>
    %c16_i32_542 = arith.constant 16 : i32
    %1206 = vector.broadcast %c16_i32_542 : i32 to vector<1x128xi32>
    %1207 = arith.addi %17, %1206 : vector<1x128xi32>
    %c0_i32_543 = arith.constant 0 : i32
    %1208 = vector.broadcast %c0_i32_543 : i32 to vector<1x128xi32>
    %1209 = arith.cmpi sge, %1207, %1208 : vector<1x128xi32>
    %c16_i32_544 = arith.constant 16 : i32
    %1210 = vector.broadcast %c16_i32_544 : i32 to vector<1x128xi32>
    %1211 = arith.addi %17, %1210 : vector<1x128xi32>
    %c64_i32_545 = arith.constant 64 : i32
    %1212 = vector.broadcast %c64_i32_545 : i32 to vector<1x128xi32>
    %1213 = arith.cmpi slt, %1211, %1212 : vector<1x128xi32>
    %1214 = arith.andi %1209, %1213 : vector<1x128xi1>
    %cst_546 = arith.constant 0.000000e+00 : f32
    %1215 = vector.shape_cast %1214 : vector<1x128xi1> to vector<1x128xi1>
    %1216 = vector.broadcast %1215 : vector<1x128xi1> to vector<8x128xi1>
    %1217 = vector.broadcast %cst_546 : f32 to vector<8x128xf32>
    %1218 = arith.select %1216, %1205, %1217 : vector<8x128xi1>, vector<8x128xf32>
    %c280_547 = arith.constant 280 : index
    %c0_548 = arith.constant 0 : index
    %1219 = vector.load %arg19[%c280_547, %c0_548] : memref<352x128xf32, #tpu.memory_space<vmem>>, vector<8x128xf32>
    tpu.vector_store %arg19[%c280_547, %c0_548], %1218 {strides = array<i32>} : memref<352x128xf32, #tpu.memory_space<vmem>>, vector<8x128xf32>,
    %c111_i32_549 = arith.constant 111 : i32
    %1220 = tpu.dynamic_rotate %680 by %c111_i32_549 dim 1 : vector<8x128xf32>, i32 -> vector<8x128xf32>
    %c17_i32_550 = arith.constant 17 : i32
    %1221 = vector.broadcast %c17_i32_550 : i32 to vector<1x128xi32>
    %1222 = arith.addi %17, %1221 : vector<1x128xi32>
    %c0_i32_551 = arith.constant 0 : i32
    %1223 = vector.broadcast %c0_i32_551 : i32 to vector<1x128xi32>
    %1224 = arith.cmpi sge, %1222, %1223 : vector<1x128xi32>
    %c17_i32_552 = arith.constant 17 : i32
    %1225 = vector.broadcast %c17_i32_552 : i32 to vector<1x128xi32>
    %1226 = arith.addi %17, %1225 : vector<1x128xi32>
    %c64_i32_553 = arith.constant 64 : i32
    %1227 = vector.broadcast %c64_i32_553 : i32 to vector<1x128xi32>
    %1228 = arith.cmpi slt, %1226, %1227 : vector<1x128xi32>
    %1229 = arith.andi %1224, %1228 : vector<1x128xi1>
    %cst_554 = arith.constant 0.000000e+00 : f32
    %1230 = vector.shape_cast %1229 : vector<1x128xi1> to vector<1x128xi1>
    %1231 = vector.broadcast %1230 : vector<1x128xi1> to vector<8x128xi1>
    %1232 = vector.broadcast %cst_554 : f32 to vector<8x128xf32>
    %1233 = arith.select %1231, %1220, %1232 : vector<8x128xi1>, vector<8x128xf32>
    %c288_555 = arith.constant 288 : index
    %c0_556 = arith.constant 0 : index
    %1234 = vector.load %arg19[%c288_555, %c0_556] : memref<352x128xf32, #tpu.memory_space<vmem>>, vector<8x128xf32>
    tpu.vector_store %arg19[%c288_555, %c0_556], %1233 {strides = array<i32>} : memref<352x128xf32, #tpu.memory_space<vmem>>, vector<8x128xf32>,
    %c110_i32_557 = arith.constant 110 : i32
    %1235 = tpu.dynamic_rotate %680 by %c110_i32_557 dim 1 : vector<8x128xf32>, i32 -> vector<8x128xf32>
    %c18_i32_558 = arith.constant 18 : i32
    %1236 = vector.broadcast %c18_i32_558 : i32 to vector<1x128xi32>
    %1237 = arith.addi %17, %1236 : vector<1x128xi32>
    %c0_i32_559 = arith.constant 0 : i32
    %1238 = vector.broadcast %c0_i32_559 : i32 to vector<1x128xi32>
    %1239 = arith.cmpi sge, %1237, %1238 : vector<1x128xi32>
    %c18_i32_560 = arith.constant 18 : i32
    %1240 = vector.broadcast %c18_i32_560 : i32 to vector<1x128xi32>
    %1241 = arith.addi %17, %1240 : vector<1x128xi32>
    %c64_i32_561 = arith.constant 64 : i32
    %1242 = vector.broadcast %c64_i32_561 : i32 to vector<1x128xi32>
    %1243 = arith.cmpi slt, %1241, %1242 : vector<1x128xi32>
    %1244 = arith.andi %1239, %1243 : vector<1x128xi1>
    %cst_562 = arith.constant 0.000000e+00 : f32
    %1245 = vector.shape_cast %1244 : vector<1x128xi1> to vector<1x128xi1>
    %1246 = vector.broadcast %1245 : vector<1x128xi1> to vector<8x128xi1>
    %1247 = vector.broadcast %cst_562 : f32 to vector<8x128xf32>
    %1248 = arith.select %1246, %1235, %1247 : vector<8x128xi1>, vector<8x128xf32>
    %c296_563 = arith.constant 296 : index
    %c0_564 = arith.constant 0 : index
    %1249 = vector.load %arg19[%c296_563, %c0_564] : memref<352x128xf32, #tpu.memory_space<vmem>>, vector<8x128xf32>
    tpu.vector_store %arg19[%c296_563, %c0_564], %1248 {strides = array<i32>} : memref<352x128xf32, #tpu.memory_space<vmem>>, vector<8x128xf32>,
    %c109_i32_565 = arith.constant 109 : i32
    %1250 = tpu.dynamic_rotate %680 by %c109_i32_565 dim 1 : vector<8x128xf32>, i32 -> vector<8x128xf32>
    %c19_i32_566 = arith.constant 19 : i32
    %1251 = vector.broadcast %c19_i32_566 : i32 to vector<1x128xi32>
    %1252 = arith.addi %17, %1251 : vector<1x128xi32>
    %c0_i32_567 = arith.constant 0 : i32
    %1253 = vector.broadcast %c0_i32_567 : i32 to vector<1x128xi32>
    %1254 = arith.cmpi sge, %1252, %1253 : vector<1x128xi32>
    %c19_i32_568 = arith.constant 19 : i32
    %1255 = vector.broadcast %c19_i32_568 : i32 to vector<1x128xi32>
    %1256 = arith.addi %17, %1255 : vector<1x128xi32>
    %c64_i32_569 = arith.constant 64 : i32
    %1257 = vector.broadcast %c64_i32_569 : i32 to vector<1x128xi32>
    %1258 = arith.cmpi slt, %1256, %1257 : vector<1x128xi32>
    %1259 = arith.andi %1254, %1258 : vector<1x128xi1>
    %cst_570 = arith.constant 0.000000e+00 : f32
    %1260 = vector.shape_cast %1259 : vector<1x128xi1> to vector<1x128xi1>
    %1261 = vector.broadcast %1260 : vector<1x128xi1> to vector<8x128xi1>
    %1262 = vector.broadcast %cst_570 : f32 to vector<8x128xf32>
    %1263 = arith.select %1261, %1250, %1262 : vector<8x128xi1>, vector<8x128xf32>
    %c304_571 = arith.constant 304 : index
    %c0_572 = arith.constant 0 : index
    %1264 = vector.load %arg19[%c304_571, %c0_572] : memref<352x128xf32, #tpu.memory_space<vmem>>, vector<8x128xf32>
    tpu.vector_store %arg19[%c304_571, %c0_572], %1263 {strides = array<i32>} : memref<352x128xf32, #tpu.memory_space<vmem>>, vector<8x128xf32>,
    %c108_i32_573 = arith.constant 108 : i32
    %1265 = tpu.dynamic_rotate %680 by %c108_i32_573 dim 1 : vector<8x128xf32>, i32 -> vector<8x128xf32>
    %c20_i32_574 = arith.constant 20 : i32
    %1266 = vector.broadcast %c20_i32_574 : i32 to vector<1x128xi32>
    %1267 = arith.addi %17, %1266 : vector<1x128xi32>
    %c0_i32_575 = arith.constant 0 : i32
    %1268 = vector.broadcast %c0_i32_575 : i32 to vector<1x128xi32>
    %1269 = arith.cmpi sge, %1267, %1268 : vector<1x128xi32>
    %c20_i32_576 = arith.constant 20 : i32
    %1270 = vector.broadcast %c20_i32_576 : i32 to vector<1x128xi32>
    %1271 = arith.addi %17, %1270 : vector<1x128xi32>
    %c64_i32_577 = arith.constant 64 : i32
    %1272 = vector.broadcast %c64_i32_577 : i32 to vector<1x128xi32>
    %1273 = arith.cmpi slt, %1271, %1272 : vector<1x128xi32>
    %1274 = arith.andi %1269, %1273 : vector<1x128xi1>
    %cst_578 = arith.constant 0.000000e+00 : f32
    %1275 = vector.shape_cast %1274 : vector<1x128xi1> to vector<1x128xi1>
    %1276 = vector.broadcast %1275 : vector<1x128xi1> to vector<8x128xi1>
    %1277 = vector.broadcast %cst_578 : f32 to vector<8x128xf32>
    %1278 = arith.select %1276, %1265, %1277 : vector<8x128xi1>, vector<8x128xf32>
    %c312_579 = arith.constant 312 : index
    %c0_580 = arith.constant 0 : index
    %1279 = vector.load %arg19[%c312_579, %c0_580] : memref<352x128xf32, #tpu.memory_space<vmem>>, vector<8x128xf32>
    tpu.vector_store %arg19[%c312_579, %c0_580], %1278 {strides = array<i32>} : memref<352x128xf32, #tpu.memory_space<vmem>>, vector<8x128xf32>,
    %c1_i32_581 = arith.constant 1 : i32
    %1280 = tpu.dynamic_rotate %678 by %c1_i32_581 dim 1 : vector<32x128xf32>, i32 -> vector<32x128xf32>
    %c-1_i32_582 = arith.constant -1 : i32
    %1281 = vector.broadcast %c-1_i32_582 : i32 to vector<1x128xi32>
    %1282 = arith.addi %17, %1281 : vector<1x128xi32>
    %c0_i32_583 = arith.constant 0 : i32
    %1283 = vector.broadcast %c0_i32_583 : i32 to vector<1x128xi32>
    %1284 = arith.cmpi sge, %1282, %1283 : vector<1x128xi32>
    %c-1_i32_584 = arith.constant -1 : i32
    %1285 = vector.broadcast %c-1_i32_584 : i32 to vector<1x128xi32>
    %1286 = arith.addi %17, %1285 : vector<1x128xi32>
    %c64_i32_585 = arith.constant 64 : i32
    %1287 = vector.broadcast %c64_i32_585 : i32 to vector<1x128xi32>
    %1288 = arith.cmpi slt, %1286, %1287 : vector<1x128xi32>
    %1289 = arith.andi %1284, %1288 : vector<1x128xi1>
    %cst_586 = arith.constant 0xFF800000 : f32
    %1290 = vector.shape_cast %1289 : vector<1x128xi1> to vector<1x128xi1>
    %1291 = vector.broadcast %1290 : vector<1x128xi1> to vector<32x128xi1>
    %1292 = vector.broadcast %cst_586 : f32 to vector<32x128xf32>
    %1293 = arith.select %1291, %1280, %1292 : vector<32x128xi1>, vector<32x128xf32>
    %c127_i32_587 = arith.constant 127 : i32
    %1294 = tpu.dynamic_rotate %678 by %c127_i32_587 dim 1 : vector<32x128xf32>, i32 -> vector<32x128xf32>
    %c1_i32_588 = arith.constant 1 : i32
    %1295 = vector.broadcast %c1_i32_588 : i32 to vector<1x128xi32>
    %1296 = arith.addi %17, %1295 : vector<1x128xi32>
    %c0_i32_589 = arith.constant 0 : i32
    %1297 = vector.broadcast %c0_i32_589 : i32 to vector<1x128xi32>
    %1298 = arith.cmpi sge, %1296, %1297 : vector<1x128xi32>
    %c1_i32_590 = arith.constant 1 : i32
    %1299 = vector.broadcast %c1_i32_590 : i32 to vector<1x128xi32>
    %1300 = arith.addi %17, %1299 : vector<1x128xi32>
    %c64_i32_591 = arith.constant 64 : i32
    %1301 = vector.broadcast %c64_i32_591 : i32 to vector<1x128xi32>
    %1302 = arith.cmpi slt, %1300, %1301 : vector<1x128xi32>
    %1303 = arith.andi %1298, %1302 : vector<1x128xi1>
    %cst_592 = arith.constant 0xFF800000 : f32
    %1304 = vector.shape_cast %1303 : vector<1x128xi1> to vector<1x128xi1>
    %1305 = vector.broadcast %1304 : vector<1x128xi1> to vector<32x128xi1>
    %1306 = vector.broadcast %cst_592 : f32 to vector<32x128xf32>
    %1307 = arith.select %1305, %1294, %1306 : vector<32x128xi1>, vector<32x128xf32>
    %1308 = arith.maximumf %1293, %678 : vector<32x128xf32>
    %1309 = arith.maximumf %1308, %1307 : vector<32x128xf32>
    %c320_593 = arith.constant 320 : index
    %c0_594 = arith.constant 0 : index
    %1310 = vector.load %arg19[%c320_593, %c0_594] : memref<352x128xf32, #tpu.memory_space<vmem>>, vector<32x128xf32>
    tpu.vector_store %arg19[%c320_593, %c0_594], %1309 {strides = array<i32>} : memref<352x128xf32, #tpu.memory_space<vmem>>, vector<32x128xf32>,
    %c0_595 = arith.constant 0 : index
    %c0_596 = arith.constant 0 : index
    %1311 = vector.load %arg7[%c0_595, %c0_596] : memref<32x352xf32, #tpu.memory_space<vmem>>, vector<32x352xf32>
    %c0_597 = arith.constant 0 : index
    %c0_598 = arith.constant 0 : index
    %1312 = vector.load %arg19[%c0_597, %c0_598] : memref<352x128xf32, #tpu.memory_space<vmem>>, vector<352x128xf32>
    %cst_599 = arith.constant dense<0.000000e+00> : vector<32x128xf32>
    %1313 = tpu.matmul %1311, %1312, %cst_599 {dimension_numbers = #tpu.dot_dimension_numbers<[1], [0], [0], [1], [0, 0, 1, 1], [], []>} : vector<32x352xf32>, vector<352x128xf32>, vector<32x128xf32> -> vector<32x128xf32>
    %c0_600 = arith.constant 0 : index
    %c0_601 = arith.constant 0 : index
    %1314 = vector.load %arg8[%c0_600, %c0_601] : memref<32x1xf32, #tpu.memory_space<vmem>>, vector<32x1xf32>
    %c0_602 = arith.constant 0 : index
    %c0_603 = arith.constant 0 : index
    %1315 = vector.load %arg9[%c0_602, %c0_603] : memref<32x1xf32, #tpu.memory_space<vmem>>, vector<32x1xf32>
    %cst_604 = arith.constant dense<0.000000e+00> : vector<32xf32>
    %1316 = vector.multi_reduction <add>, %1313, %cst_604 [1] : vector<32x128xf32> to vector<32xf32>
    %1317 = vector.shape_cast %1316 : vector<32xf32> to vector<32x1xf32>
    %cst_605 = arith.constant 7.812500e-03 : f32
    %1318 = vector.broadcast %cst_605 : f32 to vector<32x1xf32>
    %1319 = arith.mulf %1317, %1318 : vector<32x1xf32>
    %1320 = vector.broadcast %1319 : vector<32x1xf32> to vector<32x128xf32>
    %1321 = arith.subf %1313, %1320 : vector<32x128xf32>
    %1322 = arith.mulf %1321, %1321 : vector<32x128xf32>
    %cst_606 = arith.constant dense<0.000000e+00> : vector<32xf32>
    %1323 = vector.multi_reduction <add>, %1322, %cst_606 [1] : vector<32x128xf32> to vector<32xf32>
    %1324 = vector.shape_cast %1323 : vector<32xf32> to vector<32x1xf32>
    %cst_607 = arith.constant 7.812500e-03 : f32
    %1325 = vector.broadcast %cst_607 : f32 to vector<32x1xf32>
    %1326 = arith.mulf %1324, %1325 : vector<32x1xf32>
    %cst_608 = arith.constant 9.99999974E-6 : f32
    %1327 = vector.broadcast %cst_608 : f32 to vector<32x1xf32>
    %1328 = arith.addf %1326, %1327 : vector<32x1xf32>
    %1329 = math.rsqrt %1328 : vector<32x1xf32>
    %1330 = vector.broadcast %1329 : vector<32x1xf32> to vector<32x128xf32>
    %1331 = arith.mulf %1321, %1330 : vector<32x128xf32>
    %1332 = vector.broadcast %1314 : vector<32x1xf32> to vector<32x128xf32>
    %1333 = arith.mulf %1331, %1332 : vector<32x128xf32>
    %1334 = vector.broadcast %1315 : vector<32x1xf32> to vector<32x128xf32>
    %1335 = arith.addf %1333, %1334 : vector<32x128xf32>
    %cst_609 = arith.constant 0.000000e+00 : f32
    %1336 = vector.broadcast %cst_609 : f32 to vector<32x128xf32>
    %1337 = arith.maximumf %1335, %1336 : vector<32x128xf32>
    %c0_610 = arith.constant 0 : index
    %c0_611 = arith.constant 0 : index
    %1338 = vector.load %arg10[%c0_610, %c0_611] : memref<8x32xf32, #tpu.memory_space<vmem>>, vector<8x32xf32>
    %cst_612 = arith.constant dense<0.000000e+00> : vector<8x128xf32>
    %1339 = tpu.matmul %1338, %1337, %cst_612 {dimension_numbers = #tpu.dot_dimension_numbers<[1], [0], [0], [1], [0, 0, 1, 1], [], []>} : vector<8x32xf32>, vector<32x128xf32>, vector<8x128xf32> -> vector<8x128xf32>
    %c19_i32_613 = arith.constant 19 : i32
    %1340 = tpu.dynamic_rotate %1339 by %c19_i32_613 dim 1 : vector<8x128xf32>, i32 -> vector<8x128xf32>
    %c-19_i32_614 = arith.constant -19 : i32
    %1341 = vector.broadcast %c-19_i32_614 : i32 to vector<1x128xi32>
    %1342 = arith.addi %17, %1341 : vector<1x128xi32>
    %c0_i32_615 = arith.constant 0 : i32
    %1343 = vector.broadcast %c0_i32_615 : i32 to vector<1x128xi32>
    %1344 = arith.cmpi sge, %1342, %1343 : vector<1x128xi32>
    %c-19_i32_616 = arith.constant -19 : i32
    %1345 = vector.broadcast %c-19_i32_616 : i32 to vector<1x128xi32>
    %1346 = arith.addi %17, %1345 : vector<1x128xi32>
    %c64_i32_617 = arith.constant 64 : i32
    %1347 = vector.broadcast %c64_i32_617 : i32 to vector<1x128xi32>
    %1348 = arith.cmpi slt, %1346, %1347 : vector<1x128xi32>
    %1349 = arith.andi %1344, %1348 : vector<1x128xi1>
    %cst_618 = arith.constant 0.000000e+00 : f32
    %1350 = vector.shape_cast %1349 : vector<1x128xi1> to vector<1x128xi1>
    %1351 = vector.broadcast %1350 : vector<1x128xi1> to vector<8x128xi1>
    %1352 = vector.broadcast %cst_618 : f32 to vector<8x128xf32>
    %1353 = arith.select %1351, %1340, %1352 : vector<8x128xi1>, vector<8x128xf32>
    %c0_619 = arith.constant 0 : index
    %c0_620 = arith.constant 0 : index
    %1354 = vector.load %arg19[%c0_619, %c0_620] : memref<352x128xf32, #tpu.memory_space<vmem>>, vector<8x128xf32>
    tpu.vector_store %arg19[%c0_619, %c0_620], %1353 {strides = array<i32>} : memref<352x128xf32, #tpu.memory_space<vmem>>, vector<8x128xf32>,
    %c18_i32_621 = arith.constant 18 : i32
    %1355 = tpu.dynamic_rotate %1339 by %c18_i32_621 dim 1 : vector<8x128xf32>, i32 -> vector<8x128xf32>
    %c-18_i32_622 = arith.constant -18 : i32
    %1356 = vector.broadcast %c-18_i32_622 : i32 to vector<1x128xi32>
    %1357 = arith.addi %17, %1356 : vector<1x128xi32>
    %c0_i32_623 = arith.constant 0 : i32
    %1358 = vector.broadcast %c0_i32_623 : i32 to vector<1x128xi32>
    %1359 = arith.cmpi sge, %1357, %1358 : vector<1x128xi32>
    %c-18_i32_624 = arith.constant -18 : i32
    %1360 = vector.broadcast %c-18_i32_624 : i32 to vector<1x128xi32>
    %1361 = arith.addi %17, %1360 : vector<1x128xi32>
    %c64_i32_625 = arith.constant 64 : i32
    %1362 = vector.broadcast %c64_i32_625 : i32 to vector<1x128xi32>
    %1363 = arith.cmpi slt, %1361, %1362 : vector<1x128xi32>
    %1364 = arith.andi %1359, %1363 : vector<1x128xi1>
    %cst_626 = arith.constant 0.000000e+00 : f32
    %1365 = vector.shape_cast %1364 : vector<1x128xi1> to vector<1x128xi1>
    %1366 = vector.broadcast %1365 : vector<1x128xi1> to vector<8x128xi1>
    %1367 = vector.broadcast %cst_626 : f32 to vector<8x128xf32>
    %1368 = arith.select %1366, %1355, %1367 : vector<8x128xi1>, vector<8x128xf32>
    %c8_627 = arith.constant 8 : index
    %c0_628 = arith.constant 0 : index
    %1369 = vector.load %arg19[%c8_627, %c0_628] : memref<352x128xf32, #tpu.memory_space<vmem>>, vector<8x128xf32>
    tpu.vector_store %arg19[%c8_627, %c0_628], %1368 {strides = array<i32>} : memref<352x128xf32, #tpu.memory_space<vmem>>, vector<8x128xf32>,
    %c17_i32_629 = arith.constant 17 : i32
    %1370 = tpu.dynamic_rotate %1339 by %c17_i32_629 dim 1 : vector<8x128xf32>, i32 -> vector<8x128xf32>
    %c-17_i32_630 = arith.constant -17 : i32
    %1371 = vector.broadcast %c-17_i32_630 : i32 to vector<1x128xi32>
    %1372 = arith.addi %17, %1371 : vector<1x128xi32>
    %c0_i32_631 = arith.constant 0 : i32
    %1373 = vector.broadcast %c0_i32_631 : i32 to vector<1x128xi32>
    %1374 = arith.cmpi sge, %1372, %1373 : vector<1x128xi32>
    %c-17_i32_632 = arith.constant -17 : i32
    %1375 = vector.broadcast %c-17_i32_632 : i32 to vector<1x128xi32>
    %1376 = arith.addi %17, %1375 : vector<1x128xi32>
    %c64_i32_633 = arith.constant 64 : i32
    %1377 = vector.broadcast %c64_i32_633 : i32 to vector<1x128xi32>
    %1378 = arith.cmpi slt, %1376, %1377 : vector<1x128xi32>
    %1379 = arith.andi %1374, %1378 : vector<1x128xi1>
    %cst_634 = arith.constant 0.000000e+00 : f32
    %1380 = vector.shape_cast %1379 : vector<1x128xi1> to vector<1x128xi1>
    %1381 = vector.broadcast %1380 : vector<1x128xi1> to vector<8x128xi1>
    %1382 = vector.broadcast %cst_634 : f32 to vector<8x128xf32>
    %1383 = arith.select %1381, %1370, %1382 : vector<8x128xi1>, vector<8x128xf32>
    %c16_635 = arith.constant 16 : index
    %c0_636 = arith.constant 0 : index
    %1384 = vector.load %arg19[%c16_635, %c0_636] : memref<352x128xf32, #tpu.memory_space<vmem>>, vector<8x128xf32>
    tpu.vector_store %arg19[%c16_635, %c0_636], %1383 {strides = array<i32>} : memref<352x128xf32, #tpu.memory_space<vmem>>, vector<8x128xf32>,
    %c16_i32_637 = arith.constant 16 : i32
    %1385 = tpu.dynamic_rotate %1339 by %c16_i32_637 dim 1 : vector<8x128xf32>, i32 -> vector<8x128xf32>
    %c-16_i32_638 = arith.constant -16 : i32
    %1386 = vector.broadcast %c-16_i32_638 : i32 to vector<1x128xi32>
    %1387 = arith.addi %17, %1386 : vector<1x128xi32>
    %c0_i32_639 = arith.constant 0 : i32
    %1388 = vector.broadcast %c0_i32_639 : i32 to vector<1x128xi32>
    %1389 = arith.cmpi sge, %1387, %1388 : vector<1x128xi32>
    %c-16_i32_640 = arith.constant -16 : i32
    %1390 = vector.broadcast %c-16_i32_640 : i32 to vector<1x128xi32>
    %1391 = arith.addi %17, %1390 : vector<1x128xi32>
    %c64_i32_641 = arith.constant 64 : i32
    %1392 = vector.broadcast %c64_i32_641 : i32 to vector<1x128xi32>
    %1393 = arith.cmpi slt, %1391, %1392 : vector<1x128xi32>
    %1394 = arith.andi %1389, %1393 : vector<1x128xi1>
    %cst_642 = arith.constant 0.000000e+00 : f32
    %1395 = vector.shape_cast %1394 : vector<1x128xi1> to vector<1x128xi1>
    %1396 = vector.broadcast %1395 : vector<1x128xi1> to vector<8x128xi1>
    %1397 = vector.broadcast %cst_642 : f32 to vector<8x128xf32>
    %1398 = arith.select %1396, %1385, %1397 : vector<8x128xi1>, vector<8x128xf32>
    %c24_643 = arith.constant 24 : index
    %c0_644 = arith.constant 0 : index
    %1399 = vector.load %arg19[%c24_643, %c0_644] : memref<352x128xf32, #tpu.memory_space<vmem>>, vector<8x128xf32>
    tpu.vector_store %arg19[%c24_643, %c0_644], %1398 {strides = array<i32>} : memref<352x128xf32, #tpu.memory_space<vmem>>, vector<8x128xf32>,
    %c15_i32_645 = arith.constant 15 : i32
    %1400 = tpu.dynamic_rotate %1339 by %c15_i32_645 dim 1 : vector<8x128xf32>, i32 -> vector<8x128xf32>
    %c-15_i32_646 = arith.constant -15 : i32
    %1401 = vector.broadcast %c-15_i32_646 : i32 to vector<1x128xi32>
    %1402 = arith.addi %17, %1401 : vector<1x128xi32>
    %c0_i32_647 = arith.constant 0 : i32
    %1403 = vector.broadcast %c0_i32_647 : i32 to vector<1x128xi32>
    %1404 = arith.cmpi sge, %1402, %1403 : vector<1x128xi32>
    %c-15_i32_648 = arith.constant -15 : i32
    %1405 = vector.broadcast %c-15_i32_648 : i32 to vector<1x128xi32>
    %1406 = arith.addi %17, %1405 : vector<1x128xi32>
    %c64_i32_649 = arith.constant 64 : i32
    %1407 = vector.broadcast %c64_i32_649 : i32 to vector<1x128xi32>
    %1408 = arith.cmpi slt, %1406, %1407 : vector<1x128xi32>
    %1409 = arith.andi %1404, %1408 : vector<1x128xi1>
    %cst_650 = arith.constant 0.000000e+00 : f32
    %1410 = vector.shape_cast %1409 : vector<1x128xi1> to vector<1x128xi1>
    %1411 = vector.broadcast %1410 : vector<1x128xi1> to vector<8x128xi1>
    %1412 = vector.broadcast %cst_650 : f32 to vector<8x128xf32>
    %1413 = arith.select %1411, %1400, %1412 : vector<8x128xi1>, vector<8x128xf32>
    %c32_651 = arith.constant 32 : index
    %c0_652 = arith.constant 0 : index
    %1414 = vector.load %arg19[%c32_651, %c0_652] : memref<352x128xf32, #tpu.memory_space<vmem>>, vector<8x128xf32>
    tpu.vector_store %arg19[%c32_651, %c0_652], %1413 {strides = array<i32>} : memref<352x128xf32, #tpu.memory_space<vmem>>, vector<8x128xf32>,
    %c14_i32_653 = arith.constant 14 : i32
    %1415 = tpu.dynamic_rotate %1339 by %c14_i32_653 dim 1 : vector<8x128xf32>, i32 -> vector<8x128xf32>
    %c-14_i32_654 = arith.constant -14 : i32
    %1416 = vector.broadcast %c-14_i32_654 : i32 to vector<1x128xi32>
    %1417 = arith.addi %17, %1416 : vector<1x128xi32>
    %c0_i32_655 = arith.constant 0 : i32
    %1418 = vector.broadcast %c0_i32_655 : i32 to vector<1x128xi32>
    %1419 = arith.cmpi sge, %1417, %1418 : vector<1x128xi32>
    %c-14_i32_656 = arith.constant -14 : i32
    %1420 = vector.broadcast %c-14_i32_656 : i32 to vector<1x128xi32>
    %1421 = arith.addi %17, %1420 : vector<1x128xi32>
    %c64_i32_657 = arith.constant 64 : i32
    %1422 = vector.broadcast %c64_i32_657 : i32 to vector<1x128xi32>
    %1423 = arith.cmpi slt, %1421, %1422 : vector<1x128xi32>
    %1424 = arith.andi %1419, %1423 : vector<1x128xi1>
    %cst_658 = arith.constant 0.000000e+00 : f32
    %1425 = vector.shape_cast %1424 : vector<1x128xi1> to vector<1x128xi1>
    %1426 = vector.broadcast %1425 : vector<1x128xi1> to vector<8x128xi1>
    %1427 = vector.broadcast %cst_658 : f32 to vector<8x128xf32>
    %1428 = arith.select %1426, %1415, %1427 : vector<8x128xi1>, vector<8x128xf32>
    %c40_659 = arith.constant 40 : index
    %c0_660 = arith.constant 0 : index
    %1429 = vector.load %arg19[%c40_659, %c0_660] : memref<352x128xf32, #tpu.memory_space<vmem>>, vector<8x128xf32>
    tpu.vector_store %arg19[%c40_659, %c0_660], %1428 {strides = array<i32>} : memref<352x128xf32, #tpu.memory_space<vmem>>, vector<8x128xf32>,
    %c13_i32_661 = arith.constant 13 : i32
    %1430 = tpu.dynamic_rotate %1339 by %c13_i32_661 dim 1 : vector<8x128xf32>, i32 -> vector<8x128xf32>
    %c-13_i32_662 = arith.constant -13 : i32
    %1431 = vector.broadcast %c-13_i32_662 : i32 to vector<1x128xi32>
    %1432 = arith.addi %17, %1431 : vector<1x128xi32>
    %c0_i32_663 = arith.constant 0 : i32
    %1433 = vector.broadcast %c0_i32_663 : i32 to vector<1x128xi32>
    %1434 = arith.cmpi sge, %1432, %1433 : vector<1x128xi32>
    %c-13_i32_664 = arith.constant -13 : i32
    %1435 = vector.broadcast %c-13_i32_664 : i32 to vector<1x128xi32>
    %1436 = arith.addi %17, %1435 : vector<1x128xi32>
    %c64_i32_665 = arith.constant 64 : i32
    %1437 = vector.broadcast %c64_i32_665 : i32 to vector<1x128xi32>
    %1438 = arith.cmpi slt, %1436, %1437 : vector<1x128xi32>
    %1439 = arith.andi %1434, %1438 : vector<1x128xi1>
    %cst_666 = arith.constant 0.000000e+00 : f32
    %1440 = vector.shape_cast %1439 : vector<1x128xi1> to vector<1x128xi1>
    %1441 = vector.broadcast %1440 : vector<1x128xi1> to vector<8x128xi1>
    %1442 = vector.broadcast %cst_666 : f32 to vector<8x128xf32>
    %1443 = arith.select %1441, %1430, %1442 : vector<8x128xi1>, vector<8x128xf32>
    %c48_667 = arith.constant 48 : index
    %c0_668 = arith.constant 0 : index
    %1444 = vector.load %arg19[%c48_667, %c0_668] : memref<352x128xf32, #tpu.memory_space<vmem>>, vector<8x128xf32>
    tpu.vector_store %arg19[%c48_667, %c0_668], %1443 {strides = array<i32>} : memref<352x128xf32, #tpu.memory_space<vmem>>, vector<8x128xf32>,
    %c12_i32_669 = arith.constant 12 : i32
    %1445 = tpu.dynamic_rotate %1339 by %c12_i32_669 dim 1 : vector<8x128xf32>, i32 -> vector<8x128xf32>
    %c-12_i32_670 = arith.constant -12 : i32
    %1446 = vector.broadcast %c-12_i32_670 : i32 to vector<1x128xi32>
    %1447 = arith.addi %17, %1446 : vector<1x128xi32>
    %c0_i32_671 = arith.constant 0 : i32
    %1448 = vector.broadcast %c0_i32_671 : i32 to vector<1x128xi32>
    %1449 = arith.cmpi sge, %1447, %1448 : vector<1x128xi32>
    %c-12_i32_672 = arith.constant -12 : i32
    %1450 = vector.broadcast %c-12_i32_672 : i32 to vector<1x128xi32>
    %1451 = arith.addi %17, %1450 : vector<1x128xi32>
    %c64_i32_673 = arith.constant 64 : i32
    %1452 = vector.broadcast %c64_i32_673 : i32 to vector<1x128xi32>
    %1453 = arith.cmpi slt, %1451, %1452 : vector<1x128xi32>
    %1454 = arith.andi %1449, %1453 : vector<1x128xi1>
    %cst_674 = arith.constant 0.000000e+00 : f32
    %1455 = vector.shape_cast %1454 : vector<1x128xi1> to vector<1x128xi1>
    %1456 = vector.broadcast %1455 : vector<1x128xi1> to vector<8x128xi1>
    %1457 = vector.broadcast %cst_674 : f32 to vector<8x128xf32>
    %1458 = arith.select %1456, %1445, %1457 : vector<8x128xi1>, vector<8x128xf32>
    %c56_675 = arith.constant 56 : index
    %c0_676 = arith.constant 0 : index
    %1459 = vector.load %arg19[%c56_675, %c0_676] : memref<352x128xf32, #tpu.memory_space<vmem>>, vector<8x128xf32>
    tpu.vector_store %arg19[%c56_675, %c0_676], %1458 {strides = array<i32>} : memref<352x128xf32, #tpu.memory_space<vmem>>, vector<8x128xf32>,
    %c11_i32_677 = arith.constant 11 : i32
    %1460 = tpu.dynamic_rotate %1339 by %c11_i32_677 dim 1 : vector<8x128xf32>, i32 -> vector<8x128xf32>
    %c-11_i32_678 = arith.constant -11 : i32
    %1461 = vector.broadcast %c-11_i32_678 : i32 to vector<1x128xi32>
    %1462 = arith.addi %17, %1461 : vector<1x128xi32>
    %c0_i32_679 = arith.constant 0 : i32
    %1463 = vector.broadcast %c0_i32_679 : i32 to vector<1x128xi32>
    %1464 = arith.cmpi sge, %1462, %1463 : vector<1x128xi32>
    %c-11_i32_680 = arith.constant -11 : i32
    %1465 = vector.broadcast %c-11_i32_680 : i32 to vector<1x128xi32>
    %1466 = arith.addi %17, %1465 : vector<1x128xi32>
    %c64_i32_681 = arith.constant 64 : i32
    %1467 = vector.broadcast %c64_i32_681 : i32 to vector<1x128xi32>
    %1468 = arith.cmpi slt, %1466, %1467 : vector<1x128xi32>
    %1469 = arith.andi %1464, %1468 : vector<1x128xi1>
    %cst_682 = arith.constant 0.000000e+00 : f32
    %1470 = vector.shape_cast %1469 : vector<1x128xi1> to vector<1x128xi1>
    %1471 = vector.broadcast %1470 : vector<1x128xi1> to vector<8x128xi1>
    %1472 = vector.broadcast %cst_682 : f32 to vector<8x128xf32>
    %1473 = arith.select %1471, %1460, %1472 : vector<8x128xi1>, vector<8x128xf32>
    %c64_683 = arith.constant 64 : index
    %c0_684 = arith.constant 0 : index
    %1474 = vector.load %arg19[%c64_683, %c0_684] : memref<352x128xf32, #tpu.memory_space<vmem>>, vector<8x128xf32>
    tpu.vector_store %arg19[%c64_683, %c0_684], %1473 {strides = array<i32>} : memref<352x128xf32, #tpu.memory_space<vmem>>, vector<8x128xf32>,
    %c10_i32_685 = arith.constant 10 : i32
    %1475 = tpu.dynamic_rotate %1339 by %c10_i32_685 dim 1 : vector<8x128xf32>, i32 -> vector<8x128xf32>
    %c-10_i32_686 = arith.constant -10 : i32
    %1476 = vector.broadcast %c-10_i32_686 : i32 to vector<1x128xi32>
    %1477 = arith.addi %17, %1476 : vector<1x128xi32>
    %c0_i32_687 = arith.constant 0 : i32
    %1478 = vector.broadcast %c0_i32_687 : i32 to vector<1x128xi32>
    %1479 = arith.cmpi sge, %1477, %1478 : vector<1x128xi32>
    %c-10_i32_688 = arith.constant -10 : i32
    %1480 = vector.broadcast %c-10_i32_688 : i32 to vector<1x128xi32>
    %1481 = arith.addi %17, %1480 : vector<1x128xi32>
    %c64_i32_689 = arith.constant 64 : i32
    %1482 = vector.broadcast %c64_i32_689 : i32 to vector<1x128xi32>
    %1483 = arith.cmpi slt, %1481, %1482 : vector<1x128xi32>
    %1484 = arith.andi %1479, %1483 : vector<1x128xi1>
    %cst_690 = arith.constant 0.000000e+00 : f32
    %1485 = vector.shape_cast %1484 : vector<1x128xi1> to vector<1x128xi1>
    %1486 = vector.broadcast %1485 : vector<1x128xi1> to vector<8x128xi1>
    %1487 = vector.broadcast %cst_690 : f32 to vector<8x128xf32>
    %1488 = arith.select %1486, %1475, %1487 : vector<8x128xi1>, vector<8x128xf32>
    %c72_691 = arith.constant 72 : index
    %c0_692 = arith.constant 0 : index
    %1489 = vector.load %arg19[%c72_691, %c0_692] : memref<352x128xf32, #tpu.memory_space<vmem>>, vector<8x128xf32>
    tpu.vector_store %arg19[%c72_691, %c0_692], %1488 {strides = array<i32>} : memref<352x128xf32, #tpu.memory_space<vmem>>, vector<8x128xf32>,
    %c9_i32_693 = arith.constant 9 : i32
    %1490 = tpu.dynamic_rotate %1339 by %c9_i32_693 dim 1 : vector<8x128xf32>, i32 -> vector<8x128xf32>
    %c-9_i32_694 = arith.constant -9 : i32
    %1491 = vector.broadcast %c-9_i32_694 : i32 to vector<1x128xi32>
    %1492 = arith.addi %17, %1491 : vector<1x128xi32>
    %c0_i32_695 = arith.constant 0 : i32
    %1493 = vector.broadcast %c0_i32_695 : i32 to vector<1x128xi32>
    %1494 = arith.cmpi sge, %1492, %1493 : vector<1x128xi32>
    %c-9_i32_696 = arith.constant -9 : i32
    %1495 = vector.broadcast %c-9_i32_696 : i32 to vector<1x128xi32>
    %1496 = arith.addi %17, %1495 : vector<1x128xi32>
    %c64_i32_697 = arith.constant 64 : i32
    %1497 = vector.broadcast %c64_i32_697 : i32 to vector<1x128xi32>
    %1498 = arith.cmpi slt, %1496, %1497 : vector<1x128xi32>
    %1499 = arith.andi %1494, %1498 : vector<1x128xi1>
    %cst_698 = arith.constant 0.000000e+00 : f32
    %1500 = vector.shape_cast %1499 : vector<1x128xi1> to vector<1x128xi1>
    %1501 = vector.broadcast %1500 : vector<1x128xi1> to vector<8x128xi1>
    %1502 = vector.broadcast %cst_698 : f32 to vector<8x128xf32>
    %1503 = arith.select %1501, %1490, %1502 : vector<8x128xi1>, vector<8x128xf32>
    %c80_699 = arith.constant 80 : index
    %c0_700 = arith.constant 0 : index
    %1504 = vector.load %arg19[%c80_699, %c0_700] : memref<352x128xf32, #tpu.memory_space<vmem>>, vector<8x128xf32>
    tpu.vector_store %arg19[%c80_699, %c0_700], %1503 {strides = array<i32>} : memref<352x128xf32, #tpu.memory_space<vmem>>, vector<8x128xf32>,
    %c8_i32_701 = arith.constant 8 : i32
    %1505 = tpu.dynamic_rotate %1339 by %c8_i32_701 dim 1 : vector<8x128xf32>, i32 -> vector<8x128xf32>
    %c-8_i32_702 = arith.constant -8 : i32
    %1506 = vector.broadcast %c-8_i32_702 : i32 to vector<1x128xi32>
    %1507 = arith.addi %17, %1506 : vector<1x128xi32>
    %c0_i32_703 = arith.constant 0 : i32
    %1508 = vector.broadcast %c0_i32_703 : i32 to vector<1x128xi32>
    %1509 = arith.cmpi sge, %1507, %1508 : vector<1x128xi32>
    %c-8_i32_704 = arith.constant -8 : i32
    %1510 = vector.broadcast %c-8_i32_704 : i32 to vector<1x128xi32>
    %1511 = arith.addi %17, %1510 : vector<1x128xi32>
    %c64_i32_705 = arith.constant 64 : i32
    %1512 = vector.broadcast %c64_i32_705 : i32 to vector<1x128xi32>
    %1513 = arith.cmpi slt, %1511, %1512 : vector<1x128xi32>
    %1514 = arith.andi %1509, %1513 : vector<1x128xi1>
    %cst_706 = arith.constant 0.000000e+00 : f32
    %1515 = vector.shape_cast %1514 : vector<1x128xi1> to vector<1x128xi1>
    %1516 = vector.broadcast %1515 : vector<1x128xi1> to vector<8x128xi1>
    %1517 = vector.broadcast %cst_706 : f32 to vector<8x128xf32>
    %1518 = arith.select %1516, %1505, %1517 : vector<8x128xi1>, vector<8x128xf32>
    %c88_707 = arith.constant 88 : index
    %c0_708 = arith.constant 0 : index
    %1519 = vector.load %arg19[%c88_707, %c0_708] : memref<352x128xf32, #tpu.memory_space<vmem>>, vector<8x128xf32>
    tpu.vector_store %arg19[%c88_707, %c0_708], %1518 {strides = array<i32>} : memref<352x128xf32, #tpu.memory_space<vmem>>, vector<8x128xf32>,
    %c7_i32_709 = arith.constant 7 : i32
    %1520 = tpu.dynamic_rotate %1339 by %c7_i32_709 dim 1 : vector<8x128xf32>, i32 -> vector<8x128xf32>
    %c-7_i32_710 = arith.constant -7 : i32
    %1521 = vector.broadcast %c-7_i32_710 : i32 to vector<1x128xi32>
    %1522 = arith.addi %17, %1521 : vector<1x128xi32>
    %c0_i32_711 = arith.constant 0 : i32
    %1523 = vector.broadcast %c0_i32_711 : i32 to vector<1x128xi32>
    %1524 = arith.cmpi sge, %1522, %1523 : vector<1x128xi32>
    %c-7_i32_712 = arith.constant -7 : i32
    %1525 = vector.broadcast %c-7_i32_712 : i32 to vector<1x128xi32>
    %1526 = arith.addi %17, %1525 : vector<1x128xi32>
    %c64_i32_713 = arith.constant 64 : i32
    %1527 = vector.broadcast %c64_i32_713 : i32 to vector<1x128xi32>
    %1528 = arith.cmpi slt, %1526, %1527 : vector<1x128xi32>
    %1529 = arith.andi %1524, %1528 : vector<1x128xi1>
    %cst_714 = arith.constant 0.000000e+00 : f32
    %1530 = vector.shape_cast %1529 : vector<1x128xi1> to vector<1x128xi1>
    %1531 = vector.broadcast %1530 : vector<1x128xi1> to vector<8x128xi1>
    %1532 = vector.broadcast %cst_714 : f32 to vector<8x128xf32>
    %1533 = arith.select %1531, %1520, %1532 : vector<8x128xi1>, vector<8x128xf32>
    %c96_715 = arith.constant 96 : index
    %c0_716 = arith.constant 0 : index
    %1534 = vector.load %arg19[%c96_715, %c0_716] : memref<352x128xf32, #tpu.memory_space<vmem>>, vector<8x128xf32>
    tpu.vector_store %arg19[%c96_715, %c0_716], %1533 {strides = array<i32>} : memref<352x128xf32, #tpu.memory_space<vmem>>, vector<8x128xf32>,
    %c6_i32_717 = arith.constant 6 : i32
    %1535 = tpu.dynamic_rotate %1339 by %c6_i32_717 dim 1 : vector<8x128xf32>, i32 -> vector<8x128xf32>
    %c-6_i32_718 = arith.constant -6 : i32
    %1536 = vector.broadcast %c-6_i32_718 : i32 to vector<1x128xi32>
    %1537 = arith.addi %17, %1536 : vector<1x128xi32>
    %c0_i32_719 = arith.constant 0 : i32
    %1538 = vector.broadcast %c0_i32_719 : i32 to vector<1x128xi32>
    %1539 = arith.cmpi sge, %1537, %1538 : vector<1x128xi32>
    %c-6_i32_720 = arith.constant -6 : i32
    %1540 = vector.broadcast %c-6_i32_720 : i32 to vector<1x128xi32>
    %1541 = arith.addi %17, %1540 : vector<1x128xi32>
    %c64_i32_721 = arith.constant 64 : i32
    %1542 = vector.broadcast %c64_i32_721 : i32 to vector<1x128xi32>
    %1543 = arith.cmpi slt, %1541, %1542 : vector<1x128xi32>
    %1544 = arith.andi %1539, %1543 : vector<1x128xi1>
    %cst_722 = arith.constant 0.000000e+00 : f32
    %1545 = vector.shape_cast %1544 : vector<1x128xi1> to vector<1x128xi1>
    %1546 = vector.broadcast %1545 : vector<1x128xi1> to vector<8x128xi1>
    %1547 = vector.broadcast %cst_722 : f32 to vector<8x128xf32>
    %1548 = arith.select %1546, %1535, %1547 : vector<8x128xi1>, vector<8x128xf32>
    %c104_723 = arith.constant 104 : index
    %c0_724 = arith.constant 0 : index
    %1549 = vector.load %arg19[%c104_723, %c0_724] : memref<352x128xf32, #tpu.memory_space<vmem>>, vector<8x128xf32>
    tpu.vector_store %arg19[%c104_723, %c0_724], %1548 {strides = array<i32>} : memref<352x128xf32, #tpu.memory_space<vmem>>, vector<8x128xf32>,
    %c5_i32_725 = arith.constant 5 : i32
    %1550 = tpu.dynamic_rotate %1339 by %c5_i32_725 dim 1 : vector<8x128xf32>, i32 -> vector<8x128xf32>
    %c-5_i32_726 = arith.constant -5 : i32
    %1551 = vector.broadcast %c-5_i32_726 : i32 to vector<1x128xi32>
    %1552 = arith.addi %17, %1551 : vector<1x128xi32>
    %c0_i32_727 = arith.constant 0 : i32
    %1553 = vector.broadcast %c0_i32_727 : i32 to vector<1x128xi32>
    %1554 = arith.cmpi sge, %1552, %1553 : vector<1x128xi32>
    %c-5_i32_728 = arith.constant -5 : i32
    %1555 = vector.broadcast %c-5_i32_728 : i32 to vector<1x128xi32>
    %1556 = arith.addi %17, %1555 : vector<1x128xi32>
    %c64_i32_729 = arith.constant 64 : i32
    %1557 = vector.broadcast %c64_i32_729 : i32 to vector<1x128xi32>
    %1558 = arith.cmpi slt, %1556, %1557 : vector<1x128xi32>
    %1559 = arith.andi %1554, %1558 : vector<1x128xi1>
    %cst_730 = arith.constant 0.000000e+00 : f32
    %1560 = vector.shape_cast %1559 : vector<1x128xi1> to vector<1x128xi1>
    %1561 = vector.broadcast %1560 : vector<1x128xi1> to vector<8x128xi1>
    %1562 = vector.broadcast %cst_730 : f32 to vector<8x128xf32>
    %1563 = arith.select %1561, %1550, %1562 : vector<8x128xi1>, vector<8x128xf32>
    %c112_731 = arith.constant 112 : index
    %c0_732 = arith.constant 0 : index
    %1564 = vector.load %arg19[%c112_731, %c0_732] : memref<352x128xf32, #tpu.memory_space<vmem>>, vector<8x128xf32>
    tpu.vector_store %arg19[%c112_731, %c0_732], %1563 {strides = array<i32>} : memref<352x128xf32, #tpu.memory_space<vmem>>, vector<8x128xf32>,
    %c4_i32_733 = arith.constant 4 : i32
    %1565 = tpu.dynamic_rotate %1339 by %c4_i32_733 dim 1 : vector<8x128xf32>, i32 -> vector<8x128xf32>
    %c-4_i32_734 = arith.constant -4 : i32
    %1566 = vector.broadcast %c-4_i32_734 : i32 to vector<1x128xi32>
    %1567 = arith.addi %17, %1566 : vector<1x128xi32>
    %c0_i32_735 = arith.constant 0 : i32
    %1568 = vector.broadcast %c0_i32_735 : i32 to vector<1x128xi32>
    %1569 = arith.cmpi sge, %1567, %1568 : vector<1x128xi32>
    %c-4_i32_736 = arith.constant -4 : i32
    %1570 = vector.broadcast %c-4_i32_736 : i32 to vector<1x128xi32>
    %1571 = arith.addi %17, %1570 : vector<1x128xi32>
    %c64_i32_737 = arith.constant 64 : i32
    %1572 = vector.broadcast %c64_i32_737 : i32 to vector<1x128xi32>
    %1573 = arith.cmpi slt, %1571, %1572 : vector<1x128xi32>
    %1574 = arith.andi %1569, %1573 : vector<1x128xi1>
    %cst_738 = arith.constant 0.000000e+00 : f32
    %1575 = vector.shape_cast %1574 : vector<1x128xi1> to vector<1x128xi1>
    %1576 = vector.broadcast %1575 : vector<1x128xi1> to vector<8x128xi1>
    %1577 = vector.broadcast %cst_738 : f32 to vector<8x128xf32>
    %1578 = arith.select %1576, %1565, %1577 : vector<8x128xi1>, vector<8x128xf32>
    %c120_739 = arith.constant 120 : index
    %c0_740 = arith.constant 0 : index
    %1579 = vector.load %arg19[%c120_739, %c0_740] : memref<352x128xf32, #tpu.memory_space<vmem>>, vector<8x128xf32>
    tpu.vector_store %arg19[%c120_739, %c0_740], %1578 {strides = array<i32>} : memref<352x128xf32, #tpu.memory_space<vmem>>, vector<8x128xf32>,
    %c3_i32_741 = arith.constant 3 : i32
    %1580 = tpu.dynamic_rotate %1339 by %c3_i32_741 dim 1 : vector<8x128xf32>, i32 -> vector<8x128xf32>
    %c-3_i32_742 = arith.constant -3 : i32
    %1581 = vector.broadcast %c-3_i32_742 : i32 to vector<1x128xi32>
    %1582 = arith.addi %17, %1581 : vector<1x128xi32>
    %c0_i32_743 = arith.constant 0 : i32
    %1583 = vector.broadcast %c0_i32_743 : i32 to vector<1x128xi32>
    %1584 = arith.cmpi sge, %1582, %1583 : vector<1x128xi32>
    %c-3_i32_744 = arith.constant -3 : i32
    %1585 = vector.broadcast %c-3_i32_744 : i32 to vector<1x128xi32>
    %1586 = arith.addi %17, %1585 : vector<1x128xi32>
    %c64_i32_745 = arith.constant 64 : i32
    %1587 = vector.broadcast %c64_i32_745 : i32 to vector<1x128xi32>
    %1588 = arith.cmpi slt, %1586, %1587 : vector<1x128xi32>
    %1589 = arith.andi %1584, %1588 : vector<1x128xi1>
    %cst_746 = arith.constant 0.000000e+00 : f32
    %1590 = vector.shape_cast %1589 : vector<1x128xi1> to vector<1x128xi1>
    %1591 = vector.broadcast %1590 : vector<1x128xi1> to vector<8x128xi1>
    %1592 = vector.broadcast %cst_746 : f32 to vector<8x128xf32>
    %1593 = arith.select %1591, %1580, %1592 : vector<8x128xi1>, vector<8x128xf32>
    %c128_747 = arith.constant 128 : index
    %c0_748 = arith.constant 0 : index
    %1594 = vector.load %arg19[%c128_747, %c0_748] : memref<352x128xf32, #tpu.memory_space<vmem>>, vector<8x128xf32>
    tpu.vector_store %arg19[%c128_747, %c0_748], %1593 {strides = array<i32>} : memref<352x128xf32, #tpu.memory_space<vmem>>, vector<8x128xf32>,
    %c2_i32_749 = arith.constant 2 : i32
    %1595 = tpu.dynamic_rotate %1339 by %c2_i32_749 dim 1 : vector<8x128xf32>, i32 -> vector<8x128xf32>
    %c-2_i32_750 = arith.constant -2 : i32
    %1596 = vector.broadcast %c-2_i32_750 : i32 to vector<1x128xi32>
    %1597 = arith.addi %17, %1596 : vector<1x128xi32>
    %c0_i32_751 = arith.constant 0 : i32
    %1598 = vector.broadcast %c0_i32_751 : i32 to vector<1x128xi32>
    %1599 = arith.cmpi sge, %1597, %1598 : vector<1x128xi32>
    %c-2_i32_752 = arith.constant -2 : i32
    %1600 = vector.broadcast %c-2_i32_752 : i32 to vector<1x128xi32>
    %1601 = arith.addi %17, %1600 : vector<1x128xi32>
    %c64_i32_753 = arith.constant 64 : i32
    %1602 = vector.broadcast %c64_i32_753 : i32 to vector<1x128xi32>
    %1603 = arith.cmpi slt, %1601, %1602 : vector<1x128xi32>
    %1604 = arith.andi %1599, %1603 : vector<1x128xi1>
    %cst_754 = arith.constant 0.000000e+00 : f32
    %1605 = vector.shape_cast %1604 : vector<1x128xi1> to vector<1x128xi1>
    %1606 = vector.broadcast %1605 : vector<1x128xi1> to vector<8x128xi1>
    %1607 = vector.broadcast %cst_754 : f32 to vector<8x128xf32>
    %1608 = arith.select %1606, %1595, %1607 : vector<8x128xi1>, vector<8x128xf32>
    %c136_755 = arith.constant 136 : index
    %c0_756 = arith.constant 0 : index
    %1609 = vector.load %arg19[%c136_755, %c0_756] : memref<352x128xf32, #tpu.memory_space<vmem>>, vector<8x128xf32>
    tpu.vector_store %arg19[%c136_755, %c0_756], %1608 {strides = array<i32>} : memref<352x128xf32, #tpu.memory_space<vmem>>, vector<8x128xf32>,
    %c1_i32_757 = arith.constant 1 : i32
    %1610 = tpu.dynamic_rotate %1339 by %c1_i32_757 dim 1 : vector<8x128xf32>, i32 -> vector<8x128xf32>
    %c-1_i32_758 = arith.constant -1 : i32
    %1611 = vector.broadcast %c-1_i32_758 : i32 to vector<1x128xi32>
    %1612 = arith.addi %17, %1611 : vector<1x128xi32>
    %c0_i32_759 = arith.constant 0 : i32
    %1613 = vector.broadcast %c0_i32_759 : i32 to vector<1x128xi32>
    %1614 = arith.cmpi sge, %1612, %1613 : vector<1x128xi32>
    %c-1_i32_760 = arith.constant -1 : i32
    %1615 = vector.broadcast %c-1_i32_760 : i32 to vector<1x128xi32>
    %1616 = arith.addi %17, %1615 : vector<1x128xi32>
    %c64_i32_761 = arith.constant 64 : i32
    %1617 = vector.broadcast %c64_i32_761 : i32 to vector<1x128xi32>
    %1618 = arith.cmpi slt, %1616, %1617 : vector<1x128xi32>
    %1619 = arith.andi %1614, %1618 : vector<1x128xi1>
    %cst_762 = arith.constant 0.000000e+00 : f32
    %1620 = vector.shape_cast %1619 : vector<1x128xi1> to vector<1x128xi1>
    %1621 = vector.broadcast %1620 : vector<1x128xi1> to vector<8x128xi1>
    %1622 = vector.broadcast %cst_762 : f32 to vector<8x128xf32>
    %1623 = arith.select %1621, %1610, %1622 : vector<8x128xi1>, vector<8x128xf32>
    %c144_763 = arith.constant 144 : index
    %c0_764 = arith.constant 0 : index
    %1624 = vector.load %arg19[%c144_763, %c0_764] : memref<352x128xf32, #tpu.memory_space<vmem>>, vector<8x128xf32>
    tpu.vector_store %arg19[%c144_763, %c0_764], %1623 {strides = array<i32>} : memref<352x128xf32, #tpu.memory_space<vmem>>, vector<8x128xf32>,
    %c0_i32_765 = arith.constant 0 : i32
    %1625 = vector.broadcast %c0_i32_765 : i32 to vector<1x128xi32>
    %1626 = arith.addi %17, %1625 : vector<1x128xi32>
    %c0_i32_766 = arith.constant 0 : i32
    %1627 = vector.broadcast %c0_i32_766 : i32 to vector<1x128xi32>
    %1628 = arith.cmpi sge, %1626, %1627 : vector<1x128xi32>
    %c0_i32_767 = arith.constant 0 : i32
    %1629 = vector.broadcast %c0_i32_767 : i32 to vector<1x128xi32>
    %1630 = arith.addi %17, %1629 : vector<1x128xi32>
    %c64_i32_768 = arith.constant 64 : i32
    %1631 = vector.broadcast %c64_i32_768 : i32 to vector<1x128xi32>
    %1632 = arith.cmpi slt, %1630, %1631 : vector<1x128xi32>
    %1633 = arith.andi %1628, %1632 : vector<1x128xi1>
    %cst_769 = arith.constant 0.000000e+00 : f32
    %1634 = vector.shape_cast %1633 : vector<1x128xi1> to vector<1x128xi1>
    %1635 = vector.broadcast %1634 : vector<1x128xi1> to vector<8x128xi1>
    %1636 = vector.broadcast %cst_769 : f32 to vector<8x128xf32>
    %1637 = arith.select %1635, %1339, %1636 : vector<8x128xi1>, vector<8x128xf32>
    %c152_770 = arith.constant 152 : index
    %c0_771 = arith.constant 0 : index
    %1638 = vector.load %arg19[%c152_770, %c0_771] : memref<352x128xf32, #tpu.memory_space<vmem>>, vector<8x128xf32>
    tpu.vector_store %arg19[%c152_770, %c0_771], %1637 {strides = array<i32>} : memref<352x128xf32, #tpu.memory_space<vmem>>, vector<8x128xf32>,
    %c127_i32_772 = arith.constant 127 : i32
    %1639 = tpu.dynamic_rotate %1339 by %c127_i32_772 dim 1 : vector<8x128xf32>, i32 -> vector<8x128xf32>
    %c1_i32_773 = arith.constant 1 : i32
    %1640 = vector.broadcast %c1_i32_773 : i32 to vector<1x128xi32>
    %1641 = arith.addi %17, %1640 : vector<1x128xi32>
    %c0_i32_774 = arith.constant 0 : i32
    %1642 = vector.broadcast %c0_i32_774 : i32 to vector<1x128xi32>
    %1643 = arith.cmpi sge, %1641, %1642 : vector<1x128xi32>
    %c1_i32_775 = arith.constant 1 : i32
    %1644 = vector.broadcast %c1_i32_775 : i32 to vector<1x128xi32>
    %1645 = arith.addi %17, %1644 : vector<1x128xi32>
    %c64_i32_776 = arith.constant 64 : i32
    %1646 = vector.broadcast %c64_i32_776 : i32 to vector<1x128xi32>
    %1647 = arith.cmpi slt, %1645, %1646 : vector<1x128xi32>
    %1648 = arith.andi %1643, %1647 : vector<1x128xi1>
    %cst_777 = arith.constant 0.000000e+00 : f32
    %1649 = vector.shape_cast %1648 : vector<1x128xi1> to vector<1x128xi1>
    %1650 = vector.broadcast %1649 : vector<1x128xi1> to vector<8x128xi1>
    %1651 = vector.broadcast %cst_777 : f32 to vector<8x128xf32>
    %1652 = arith.select %1650, %1639, %1651 : vector<8x128xi1>, vector<8x128xf32>
    %c160_778 = arith.constant 160 : index
    %c0_779 = arith.constant 0 : index
    %1653 = vector.load %arg19[%c160_778, %c0_779] : memref<352x128xf32, #tpu.memory_space<vmem>>, vector<8x128xf32>
    tpu.vector_store %arg19[%c160_778, %c0_779], %1652 {strides = array<i32>} : memref<352x128xf32, #tpu.memory_space<vmem>>, vector<8x128xf32>,
    %c126_i32_780 = arith.constant 126 : i32
    %1654 = tpu.dynamic_rotate %1339 by %c126_i32_780 dim 1 : vector<8x128xf32>, i32 -> vector<8x128xf32>
    %c2_i32_781 = arith.constant 2 : i32
    %1655 = vector.broadcast %c2_i32_781 : i32 to vector<1x128xi32>
    %1656 = arith.addi %17, %1655 : vector<1x128xi32>
    %c0_i32_782 = arith.constant 0 : i32
    %1657 = vector.broadcast %c0_i32_782 : i32 to vector<1x128xi32>
    %1658 = arith.cmpi sge, %1656, %1657 : vector<1x128xi32>
    %c2_i32_783 = arith.constant 2 : i32
    %1659 = vector.broadcast %c2_i32_783 : i32 to vector<1x128xi32>
    %1660 = arith.addi %17, %1659 : vector<1x128xi32>
    %c64_i32_784 = arith.constant 64 : i32
    %1661 = vector.broadcast %c64_i32_784 : i32 to vector<1x128xi32>
    %1662 = arith.cmpi slt, %1660, %1661 : vector<1x128xi32>
    %1663 = arith.andi %1658, %1662 : vector<1x128xi1>
    %cst_785 = arith.constant 0.000000e+00 : f32
    %1664 = vector.shape_cast %1663 : vector<1x128xi1> to vector<1x128xi1>
    %1665 = vector.broadcast %1664 : vector<1x128xi1> to vector<8x128xi1>
    %1666 = vector.broadcast %cst_785 : f32 to vector<8x128xf32>
    %1667 = arith.select %1665, %1654, %1666 : vector<8x128xi1>, vector<8x128xf32>
    %c168_786 = arith.constant 168 : index
    %c0_787 = arith.constant 0 : index
    %1668 = vector.load %arg19[%c168_786, %c0_787] : memref<352x128xf32, #tpu.memory_space<vmem>>, vector<8x128xf32>
    tpu.vector_store %arg19[%c168_786, %c0_787], %1667 {strides = array<i32>} : memref<352x128xf32, #tpu.memory_space<vmem>>, vector<8x128xf32>,
    %c125_i32_788 = arith.constant 125 : i32
    %1669 = tpu.dynamic_rotate %1339 by %c125_i32_788 dim 1 : vector<8x128xf32>, i32 -> vector<8x128xf32>
    %c3_i32_789 = arith.constant 3 : i32
    %1670 = vector.broadcast %c3_i32_789 : i32 to vector<1x128xi32>
    %1671 = arith.addi %17, %1670 : vector<1x128xi32>
    %c0_i32_790 = arith.constant 0 : i32
    %1672 = vector.broadcast %c0_i32_790 : i32 to vector<1x128xi32>
    %1673 = arith.cmpi sge, %1671, %1672 : vector<1x128xi32>
    %c3_i32_791 = arith.constant 3 : i32
    %1674 = vector.broadcast %c3_i32_791 : i32 to vector<1x128xi32>
    %1675 = arith.addi %17, %1674 : vector<1x128xi32>
    %c64_i32_792 = arith.constant 64 : i32
    %1676 = vector.broadcast %c64_i32_792 : i32 to vector<1x128xi32>
    %1677 = arith.cmpi slt, %1675, %1676 : vector<1x128xi32>
    %1678 = arith.andi %1673, %1677 : vector<1x128xi1>
    %cst_793 = arith.constant 0.000000e+00 : f32
    %1679 = vector.shape_cast %1678 : vector<1x128xi1> to vector<1x128xi1>
    %1680 = vector.broadcast %1679 : vector<1x128xi1> to vector<8x128xi1>
    %1681 = vector.broadcast %cst_793 : f32 to vector<8x128xf32>
    %1682 = arith.select %1680, %1669, %1681 : vector<8x128xi1>, vector<8x128xf32>
    %c176_794 = arith.constant 176 : index
    %c0_795 = arith.constant 0 : index
    %1683 = vector.load %arg19[%c176_794, %c0_795] : memref<352x128xf32, #tpu.memory_space<vmem>>, vector<8x128xf32>
    tpu.vector_store %arg19[%c176_794, %c0_795], %1682 {strides = array<i32>} : memref<352x128xf32, #tpu.memory_space<vmem>>, vector<8x128xf32>,
    %c124_i32_796 = arith.constant 124 : i32
    %1684 = tpu.dynamic_rotate %1339 by %c124_i32_796 dim 1 : vector<8x128xf32>, i32 -> vector<8x128xf32>
    %c4_i32_797 = arith.constant 4 : i32
    %1685 = vector.broadcast %c4_i32_797 : i32 to vector<1x128xi32>
    %1686 = arith.addi %17, %1685 : vector<1x128xi32>
    %c0_i32_798 = arith.constant 0 : i32
    %1687 = vector.broadcast %c0_i32_798 : i32 to vector<1x128xi32>
    %1688 = arith.cmpi sge, %1686, %1687 : vector<1x128xi32>
    %c4_i32_799 = arith.constant 4 : i32
    %1689 = vector.broadcast %c4_i32_799 : i32 to vector<1x128xi32>
    %1690 = arith.addi %17, %1689 : vector<1x128xi32>
    %c64_i32_800 = arith.constant 64 : i32
    %1691 = vector.broadcast %c64_i32_800 : i32 to vector<1x128xi32>
    %1692 = arith.cmpi slt, %1690, %1691 : vector<1x128xi32>
    %1693 = arith.andi %1688, %1692 : vector<1x128xi1>
    %cst_801 = arith.constant 0.000000e+00 : f32
    %1694 = vector.shape_cast %1693 : vector<1x128xi1> to vector<1x128xi1>
    %1695 = vector.broadcast %1694 : vector<1x128xi1> to vector<8x128xi1>
    %1696 = vector.broadcast %cst_801 : f32 to vector<8x128xf32>
    %1697 = arith.select %1695, %1684, %1696 : vector<8x128xi1>, vector<8x128xf32>
    %c184_802 = arith.constant 184 : index
    %c0_803 = arith.constant 0 : index
    %1698 = vector.load %arg19[%c184_802, %c0_803] : memref<352x128xf32, #tpu.memory_space<vmem>>, vector<8x128xf32>
    tpu.vector_store %arg19[%c184_802, %c0_803], %1697 {strides = array<i32>} : memref<352x128xf32, #tpu.memory_space<vmem>>, vector<8x128xf32>,
    %c123_i32_804 = arith.constant 123 : i32
    %1699 = tpu.dynamic_rotate %1339 by %c123_i32_804 dim 1 : vector<8x128xf32>, i32 -> vector<8x128xf32>
    %c5_i32_805 = arith.constant 5 : i32
    %1700 = vector.broadcast %c5_i32_805 : i32 to vector<1x128xi32>
    %1701 = arith.addi %17, %1700 : vector<1x128xi32>
    %c0_i32_806 = arith.constant 0 : i32
    %1702 = vector.broadcast %c0_i32_806 : i32 to vector<1x128xi32>
    %1703 = arith.cmpi sge, %1701, %1702 : vector<1x128xi32>
    %c5_i32_807 = arith.constant 5 : i32
    %1704 = vector.broadcast %c5_i32_807 : i32 to vector<1x128xi32>
    %1705 = arith.addi %17, %1704 : vector<1x128xi32>
    %c64_i32_808 = arith.constant 64 : i32
    %1706 = vector.broadcast %c64_i32_808 : i32 to vector<1x128xi32>
    %1707 = arith.cmpi slt, %1705, %1706 : vector<1x128xi32>
    %1708 = arith.andi %1703, %1707 : vector<1x128xi1>
    %cst_809 = arith.constant 0.000000e+00 : f32
    %1709 = vector.shape_cast %1708 : vector<1x128xi1> to vector<1x128xi1>
    %1710 = vector.broadcast %1709 : vector<1x128xi1> to vector<8x128xi1>
    %1711 = vector.broadcast %cst_809 : f32 to vector<8x128xf32>
    %1712 = arith.select %1710, %1699, %1711 : vector<8x128xi1>, vector<8x128xf32>
    %c192_810 = arith.constant 192 : index
    %c0_811 = arith.constant 0 : index
    %1713 = vector.load %arg19[%c192_810, %c0_811] : memref<352x128xf32, #tpu.memory_space<vmem>>, vector<8x128xf32>
    tpu.vector_store %arg19[%c192_810, %c0_811], %1712 {strides = array<i32>} : memref<352x128xf32, #tpu.memory_space<vmem>>, vector<8x128xf32>,
    %c122_i32_812 = arith.constant 122 : i32
    %1714 = tpu.dynamic_rotate %1339 by %c122_i32_812 dim 1 : vector<8x128xf32>, i32 -> vector<8x128xf32>
    %c6_i32_813 = arith.constant 6 : i32
    %1715 = vector.broadcast %c6_i32_813 : i32 to vector<1x128xi32>
    %1716 = arith.addi %17, %1715 : vector<1x128xi32>
    %c0_i32_814 = arith.constant 0 : i32
    %1717 = vector.broadcast %c0_i32_814 : i32 to vector<1x128xi32>
    %1718 = arith.cmpi sge, %1716, %1717 : vector<1x128xi32>
    %c6_i32_815 = arith.constant 6 : i32
    %1719 = vector.broadcast %c6_i32_815 : i32 to vector<1x128xi32>
    %1720 = arith.addi %17, %1719 : vector<1x128xi32>
    %c64_i32_816 = arith.constant 64 : i32
    %1721 = vector.broadcast %c64_i32_816 : i32 to vector<1x128xi32>
    %1722 = arith.cmpi slt, %1720, %1721 : vector<1x128xi32>
    %1723 = arith.andi %1718, %1722 : vector<1x128xi1>
    %cst_817 = arith.constant 0.000000e+00 : f32
    %1724 = vector.shape_cast %1723 : vector<1x128xi1> to vector<1x128xi1>
    %1725 = vector.broadcast %1724 : vector<1x128xi1> to vector<8x128xi1>
    %1726 = vector.broadcast %cst_817 : f32 to vector<8x128xf32>
    %1727 = arith.select %1725, %1714, %1726 : vector<8x128xi1>, vector<8x128xf32>
    %c200_818 = arith.constant 200 : index
    %c0_819 = arith.constant 0 : index
    %1728 = vector.load %arg19[%c200_818, %c0_819] : memref<352x128xf32, #tpu.memory_space<vmem>>, vector<8x128xf32>
    tpu.vector_store %arg19[%c200_818, %c0_819], %1727 {strides = array<i32>} : memref<352x128xf32, #tpu.memory_space<vmem>>, vector<8x128xf32>,
    %c121_i32_820 = arith.constant 121 : i32
    %1729 = tpu.dynamic_rotate %1339 by %c121_i32_820 dim 1 : vector<8x128xf32>, i32 -> vector<8x128xf32>
    %c7_i32_821 = arith.constant 7 : i32
    %1730 = vector.broadcast %c7_i32_821 : i32 to vector<1x128xi32>
    %1731 = arith.addi %17, %1730 : vector<1x128xi32>
    %c0_i32_822 = arith.constant 0 : i32
    %1732 = vector.broadcast %c0_i32_822 : i32 to vector<1x128xi32>
    %1733 = arith.cmpi sge, %1731, %1732 : vector<1x128xi32>
    %c7_i32_823 = arith.constant 7 : i32
    %1734 = vector.broadcast %c7_i32_823 : i32 to vector<1x128xi32>
    %1735 = arith.addi %17, %1734 : vector<1x128xi32>
    %c64_i32_824 = arith.constant 64 : i32
    %1736 = vector.broadcast %c64_i32_824 : i32 to vector<1x128xi32>
    %1737 = arith.cmpi slt, %1735, %1736 : vector<1x128xi32>
    %1738 = arith.andi %1733, %1737 : vector<1x128xi1>
    %cst_825 = arith.constant 0.000000e+00 : f32
    %1739 = vector.shape_cast %1738 : vector<1x128xi1> to vector<1x128xi1>
    %1740 = vector.broadcast %1739 : vector<1x128xi1> to vector<8x128xi1>
    %1741 = vector.broadcast %cst_825 : f32 to vector<8x128xf32>
    %1742 = arith.select %1740, %1729, %1741 : vector<8x128xi1>, vector<8x128xf32>
    %c208_826 = arith.constant 208 : index
    %c0_827 = arith.constant 0 : index
    %1743 = vector.load %arg19[%c208_826, %c0_827] : memref<352x128xf32, #tpu.memory_space<vmem>>, vector<8x128xf32>
    tpu.vector_store %arg19[%c208_826, %c0_827], %1742 {strides = array<i32>} : memref<352x128xf32, #tpu.memory_space<vmem>>, vector<8x128xf32>,
    %c120_i32_828 = arith.constant 120 : i32
    %1744 = tpu.dynamic_rotate %1339 by %c120_i32_828 dim 1 : vector<8x128xf32>, i32 -> vector<8x128xf32>
    %c8_i32_829 = arith.constant 8 : i32
    %1745 = vector.broadcast %c8_i32_829 : i32 to vector<1x128xi32>
    %1746 = arith.addi %17, %1745 : vector<1x128xi32>
    %c0_i32_830 = arith.constant 0 : i32
    %1747 = vector.broadcast %c0_i32_830 : i32 to vector<1x128xi32>
    %1748 = arith.cmpi sge, %1746, %1747 : vector<1x128xi32>
    %c8_i32_831 = arith.constant 8 : i32
    %1749 = vector.broadcast %c8_i32_831 : i32 to vector<1x128xi32>
    %1750 = arith.addi %17, %1749 : vector<1x128xi32>
    %c64_i32_832 = arith.constant 64 : i32
    %1751 = vector.broadcast %c64_i32_832 : i32 to vector<1x128xi32>
    %1752 = arith.cmpi slt, %1750, %1751 : vector<1x128xi32>
    %1753 = arith.andi %1748, %1752 : vector<1x128xi1>
    %cst_833 = arith.constant 0.000000e+00 : f32
    %1754 = vector.shape_cast %1753 : vector<1x128xi1> to vector<1x128xi1>
    %1755 = vector.broadcast %1754 : vector<1x128xi1> to vector<8x128xi1>
    %1756 = vector.broadcast %cst_833 : f32 to vector<8x128xf32>
    %1757 = arith.select %1755, %1744, %1756 : vector<8x128xi1>, vector<8x128xf32>
    %c216_834 = arith.constant 216 : index
    %c0_835 = arith.constant 0 : index
    %1758 = vector.load %arg19[%c216_834, %c0_835] : memref<352x128xf32, #tpu.memory_space<vmem>>, vector<8x128xf32>
    tpu.vector_store %arg19[%c216_834, %c0_835], %1757 {strides = array<i32>} : memref<352x128xf32, #tpu.memory_space<vmem>>, vector<8x128xf32>,
    %c119_i32_836 = arith.constant 119 : i32
    %1759 = tpu.dynamic_rotate %1339 by %c119_i32_836 dim 1 : vector<8x128xf32>, i32 -> vector<8x128xf32>
    %c9_i32_837 = arith.constant 9 : i32
    %1760 = vector.broadcast %c9_i32_837 : i32 to vector<1x128xi32>
    %1761 = arith.addi %17, %1760 : vector<1x128xi32>
    %c0_i32_838 = arith.constant 0 : i32
    %1762 = vector.broadcast %c0_i32_838 : i32 to vector<1x128xi32>
    %1763 = arith.cmpi sge, %1761, %1762 : vector<1x128xi32>
    %c9_i32_839 = arith.constant 9 : i32
    %1764 = vector.broadcast %c9_i32_839 : i32 to vector<1x128xi32>
    %1765 = arith.addi %17, %1764 : vector<1x128xi32>
    %c64_i32_840 = arith.constant 64 : i32
    %1766 = vector.broadcast %c64_i32_840 : i32 to vector<1x128xi32>
    %1767 = arith.cmpi slt, %1765, %1766 : vector<1x128xi32>
    %1768 = arith.andi %1763, %1767 : vector<1x128xi1>
    %cst_841 = arith.constant 0.000000e+00 : f32
    %1769 = vector.shape_cast %1768 : vector<1x128xi1> to vector<1x128xi1>
    %1770 = vector.broadcast %1769 : vector<1x128xi1> to vector<8x128xi1>
    %1771 = vector.broadcast %cst_841 : f32 to vector<8x128xf32>
    %1772 = arith.select %1770, %1759, %1771 : vector<8x128xi1>, vector<8x128xf32>
    %c224_842 = arith.constant 224 : index
    %c0_843 = arith.constant 0 : index
    %1773 = vector.load %arg19[%c224_842, %c0_843] : memref<352x128xf32, #tpu.memory_space<vmem>>, vector<8x128xf32>
    tpu.vector_store %arg19[%c224_842, %c0_843], %1772 {strides = array<i32>} : memref<352x128xf32, #tpu.memory_space<vmem>>, vector<8x128xf32>,
    %c118_i32_844 = arith.constant 118 : i32
    %1774 = tpu.dynamic_rotate %1339 by %c118_i32_844 dim 1 : vector<8x128xf32>, i32 -> vector<8x128xf32>
    %c10_i32_845 = arith.constant 10 : i32
    %1775 = vector.broadcast %c10_i32_845 : i32 to vector<1x128xi32>
    %1776 = arith.addi %17, %1775 : vector<1x128xi32>
    %c0_i32_846 = arith.constant 0 : i32
    %1777 = vector.broadcast %c0_i32_846 : i32 to vector<1x128xi32>
    %1778 = arith.cmpi sge, %1776, %1777 : vector<1x128xi32>
    %c10_i32_847 = arith.constant 10 : i32
    %1779 = vector.broadcast %c10_i32_847 : i32 to vector<1x128xi32>
    %1780 = arith.addi %17, %1779 : vector<1x128xi32>
    %c64_i32_848 = arith.constant 64 : i32
    %1781 = vector.broadcast %c64_i32_848 : i32 to vector<1x128xi32>
    %1782 = arith.cmpi slt, %1780, %1781 : vector<1x128xi32>
    %1783 = arith.andi %1778, %1782 : vector<1x128xi1>
    %cst_849 = arith.constant 0.000000e+00 : f32
    %1784 = vector.shape_cast %1783 : vector<1x128xi1> to vector<1x128xi1>
    %1785 = vector.broadcast %1784 : vector<1x128xi1> to vector<8x128xi1>
    %1786 = vector.broadcast %cst_849 : f32 to vector<8x128xf32>
    %1787 = arith.select %1785, %1774, %1786 : vector<8x128xi1>, vector<8x128xf32>
    %c232_850 = arith.constant 232 : index
    %c0_851 = arith.constant 0 : index
    %1788 = vector.load %arg19[%c232_850, %c0_851] : memref<352x128xf32, #tpu.memory_space<vmem>>, vector<8x128xf32>
    tpu.vector_store %arg19[%c232_850, %c0_851], %1787 {strides = array<i32>} : memref<352x128xf32, #tpu.memory_space<vmem>>, vector<8x128xf32>,
    %c117_i32_852 = arith.constant 117 : i32
    %1789 = tpu.dynamic_rotate %1339 by %c117_i32_852 dim 1 : vector<8x128xf32>, i32 -> vector<8x128xf32>
    %c11_i32_853 = arith.constant 11 : i32
    %1790 = vector.broadcast %c11_i32_853 : i32 to vector<1x128xi32>
    %1791 = arith.addi %17, %1790 : vector<1x128xi32>
    %c0_i32_854 = arith.constant 0 : i32
    %1792 = vector.broadcast %c0_i32_854 : i32 to vector<1x128xi32>
    %1793 = arith.cmpi sge, %1791, %1792 : vector<1x128xi32>
    %c11_i32_855 = arith.constant 11 : i32
    %1794 = vector.broadcast %c11_i32_855 : i32 to vector<1x128xi32>
    %1795 = arith.addi %17, %1794 : vector<1x128xi32>
    %c64_i32_856 = arith.constant 64 : i32
    %1796 = vector.broadcast %c64_i32_856 : i32 to vector<1x128xi32>
    %1797 = arith.cmpi slt, %1795, %1796 : vector<1x128xi32>
    %1798 = arith.andi %1793, %1797 : vector<1x128xi1>
    %cst_857 = arith.constant 0.000000e+00 : f32
    %1799 = vector.shape_cast %1798 : vector<1x128xi1> to vector<1x128xi1>
    %1800 = vector.broadcast %1799 : vector<1x128xi1> to vector<8x128xi1>
    %1801 = vector.broadcast %cst_857 : f32 to vector<8x128xf32>
    %1802 = arith.select %1800, %1789, %1801 : vector<8x128xi1>, vector<8x128xf32>
    %c240_858 = arith.constant 240 : index
    %c0_859 = arith.constant 0 : index
    %1803 = vector.load %arg19[%c240_858, %c0_859] : memref<352x128xf32, #tpu.memory_space<vmem>>, vector<8x128xf32>
    tpu.vector_store %arg19[%c240_858, %c0_859], %1802 {strides = array<i32>} : memref<352x128xf32, #tpu.memory_space<vmem>>, vector<8x128xf32>,
    %c116_i32_860 = arith.constant 116 : i32
    %1804 = tpu.dynamic_rotate %1339 by %c116_i32_860 dim 1 : vector<8x128xf32>, i32 -> vector<8x128xf32>
    %c12_i32_861 = arith.constant 12 : i32
    %1805 = vector.broadcast %c12_i32_861 : i32 to vector<1x128xi32>
    %1806 = arith.addi %17, %1805 : vector<1x128xi32>
    %c0_i32_862 = arith.constant 0 : i32
    %1807 = vector.broadcast %c0_i32_862 : i32 to vector<1x128xi32>
    %1808 = arith.cmpi sge, %1806, %1807 : vector<1x128xi32>
    %c12_i32_863 = arith.constant 12 : i32
    %1809 = vector.broadcast %c12_i32_863 : i32 to vector<1x128xi32>
    %1810 = arith.addi %17, %1809 : vector<1x128xi32>
    %c64_i32_864 = arith.constant 64 : i32
    %1811 = vector.broadcast %c64_i32_864 : i32 to vector<1x128xi32>
    %1812 = arith.cmpi slt, %1810, %1811 : vector<1x128xi32>
    %1813 = arith.andi %1808, %1812 : vector<1x128xi1>
    %cst_865 = arith.constant 0.000000e+00 : f32
    %1814 = vector.shape_cast %1813 : vector<1x128xi1> to vector<1x128xi1>
    %1815 = vector.broadcast %1814 : vector<1x128xi1> to vector<8x128xi1>
    %1816 = vector.broadcast %cst_865 : f32 to vector<8x128xf32>
    %1817 = arith.select %1815, %1804, %1816 : vector<8x128xi1>, vector<8x128xf32>
    %c248_866 = arith.constant 248 : index
    %c0_867 = arith.constant 0 : index
    %1818 = vector.load %arg19[%c248_866, %c0_867] : memref<352x128xf32, #tpu.memory_space<vmem>>, vector<8x128xf32>
    tpu.vector_store %arg19[%c248_866, %c0_867], %1817 {strides = array<i32>} : memref<352x128xf32, #tpu.memory_space<vmem>>, vector<8x128xf32>,
    %c115_i32_868 = arith.constant 115 : i32
    %1819 = tpu.dynamic_rotate %1339 by %c115_i32_868 dim 1 : vector<8x128xf32>, i32 -> vector<8x128xf32>
    %c13_i32_869 = arith.constant 13 : i32
    %1820 = vector.broadcast %c13_i32_869 : i32 to vector<1x128xi32>
    %1821 = arith.addi %17, %1820 : vector<1x128xi32>
    %c0_i32_870 = arith.constant 0 : i32
    %1822 = vector.broadcast %c0_i32_870 : i32 to vector<1x128xi32>
    %1823 = arith.cmpi sge, %1821, %1822 : vector<1x128xi32>
    %c13_i32_871 = arith.constant 13 : i32
    %1824 = vector.broadcast %c13_i32_871 : i32 to vector<1x128xi32>
    %1825 = arith.addi %17, %1824 : vector<1x128xi32>
    %c64_i32_872 = arith.constant 64 : i32
    %1826 = vector.broadcast %c64_i32_872 : i32 to vector<1x128xi32>
    %1827 = arith.cmpi slt, %1825, %1826 : vector<1x128xi32>
    %1828 = arith.andi %1823, %1827 : vector<1x128xi1>
    %cst_873 = arith.constant 0.000000e+00 : f32
    %1829 = vector.shape_cast %1828 : vector<1x128xi1> to vector<1x128xi1>
    %1830 = vector.broadcast %1829 : vector<1x128xi1> to vector<8x128xi1>
    %1831 = vector.broadcast %cst_873 : f32 to vector<8x128xf32>
    %1832 = arith.select %1830, %1819, %1831 : vector<8x128xi1>, vector<8x128xf32>
    %c256_874 = arith.constant 256 : index
    %c0_875 = arith.constant 0 : index
    %1833 = vector.load %arg19[%c256_874, %c0_875] : memref<352x128xf32, #tpu.memory_space<vmem>>, vector<8x128xf32>
    tpu.vector_store %arg19[%c256_874, %c0_875], %1832 {strides = array<i32>} : memref<352x128xf32, #tpu.memory_space<vmem>>, vector<8x128xf32>,
    %c114_i32_876 = arith.constant 114 : i32
    %1834 = tpu.dynamic_rotate %1339 by %c114_i32_876 dim 1 : vector<8x128xf32>, i32 -> vector<8x128xf32>
    %c14_i32_877 = arith.constant 14 : i32
    %1835 = vector.broadcast %c14_i32_877 : i32 to vector<1x128xi32>
    %1836 = arith.addi %17, %1835 : vector<1x128xi32>
    %c0_i32_878 = arith.constant 0 : i32
    %1837 = vector.broadcast %c0_i32_878 : i32 to vector<1x128xi32>
    %1838 = arith.cmpi sge, %1836, %1837 : vector<1x128xi32>
    %c14_i32_879 = arith.constant 14 : i32
    %1839 = vector.broadcast %c14_i32_879 : i32 to vector<1x128xi32>
    %1840 = arith.addi %17, %1839 : vector<1x128xi32>
    %c64_i32_880 = arith.constant 64 : i32
    %1841 = vector.broadcast %c64_i32_880 : i32 to vector<1x128xi32>
    %1842 = arith.cmpi slt, %1840, %1841 : vector<1x128xi32>
    %1843 = arith.andi %1838, %1842 : vector<1x128xi1>
    %cst_881 = arith.constant 0.000000e+00 : f32
    %1844 = vector.shape_cast %1843 : vector<1x128xi1> to vector<1x128xi1>
    %1845 = vector.broadcast %1844 : vector<1x128xi1> to vector<8x128xi1>
    %1846 = vector.broadcast %cst_881 : f32 to vector<8x128xf32>
    %1847 = arith.select %1845, %1834, %1846 : vector<8x128xi1>, vector<8x128xf32>
    %c264_882 = arith.constant 264 : index
    %c0_883 = arith.constant 0 : index
    %1848 = vector.load %arg19[%c264_882, %c0_883] : memref<352x128xf32, #tpu.memory_space<vmem>>, vector<8x128xf32>
    tpu.vector_store %arg19[%c264_882, %c0_883], %1847 {strides = array<i32>} : memref<352x128xf32, #tpu.memory_space<vmem>>, vector<8x128xf32>,
    %c113_i32_884 = arith.constant 113 : i32
    %1849 = tpu.dynamic_rotate %1339 by %c113_i32_884 dim 1 : vector<8x128xf32>, i32 -> vector<8x128xf32>
    %c15_i32_885 = arith.constant 15 : i32
    %1850 = vector.broadcast %c15_i32_885 : i32 to vector<1x128xi32>
    %1851 = arith.addi %17, %1850 : vector<1x128xi32>
    %c0_i32_886 = arith.constant 0 : i32
    %1852 = vector.broadcast %c0_i32_886 : i32 to vector<1x128xi32>
    %1853 = arith.cmpi sge, %1851, %1852 : vector<1x128xi32>
    %c15_i32_887 = arith.constant 15 : i32
    %1854 = vector.broadcast %c15_i32_887 : i32 to vector<1x128xi32>
    %1855 = arith.addi %17, %1854 : vector<1x128xi32>
    %c64_i32_888 = arith.constant 64 : i32
    %1856 = vector.broadcast %c64_i32_888 : i32 to vector<1x128xi32>
    %1857 = arith.cmpi slt, %1855, %1856 : vector<1x128xi32>
    %1858 = arith.andi %1853, %1857 : vector<1x128xi1>
    %cst_889 = arith.constant 0.000000e+00 : f32
    %1859 = vector.shape_cast %1858 : vector<1x128xi1> to vector<1x128xi1>
    %1860 = vector.broadcast %1859 : vector<1x128xi1> to vector<8x128xi1>
    %1861 = vector.broadcast %cst_889 : f32 to vector<8x128xf32>
    %1862 = arith.select %1860, %1849, %1861 : vector<8x128xi1>, vector<8x128xf32>
    %c272_890 = arith.constant 272 : index
    %c0_891 = arith.constant 0 : index
    %1863 = vector.load %arg19[%c272_890, %c0_891] : memref<352x128xf32, #tpu.memory_space<vmem>>, vector<8x128xf32>
    tpu.vector_store %arg19[%c272_890, %c0_891], %1862 {strides = array<i32>} : memref<352x128xf32, #tpu.memory_space<vmem>>, vector<8x128xf32>,
    %c112_i32_892 = arith.constant 112 : i32
    %1864 = tpu.dynamic_rotate %1339 by %c112_i32_892 dim 1 : vector<8x128xf32>, i32 -> vector<8x128xf32>
    %c16_i32_893 = arith.constant 16 : i32
    %1865 = vector.broadcast %c16_i32_893 : i32 to vector<1x128xi32>
    %1866 = arith.addi %17, %1865 : vector<1x128xi32>
    %c0_i32_894 = arith.constant 0 : i32
    %1867 = vector.broadcast %c0_i32_894 : i32 to vector<1x128xi32>
    %1868 = arith.cmpi sge, %1866, %1867 : vector<1x128xi32>
    %c16_i32_895 = arith.constant 16 : i32
    %1869 = vector.broadcast %c16_i32_895 : i32 to vector<1x128xi32>
    %1870 = arith.addi %17, %1869 : vector<1x128xi32>
    %c64_i32_896 = arith.constant 64 : i32
    %1871 = vector.broadcast %c64_i32_896 : i32 to vector<1x128xi32>
    %1872 = arith.cmpi slt, %1870, %1871 : vector<1x128xi32>
    %1873 = arith.andi %1868, %1872 : vector<1x128xi1>
    %cst_897 = arith.constant 0.000000e+00 : f32
    %1874 = vector.shape_cast %1873 : vector<1x128xi1> to vector<1x128xi1>
    %1875 = vector.broadcast %1874 : vector<1x128xi1> to vector<8x128xi1>
    %1876 = vector.broadcast %cst_897 : f32 to vector<8x128xf32>
    %1877 = arith.select %1875, %1864, %1876 : vector<8x128xi1>, vector<8x128xf32>
    %c280_898 = arith.constant 280 : index
    %c0_899 = arith.constant 0 : index
    %1878 = vector.load %arg19[%c280_898, %c0_899] : memref<352x128xf32, #tpu.memory_space<vmem>>, vector<8x128xf32>
    tpu.vector_store %arg19[%c280_898, %c0_899], %1877 {strides = array<i32>} : memref<352x128xf32, #tpu.memory_space<vmem>>, vector<8x128xf32>,
    %c111_i32_900 = arith.constant 111 : i32
    %1879 = tpu.dynamic_rotate %1339 by %c111_i32_900 dim 1 : vector<8x128xf32>, i32 -> vector<8x128xf32>
    %c17_i32_901 = arith.constant 17 : i32
    %1880 = vector.broadcast %c17_i32_901 : i32 to vector<1x128xi32>
    %1881 = arith.addi %17, %1880 : vector<1x128xi32>
    %c0_i32_902 = arith.constant 0 : i32
    %1882 = vector.broadcast %c0_i32_902 : i32 to vector<1x128xi32>
    %1883 = arith.cmpi sge, %1881, %1882 : vector<1x128xi32>
    %c17_i32_903 = arith.constant 17 : i32
    %1884 = vector.broadcast %c17_i32_903 : i32 to vector<1x128xi32>
    %1885 = arith.addi %17, %1884 : vector<1x128xi32>
    %c64_i32_904 = arith.constant 64 : i32
    %1886 = vector.broadcast %c64_i32_904 : i32 to vector<1x128xi32>
    %1887 = arith.cmpi slt, %1885, %1886 : vector<1x128xi32>
    %1888 = arith.andi %1883, %1887 : vector<1x128xi1>
    %cst_905 = arith.constant 0.000000e+00 : f32
    %1889 = vector.shape_cast %1888 : vector<1x128xi1> to vector<1x128xi1>
    %1890 = vector.broadcast %1889 : vector<1x128xi1> to vector<8x128xi1>
    %1891 = vector.broadcast %cst_905 : f32 to vector<8x128xf32>
    %1892 = arith.select %1890, %1879, %1891 : vector<8x128xi1>, vector<8x128xf32>
    %c288_906 = arith.constant 288 : index
    %c0_907 = arith.constant 0 : index
    %1893 = vector.load %arg19[%c288_906, %c0_907] : memref<352x128xf32, #tpu.memory_space<vmem>>, vector<8x128xf32>
    tpu.vector_store %arg19[%c288_906, %c0_907], %1892 {strides = array<i32>} : memref<352x128xf32, #tpu.memory_space<vmem>>, vector<8x128xf32>,
    %c110_i32_908 = arith.constant 110 : i32
    %1894 = tpu.dynamic_rotate %1339 by %c110_i32_908 dim 1 : vector<8x128xf32>, i32 -> vector<8x128xf32>
    %c18_i32_909 = arith.constant 18 : i32
    %1895 = vector.broadcast %c18_i32_909 : i32 to vector<1x128xi32>
    %1896 = arith.addi %17, %1895 : vector<1x128xi32>
    %c0_i32_910 = arith.constant 0 : i32
    %1897 = vector.broadcast %c0_i32_910 : i32 to vector<1x128xi32>
    %1898 = arith.cmpi sge, %1896, %1897 : vector<1x128xi32>
    %c18_i32_911 = arith.constant 18 : i32
    %1899 = vector.broadcast %c18_i32_911 : i32 to vector<1x128xi32>
    %1900 = arith.addi %17, %1899 : vector<1x128xi32>
    %c64_i32_912 = arith.constant 64 : i32
    %1901 = vector.broadcast %c64_i32_912 : i32 to vector<1x128xi32>
    %1902 = arith.cmpi slt, %1900, %1901 : vector<1x128xi32>
    %1903 = arith.andi %1898, %1902 : vector<1x128xi1>
    %cst_913 = arith.constant 0.000000e+00 : f32
    %1904 = vector.shape_cast %1903 : vector<1x128xi1> to vector<1x128xi1>
    %1905 = vector.broadcast %1904 : vector<1x128xi1> to vector<8x128xi1>
    %1906 = vector.broadcast %cst_913 : f32 to vector<8x128xf32>
    %1907 = arith.select %1905, %1894, %1906 : vector<8x128xi1>, vector<8x128xf32>
    %c296_914 = arith.constant 296 : index
    %c0_915 = arith.constant 0 : index
    %1908 = vector.load %arg19[%c296_914, %c0_915] : memref<352x128xf32, #tpu.memory_space<vmem>>, vector<8x128xf32>
    tpu.vector_store %arg19[%c296_914, %c0_915], %1907 {strides = array<i32>} : memref<352x128xf32, #tpu.memory_space<vmem>>, vector<8x128xf32>,
    %c109_i32_916 = arith.constant 109 : i32
    %1909 = tpu.dynamic_rotate %1339 by %c109_i32_916 dim 1 : vector<8x128xf32>, i32 -> vector<8x128xf32>
    %c19_i32_917 = arith.constant 19 : i32
    %1910 = vector.broadcast %c19_i32_917 : i32 to vector<1x128xi32>
    %1911 = arith.addi %17, %1910 : vector<1x128xi32>
    %c0_i32_918 = arith.constant 0 : i32
    %1912 = vector.broadcast %c0_i32_918 : i32 to vector<1x128xi32>
    %1913 = arith.cmpi sge, %1911, %1912 : vector<1x128xi32>
    %c19_i32_919 = arith.constant 19 : i32
    %1914 = vector.broadcast %c19_i32_919 : i32 to vector<1x128xi32>
    %1915 = arith.addi %17, %1914 : vector<1x128xi32>
    %c64_i32_920 = arith.constant 64 : i32
    %1916 = vector.broadcast %c64_i32_920 : i32 to vector<1x128xi32>
    %1917 = arith.cmpi slt, %1915, %1916 : vector<1x128xi32>
    %1918 = arith.andi %1913, %1917 : vector<1x128xi1>
    %cst_921 = arith.constant 0.000000e+00 : f32
    %1919 = vector.shape_cast %1918 : vector<1x128xi1> to vector<1x128xi1>
    %1920 = vector.broadcast %1919 : vector<1x128xi1> to vector<8x128xi1>
    %1921 = vector.broadcast %cst_921 : f32 to vector<8x128xf32>
    %1922 = arith.select %1920, %1909, %1921 : vector<8x128xi1>, vector<8x128xf32>
    %c304_922 = arith.constant 304 : index
    %c0_923 = arith.constant 0 : index
    %1923 = vector.load %arg19[%c304_922, %c0_923] : memref<352x128xf32, #tpu.memory_space<vmem>>, vector<8x128xf32>
    tpu.vector_store %arg19[%c304_922, %c0_923], %1922 {strides = array<i32>} : memref<352x128xf32, #tpu.memory_space<vmem>>, vector<8x128xf32>,
    %c108_i32_924 = arith.constant 108 : i32
    %1924 = tpu.dynamic_rotate %1339 by %c108_i32_924 dim 1 : vector<8x128xf32>, i32 -> vector<8x128xf32>
    %c20_i32_925 = arith.constant 20 : i32
    %1925 = vector.broadcast %c20_i32_925 : i32 to vector<1x128xi32>
    %1926 = arith.addi %17, %1925 : vector<1x128xi32>
    %c0_i32_926 = arith.constant 0 : i32
    %1927 = vector.broadcast %c0_i32_926 : i32 to vector<1x128xi32>
    %1928 = arith.cmpi sge, %1926, %1927 : vector<1x128xi32>
    %c20_i32_927 = arith.constant 20 : i32
    %1929 = vector.broadcast %c20_i32_927 : i32 to vector<1x128xi32>
    %1930 = arith.addi %17, %1929 : vector<1x128xi32>
    %c64_i32_928 = arith.constant 64 : i32
    %1931 = vector.broadcast %c64_i32_928 : i32 to vector<1x128xi32>
    %1932 = arith.cmpi slt, %1930, %1931 : vector<1x128xi32>
    %1933 = arith.andi %1928, %1932 : vector<1x128xi1>
    %cst_929 = arith.constant 0.000000e+00 : f32
    %1934 = vector.shape_cast %1933 : vector<1x128xi1> to vector<1x128xi1>
    %1935 = vector.broadcast %1934 : vector<1x128xi1> to vector<8x128xi1>
    %1936 = vector.broadcast %cst_929 : f32 to vector<8x128xf32>
    %1937 = arith.select %1935, %1924, %1936 : vector<8x128xi1>, vector<8x128xf32>
    %c312_930 = arith.constant 312 : index
    %c0_931 = arith.constant 0 : index
    %1938 = vector.load %arg19[%c312_930, %c0_931] : memref<352x128xf32, #tpu.memory_space<vmem>>, vector<8x128xf32>
    tpu.vector_store %arg19[%c312_930, %c0_931], %1937 {strides = array<i32>} : memref<352x128xf32, #tpu.memory_space<vmem>>, vector<8x128xf32>,
    %c1_i32_932 = arith.constant 1 : i32
    %1939 = tpu.dynamic_rotate %1337 by %c1_i32_932 dim 1 : vector<32x128xf32>, i32 -> vector<32x128xf32>
    %c-1_i32_933 = arith.constant -1 : i32
    %1940 = vector.broadcast %c-1_i32_933 : i32 to vector<1x128xi32>
    %1941 = arith.addi %17, %1940 : vector<1x128xi32>
    %c0_i32_934 = arith.constant 0 : i32
    %1942 = vector.broadcast %c0_i32_934 : i32 to vector<1x128xi32>
    %1943 = arith.cmpi sge, %1941, %1942 : vector<1x128xi32>
    %c-1_i32_935 = arith.constant -1 : i32
    %1944 = vector.broadcast %c-1_i32_935 : i32 to vector<1x128xi32>
    %1945 = arith.addi %17, %1944 : vector<1x128xi32>
    %c64_i32_936 = arith.constant 64 : i32
    %1946 = vector.broadcast %c64_i32_936 : i32 to vector<1x128xi32>
    %1947 = arith.cmpi slt, %1945, %1946 : vector<1x128xi32>
    %1948 = arith.andi %1943, %1947 : vector<1x128xi1>
    %cst_937 = arith.constant 0xFF800000 : f32
    %1949 = vector.shape_cast %1948 : vector<1x128xi1> to vector<1x128xi1>
    %1950 = vector.broadcast %1949 : vector<1x128xi1> to vector<32x128xi1>
    %1951 = vector.broadcast %cst_937 : f32 to vector<32x128xf32>
    %1952 = arith.select %1950, %1939, %1951 : vector<32x128xi1>, vector<32x128xf32>
    %c127_i32_938 = arith.constant 127 : i32
    %1953 = tpu.dynamic_rotate %1337 by %c127_i32_938 dim 1 : vector<32x128xf32>, i32 -> vector<32x128xf32>
    %c1_i32_939 = arith.constant 1 : i32
    %1954 = vector.broadcast %c1_i32_939 : i32 to vector<1x128xi32>
    %1955 = arith.addi %17, %1954 : vector<1x128xi32>
    %c0_i32_940 = arith.constant 0 : i32
    %1956 = vector.broadcast %c0_i32_940 : i32 to vector<1x128xi32>
    %1957 = arith.cmpi sge, %1955, %1956 : vector<1x128xi32>
    %c1_i32_941 = arith.constant 1 : i32
    %1958 = vector.broadcast %c1_i32_941 : i32 to vector<1x128xi32>
    %1959 = arith.addi %17, %1958 : vector<1x128xi32>
    %c64_i32_942 = arith.constant 64 : i32
    %1960 = vector.broadcast %c64_i32_942 : i32 to vector<1x128xi32>
    %1961 = arith.cmpi slt, %1959, %1960 : vector<1x128xi32>
    %1962 = arith.andi %1957, %1961 : vector<1x128xi1>
    %cst_943 = arith.constant 0xFF800000 : f32
    %1963 = vector.shape_cast %1962 : vector<1x128xi1> to vector<1x128xi1>
    %1964 = vector.broadcast %1963 : vector<1x128xi1> to vector<32x128xi1>
    %1965 = vector.broadcast %cst_943 : f32 to vector<32x128xf32>
    %1966 = arith.select %1964, %1953, %1965 : vector<32x128xi1>, vector<32x128xf32>
    %1967 = arith.maximumf %1952, %1337 : vector<32x128xf32>
    %1968 = arith.maximumf %1967, %1966 : vector<32x128xf32>
    %c320_944 = arith.constant 320 : index
    %c0_945 = arith.constant 0 : index
    %1969 = vector.load %arg19[%c320_944, %c0_945] : memref<352x128xf32, #tpu.memory_space<vmem>>, vector<32x128xf32>
    tpu.vector_store %arg19[%c320_944, %c0_945], %1968 {strides = array<i32>} : memref<352x128xf32, #tpu.memory_space<vmem>>, vector<32x128xf32>,
    %c0_946 = arith.constant 0 : index
    %c0_947 = arith.constant 0 : index
    %1970 = vector.load %arg11[%c0_946, %c0_947] : memref<32x352xf32, #tpu.memory_space<vmem>>, vector<32x352xf32>
    %c0_948 = arith.constant 0 : index
    %c0_949 = arith.constant 0 : index
    %1971 = vector.load %arg19[%c0_948, %c0_949] : memref<352x128xf32, #tpu.memory_space<vmem>>, vector<352x128xf32>
    %cst_950 = arith.constant dense<0.000000e+00> : vector<32x128xf32>
    %1972 = tpu.matmul %1970, %1971, %cst_950 {dimension_numbers = #tpu.dot_dimension_numbers<[1], [0], [0], [1], [0, 0, 1, 1], [], []>} : vector<32x352xf32>, vector<352x128xf32>, vector<32x128xf32> -> vector<32x128xf32>
    %c0_951 = arith.constant 0 : index
    %c0_952 = arith.constant 0 : index
    %1973 = vector.load %arg12[%c0_951, %c0_952] : memref<32x1xf32, #tpu.memory_space<vmem>>, vector<32x1xf32>
    %c0_953 = arith.constant 0 : index
    %c0_954 = arith.constant 0 : index
    %1974 = vector.load %arg13[%c0_953, %c0_954] : memref<32x1xf32, #tpu.memory_space<vmem>>, vector<32x1xf32>
    %cst_955 = arith.constant dense<0.000000e+00> : vector<32xf32>
    %1975 = vector.multi_reduction <add>, %1972, %cst_955 [1] : vector<32x128xf32> to vector<32xf32>
    %1976 = vector.shape_cast %1975 : vector<32xf32> to vector<32x1xf32>
    %cst_956 = arith.constant 7.812500e-03 : f32
    %1977 = vector.broadcast %cst_956 : f32 to vector<32x1xf32>
    %1978 = arith.mulf %1976, %1977 : vector<32x1xf32>
    %1979 = vector.broadcast %1978 : vector<32x1xf32> to vector<32x128xf32>
    %1980 = arith.subf %1972, %1979 : vector<32x128xf32>
    %1981 = arith.mulf %1980, %1980 : vector<32x128xf32>
    %cst_957 = arith.constant dense<0.000000e+00> : vector<32xf32>
    %1982 = vector.multi_reduction <add>, %1981, %cst_957 [1] : vector<32x128xf32> to vector<32xf32>
    %1983 = vector.shape_cast %1982 : vector<32xf32> to vector<32x1xf32>
    %cst_958 = arith.constant 7.812500e-03 : f32
    %1984 = vector.broadcast %cst_958 : f32 to vector<32x1xf32>
    %1985 = arith.mulf %1983, %1984 : vector<32x1xf32>
    %cst_959 = arith.constant 9.99999974E-6 : f32
    %1986 = vector.broadcast %cst_959 : f32 to vector<32x1xf32>
    %1987 = arith.addf %1985, %1986 : vector<32x1xf32>
    %1988 = math.rsqrt %1987 : vector<32x1xf32>
    %1989 = vector.broadcast %1988 : vector<32x1xf32> to vector<32x128xf32>
    %1990 = arith.mulf %1980, %1989 : vector<32x128xf32>
    %1991 = vector.broadcast %1973 : vector<32x1xf32> to vector<32x128xf32>
    %1992 = arith.mulf %1990, %1991 : vector<32x128xf32>
    %1993 = vector.broadcast %1974 : vector<32x1xf32> to vector<32x128xf32>
    %1994 = arith.addf %1992, %1993 : vector<32x128xf32>
    %cst_960 = arith.constant 0.000000e+00 : f32
    %1995 = vector.broadcast %cst_960 : f32 to vector<32x128xf32>
    %1996 = arith.maximumf %1994, %1995 : vector<32x128xf32>
    %c0_961 = arith.constant 0 : index
    %c0_962 = arith.constant 0 : index
    %1997 = vector.load %arg14[%c0_961, %c0_962] : memref<32x4xf32, #tpu.memory_space<vmem>>, vector<32x4xf32>
    %cst_963 = arith.constant dense<0.000000e+00> : vector<32x128xf32>
    %1998 = tpu.matmul %1997, %0, %cst_963 {dimension_numbers = #tpu.dot_dimension_numbers<[1], [0], [0], [1], [0, 0, 1, 1], [], []>} : vector<32x4xf32>, vector<4x128xf32>, vector<32x128xf32> -> vector<32x128xf32>
    %c0_964 = arith.constant 0 : index
    %c0_965 = arith.constant 0 : index
    %1999 = vector.load %arg15[%c0_964, %c0_965] : memref<32x1xf32, #tpu.memory_space<vmem>>, vector<32x1xf32>
    %2000 = vector.broadcast %1999 : vector<32x1xf32> to vector<32x128xf32>
    %2001 = arith.addf %1998, %2000 : vector<32x128xf32>
    %c0_966 = arith.constant 0 : index
    %c0_967 = arith.constant 0 : index
    %2002 = vector.load %arg16[%c0_966, %c0_967] : memref<32x1xf32, #tpu.memory_space<vmem>>, vector<32x1xf32>
    %c0_968 = arith.constant 0 : index
    %c0_969 = arith.constant 0 : index
    %2003 = vector.load %arg17[%c0_968, %c0_969] : memref<32x1xf32, #tpu.memory_space<vmem>>, vector<32x1xf32>
    %cst_970 = arith.constant dense<0.000000e+00> : vector<32xf32>
    %2004 = vector.multi_reduction <add>, %2001, %cst_970 [1] : vector<32x128xf32> to vector<32xf32>
    %2005 = vector.shape_cast %2004 : vector<32xf32> to vector<32x1xf32>
    %cst_971 = arith.constant 7.812500e-03 : f32
    %2006 = vector.broadcast %cst_971 : f32 to vector<32x1xf32>
    %2007 = arith.mulf %2005, %2006 : vector<32x1xf32>
    %2008 = vector.broadcast %2007 : vector<32x1xf32> to vector<32x128xf32>
    %2009 = arith.subf %2001, %2008 : vector<32x128xf32>
    %2010 = arith.mulf %2009, %2009 : vector<32x128xf32>
    %cst_972 = arith.constant dense<0.000000e+00> : vector<32xf32>
    %2011 = vector.multi_reduction <add>, %2010, %cst_972 [1] : vector<32x128xf32> to vector<32xf32>
    %2012 = vector.shape_cast %2011 : vector<32xf32> to vector<32x1xf32>
    %cst_973 = arith.constant 7.812500e-03 : f32
    %2013 = vector.broadcast %cst_973 : f32 to vector<32x1xf32>
    %2014 = arith.mulf %2012, %2013 : vector<32x1xf32>
    %cst_974 = arith.constant 9.99999974E-6 : f32
    %2015 = vector.broadcast %cst_974 : f32 to vector<32x1xf32>
    %2016 = arith.addf %2014, %2015 : vector<32x1xf32>
    %2017 = math.rsqrt %2016 : vector<32x1xf32>
    %2018 = vector.broadcast %2017 : vector<32x1xf32> to vector<32x128xf32>
    %2019 = arith.mulf %2009, %2018 : vector<32x128xf32>
    %2020 = vector.broadcast %2002 : vector<32x1xf32> to vector<32x128xf32>
    %2021 = arith.mulf %2019, %2020 : vector<32x128xf32>
    %2022 = vector.broadcast %2003 : vector<32x1xf32> to vector<32x128xf32>
    %2023 = arith.addf %2021, %2022 : vector<32x128xf32>
    %2024 = arith.addf %1996, %2023 : vector<32x128xf32>
    %cst_975 = arith.constant 0.000000e+00 : f32
    %2025 = vector.broadcast %cst_975 : f32 to vector<32x128xf32>
    %2026 = arith.maximumf %2024, %2025 : vector<32x128xf32>
    %c0_976 = arith.constant 0 : index
    %c0_977 = arith.constant 0 : index
    %2027 = vector.load %arg18[%c0_976, %c0_977] : memref<32x128xf32, #tpu.memory_space<vmem>>, vector<32x128xf32>
    tpu.vector_store %arg18[%c0_976, %c0_977], %2026 {strides = array<i32>} : memref<32x128xf32, #tpu.memory_space<vmem>>, vector<32x128xf32>,
    return
  }
  func.func @transform_0(%arg0: i32) -> (i32, i32) {
    %c0_i32 = arith.constant 0 : i32
    %c0_i32_0 = arith.constant 0 : i32
    %c0_i32_1 = arith.constant 0 : i32
    return %c0_i32, %c0_i32_0 : i32, i32
  }
  func.func @transform_1(%arg0: i32) -> (i32, i32) {
    %c0_i32 = arith.constant 0 : i32
    %c0_i32_0 = arith.constant 0 : i32
    %c0_i32_1 = arith.constant 0 : i32
    return %c0_i32, %c0_i32_0 : i32, i32
  }
  func.func @transform_2(%arg0: i32) -> (i32, i32) {
    %c0_i32 = arith.constant 0 : i32
    %c0_i32_0 = arith.constant 0 : i32
    %c0_i32_1 = arith.constant 0 : i32
    return %c0_i32, %c0_i32_0 : i32, i32
  }
  func.func @transform_3(%arg0: i32) -> (i32, i32) {
    %c0_i32 = arith.constant 0 : i32
    %c0_i32_0 = arith.constant 0 : i32
    %c0_i32_1 = arith.constant 0 : i32
    return %c0_i32, %c0_i32_0 : i32, i32
  }
  func.func @transform_4(%arg0: i32) -> (i32, i32) {
    %c0_i32 = arith.constant 0 : i32
    %c0_i32_0 = arith.constant 0 : i32
    %c0_i32_1 = arith.constant 0 : i32
    return %c0_i32, %c0_i32_0 : i32, i32
  }
  func.func @transform_5(%arg0: i32) -> (i32, i32) {
    %c0_i32 = arith.constant 0 : i32
    %c0_i32_0 = arith.constant 0 : i32
    %c0_i32_1 = arith.constant 0 : i32
    return %c0_i32, %c0_i32_0 : i32, i32
  }
  func.func @transform_6(%arg0: i32) -> (i32, i32) {
    %c0_i32 = arith.constant 0 : i32
    %c0_i32_0 = arith.constant 0 : i32
    %c0_i32_1 = arith.constant 0 : i32
    return %c0_i32, %c0_i32_0 : i32, i32
  }
  func.func @transform_7(%arg0: i32) -> (i32, i32) {
    %c0_i32 = arith.constant 0 : i32
    %c0_i32_0 = arith.constant 0 : i32
    %c0_i32_1 = arith.constant 0 : i32
    return %c0_i32, %c0_i32_0 : i32, i32
  }
  func.func @transform_8(%arg0: i32) -> (i32, i32) {
    %c0_i32 = arith.constant 0 : i32
    %c0_i32_0 = arith.constant 0 : i32
    %c0_i32_1 = arith.constant 0 : i32
    return %c0_i32, %c0_i32_0 : i32, i32
  }
  func.func @transform_9(%arg0: i32) -> (i32, i32) {
    %c0_i32 = arith.constant 0 : i32
    %c0_i32_0 = arith.constant 0 : i32
    %c0_i32_1 = arith.constant 0 : i32
    return %c0_i32, %c0_i32_0 : i32, i32
  }
  func.func @transform_10(%arg0: i32) -> (i32, i32) {
    %c0_i32 = arith.constant 0 : i32
    %c0_i32_0 = arith.constant 0 : i32
    %c0_i32_1 = arith.constant 0 : i32
    return %c0_i32, %c0_i32_0 : i32, i32
  }
  func.func @transform_11(%arg0: i32) -> (i32, i32) {
    %c0_i32 = arith.constant 0 : i32
    %c0_i32_0 = arith.constant 0 : i32
    %c0_i32_1 = arith.constant 0 : i32
    return %c0_i32, %c0_i32_0 : i32, i32
  }
  func.func @transform_12(%arg0: i32) -> (i32, i32) {
    %c0_i32 = arith.constant 0 : i32
    %c0_i32_0 = arith.constant 0 : i32
    %c0_i32_1 = arith.constant 0 : i32
    return %c0_i32, %c0_i32_0 : i32, i32
  }
  func.func @transform_13(%arg0: i32) -> (i32, i32) {
    %c0_i32 = arith.constant 0 : i32
    %c0_i32_0 = arith.constant 0 : i32
    %c0_i32_1 = arith.constant 0 : i32
    return %c0_i32, %c0_i32_0 : i32, i32
  }
  func.func @transform_14(%arg0: i32) -> (i32, i32) {
    %c0_i32 = arith.constant 0 : i32
    %c0_i32_0 = arith.constant 0 : i32
    %c0_i32_1 = arith.constant 0 : i32
    return %c0_i32, %c0_i32_0 : i32, i32
  }
  func.func @transform_15(%arg0: i32) -> (i32, i32) {
    %c0_i32 = arith.constant 0 : i32
    %c0_i32_0 = arith.constant 0 : i32
    %c0_i32_1 = arith.constant 0 : i32
    return %c0_i32, %c0_i32_0 : i32, i32
  }
  func.func @transform_16(%arg0: i32) -> (i32, i32) {
    %c0_i32 = arith.constant 0 : i32
    %c0_i32_0 = arith.constant 0 : i32
    %c0_i32_1 = arith.constant 0 : i32
    return %c0_i32, %c0_i32_0 : i32, i32
  }
  func.func @transform_17(%arg0: i32) -> (i32, i32) {
    %c0_i32 = arith.constant 0 : i32
    %c0_i32_0 = arith.constant 0 : i32
    %c0_i32_1 = arith.constant 0 : i32
    return %c0_i32, %c0_i32_0 : i32, i32
  }
}

</mosaic_0001>

<bundles_post_ra>
// kernel: inception_block_forward.1
= control target key start
LH: loop header
LB: loop body
LE: loop exit
PB: predicated region body
PF: predicated region fallthrough
CT: control target
= control target key end

     0   :  { %vm4419_vm0 = vcmask 1043456   ;;  %vm4418_vm1 = vcmask 31744   ;;  %v3182_v0 = vmov 0.0   ;;  %vm4420_vm2 = vmmov 0   ;;  %s4458_s30 = smov 3   ;;  %s4457_s18 = smov 18   ;;  %s4345_s0 = inlined_call_operand.vmem [shape: f32[4,128], index: 0, kind: input, shape index: {}]   ;;  %s4346_s1 = inlined_call_operand.vmem [shape: f32[8,4], index: 1, kind: input, shape index: {}]   ;;  %s4347_s2 = inlined_call_operand.vmem [shape: f32[32,352], index: 2, kind: input, shape index: {}]   ;;  %s4348_s3 = inlined_call_operand.vmem [shape: f32[32,1], index: 3, kind: input, shape index: {}]   ;;  %s4349_s4 = inlined_call_operand.vmem [shape: f32[32,1], index: 4, kind: input, shape index: {}]   ;;  %s4350_s5 = inlined_call_operand.vmem [shape: f32[8,32], index: 5, kind: input, shape index: {}]   ;;  %s4351_s6 = inlined_call_operand.vmem [shape: f32[32,352], index: 6, kind: input, shape index: {}]   ;;  %s4352_s7 = inlined_call_operand.vmem [shape: f32[32,1], index: 7, kind: input, shape index: {}]   ;;  %s4353_s8 = inlined_call_operand.vmem [shape: f32[32,1], index: 8, kind: input, shape index: {}]   ;;  %s4354_s9 = inlined_call_operand.vmem [shape: f32[8,32], index: 9, kind: input, shape index: {}]   ;;  %s4355_s10 = inlined_call_operand.vmem [shape: f32[32,352], index: 10, kind: input, shape index: {}]   ;;  %s4356_s14 = inlined_call_operand.vmem [shape: f32[32,1], index: 14, kind: input, shape index: {}]   ;;  %s4357_s11 = inlined_call_operand.vmem [shape: f32[32,1], index: 11, kind: input, shape index: {}]   ;;  %s4358_s12 = inlined_call_operand.vmem [shape: f32[32,1], index: 12, kind: input, shape index: {}]   ;;  %s4359_s13 = inlined_call_operand.vmem [shape: f32[32,4], index: 13, kind: input, shape index: {}]   ;;  %s4360_s15 = inlined_call_operand.vmem [shape: f32[32,1], index: 15, kind: input, shape index: {}]   ;;  %s4361_s16 = inlined_call_operand.vmem [shape: f32[32,1], index: 16, kind: input, shape index: {}]   ;;  %s4362_s17 = inlined_call_operand.vmem [shape: f32[32,128], index: 17, kind: output, shape index: {}]  }
   0x1   :  { %4476 = sst [smem:[#allocation3_spill]] %s4345_s0  ;;  %2583 = vmatprep.subr.mxu0 %v3182_v0  ;;  %71 = vst [vmem:[#allocation2 + $0x140] sm:$0xff] %v3182_v0  ;;  %2585 = vmatprep.mubr.msk.f32.mxu0 %vm4420_vm2, %v3182_v0  ;;  %s4455_s0 = smov 19   ;;  %v561_v5 = vld [vmem:[%s4347_s2 + $0x8] sm:$0xff]  ;;  %v562_v6 = vld [vmem:[%s4347_s2 + $0x10] sm:$0xff]  ;;  %vm4422_vm3 = vcmask 785408   ;;  %v57_v7 = vlaneseq }
   0x2   :  { %4477 = sst [smem:[#allocation4_spill]] %s4346_s1  ;;  %s4486_s26 = sld [smem:[#allocation3_spill]]  ;;  %693 = vmatprep.mubr.f32.mxu1 %v561_v5  ;;  %vm3223_vm13 = vmmov 1   ;;  %v4502_v61 = vmov 0  ;;  %v4504_v5 = vmov 0 }
   0x3   :  { %4478 = sst [smem:[#allocation5_spill]] %s4355_s10  ;;  %s4487_s29 = sld [smem:[#allocation4_spill]]  ;;  %v58_v8 = vand.u32 127, %v57_v7 }
   0x4   :  { %4479 = sst [smem:[#allocation6_spill]] %s4356_s14  ;;  %s4459_s19 = smov 2  }
   0x5   :  { %4480 = sst [smem:[#allocation7_spill]] %s4357_s11  ;;  %s4453_s1 = smov 17   ;;  %v3422_v9 = vand.u32 63, %v58_v8 }
   0x6   :  { %4481 = sst [smem:[#allocation8_spill]] %s4358_s12  ;;  %s4462_s20 = smov 1  }
   0x7   :  { %4482 = sst [smem:[#allocation9_spill]] %s4359_s13  ;;  %s4460_s21 = smov 127   ;;  %v156_v10 = vadd.s32 4294967277, %v3422_v9  ;;  %v316_v11 = vadd.s32 4294967293, %v3422_v9  ;;  %v166_v12 = vadd.s32 4294967278, %v3422_v9  ;;  %v326_v13 = vadd.s32 4294967294, %v3422_v9 }
   0x8   :  { %4483 = sst [smem:[#allocation10_spill]] %s4360_s15  ;;  %v3321_v1 = vld [vmem:[%s4486_s26] sm:$0xf]  ;;  %s4410_s22 = smov 16   ;;  %v3429_v16 = vadd.s32 4294967295, %v3422_v9  ;;  %v176_v19 = vadd.s32 4294967279, %v3422_v9 }
   0x9   :  { %4484 = sst [smem:[#allocation11_spill]] %s4361_s16  ;;  %v75_v2 = vld [vmem:[%s4487_s29] sm:$0xff]  ;;  %2584 = vmatpush3.msk.msra.mxu0 %vm4419_vm0, %v3321_v1  ;;  %s4364_s23 = smov 15   ;;  %vm157_vm4 = vcmp.ge.s32.totalorder %v156_v10, 0  ;;  %vm317_vm5 = vcmp.ge.s32.totalorder %v316_v11, 0  ;;  %vm167_vm6 = vcmp.ge.s32.totalorder %v166_v12, 0 }
   0xa   :  { %4485 = sst [smem:[#allocation12_spill]] %s4362_s17  ;;  %2586 = vmatmul.mubr.msk.f32.vlgmr.msra.gmra.mrb[0].mxu0 %vm4418_vm1, %v75_v2  ;;  %s4366_s24 = smov 126   ;;  %vm327_vm7 = vcmp.ge.s32.totalorder %v326_v13, 0  ;;  %vm4424_vm8 = vcmp.ge.s32.totalorder %v3429_v16, 0  ;;  %v186_v20 = vadd.s32 4294967280, %v3422_v9  ;;  %v3441_v25 = vadd.s32 1, %v3422_v9  ;;  %vm3444_vm10 = vmpackc.low %vm167_vm6, %vm157_vm4 }
   0xb   :  { %s4368_s25 = smov 125   ;;  %s4370_s27 = smov 14   ;;  %2612 = vmatprep.mubr.msk.f32.mxu0 %vm4422_vm3, %v562_v6  ;;  %vm3434_vm9 = vmpackc.low %vm327_vm7, %vm317_vm5  ;;  %vm177_vm11 = vcmp.ge.s32.totalorder %v176_v19, 0  ;;  %v363_v28 = vadd.s32 2, %v3422_v9  ;;  %v196_v33 = vadd.s32 4294967281, %v3422_v9  ;;  %v206_v34 = vadd.s32 4294967282, %v3422_v9 }
   0xc   :  { %s4372_s28 = smov 13   ;;  %s4374_s29 = smov 124   ;;  %vm187_vm12 = vcmp.ge.s32.totalorder %v186_v20, 0  ;;  %vm3453_vm14 = vmpackc.low %vm3223_vm13, %vm4424_vm8  ;;  %vm4423_vm15 = vcmp.lt.s32.totalorder %v3441_v25, 64  ;;  %v373_v39 = vadd.s32 3, %v3422_v9  ;;  %v383_v40 = vadd.s32 4, %v3422_v9 }
   0xd   :  { %vm365_vm4 = vcmp.lt.s32.totalorder %v363_v28, 64  ;;  %vm3464_vm5 = vmpackc.low %vm187_vm12, %vm177_vm11  ;;  %vm197_vm6 = vcmp.ge.s32.totalorder %v196_v33, 0  ;;  %vm207_vm7 = vcmp.ge.s32.totalorder %v206_v34, 0  ;;  %v216_v45 = vadd.s32 4294967283, %v3422_v9  ;;  %s4553_s17 = smov 120   ;;  %s4554_s16 = smov 113  }
   0xe   :  { %vm3474_vm13 = vmpackc.low %vm365_vm4, %vm4423_vm15  ;;  %vm375_vm11 = vcmp.lt.s32.totalorder %v373_v39, 64  ;;  %vm385_vm12 = vcmp.lt.s32.totalorder %v383_v40, 64  ;;  %v226_v46 = vadd.s32 4294967284, %v3422_v9  ;;  %v393_v51 = vadd.s32 5, %v3422_v9  ;;  %s4555_s15 = smov 8   ;;  %s4556_s13 = smov 119  }
   0xf   :  { %vm3482_vm1 = vmpackc.low %vm207_vm7, %vm197_vm6  ;;  %vm217_vm4 = vcmp.ge.s32.totalorder %v216_v45, 0  ;;  %v403_v52 = vadd.s32 6, %v3422_v9  ;;  %v236_v57 = vadd.s32 4294967285, %v3422_v9  ;;  %v246_v58 = vadd.s32 4294967286, %v3422_v9  ;;  %s4557_s26 = smov 112   ;;  %s4558_s12 = smov 7  }
  0x10   :  { %vm227_vm0 = vcmp.ge.s32.totalorder %v226_v46, 0  ;;  %vm3491_vm2 = vmpackc.low %vm385_vm12, %vm375_vm11  ;;  %vm395_vm6 = vcmp.lt.s32.totalorder %v393_v51, 64  ;;  %v473_v63 = vadd.s32 13, %v3422_v9  ;;  %v483_v2 = vadd.s32 14, %v3422_v9  ;;  %s4559_s11 = smov 118   ;;  %s4560_s14 = smov 111  }
  0x11   :  { %vm405_vm7 = vcmp.lt.s32.totalorder %v403_v52, 64  ;;  %vm3499_vm3 = vmpackc.low %vm227_vm0, %vm217_vm4  ;;  %vm237_vm11 = vcmp.ge.s32.totalorder %v236_v57, 0  ;;  %vm247_vm12 = vcmp.ge.s32.totalorder %v246_v58, 0  ;;  %v413_v7 = vadd.s32 7, %v3422_v9  ;;  %s4561_s10 = smov 6  }
  0x12   :  { %v4503_v61 = vsel %vm3499_vm3, 4294967295, %v4502_v61  ;;  %vm3508_vm15 = vmpackc.low %vm405_vm7, %vm395_vm6  ;;  %vm475_vm0 = vcmp.lt.s32.totalorder %v473_v63, 64  ;;  %vm485_vm4 = vcmp.lt.s32.totalorder %v483_v2, 64  ;;  %v423_v8 = vadd.s32 8, %v3422_v9 }
  0x13   :  { %v4505_v5 = vsel %vm3508_vm15, 4294967295, %v4504_v5  ;;  %vm3516_vm8 = vmpackc.low %vm247_vm12, %vm237_vm11  ;;  %v4506_v12 = vmov 0  ;;  %vm415_vm6 = vcmp.lt.s32.totalorder %v413_v7, 64  ;;  %v4508_v19 = vmov 0 }
  0x14   :  { %v4507_v12 = vsel %vm3516_vm8, 4294967295, %v4506_v12  ;;  %vm425_vm7 = vcmp.lt.s32.totalorder %v423_v8, 64  ;;  %v4510_v28 = vmov 0  ;;  %v286_v39 = vadd.s32 4294967290, %v3422_v9 }
  0x15   :  { %v513_v45 = vadd.s32 17, %v3422_v9  ;;  %v523_v46 = vadd.s32 18, %v3422_v9  ;;  %v453_v52 = vadd.s32 11, %v3422_v9  ;;  %v4519_v57 = vmov 0 }
  0x16   :  { %v4521_v2 = vmov 0 }
  0xdd   :  { %v3331_v3 = vpop.f32.mrb[0].mxu0 }
  0xde   :  { %154 = vrot.lane.b32.xlu1 %v3331_v3, %s4455_s0  ;;  %314 = vrot.lane.b32.xlu0 %v3331_v3, %s4458_s30  ;;  %v2587_v4 = vpop.f32.mrb[1].mxu0  ;;  %s4544_s0 = smov 123  }
  0xe2   :  { %164 = vrot.lane.b32.xlu1 %v3331_v3, %s4457_s18  ;;  %324 = vrot.lane.b32.xlu0 %v3331_v3, %s4459_s19 }
  0xe6   :  { %174 = vrot.lane.b32.xlu1 %v3331_v3, %s4453_s1  ;;  %334 = vrot.lane.b32.xlu0 %v3331_v3, %s4462_s20  ;;  %s4538_s1 = smov 15  }
  0xea   :  { %351 = vrot.lane.b32.xlu1 %v3331_v3, %s4460_s21  ;;  %184 = vrot.lane.b32.xlu0 %v3331_v3, %s4410_s22  ;;  %s4541_s22 = smov 14  }
  0xee   :  { %194 = vrot.lane.b32.xlu1 %v3331_v3, %s4364_s23  ;;  %361 = vrot.lane.b32.xlu0 %v3331_v3, %s4366_s24  ;;  %s4376_s23 = smov 123   ;;  %s4378_s24 = smov 12  }
  0xf2   :  { %371 = vrot.lane.b32.xlu1 %v3331_v3, %s4368_s25  ;;  %204 = vrot.lane.b32.xlu0 %v3331_v3, %s4370_s27  ;;  %s4380_s25 = smov 11   ;;  %s4382_s27 = smov 122  }
  0xf6   :  { %214 = vrot.lane.b32.xlu1 %v3331_v3, %s4372_s28  ;;  %381 = vrot.lane.b32.xlu0 %v3331_v3, %s4374_s29  ;;  %s4384_s28 = smov 115   ;;  %s4386_s29 = smov 10  }
  0xfa   :  { %391 = vrot.lane.b32.xlu1 %v3331_v3, %s4376_s23  ;;  %224 = vrot.lane.b32.xlu0 %v3331_v3, %s4378_s24  ;;  %s4388_s23 = smov 121   ;;  %s4390_s24 = smov 114  }
  0xfe   :  { %234 = vrot.lane.b32.xlu1 %v3331_v3, %s4380_s25  ;;  %401 = vrot.lane.b32.xlu0 %v3331_v3, %s4382_s27  ;;  %s4392_s25 = smov 9   ;;  %s4394_s27 = smov 120  }
 0x102   :  { %471 = vrot.lane.b32.xlu1 %v3331_v3, %s4384_s28  ;;  %244 = vrot.lane.b32.xlu0 %v3331_v3, %s4386_s29  ;;  %s4396_s28 = smov 113   ;;  %s4398_s29 = smov 8  }
 0x106   :  { %411 = vrot.lane.b32.xlu1 %v3331_v3, %s4388_s23  ;;  %481 = vrot.lane.b32.xlu0 %v3331_v3, %s4390_s24  ;;  %s4400_s23 = smov 119   ;;  %s4402_s24 = smov 112  }
 0x10a   :  { %254 = vrot.lane.b32.xlu1 %v3331_v3, %s4392_s25  ;;  %421 = vrot.lane.b32.xlu0 %v3331_v3, %s4394_s27  ;;  %s4404_s25 = smov 7   ;;  %s4406_s27 = smov 118  }
 0x10e   :  { %491 = vrot.lane.b32.xlu1 %v3331_v3, %s4396_s28  ;;  %264 = vrot.lane.b32.xlu0 %v3331_v3, %s4398_s29  ;;  %s4408_s28 = smov 111   ;;  %s4412_s29 = smov 6  }
 0x112   :  { %431 = vrot.lane.b32.xlu1 %v3331_v3, %s4400_s23  ;;  %501 = vrot.lane.b32.xlu0 %v3331_v3, %s4402_s24  ;;  %s4414_s23 = smov 117   ;;  %s4416_s24 = smov 110  }
 0x116   :  { %274 = vrot.lane.b32.xlu1 %v3331_v3, %s4404_s25  ;;  %441 = vrot.lane.b32.xlu0 %v3331_v3, %s4406_s27  ;;  %s4451_s25 = smov 5   ;;  %s4449_s27 = smov 116  }
 0x11a   :  { %511 = vrot.lane.b32.xlu1 %v3331_v3, %s4408_s28  ;;  %284 = vrot.lane.b32.xlu0 %v3331_v3, %s4412_s29  ;;  %s4447_s29 = smov 109   ;;  %s4542_s28 = smov 13  }
 0x11e   :  { %451 = vrot.lane.b32.xlu1 %v3331_v3, %s4414_s23  ;;  %521 = vrot.lane.b32.xlu0 %v3331_v3, %s4416_s24  ;;  %s4445_s23 = smov 4   ;;  %s4443_s24 = smov 108  }
 0x122   :  { %294 = vrot.lane.b32.xlu1 %v3331_v3, %s4451_s25  ;;  %461 = vrot.lane.b32.xlu0 %v3331_v3, %s4449_s27  ;;  %s4539_s25 = smov 126   ;;  %s4543_s27 = smov 124  }
 0x126   :  { %531 = vrot.lane.b32.xlu1 %v3331_v3, %s4447_s29  ;;  %304 = vrot.lane.b32.xlu0 %v3331_v3, %s4445_s23  ;;  %s4535_s23 = smov 19   ;;  %s4545_s29 = smov 12  }
 0x12a   :  { %541 = vrot.lane.b32.xlu0 %v3331_v3, %s4443_s24  ;;  %551 = vrot.lane.b32.xlu1 %v3321_v1, %s4462_s20  ;;  %s4536_s24 = smov 17  }
 0x12e   :  { %554 = vrot.lane.b32.xlu0 %v3321_v1, %s4460_s21 }
 0x150   :  { %v155_v14 = vpop.permute.xlu1 %154  ;;  %v315_v15 = vpop.permute.xlu0 %314 }
 0x154   :  { %v165_v17 = vpop.permute.xlu1 %164  ;;  %v325_v18 = vpop.permute.xlu0 %324 }
 0x155   :  { %v2967_v24 = vpack.c.bf16 %v325_v18, %v315_v15  ;;  %v2970_v27 = vpack.c.bf16 %v165_v17, %v155_v14  ;;  %v256_v14 = vadd.s32 4294967287, %v3422_v9  ;;  %v266_v15 = vadd.s32 4294967288, %v3422_v9 }
 0x157   :  { %2968 = vmatprep.subr.msk.bf16.mxu1 %vm3434_vm9, %v2967_v24  ;;  %vm267_vm12 = vcmp.ge.s32.totalorder %v266_v15, 0 }
 0x158   :  { %v175_v21 = vpop.permute.xlu1 %174  ;;  %v335_v22 = vpop.permute.xlu0 %334  ;;  %2971 = vmatpush3.bf16.msk.msra.mxu1 %vm3444_vm10, %v2970_v27 }
 0x159   :  { %v2973_v32 = vpack.c.bf16 %v3331_v3, %v335_v22  ;;  %v503_v22 = vadd.s32 16, %v3422_v9 }
 0x15b   :  { %2974 = vmatprep.subr.msk.bf16.mxu1 %vm3453_vm14, %v2973_v32  ;;  %vm505_vm11 = vcmp.lt.s32.totalorder %v503_v22, 64  ;;  %v443_v32 = vadd.s32 10, %v3422_v9 }
 0x15c   :  { %v352_v29 = vpop.permute.xlu1 %351  ;;  %v185_v30 = vpop.permute.xlu0 %184 }
 0x15d   :  { %v2976_v38 = vpack.c.bf16 %v185_v30, %v175_v21  ;;  %v493_v21 = vadd.s32 15, %v3422_v9  ;;  %v433_v30 = vadd.s32 9, %v3422_v9 }
 0x15f   :  { %2977 = vmatpush3.bf16.msk.msra.mxu1 %vm3464_vm5, %v2976_v38  ;;  %v276_v38 = vadd.s32 4294967289, %v3422_v9 }
 0x160   :  { %v195_v35 = vpop.permute.xlu1 %194  ;;  %v362_v36 = vpop.permute.xlu0 %361 }
 0x161   :  { %v2979_v44 = vpack.c.bf16 %v362_v36, %v352_v29 }
 0x163   :  { %2980 = vmatprep.subr.msk.bf16.mxu1 %vm3474_vm13, %v2979_v44 }
 0x164   :  { %v372_v41 = vpop.permute.xlu1 %371  ;;  %v205_v42 = vpop.permute.xlu0 %204 }
 0x165   :  { %v2982_v50 = vpack.c.bf16 %v205_v42, %v195_v35  ;;  %v4513_v35 = vmov 0  ;;  %v4515_v42 = vmov 0 }
 0x167   :  { %2983 = vmatpush3.bf16.msk.msra.mxu1 %vm3482_vm1, %v2982_v50  ;;  %v4517_v50 = vmov 0 }
 0x168   :  { %v215_v47 = vpop.permute.xlu1 %214  ;;  %v382_v48 = vpop.permute.xlu0 %381 }
 0x169   :  { %v2985_v56 = vpack.c.bf16 %v382_v48, %v372_v41 }
 0x16b   :  { %2986 = vmatprep.subr.msk.bf16.mxu1 %vm3491_vm2, %v2985_v56 }
 0x16c   :  { %v392_v53 = vpop.permute.xlu1 %391  ;;  %v225_v54 = vpop.permute.xlu0 %224 }
 0x16d   :  { %v2988_v62 = vpack.c.bf16 %v225_v54, %v215_v47 }
 0x16f   :  { %2989 = vmatpush3.bf16.msk.msra.mxu1 %vm3499_vm3, %v2988_v62 }
 0x170   :  { %v235_v59 = vpop.permute.xlu1 %234  ;;  %v402_v60 = vpop.permute.xlu0 %401 }
 0x171   :  { %v2991_v6 = vpack.c.bf16 %v402_v60, %v392_v53  ;;  %v463_v53 = vadd.s32 12, %v3422_v9  ;;  %v306_v60 = vadd.s32 4294967292, %v3422_v9 }
 0x173   :  { %2992 = vmatprep.subr.msk.bf16.mxu1 %vm3508_vm15, %v2991_v6  ;;  %vm3525_vm15 = vmpackc.low %vm485_vm4, %vm475_vm0  ;;  %vm495_vm4 = vcmp.lt.s32.totalorder %v493_v21, 64  ;;  %v543_v6 = vadd.s32 20, %v3422_v9 }
 0x174   :  { %v472_v3 = vpop.permute.xlu1 %471  ;;  %v245_v4 = vpop.permute.xlu0 %244  ;;  %v4509_v19 = vsel %vm3525_vm15, 4294967295, %v4508_v19  ;;  %vm3536_vm0 = vmpackc.low %vm425_vm7, %vm415_vm6  ;;  %vm435_vm6 = vcmp.lt.s32.totalorder %v433_v30, 64  ;;  %vm445_vm7 = vcmp.lt.s32.totalorder %v443_v32, 64 }
 0x175   :  { %v2994_v13 = vpack.c.bf16 %v245_v4, %v235_v59  ;;  %v4511_v28 = vsel %vm3536_vm0, 4294967295, %v4510_v28  ;;  %v296_v59 = vadd.s32 4294967291, %v3422_v9  ;;  %v533_v4 = vadd.s32 19, %v3422_v9 }
 0x177   :  { %2995 = vmatpush3.bf16.msk.msra.mxu1 %vm3516_vm8, %v2994_v13 }
 0x178   :  { %v412_v10 = vpop.permute.xlu1 %411  ;;  %v482_v11 = vpop.permute.xlu0 %481 }
 0x179   :  { %v2997_v20 = vpack.c.bf16 %v482_v11, %v472_v3 }
 0x17b   :  { %2998 = vmatprep.subr.msk.bf16.mxu0 %vm3525_vm15, %v2997_v20 }
 0x17c   :  { %v255_v17 = vpop.permute.xlu1 %254  ;;  %v422_v18 = vpop.permute.xlu0 %421  ;;  %3001 = vmatpush3.bf16.msk.msra.mxu0 %vm3525_vm15, %v2997_v20  ;;  %vm4512_vm15 = vcmp.ge.s32.totalorder %v256_v14, 0  ;;  %v564_v20 = vld [vmem:[%s4347_s2 + $0x20] sm:$0xff] }
 0x17d   :  { %v3003_v29 = vpack.c.bf16 %v422_v18, %v412_v10  ;;  %vm3545_vm8 = vmpackc.low %vm267_vm12, %vm4512_vm15  ;;  %vm277_vm15 = vcmp.ge.s32.totalorder %v276_v38, 0  ;;  %vm287_vm12 = vcmp.ge.s32.totalorder %v286_v39, 0 }
 0x17e   :  { %v4514_v35 = vsel %vm3545_vm8, 4294967295, %v4513_v35 }
 0x17f   :  { %3004 = vmatprep.subr.msk.bf16.mxu1 %vm3536_vm0, %v3003_v29  ;;  %vm3553_vm0 = vmpackc.low %vm505_vm11, %vm495_vm4  ;;  %vm515_vm4 = vcmp.lt.s32.totalorder %v513_v45, 64  ;;  %v563_v29 = vld [vmem:[%s4347_s2 + $0x18] sm:$0xff] }
 0x180   :  { %v492_v24 = vpop.permute.xlu1 %491  ;;  %v265_v27 = vpop.permute.xlu0 %264  ;;  %v4516_v42 = vsel %vm3553_vm0, 4294967295, %v4515_v42  ;;  %vm3564_vm11 = vmpackc.low %vm445_vm7, %vm435_vm6  ;;  %vm455_vm6 = vcmp.lt.s32.totalorder %v453_v52, 64  ;;  %vm465_vm7 = vcmp.lt.s32.totalorder %v463_v53, 64  ;;  %v571_v45 = vld [vmem:[%s4347_s2 + $0x58] sm:$0xff] }
 0x181   :  { %v3006_v36 = vpack.c.bf16 %v265_v27, %v255_v17  ;;  %v4518_v50 = vsel %vm3564_vm11, 4294967295, %v4517_v50  ;;  %v560_v17 = vld [vmem:[%s4347_s2] sm:$0xff] }
 0x183   :  { %3007 = vmatpush3.bf16.msk.msra.mxu1 %vm3545_vm8, %v3006_v36  ;;  %vm525_vm8 = vcmp.lt.s32.totalorder %v523_v46, 64  ;;  %v569_v36 = vld [vmem:[%s4347_s2 + $0x48] sm:$0xff] }
 0x184   :  { %v432_v33 = vpop.permute.xlu1 %431  ;;  %v502_v34 = vpop.permute.xlu0 %501 }
 0x185   :  { %v3009_v44 = vpack.c.bf16 %v502_v34, %v492_v24  ;;  %v570_v34 = vld [vmem:[%s4347_s2 + $0x50] sm:$0xff] }
 0x187   :  { %3010 = vmatprep.subr.msk.bf16.mxu0 %vm3553_vm0, %v3009_v44 }
 0x188   :  { %v275_v40 = vpop.permute.xlu1 %274  ;;  %v442_v41 = vpop.permute.xlu0 %441  ;;  %3013 = vmatpush3.bf16.msk.msra.mxu0 %vm3553_vm0, %v3009_v44  ;;  %vm3572_vm0 = vmpackc.low %vm287_vm12, %vm277_vm15  ;;  %vm297_vm15 = vcmp.ge.s32.totalorder %v296_v59, 0  ;;  %vm307_vm12 = vcmp.ge.s32.totalorder %v306_v60, 0  ;;  %v568_v44 = vld [vmem:[%s4347_s2 + $0x40] sm:$0xff] }
 0x189   :  { %v3015_v51 = vpack.c.bf16 %v442_v41, %v432_v33  ;;  %v4520_v57 = vsel %vm3572_vm0, 4294967295, %v4519_v57  ;;  %v566_v33 = vld [vmem:[%s4347_s2 + $0x30] sm:$0xff]  ;;  %v565_v41 = vld [vmem:[%s4347_s2 + $0x28] sm:$0xff] }
 0x18b   :  { %3016 = vmatprep.subr.msk.bf16.mxu1 %vm3564_vm11, %v3015_v51  ;;  %vm3581_vm11 = vmpackc.low %vm525_vm8, %vm515_vm4  ;;  %vm535_vm4 = vcmp.lt.s32.totalorder %v533_v4, 64 }
 0x18c   :  { %v512_v47 = vpop.permute.xlu1 %511  ;;  %v285_v48 = vpop.permute.xlu0 %284  ;;  %v4522_v2 = vsel %vm3581_vm11, 4294967295, %v4521_v2  ;;  %vm3592_vm8 = vmpackc.low %vm465_vm7, %vm455_vm6  ;;  %vm4527_vm6 = vcmp.ge.s32.totalorder %v3429_v16, 0 }
 0x18d   :  { %v3018_v58 = vpack.c.bf16 %v285_v48, %v275_v40  ;;  %v3224_v40 = vmov 0.0|0.0  }
 0x18f   :  { %3019 = vmatpush3.bf16.msk.msra.mxu1 %vm3572_vm0, %v3018_v58  ;;  %vm545_vm0 = vcmp.lt.s32.totalorder %v543_v6, 64 }
 0x190   :  { %v452_v54 = vpop.permute.xlu1 %451  ;;  %v522_v56 = vpop.permute.xlu0 %521  ;;  %vm3613_vm7 = vmpackc.low %vm545_vm0, %vm535_vm4  ;;  %vm4531_vm0 = vcmask 785408  }
 0x191   :  { %v3021_v3 = vpack.c.bf16 %v522_v56, %v512_v47  ;;  %vm4533_vm4 = vmmov %vm4531_vm0 }
 0x193   :  { %3022 = vmatprep.subr.msk.bf16.mxu0 %vm3581_vm11, %v3021_v3 }
 0x194   :  { %v295_v62 = vpop.permute.xlu1 %294  ;;  %v462_v63 = vpop.permute.xlu0 %461  ;;  %3025 = vmatpush3.bf16.msk.msra.mxu0 %vm3581_vm11, %v3021_v3  ;;  %vm3598_vm11 = vmpackc.low %vm307_vm12, %vm297_vm15  ;;  %vm4530_vm15 = vcmp.lt.s32.totalorder %v3441_v25, 64 }
 0x195   :  { %v3027_v11 = vpack.c.bf16 %v462_v63, %v452_v54  ;;  %vm4532_vm12 = vmmov %vm4531_vm0 }
 0x197   :  { %3028 = vmatprep.subr.msk.bf16.mxu1 %vm3592_vm8, %v3027_v11 }
 0x198   :  { %v532_v7 = vpop.permute.xlu1 %531  ;;  %v305_v8 = vpop.permute.xlu0 %304 }
 0x199   :  { %v3030_v9 = vpack.c.bf16 %v305_v8, %v295_v62 }
 0x19b   :  { %3031 = vmatpush3.bf16.msk.msra.mxu1 %vm3598_vm11, %v3030_v9 }
 0x19c   :  { %v542_v13 = vpop.permute.xlu0 %541  ;;  %v552_v14 = vpop.permute.xlu1 %551 }
 0x19d   :  { %v553_v18 = vsel %vm4527_vm6, %v552_v14, -inf  ;;  %v3033_v27 = vpack.c.bf16 %v542_v13, %v532_v7  ;;  %vm4534_vm6 = vmmov 0   ;;  %v3225_v14 = vmov 0  }
 0x19e   :  { %v557_v21 = vmax.f32 %v553_v18, %v3321_v1  ;;  %694 = vmatmul.mubr.f32.vlgmr.msra.gmra.mrb[0].mxu1 %v560_v17  ;;  %v567_v1 = vld [vmem:[%s4347_s2 + $0x38] sm:$0xff]  ;;  %2932 = vset.pattern.permute.xlu1 %v3225_v14  ;;  %s4540_s2 = smov 125  }
 0x19f   :  { %3034 = vmatprep.subr.msk.bf16.mxu0 %vm3613_vm7, %v3033_v27  ;;  %698 = vmatprep.mubr.f32.mxu1 %v564_v20 }
 0x1a0   :  { %v555_v22 = vpop.permute.xlu0 %554  ;;  %3037 = vmatpush3.bf16.msk.msra.mxu0 %vm3613_vm7, %v3033_v27  ;;  %2931 = vset.pattern.permute.xlu0 %v3225_v14 }
 0x1a1   :  { %v556_v30 = vsel %vm4530_vm15, %v555_v22, -inf  ;;  %vm4472_vm15 = vcmask 261120  }
 0x1a2   :  { %v558_v32 = vmax.f32 %v557_v21, %v556_v30  ;;  %699 = vmatmul.mubr.f32.gmra.mrb[2].mxu1 %v563_v29 }
 0x1a3   :  { %703 = vmatprep.mubr.f32.mxu1 %v567_v1 }
 0x1a4   :  { %559 = vst [vmem:[#allocation2 + $0x140] sm:$0xf] %v558_v32 }
 0x1a6   :  { %704 = vmatmul.mubr.f32.gmra.mrb[4].mxu1 %v566_v33 }
 0x1a7   :  { %708 = vmatprep.mubr.f32.mxu1 %v570_v34  ;;  %v800_v34 = vld [vmem:[%s4348_s3 + $0x8] sm:$0xff] }
 0x1aa   :  { %709 = vmatmul.mubr.f32.gmra.mrb[6].mxu1 %v569_v36  ;;  %v803_v36 = vld [vmem:[%s4349_s4] sm:$0xff] }
 0x1ab   :  { %v612_v38 = vld [vmem:[#allocation2 + $0x140] sm:$0xff] }
 0x1ac   :  { %v2756_v39 = vpack.c.bf16 %v3182_v0, %v612_v38  ;;  %v804_v38 = vld [vmem:[%s4349_s4 + $0x8] sm:$0xff] }
 0x1ae   :  { %2757 = vmatprep.subr.bf16.mxu0 %v2756_v39 }
 0x1af   :  { %2759 = vmatpush3.bf16.msra.mxu0 %v2756_v39  ;;  %v799_v39 = vld [vmem:[%s4348_s3] sm:$0xff] }
 0x1b0   :  { %2761 = vmatprep.subr.bf16.mxu0 %v3224_v40 }
 0x1b3   :  { %2763 = vmatpush3.bf16.msra.mxu0 %v3224_v40 }
 0x1b4   :  { %2764 = vmatprep.subr.bf16.mxu0 %v3224_v40 }
 0x1b6   :  { %2613 = vmatmul.mubr.msk.f32.vlgmr.msra.gmra.mrb[2].mxu0 %vm4531_vm0, %v565_v41  ;;  %v801_v41 = vld [vmem:[%s4348_s3 + $0x10] sm:$0xff] }
 0x1b7   :  { %2615 = vmatprep.mubr.msk.f32.mxu0 %vm4532_vm12, %v568_v44  ;;  %v802_v44 = vld [vmem:[%s4348_s3 + $0x18] sm:$0xff]  ;;  %s4546_s3 = smov 11   ;;  %vm4571_vm12 = vnez %v4505_v5 }
 0x1ba   :  { %2616 = vmatmul.mubr.msk.f32.gmra.mrb[4].mxu0 %vm4533_vm4, %v571_v45  ;;  %v805_v45 = vld [vmem:[%s4349_s4 + $0x10] sm:$0xff]  ;;  %vm4572_vm4 = vnez %v4507_v12 }
 0x1bb   :  { %2626 = vmatprep.mubr.msk.f32.mxu0 %vm4534_vm6, %v3182_v0 }
 0x271   :  { %v2420_v46 = vpop.f32.mrb[0].mxu1 }
 0x272   :  { %v2421_v47 = vpop.f32.mrb[1].mxu1 }
 0x273   :  { %v2422_v48 = vadd.f32 %v2421_v47, %v2420_v46 }
 0x275   :  { %v2423_v51 = vpop.f32.mrb[2].mxu1 }
 0x276   :  { %v2424_v52 = vpop.f32.mrb[3].mxu1 }
 0x277   :  { %v2425_v53 = vadd.f32 %v2424_v52, %v2423_v51  ;;  %v806_v52 = vld [vmem:[%s4349_s4 + $0x18] sm:$0xff]  ;;  %s4547_s4 = smov 122  }
 0x279   :  { %v2426_v54 = vpop.f32.mrb[4].mxu1 }
 0x27a   :  { %v2427_v56 = vpop.f32.mrb[5].mxu1 }
 0x27b   :  { %v2428_v58 = vadd.f32 %v2427_v56, %v2426_v54 }
 0x27d   :  { %v2429_v59 = vpop.f32.mrb[6].mxu1 }
 0x27e   :  { %v2430_v60 = vpop.f32.mrb[7].mxu1 }
 0x27f   :  { %v2431_v62 = vadd.f32 %v2430_v60, %v2429_v59 }
 0x289   :  { %v2614_v63 = vpop.f32.mrb[2].mxu0 }
 0x28a   :  { %v786_v3 = vadd.f32 %v2614_v63, %v2425_v53  ;;  %v780_v4 = vpop.f32.mrb[3].mxu0 }
 0x28b   :  { %v781_v6 = vadd.f32 %v2422_v48, %v780_v4 }
 0x28c   :  { %809 = vadd.xlane.f32.xlu0 %v786_v3 }
 0x28d   :  { %v2617_v7 = vpop.f32.mrb[4].mxu0  ;;  %807 = vadd.xlane.f32.xlu1 %v781_v6 }
 0x28e   :  { %v796_v8 = vadd.f32 %v2617_v7, %v2431_v62  ;;  %v790_v11 = vpop.f32.mrb[5].mxu0 }
 0x28f   :  { %v791_v13 = vadd.f32 %v2428_v58, %v790_v11 }
 0x291   :  { %811 = vadd.xlane.f32.xlu0 %v791_v13  ;;  %813 = vadd.xlane.f32.xlu1 %v796_v8 }
 0x319   :  { %v810_v9 = vpop.xlane.xlu0 %809 }
 0x31a   :  { %v816_v17 = vmul.f32 0.0078125, %v810_v9  ;;  %v808_v18 = vpop.xlane.xlu1 %807 }
 0x31b   :  { %v815_v20 = vmul.f32 0.0078125, %v808_v18 }
 0x31c   :  { %v820_v21 = vsub.f32 %v786_v3, %v816_v17 }
 0x31d   :  { %v819_v22 = vsub.f32 %v781_v6, %v815_v20 }
 0x31e   :  { %v812_v27 = vpop.xlane.xlu0 %811  ;;  %v824_v29 = vmul.f32 %v820_v21, %v820_v21  ;;  %v814_v46 = vpop.xlane.xlu1 %813 }
 0x31f   :  { %v817_v30 = vmul.f32 0.0078125, %v812_v27  ;;  %v823_v1 = vmul.f32 %v819_v22, %v819_v22  ;;  %v818_v47 = vmul.f32 0.0078125, %v814_v46 }
 0x320   :  { %829 = vadd.xlane.f32.xlu1 %v824_v29 }
 0x321   :  { %827 = vadd.xlane.f32.xlu0 %v823_v1  ;;  %v3655_v32 = vsub.f32 %v791_v13, %v817_v30  ;;  %v822_v48 = vsub.f32 %v796_v8, %v818_v47 }
 0x323   :  { %v825_v33 = vmul.f32 %v3655_v32, %v3655_v32  ;;  %v826_v51 = vmul.f32 %v822_v48, %v822_v48 }
 0x325   :  { %831 = vadd.xlane.f32.xlu0 %v825_v33 }
 0x331   :  { %858 = vperm.xlu1 %2932, %v800_v34  }
 0x335   :  { %877 = vperm.xlu1 %2932, %v803_v36  }
 0x339   :  { %882 = vperm.xlu1 %2932, %v804_v38  }
 0x33b   :  { %853 = vperm.xlu0 %2931, %v799_v39  }
 0x33d   :  { %863 = vperm.xlu1 %2932, %v801_v41  }
 0x341   :  { %868 = vperm.xlu1 %2932, %v802_v44  }
 0x345   :  { %887 = vperm.xlu1 %2932, %v805_v45  }
 0x369   :  { %833 = vadd.xlane.f32.xlu1 %v826_v51 }
 0x37a   :  { %892 = vperm.xlu1 %2932, %v806_v52  }
 0x3ad   :  { %v830_v53 = vpop.xlane.xlu1 %829 }
 0x3ae   :  { %v836_v54 = vmul.f32 0.0078125, %v830_v53  ;;  %v828_v56 = vpop.xlane.xlu0 %827 }
 0x3af   :  { %v835_v58 = vmul.f32 0.0078125, %v828_v56 }
 0x3b0   :  { %v840_v59 = vadd.f32 1e-05, %v836_v54 }
 0x3b1   :  { %v839_v60 = vadd.f32 1e-05, %v835_v58  ;;  %v859_v62 = vpop.permute.xlu1 %858 }
 0x3b2   :  { %2933 = vrsqrt.f32 %v840_v59  ;;  %v832_v63 = vpop.xlane.xlu0 %831  ;;  %v903_v59 = vld [vmem:[%s4350_s5] sm:$0xff]  ;;  %s4537_s5 = smov 16  }
 0x3b3   :  { %2935 = vrsqrt.f32 %v839_v60  ;;  %v837_v29 = vmul.f32 0.0078125, %v832_v63  ;;  %v1173_v60 = vld [vmem:[%s4351_s6 + $0x8] sm:$0xff] }
 0x3b4   :  { %1304 = vmatprep.mubr.f32.mxu1 %v1173_v60 }
 0x3b5   :  { %v878_v3 = vpop.permute.xlu1 %877  ;;  %v841_v1 = vadd.f32 1e-05, %v837_v29 }
 0x3b7   :  { %2937 = vrsqrt.f32 %v841_v1 }
 0x3b9   :  { %v883_v14 = vpop.permute.xlu1 %882 }
 0x3ba   :  { %v854_v8 = vpop.permute.xlu0 %853 }
 0x3bc   :  { %v2934_v4 = vpop.eup %2933 }
 0x3bd   :  { %v2936_v6 = vpop.eup %2935  ;;  %v848_v7 = vmul.f32 %v2934_v4, %v820_v21 }
 0x3be   :  { %v847_v11 = vmul.f32 %v2936_v6, %v819_v22  ;;  %v864_v22 = vpop.permute.xlu1 %863 }
 0x3bf   :  { %v872_v13 = vmul.f32 %v859_v62, %v848_v7  ;;  %v1174_v62 = vld [vmem:[%s4351_s6 + $0x10] sm:$0xff] }
 0x3c0   :  { %v871_v9 = vmul.f32 %v854_v8, %v847_v11 }
 0x3c1   :  { %v896_v17 = vadd.f32 %v883_v14, %v872_v13  ;;  %v2938_v39 = vpop.eup %2937 }
 0x3c2   :  { %v895_v18 = vadd.f32 %v878_v3, %v871_v9  ;;  %v869_v30 = vpop.permute.xlu1 %868  ;;  %v849_v41 = vmul.f32 %v2938_v39, %v3655_v32 }
 0x3c3   :  { %v3684_v20 = vmax.f32 %v896_v17, 0.0 }
 0x3c4   :  { %v3686_v27 = vmax.f32 %v895_v18, 0.0  ;;  %v873_v44 = vmul.f32 %v864_v22, %v849_v41 }
 0x3c5   :  { %1138 = vrot.lane.b32.xlu1 %v3684_v20, %s4462_s20 }
 0x3c6   :  { %1136 = vrot.lane.b32.xlu0 %v3686_v27, %s4462_s20  ;;  %v2765_v21 = vpack.c.bf16 %v3684_v20, %v3686_v27  ;;  %v888_v33 = vpop.permute.xlu1 %887 }
 0x3c7   :  { %v897_v47 = vadd.f32 %v888_v33, %v873_v44 }
 0x3c8   :  { %2766 = vmatpush3.bf16.msra.mxu0 %v2765_v21 }
 0x3c9   :  { %1150 = vrot.lane.b32.xlu1 %v3684_v20, %s4460_s21  ;;  %2767 = vmatprep.subr.bf16.mxu0 %v3224_v40  ;;  %v3700_v54 = vmax.f32 %v897_v47, 0.0 }
 0x3ca   :  { %1148 = vrot.lane.b32.xlu0 %v3686_v27, %s4460_s21 }
 0x3f6   :  { %v834_v34 = vpop.xlane.xlu1 %833 }
 0x3f7   :  { %v838_v36 = vmul.f32 0.0078125, %v834_v34 }
 0x3f9   :  { %v842_v38 = vadd.f32 1e-05, %v838_v36 }
 0x3fa   :  { %v893_v52 = vpop.permute.xlu1 %892 }
 0x3fb   :  { %2939 = vrsqrt.f32 %v842_v38 }
 0x405   :  { %v2940_v45 = vpop.eup %2939 }
 0x406   :  { %v850_v46 = vmul.f32 %v2940_v45, %v822_v48 }
 0x408   :  { %v874_v51 = vmul.f32 %v869_v30, %v850_v46 }
 0x40a   :  { %v898_v53 = vadd.f32 %v893_v52, %v874_v51 }
 0x40c   :  { %v3702_v56 = vmax.f32 %v898_v53, 0.0 }
 0x40e   :  { %v2768_v58 = vpack.c.bf16 %v3702_v56, %v3700_v54 }
 0x410   :  { %2769 = vmatpush3.bf16.msra.mxu0 %v2768_v58 }
 0x413   :  { %2627 = vmatmul.mubr.msk.f32.vlgmr.msra.gmra.mrb[6].mxu0 %vm4472_vm15, %v903_v59  ;;  %vm4574_vm15 = vnez %v4511_v28 }
 0x414   :  { %2653 = vmatprep.mubr.msk.f32.mxu0 %vm4531_vm0, %v1174_v62  ;;  %vm4573_vm0 = vnez %v4509_v19 }
 0x437   :  { %v3805_v63 = vpop.permute.xlu1 %1138 }
 0x438   :  { %v3807_v3 = vpop.permute.xlu0 %1136 }
 0x43b   :  { %v3809_v4 = vpop.permute.xlu1 %1150 }
 0x43c   :  { %v3811_v6 = vpop.permute.xlu0 %1148 }
 0x4e6   :  { %v3710_v32 = vpop.f32.mrb[6].mxu0 }
 0x4e7   :  { %1046 = vrot.lane.b32.xlu0 %v3710_v32, %s4459_s19  ;;  %1042 = vrot.lane.b32.xlu1 %v3710_v32, %s4458_s30  ;;  %v2628_v48 = vpop.f32.mrb[7].mxu0  ;;  %s4549_s30 = smov 10   ;;  %s4550_s19 = smov 121  }
 0x4eb   :  { %982 = vrot.lane.b32.xlu0 %v3710_v32, %s4457_s18  ;;  %978 = vrot.lane.b32.xlu1 %v3710_v32, %s4535_s23  ;;  %s4548_s18 = smov 115  }
 0x4ef   :  { %986 = vrot.lane.b32.xlu0 %v3710_v32, %s4536_s24  ;;  %1050 = vrot.lane.b32.xlu1 %v3710_v32, %s4462_s20  ;;  %s4552_s20 = smov 9  }
 0x4f3   :  { %1056 = vrot.lane.b32.xlu0 %v3710_v32, %s4460_s21  ;;  %990 = vrot.lane.b32.xlu1 %v3710_v32, %s4537_s5  ;;  %s4551_s21 = smov 114  }
 0x4f7   :  { %994 = vrot.lane.b32.xlu0 %v3710_v32, %s4538_s1  ;;  %1060 = vrot.lane.b32.xlu1 %v3710_v32, %s4539_s25 }
 0x4fb   :  { %1064 = vrot.lane.b32.xlu0 %v3710_v32, %s4540_s2  ;;  %998 = vrot.lane.b32.xlu1 %v3710_v32, %s4541_s22 }
 0x4ff   :  { %1002 = vrot.lane.b32.xlu0 %v3710_v32, %s4542_s28  ;;  %1068 = vrot.lane.b32.xlu1 %v3710_v32, %s4543_s27 }
 0x503   :  { %1072 = vrot.lane.b32.xlu0 %v3710_v32, %s4544_s0  ;;  %1006 = vrot.lane.b32.xlu1 %v3710_v32, %s4545_s29 }
 0x507   :  { %1010 = vrot.lane.b32.xlu0 %v3710_v32, %s4546_s3  ;;  %1076 = vrot.lane.b32.xlu1 %v3710_v32, %s4547_s4 }
 0x50b   :  { %1104 = vrot.lane.b32.xlu0 %v3710_v32, %s4548_s18  ;;  %1014 = vrot.lane.b32.xlu1 %v3710_v32, %s4549_s30 }
 0x50f   :  { %1080 = vrot.lane.b32.xlu0 %v3710_v32, %s4550_s19  ;;  %1108 = vrot.lane.b32.xlu1 %v3710_v32, %s4551_s21 }
 0x513   :  { %1018 = vrot.lane.b32.xlu0 %v3710_v32, %s4552_s20  ;;  %1084 = vrot.lane.b32.xlu1 %v3710_v32, %s4553_s17  ;;  %s4562_s20 = smov 117   ;;  %s4614_s17 = smov 5  }
 0x517   :  { %1112 = vrot.lane.b32.xlu0 %v3710_v32, %s4554_s16  ;;  %1022 = vrot.lane.b32.xlu1 %v3710_v32, %s4555_s15  ;;  %s4563_s15 = smov 110  }
 0x51b   :  { %1088 = vrot.lane.b32.xlu0 %v3710_v32, %s4556_s13  ;;  %1116 = vrot.lane.b32.xlu1 %v3710_v32, %s4557_s26  ;;  %s4613_s13 = smov 6   ;;  %s4617_s26 = smov 4  }
 0x51f   :  { %1026 = vrot.lane.b32.xlu0 %v3710_v32, %s4558_s12  ;;  %1092 = vrot.lane.b32.xlu1 %v3710_v32, %s4559_s11  ;;  %s4564_s12 = smov 5   ;;  %s4565_s11 = smov 116  }
 0x523   :  { %1120 = vrot.lane.b32.xlu0 %v3710_v32, %s4560_s14  ;;  %1030 = vrot.lane.b32.xlu1 %v3710_v32, %s4561_s10  ;;  %s4566_s14 = smov 109   ;;  %s4567_s10 = smov 4  }
 0x527   :  { %1096 = vrot.lane.b32.xlu0 %v3710_v32, %s4562_s20  ;;  %1124 = vrot.lane.b32.xlu1 %v3710_v32, %s4563_s15  ;;  %s4568_s20 = smov 1   ;;  %s4569_s15 = smov 108  }
 0x52b   :  { %1034 = vrot.lane.b32.xlu0 %v3710_v32, %s4564_s12  ;;  %1100 = vrot.lane.b32.xlu1 %v3710_v32, %s4565_s11  ;;  %s4570_s11 = smov 127  }
 0x52f   :  { %1128 = vrot.lane.b32.xlu0 %v3710_v32, %s4566_s14  ;;  %1038 = vrot.lane.b32.xlu1 %v3710_v32, %s4567_s10  ;;  %s4596_s14 = smov 3  }
 0x533   :  { %1140 = vrot.lane.b32.xlu0 %v3700_v54, %s4568_s20  ;;  %1132 = vrot.lane.b32.xlu1 %v3710_v32, %s4569_s15  ;;  %s4597_s15 = smov 18  }
 0x537   :  { %1152 = vrot.lane.b32.xlu0 %v3700_v54, %s4570_s11  ;;  %1142 = vrot.lane.b32.xlu1 %v3702_v56, %s4568_s20 }
 0x53b   :  { %1154 = vrot.lane.b32.xlu1 %v3702_v56, %s4570_s11 }
 0x559   :  { %v1047_v7 = vpop.permute.xlu0 %1046  ;;  %v1043_v8 = vpop.permute.xlu1 %1042 }
 0x55a   :  { %v3039_v14 = vpack.c.bf16 %v1047_v7, %v1043_v8 }
 0x55c   :  { %3040 = vmatprep.subr.msk.bf16.mxu1 %vm3434_vm9, %v3039_v14 }
 0x55d   :  { %v983_v11 = vpop.permute.xlu0 %982  ;;  %v979_v13 = vpop.permute.xlu1 %978 }
 0x55e   :  { %v3042_v18 = vpack.c.bf16 %v983_v11, %v979_v13 }
 0x560   :  { %3043 = vmatpush3.bf16.msk.msra.mxu1 %vm3444_vm10, %v3042_v18 }
 0x561   :  { %v987_v9 = vpop.permute.xlu0 %986  ;;  %v1051_v17 = vpop.permute.xlu1 %1050 }
 0x562   :  { %v3045_v29 = vpack.c.bf16 %v3710_v32, %v1051_v17 }
 0x564   :  { %3046 = vmatprep.subr.msk.bf16.mxu1 %vm3453_vm14, %v3045_v29 }
 0x565   :  { %v1057_v21 = vpop.permute.xlu0 %1056  ;;  %v991_v22 = vpop.permute.xlu1 %990 }
 0x566   :  { %v3048_v33 = vpack.c.bf16 %v991_v22, %v987_v9 }
 0x568   :  { %3049 = vmatpush3.bf16.msk.msra.mxu1 %vm3464_vm5, %v3048_v33 }
 0x569   :  { %v995_v30 = vpop.permute.xlu0 %994  ;;  %v1061_v1 = vpop.permute.xlu1 %1060 }
 0x56a   :  { %v3051_v38 = vpack.c.bf16 %v1061_v1, %v1057_v21 }
 0x56c   :  { %3052 = vmatprep.subr.msk.bf16.mxu1 %vm3474_vm13, %v3051_v38 }
 0x56d   :  { %v1065_v34 = vpop.permute.xlu0 %1064  ;;  %v999_v36 = vpop.permute.xlu1 %998 }
 0x56e   :  { %v3054_v44 = vpack.c.bf16 %v999_v36, %v995_v30 }
 0x570   :  { %3055 = vmatpush3.bf16.msk.msra.mxu1 %vm3482_vm1, %v3054_v44 }
 0x571   :  { %v1003_v39 = vpop.permute.xlu0 %1002  ;;  %v1069_v41 = vpop.permute.xlu1 %1068 }
 0x572   :  { %v3057_v47 = vpack.c.bf16 %v1069_v41, %v1065_v34 }
 0x574   :  { %3058 = vmatprep.subr.msk.bf16.mxu1 %vm3491_vm2, %v3057_v47 }
 0x575   :  { %v1073_v45 = vpop.permute.xlu0 %1072  ;;  %v1007_v46 = vpop.permute.xlu1 %1006 }
 0x576   :  { %v3060_v53 = vpack.c.bf16 %v1007_v46, %v1003_v39 }
 0x578   :  { %3061 = vmatpush3.bf16.msk.msra.mxu1 %vm3499_vm3, %v3060_v53  ;;  %vm4579_vm3 = vnez %v4522_v2 }
 0x579   :  { %v1011_v51 = vpop.permute.xlu0 %1010  ;;  %v1077_v52 = vpop.permute.xlu1 %1076 }
 0x57a   :  { %v3063_v32 = vpack.c.bf16 %v1077_v52, %v1073_v45 }
 0x57c   :  { %3064 = vmatprep.subr.msk.bf16.mxu1 %vm4571_vm12, %v3063_v32  ;;  %vm4576_vm12 = vnez %v4516_v42 }
 0x57d   :  { %v1105_v58 = vpop.permute.xlu0 %1104  ;;  %v1015_v59 = vpop.permute.xlu1 %1014 }
 0x57e   :  { %v3066_v62 = vpack.c.bf16 %v1015_v59, %v1011_v51 }
 0x580   :  { %3067 = vmatpush3.bf16.msk.msra.mxu1 %vm4572_vm4, %v3066_v62  ;;  %vm4575_vm4 = vnez %v4514_v35 }
 0x581   :  { %v1081_v48 = vpop.permute.xlu0 %1080  ;;  %v1109_v60 = vpop.permute.xlu1 %1108 }
 0x582   :  { %v3069_v11 = vpack.c.bf16 %v1109_v60, %v1105_v58 }
 0x584   :  { %3070 = vmatprep.subr.msk.bf16.mxu0 %vm4573_vm0, %v3069_v11 }
 0x585   :  { %v1019_v7 = vpop.permute.xlu0 %1018  ;;  %v1085_v8 = vpop.permute.xlu1 %1084  ;;  %3073 = vmatpush3.bf16.msk.msra.mxu0 %vm4573_vm0, %v3069_v11 }
 0x586   :  { %v3075_v9 = vpack.c.bf16 %v1085_v8, %v1081_v48 }
 0x588   :  { %3076 = vmatprep.subr.msk.bf16.mxu1 %vm4574_vm15, %v3075_v9  ;;  %vm4577_vm15 = vnez %v4518_v50 }
 0x589   :  { %v1113_v13 = vpop.permute.xlu0 %1112  ;;  %v1023_v14 = vpop.permute.xlu1 %1022 }
 0x58a   :  { %v3078_v21 = vpack.c.bf16 %v1023_v14, %v1019_v7 }
 0x58c   :  { %3079 = vmatpush3.bf16.msk.msra.mxu1 %vm4575_vm4, %v3078_v21  ;;  %vm4578_vm4 = vnez %v4520_v57 }
 0x58d   :  { %v1089_v17 = vpop.permute.xlu0 %1088  ;;  %v1117_v18 = vpop.permute.xlu1 %1116 }
 0x58e   :  { %v3081_v30 = vpack.c.bf16 %v1117_v18, %v1113_v13  ;;  %v1175_v13 = vld [vmem:[%s4351_s6 + $0x18] sm:$0xff] }
 0x590   :  { %3082 = vmatprep.subr.msk.bf16.mxu0 %vm4576_vm12, %v3081_v30 }
 0x591   :  { %v1027_v22 = vpop.permute.xlu0 %1026  ;;  %v1093_v29 = vpop.permute.xlu1 %1092  ;;  %3085 = vmatpush3.bf16.msk.msra.mxu0 %vm4576_vm12, %v3081_v30  ;;  %vm4580_vm12 = vcmp.ge.s32.totalorder %v3429_v16, 0  ;;  %v1178_v30 = vld [vmem:[%s4351_s6 + $0x30] sm:$0xff] }
 0x592   :  { %v3087_v34 = vpack.c.bf16 %v1093_v29, %v1089_v17  ;;  %v1145_v46 = vsel %vm4580_vm12, %v3805_v63, -inf  ;;  %v1179_v17 = vld [vmem:[%s4351_s6 + $0x38] sm:$0xff] }
 0x593   :  { %v1161_v63 = vmax.f32 %v1145_v46, %v3684_v20 }
 0x594   :  { %3088 = vmatprep.subr.msk.bf16.mxu1 %vm4577_vm15, %v3087_v34  ;;  %vm4581_vm15 = vmmov %vm4580_vm12 }
 0x595   :  { %v1121_v1 = vpop.permute.xlu0 %1120  ;;  %v1031_v33 = vpop.permute.xlu1 %1030  ;;  %v1144_v47 = vsel %vm4581_vm15, %v3807_v3, -inf }
 0x596   :  { %v3090_v39 = vpack.c.bf16 %v1031_v33, %v1027_v22  ;;  %v1160_v32 = vmax.f32 %v1144_v47, %v3686_v27  ;;  %v1182_v33 = vld [vmem:[%s4351_s6 + $0x50] sm:$0xff] }
 0x598   :  { %3091 = vmatpush3.bf16.msk.msra.mxu1 %vm4578_vm4, %v3090_v39  ;;  %vm4582_vm4 = vcmp.lt.s32.totalorder %v3441_v25, 64  ;;  %v1180_v39 = vld [vmem:[%s4351_s6 + $0x40] sm:$0xff] }
 0x599   :  { %v1097_v36 = vpop.permute.xlu0 %1096  ;;  %v1125_v38 = vpop.permute.xlu1 %1124  ;;  %v1157_v58 = vsel %vm4582_vm4, %v3809_v4, -inf  ;;  %v1172_v4 = vld [vmem:[%s4351_s6] sm:$0xff] }
 0x59a   :  { %v3093_v45 = vpack.c.bf16 %v1125_v38, %v1121_v1  ;;  %v1165_v48 = vmax.f32 %v1161_v63, %v1157_v58  ;;  %v1177_v38 = vld [vmem:[%s4351_s6 + $0x28] sm:$0xff] }
 0x59c   :  { %3094 = vmatprep.subr.msk.bf16.mxu0 %vm4579_vm3, %v3093_v45 }
 0x59d   :  { %v1035_v41 = vpop.permute.xlu0 %1034  ;;  %v1101_v44 = vpop.permute.xlu1 %1100  ;;  %3097 = vmatpush3.bf16.msk.msra.mxu0 %vm4579_vm3, %v3093_v45  ;;  %vm4583_vm3 = vmmov %vm4582_vm4 }
 0x59e   :  { %v3099_v53 = vpack.c.bf16 %v1101_v44, %v1097_v36  ;;  %v1156_v59 = vsel %vm4583_vm3, %v3811_v6, -inf  ;;  %v1176_v6 = vld [vmem:[%s4351_s6 + $0x20] sm:$0xff]  ;;  %vm4584_vm3 = vmmov %vm4580_vm12 }
 0x59f   :  { %v1164_v3 = vmax.f32 %v1160_v32, %v1156_v59  ;;  %vm4585_vm15 = vmmov %vm4584_vm3 }
 0x5a0   :  { %3100 = vmatprep.subr.msk.bf16.mxu1 %vm3592_vm8, %v3099_v53  ;;  %vm4586_vm12 = vmmov %vm4582_vm4 }
 0x5a1   :  { %v1129_v51 = vpop.permute.xlu0 %1128  ;;  %v1039_v52 = vpop.permute.xlu1 %1038  ;;  %v2818_v11 = vpack.c.bf16 %v1165_v48, %v1164_v3 }
 0x5a2   :  { %v3102_v7 = vpack.c.bf16 %v1039_v52, %v1035_v41  ;;  %v1183_v41 = vld [vmem:[%s4351_s6 + $0x58] sm:$0xff] }
 0x5a4   :  { %3103 = vmatpush3.bf16.msk.msra.mxu1 %vm3598_vm11, %v3102_v7 }
 0x5a5   :  { %v1141_v60 = vpop.permute.xlu0 %1140  ;;  %v1133_v62 = vpop.permute.xlu1 %1132 }
 0x5a6   :  { %v3105_v27 = vpack.c.bf16 %v1133_v62, %v1129_v51  ;;  %v1146_v14 = vsel %vm4584_vm3, %v1141_v60, -inf  ;;  %vm4587_vm3 = vcmask 785408  }
 0x5a7   :  { %1305 = vmatmul.mubr.f32.vlgmr.msra.gmra.mrb[8].mxu1 %v1172_v4  ;;  %v1162_v21 = vmax.f32 %v1146_v14, %v3700_v54  ;;  %v1411_v14 = vld [vmem:[%s4352_s7 + $0x8] sm:$0xff] }
 0x5a8   :  { %3106 = vmatprep.subr.msk.bf16.mxu0 %vm3613_vm7, %v3105_v27  ;;  %1309 = vmatprep.mubr.f32.mxu1 %v1176_v6 }
 0x5a9   :  { %v1153_v20 = vpop.permute.xlu0 %1152  ;;  %v1143_v8 = vpop.permute.xlu1 %1142  ;;  %3109 = vmatpush3.bf16.msk.msra.mxu0 %vm3613_vm7, %v3105_v27  ;;  %v1414_v27 = vld [vmem:[%s4353_s8] sm:$0xff] }
 0x5aa   :  { %v1147_v9 = vsel %vm4585_vm15, %v1143_v8, -inf  ;;  %2819 = vmatprep.subr.bf16.mxu0 %v2818_v11  ;;  %v1158_v18 = vsel %vm4586_vm12, %v1153_v20, -inf  ;;  %vm4588_vm15 = vmmov %vm4587_vm3  ;;  %v1410_v8 = vld [vmem:[%s4352_s7] sm:$0xff] }
 0x5ab   :  { %1310 = vmatmul.mubr.f32.gmra.mrb[10].mxu1 %v1175_v13  ;;  %v1163_v22 = vmax.f32 %v1147_v9, %v3702_v56  ;;  %v1166_v34 = vmax.f32 %v1162_v21, %v1158_v18  ;;  %v1181_v56 = vld [vmem:[%s4351_s6 + $0x48] sm:$0xff]  ;;  %vm4589_vm12 = vmmov %vm4587_vm3  ;;  %v1413_v13 = vld [vmem:[%s4352_s7 + $0x18] sm:$0xff]  ;;  %s4615_s6 = smov 116  }
 0x5ac   :  { %1314 = vmatprep.mubr.f32.mxu1 %v1179_v17  ;;  %v1412_v9 = vld [vmem:[%s4352_s7 + $0x10] sm:$0xff] }
 0x5ad   :  { %v1155_v29 = vpop.permute.xlu1 %1154  ;;  %2821 = vmatpush3.bf16.msra.mxu0 %v2818_v11  ;;  %v1415_v11 = vld [vmem:[%s4353_s8 + $0x8] sm:$0xff] }
 0x5ae   :  { %v1159_v1 = vsel %vm4582_vm4, %v1155_v29, -inf  ;;  %vm4591_vm4 = vcmp.ge.s32.totalorder %v3429_v16, 0 }
 0x5af   :  { %v1167_v36 = vmax.f32 %v1163_v22, %v1159_v1  ;;  %1315 = vmatmul.mubr.f32.gmra.mrb[12].mxu1 %v1178_v30 }
 0x5b0   :  { %1319 = vmatprep.mubr.f32.mxu1 %v1182_v33 }
 0x5b1   :  { %v2822_v54 = vpack.c.bf16 %v1167_v36, %v1166_v34 }
 0x5b3   :  { %2823 = vmatprep.subr.bf16.mxu0 %v2822_v54  ;;  %1320 = vmatmul.mubr.f32.gmra.mrb[14].mxu1 %v1181_v56 }
 0x5b4   :  { %2825 = vmatpush3.bf16.msra.mxu0 %v2822_v54 }
 0x5b5   :  { %2826 = vmatprep.subr.bf16.mxu0 %v3224_v40 }
 0x5b7   :  { %2654 = vmatmul.mubr.msk.f32.vlgmr.msra.gmra.mrb[8].mxu0 %vm4587_vm3, %v1177_v38  ;;  %vm4592_vm3 = vmmov %vm4591_vm4 }
 0x5b8   :  { %2656 = vmatprep.mubr.msk.f32.mxu0 %vm4588_vm15, %v1180_v39  ;;  %vm4593_vm15 = vcmp.lt.s32.totalorder %v3441_v25, 64 }
 0x5bb   :  { %2657 = vmatmul.mubr.msk.f32.gmra.mrb[10].mxu0 %vm4589_vm12, %v1183_v41  ;;  %vm4594_vm12 = vmmov %vm4593_vm15 }
 0x5bc   :  { %2667 = vmatprep.mubr.msk.f32.mxu0 %vm4534_vm6, %v3182_v0  ;;  %vm4590_vm6 = vcmask 261120  }
 0x67a   :  { %v2485_v44 = vpop.f32.mrb[8].mxu1 }
 0x67b   :  { %v2486_v45 = vpop.f32.mrb[9].mxu1 }
 0x67c   :  { %v2487_v46 = vadd.f32 %v2486_v45, %v2485_v44  ;;  %v1417_v45 = vld [vmem:[%s4353_s8 + $0x18] sm:$0xff] }
 0x67e   :  { %v2488_v47 = vpop.f32.mrb[10].mxu1 }
 0x67f   :  { %v2489_v51 = vpop.f32.mrb[11].mxu1 }
 0x680   :  { %v2490_v52 = vadd.f32 %v2489_v51, %v2488_v47 }
 0x682   :  { %v2491_v53 = vpop.f32.mrb[12].mxu1 }
 0x683   :  { %v2492_v58 = vpop.f32.mrb[13].mxu1 }
 0x684   :  { %v2493_v59 = vadd.f32 %v2492_v58, %v2491_v53 }
 0x686   :  { %v2494_v63 = vpop.f32.mrb[14].mxu1 }
 0x687   :  { %v2495_v32 = vpop.f32.mrb[15].mxu1 }
 0x688   :  { %v2496_v48 = vadd.f32 %v2495_v32, %v2494_v63 }
 0x68a   :  { %v2655_v3 = vpop.f32.mrb[8].mxu0 }
 0x68b   :  { %v1397_v60 = vadd.f32 %v2655_v3, %v2490_v52  ;;  %v1391_v62 = vpop.f32.mrb[9].mxu0 }
 0x68c   :  { %v1392_v7 = vadd.f32 %v2487_v46, %v1391_v62  ;;  %v1416_v46 = vld [vmem:[%s4353_s8 + $0x10] sm:$0xff]  ;;  %s4618_s8 = sld [smem:[#allocation6_spill]] }
 0x68d   :  { %1420 = vadd.xlane.f32.xlu1 %v1397_v60 }
 0x68e   :  { %v2658_v4 = vpop.f32.mrb[10].mxu0  ;;  %1418 = vadd.xlane.f32.xlu0 %v1392_v7 }
 0x68f   :  { %v1407_v0 = vadd.f32 %v2658_v4, %v2496_v48  ;;  %v1401_v6 = vpop.f32.mrb[11].mxu0 }
 0x690   :  { %v1402_v20 = vadd.f32 %v2493_v59, %v1401_v6 }
 0x692   :  { %1422 = vadd.xlane.f32.xlu0 %v1402_v20 }
 0x696   :  { %1424 = vadd.xlane.f32.xlu0 %v1407_v0 }
 0x69e   :  { %1464 = vperm.xlu1 %2932, %v1410_v8  }
 0x6a2   :  { %1488 = vperm.xlu1 %2932, %v1414_v27  }
 0x6a6   :  { %1493 = vperm.xlu1 %2932, %v1415_v11  }
 0x6aa   :  { %1479 = vperm.xlu1 %2932, %v1413_v13  }
 0x6ac   :  { %1469 = vperm.xlu0 %2931, %v1411_v14  }
 0x6b0   :  { %1474 = vperm.xlu0 %2931, %v1412_v9  }
 0x71a   :  { %v1421_v17 = vpop.xlane.xlu1 %1420 }
 0x71b   :  { %v1427_v18 = vmul.f32 0.0078125, %v1421_v17  ;;  %v1419_v21 = vpop.xlane.xlu0 %1418 }
 0x71c   :  { %v1426_v22 = vmul.f32 0.0078125, %v1419_v21 }
 0x71d   :  { %v1431_v29 = vsub.f32 %v1397_v60, %v1427_v18 }
 0x71e   :  { %v1430_v30 = vsub.f32 %v1392_v7, %v1426_v22  ;;  %v1465_v47 = vpop.permute.xlu1 %1464 }
 0x71f   :  { %v1423_v1 = vpop.xlane.xlu0 %1422  ;;  %v1435_v33 = vmul.f32 %v1431_v29, %v1431_v29 }
 0x720   :  { %v1428_v34 = vmul.f32 0.0078125, %v1423_v1  ;;  %v1434_v36 = vmul.f32 %v1430_v30, %v1430_v30 }
 0x721   :  { %1440 = vadd.xlane.f32.xlu0 %v1435_v33 }
 0x722   :  { %v1432_v54 = vsub.f32 %v1402_v20, %v1428_v34  ;;  %1438 = vadd.xlane.f32.xlu1 %v1434_v36  ;;  %v1489_v51 = vpop.permute.xlu1 %1488 }
 0x723   :  { %v1425_v56 = vpop.xlane.xlu0 %1424 }
 0x724   :  { %v1429_v38 = vmul.f32 0.0078125, %v1425_v56  ;;  %v1436_v39 = vmul.f32 %v1432_v54, %v1432_v54 }
 0x726   :  { %v1433_v41 = vsub.f32 %v1407_v0, %v1429_v38  ;;  %1442 = vadd.xlane.f32.xlu1 %v1436_v39  ;;  %v1494_v53 = vpop.permute.xlu1 %1493 }
 0x728   :  { %v1437_v44 = vmul.f32 %v1433_v41, %v1433_v41 }
 0x72a   :  { %1444 = vadd.xlane.f32.xlu0 %v1437_v44  ;;  %v1480_v59 = vpop.permute.xlu1 %1479 }
 0x72b   :  { %v1470_v52 = vpop.permute.xlu0 %1469 }
 0x72f   :  { %v1475_v58 = vpop.permute.xlu0 %1474 }
 0x737   :  { %1503 = vperm.xlu1 %2932, %v1417_v45  }
 0x740   :  { %1498 = vperm.xlu0 %2931, %v1416_v46  }
 0x7ae   :  { %v1441_v63 = vpop.xlane.xlu0 %1440 }
 0x7af   :  { %v1447_v32 = vmul.f32 0.0078125, %v1441_v63  ;;  %v1439_v48 = vpop.xlane.xlu1 %1438 }
 0x7b0   :  { %v1446_v3 = vmul.f32 0.0078125, %v1439_v48 }
 0x7b1   :  { %v1451_v60 = vadd.f32 1e-05, %v1447_v32 }
 0x7b2   :  { %v1450_v62 = vadd.f32 1e-05, %v1446_v3 }
 0x7b3   :  { %2941 = vrsqrt.f32 %v1451_v60  ;;  %v1443_v7 = vpop.xlane.xlu1 %1442 }
 0x7b4   :  { %2943 = vrsqrt.f32 %v1450_v62  ;;  %v1448_v4 = vmul.f32 0.0078125, %v1443_v7 }
 0x7b6   :  { %v1452_v0 = vadd.f32 1e-05, %v1448_v4 }
 0x7b7   :  { %v1445_v6 = vpop.xlane.xlu0 %1444 }
 0x7b8   :  { %2945 = vrsqrt.f32 %v1452_v0  ;;  %v1449_v20 = vmul.f32 0.0078125, %v1445_v6 }
 0x7ba   :  { %v1453_v8 = vadd.f32 1e-05, %v1449_v20 }
 0x7bc   :  { %2947 = vrsqrt.f32 %v1453_v8 }
 0x7bd   :  { %v2942_v27 = vpop.eup %2941 }
 0x7be   :  { %v2944_v11 = vpop.eup %2943  ;;  %v1459_v13 = vmul.f32 %v2942_v27, %v1431_v29  ;;  %v2128_v27 = vld [vmem:[%s4618_s8] sm:$0xff] }
 0x7bf   :  { %v1458_v14 = vmul.f32 %v2944_v11, %v1430_v30  ;;  %v1499_v44 = vpop.permute.xlu0 %1498  ;;  %v1504_v30 = vpop.permute.xlu1 %1503  ;;  %v2130_v11 = vld [vmem:[%s4618_s8 + $0x10] sm:$0xff] }
 0x7c0   :  { %v1483_v9 = vmul.f32 %v1470_v52, %v1459_v13  ;;  %v2129_v13 = vld [vmem:[%s4618_s8 + $0x8] sm:$0xff] }
 0x7c1   :  { %v1482_v17 = vmul.f32 %v1465_v47, %v1458_v14 }
 0x7c2   :  { %v2946_v18 = vpop.eup %2945  ;;  %v1507_v21 = vadd.f32 %v1494_v53, %v1483_v9  ;;  %v2131_v9 = vld [vmem:[%s4618_s8 + $0x18] sm:$0xff] }
 0x7c3   :  { %v1460_v22 = vmul.f32 %v2946_v18, %v1432_v54  ;;  %v1506_v1 = vadd.f32 %v1489_v51, %v1482_v17 }
 0x7c4   :  { %v1511_v33 = vmax.f32 %v1507_v21, 0.0 }
 0x7c5   :  { %v1484_v34 = vmul.f32 %v1475_v58, %v1460_v22  ;;  %v1510_v36 = vmax.f32 %v1506_v1, 0.0 }
 0x7c6   :  { %v2948_v56 = vpop.eup %2947  ;;  %1748 = vrot.lane.b32.xlu0 %v1511_v33, %s4568_s20 }
 0x7c7   :  { %1746 = vrot.lane.b32.xlu1 %v1510_v36, %s4568_s20  ;;  %v2827_v38 = vpack.c.bf16 %v1511_v33, %v1510_v36  ;;  %v1461_v39 = vmul.f32 %v2948_v56, %v1433_v41  ;;  %v1508_v45 = vadd.f32 %v1499_v44, %v1484_v34 }
 0x7c9   :  { %2828 = vmatpush3.bf16.msra.mxu0 %v2827_v38  ;;  %v1485_v29 = vmul.f32 %v1480_v59, %v1461_v39  ;;  %v3951_v46 = vmax.f32 %v1508_v45, 0.0 }
 0x7ca   :  { %1760 = vrot.lane.b32.xlu0 %v1511_v33, %s4570_s11  ;;  %2829 = vmatprep.subr.bf16.mxu0 %v3224_v40  ;;  %v1514_v40 = vld [vmem:[%s4354_s9] sm:$0xff]  ;;  %s4595_s9 = smov 2  }
 0x7cb   :  { %1758 = vrot.lane.b32.xlu1 %v1510_v36, %s4570_s11  ;;  %v1509_v54 = vadd.f32 %v1504_v30, %v1485_v29 }
 0x7cd   :  { %v3953_v47 = vmax.f32 %v1509_v54, 0.0 }
 0x7cf   :  { %1752 = vrot.lane.b32.xlu0 %v3953_v47, %s4568_s20  ;;  %1750 = vrot.lane.b32.xlu1 %v3951_v46, %s4568_s20  ;;  %v2830_v41 = vpack.c.bf16 %v3953_v47, %v3951_v46 }
 0x7d1   :  { %2831 = vmatpush3.bf16.msra.mxu0 %v2830_v41 }
 0x7d4   :  { %2668 = vmatmul.mubr.msk.f32.vlgmr.msra.gmra.mrb[12].mxu0 %vm4590_vm6, %v1514_v40  ;;  %vm4616_vm6 = vcmask 785408  }
 0x838   :  { %v1749_v51 = vpop.permute.xlu0 %1748 }
 0x839   :  { %v1755_v52 = vsel %vm4591_vm4, %v1749_v51, -inf  ;;  %v1747_v53 = vpop.permute.xlu1 %1746  ;;  %vm4629_vm4 = vnez %v4520_v57 }
 0x83a   :  { %v1754_v58 = vsel %vm4592_vm3, %v1747_v53, -inf  ;;  %v1771_v59 = vmax.f32 %v1755_v52, %v1511_v33 }
 0x83b   :  { %v1770_v32 = vmax.f32 %v1754_v58, %v1510_v36 }
 0x83c   :  { %v1761_v63 = vpop.permute.xlu0 %1760 }
 0x83d   :  { %v1767_v48 = vsel %vm4593_vm15, %v1761_v63, -inf  ;;  %v1759_v3 = vpop.permute.xlu1 %1758  ;;  %vm4631_vm15 = vmmov %vm4594_vm12 }
 0x83e   :  { %v1775_v60 = vmax.f32 %v1771_v59, %v1767_v48  ;;  %v1766_v62 = vsel %vm4594_vm12, %v1759_v3, -inf }
 0x83f   :  { %v1774_v7 = vmax.f32 %v1770_v32, %v1766_v62 }
 0x841   :  { %1778 = vst [vmem:[#allocation2 + $0x140] sm:$0xff] %v1774_v7  ;;  %v3973_v4 = vpack.c.bf16 %v1775_v60, %v1774_v7  ;;  %v4099_v34 = vpop.permute.xlu1 %1750  ;;  %v4101_v36 = vpop.permute.xlu0 %1752 }
 0x8a7   :  { %v3975_v0 = vpop.f32.mrb[12].mxu0 }
 0x8a8   :  { %1656 = vrot.lane.b32.xlu1 %v3975_v0, %s4595_s9  ;;  %1652 = vrot.lane.b32.xlu0 %v3975_v0, %s4596_s14  ;;  %v2669_v6 = vpop.f32.mrb[13].mxu0 }
 0x8ac   :  { %1592 = vrot.lane.b32.xlu1 %v3975_v0, %s4597_s15  ;;  %1588 = vrot.lane.b32.xlu0 %v3975_v0, %s4535_s23  ;;  %s4601_s23 = smov 111   ;;  %s4645_s15 = sld [smem:[#allocation11_spill]] }
 0x8b0   :  { %1596 = vrot.lane.b32.xlu1 %v3975_v0, %s4536_s24  ;;  %1660 = vrot.lane.b32.xlu0 %v3975_v0, %s4568_s20  ;;  %s4599_s20 = smov 121   ;;  %s4602_s24 = smov 120  }
 0x8b4   :  { %1666 = vrot.lane.b32.xlu1 %v3975_v0, %s4570_s11  ;;  %1600 = vrot.lane.b32.xlu0 %v3975_v0, %s4537_s5  ;;  %s4604_s5 = smov 110  }
 0x8b8   :  { %1604 = vrot.lane.b32.xlu1 %v3975_v0, %s4538_s1  ;;  %1670 = vrot.lane.b32.xlu0 %v3975_v0, %s4539_s25  ;;  %s4605_s1 = smov 119   ;;  %s4606_s25 = smov 8  }
 0x8bc   :  { %1674 = vrot.lane.b32.xlu1 %v3975_v0, %s4540_s2  ;;  %1608 = vrot.lane.b32.xlu0 %v3975_v0, %s4541_s22  ;;  %s4607_s2 = smov 109   ;;  %s4608_s22 = smov 118  }
 0x8c0   :  { %1714 = vrot.lane.b32.xlu1 %v3975_v0, %s4548_s18  ;;  %1678 = vrot.lane.b32.xlu0 %v3975_v0, %s4543_s27  ;;  %s4598_s18 = smov 112   ;;  %s4610_s27 = smov 108  }
 0x8c4   :  { %1612 = vrot.lane.b32.xlu1 %v3975_v0, %s4542_s28  ;;  %1718 = vrot.lane.b32.xlu0 %v3975_v0, %s4551_s21  ;;  %s4600_s21 = smov 10   ;;  %s4609_s28 = smov 7  }
 0x8c8   :  { %1682 = vrot.lane.b32.xlu1 %v3975_v0, %s4544_s0  ;;  %1616 = vrot.lane.b32.xlu0 %v3975_v0, %s4545_s29  ;;  %s4638_s0 = sld [smem:[#allocation9_spill]] }
 0x8cc   :  { %1722 = vrot.lane.b32.xlu1 %v3975_v0, %s4554_s16  ;;  %1686 = vrot.lane.b32.xlu0 %v3975_v0, %s4547_s4  ;;  %s4603_s16 = smov 9   ;;  %s4612_s4 = smov 117  }
 0x8d0   :  { %1620 = vrot.lane.b32.xlu1 %v3975_v0, %s4546_s3  ;;  %1726 = vrot.lane.b32.xlu0 %v3975_v0, %s4598_s18  ;;  %s4611_s3 = sld [smem:[#allocation5_spill]]  ;;  %s4633_s18 = sld [smem:[#allocation3_spill]] }
 0x8d4   :  { %1690 = vrot.lane.b32.xlu1 %v3975_v0, %s4599_s20  ;;  %1624 = vrot.lane.b32.xlu0 %v3975_v0, %s4600_s21  ;;  %s4619_s21 = sld [smem:[#allocation7_spill]] }
 0x8d6   :  { %v1783_v20 = vld [vmem:[%s4611_s3 + $0x8] sm:$0xff]  ;;  %v1784_v8 = vld [vmem:[%s4611_s3 + $0x10] sm:$0xff]  ;;  %v1782_v10 = vld [vmem:[%s4611_s3] sm:$0xff] }
 0x8d7   :  { %1914 = vmatprep.mubr.f32.mxu1 %v1783_v20  ;;  %2694 = vmatprep.mubr.msk.f32.mxu0 %vm4616_vm6, %v1784_v8  ;;  %v1786_v16 = vld [vmem:[%s4611_s3 + $0x20] sm:$0xff]  ;;  %v1785_v15 = vld [vmem:[%s4611_s3 + $0x18] sm:$0xff]  ;;  %v1787_v25 = vld [vmem:[%s4611_s3 + $0x28] sm:$0xff] }
 0x8d8   :  { %1730 = vrot.lane.b32.xlu1 %v3975_v0, %s4601_s23  ;;  %1694 = vrot.lane.b32.xlu0 %v3975_v0, %s4602_s24 }
 0x8da   :  { %v2021_v14 = vld [vmem:[%s4619_s21 + $0x8] sm:$0xff]  ;;  %v2023_v17 = vld [vmem:[%s4619_s21 + $0x18] sm:$0xff]  ;;  %v2020_v18 = vld [vmem:[%s4619_s21] sm:$0xff] }
 0x8db   :  { %v2022_v22 = vld [vmem:[%s4619_s21 + $0x10] sm:$0xff] }
 0x8dc   :  { %1628 = vrot.lane.b32.xlu1 %v3975_v0, %s4603_s16  ;;  %1734 = vrot.lane.b32.xlu0 %v3975_v0, %s4604_s5 }
 0x8e0   :  { %1698 = vrot.lane.b32.xlu1 %v3975_v0, %s4605_s1  ;;  %1632 = vrot.lane.b32.xlu0 %v3975_v0, %s4606_s25 }
 0x8e4   :  { %1738 = vrot.lane.b32.xlu1 %v3975_v0, %s4607_s2  ;;  %1702 = vrot.lane.b32.xlu0 %v3975_v0, %s4608_s22  ;;  %s4620_s22 = sld [smem:[#allocation8_spill]] }
 0x8e8   :  { %1636 = vrot.lane.b32.xlu1 %v3975_v0, %s4609_s28  ;;  %1742 = vrot.lane.b32.xlu0 %v3975_v0, %s4610_s27  ;;  %s4646_s28 = sld [smem:[#allocation12_spill]] }
 0x8ea   :  { %v2024_v21 = vld [vmem:[%s4620_s22] sm:$0xff]  ;;  %v2026_v1 = vld [vmem:[%s4620_s22 + $0x10] sm:$0xff]  ;;  %v2025_v33 = vld [vmem:[%s4620_s22 + $0x8] sm:$0xff] }
 0x8ec   :  { %1706 = vrot.lane.b32.xlu1 %v3975_v0, %s4612_s4  ;;  %1640 = vrot.lane.b32.xlu0 %v3975_v0, %s4613_s13 }
 0x8f0   :  { %1644 = vrot.lane.b32.xlu1 %v3975_v0, %s4614_s17  ;;  %1710 = vrot.lane.b32.xlu0 %v3975_v0, %s4615_s6 }
 0x8f4   :  { %1762 = vrot.lane.b32.xlu1 %v3951_v46, %s4570_s11  ;;  %1648 = vrot.lane.b32.xlu0 %v3975_v0, %s4617_s26  ;;  %s4644_s26 = sld [smem:[#allocation10_spill]] }
 0x8f8   :  { %2134 = vperm.xlu1 %2932, %v2128_v27   ;;  %1764 = vrot.lane.b32.xlu0 %v3953_v47, %s4570_s11 }
 0x8fc   :  { %2144 = vperm.xlu1 %2932, %v2130_v11   ;;  %2139 = vperm.xlu0 %2931, %v2129_v13  }
 0x900   :  { %2079 = vperm.xlu1 %2932, %v2021_v14   ;;  %2149 = vperm.xlu0 %2931, %v2131_v9  }
 0x904   :  { %2089 = vperm.xlu1 %2932, %v2023_v17   ;;  %2074 = vperm.xlu0 %2931, %v2020_v18  }
 0x908   :  { %2098 = vperm.xlu1 %2932, %v2024_v21   ;;  %2084 = vperm.xlu0 %2931, %v2022_v22  }
 0x90c   :  { %2108 = vperm.xlu1 %2932, %v2026_v1   ;;  %2103 = vperm.xlu0 %2931, %v2025_v33  }
 0x91a   :  { %v1657_v56 = vpop.permute.xlu1 %1656  ;;  %v1653_v38 = vpop.permute.xlu0 %1652 }
 0x91b   :  { %v3111_v45 = vpack.c.bf16 %v1657_v56, %v1653_v38 }
 0x91d   :  { %3112 = vmatprep.subr.msk.bf16.mxu1 %vm3434_vm9, %v3111_v45  ;;  %vm4623_vm9 = vnez %v4516_v42 }
 0x91e   :  { %v1593_v39 = vpop.permute.xlu1 %1592  ;;  %v1589_v44 = vpop.permute.xlu0 %1588 }
 0x91f   :  { %v3114_v54 = vpack.c.bf16 %v1593_v39, %v1589_v44 }
 0x921   :  { %3115 = vmatpush3.bf16.msk.msra.mxu1 %vm3444_vm10, %v3114_v54  ;;  %vm4624_vm10 = vnez %v4507_v12 }
 0x922   :  { %v1597_v29 = vpop.permute.xlu1 %1596  ;;  %v1661_v30 = vpop.permute.xlu0 %1660 }
 0x923   :  { %v3117_v51 = vpack.c.bf16 %v3975_v0, %v1661_v30 }
 0x925   :  { %3118 = vmatprep.subr.msk.bf16.mxu1 %vm3453_vm14, %v3117_v51  ;;  %vm4625_vm14 = vnez %v4511_v28  ;;  %v1789_v51 = vld [vmem:[%s4611_s3 + $0x38] sm:$0xff] }
 0x926   :  { %v1667_v41 = vpop.permute.xlu1 %1666  ;;  %v1601_v40 = vpop.permute.xlu0 %1600 }
 0x927   :  { %v3120_v58 = vpack.c.bf16 %v1601_v40, %v1597_v29 }
 0x929   :  { %3121 = vmatpush3.bf16.msk.msra.mxu1 %vm3464_vm5, %v3120_v58  ;;  %vm4626_vm5 = vnez %v4522_v2  ;;  %v1790_v58 = vld [vmem:[%s4611_s3 + $0x40] sm:$0xff] }
 0x92a   :  { %v1605_v52 = vpop.permute.xlu1 %1604  ;;  %v1671_v53 = vpop.permute.xlu0 %1670 }
 0x92b   :  { %v3123_v63 = vpack.c.bf16 %v1671_v53, %v1667_v41  ;;  %v1788_v53 = vld [vmem:[%s4611_s3 + $0x30] sm:$0xff] }
 0x92d   :  { %3124 = vmatprep.subr.msk.bf16.mxu1 %vm3474_vm13, %v3123_v63  ;;  %vm4627_vm13 = vnez %v4514_v35  ;;  %v1791_v63 = vld [vmem:[%s4611_s3 + $0x48] sm:$0xff] }
 0x92e   :  { %v1675_v23 = vpop.permute.xlu1 %1674  ;;  %v1609_v59 = vpop.permute.xlu0 %1608 }
 0x92f   :  { %v3126_v48 = vpack.c.bf16 %v1609_v59, %v1605_v52  ;;  %v2965_v52 = vld [vmem:[%s4633_s18] sm:$0xf]  ;;  %v1793_v59 = vld [vmem:[%s4611_s3 + $0x58] sm:$0xff] }
 0x931   :  { %3127 = vmatpush3.bf16.msk.msra.mxu1 %vm3482_vm1, %v3126_v48  ;;  %vm4621_vm1 = vnez %v4503_v61  ;;  %v2126_v48 = vld [vmem:[%s4638_s0 + $0x10] sm:$0xff] }
 0x932   :  { %v1715_v26 = vpop.permute.xlu1 %1714  ;;  %v1679_v32 = vpop.permute.xlu0 %1678 }
 0x933   :  { %v3129_v60 = vpack.c.bf16 %v1679_v32, %v1675_v23  ;;  %v1792_v23 = vld [vmem:[%s4611_s3 + $0x50] sm:$0xff]  ;;  %v2125_v32 = vld [vmem:[%s4638_s0 + $0x8] sm:$0xff] }
 0x935   :  { %3130 = vmatprep.subr.msk.bf16.mxu1 %vm3491_vm2, %v3129_v60  ;;  %vm4622_vm2 = vnez %v4505_v5 }
 0x936   :  { %v1613_v31 = vpop.permute.xlu1 %1612  ;;  %v1719_v3 = vpop.permute.xlu0 %1718 }
 0x937   :  { %v3132_v7 = vpack.c.bf16 %v1719_v3, %v1715_v26  ;;  %v2124_v26 = vld [vmem:[%s4638_s0] sm:$0xff] }
 0x939   :  { %3133 = vmatprep.subr.msk.bf16.mxu0 %vm4573_vm0, %v3132_v7 }
 0x93a   :  { %v1683_v37 = vpop.permute.xlu1 %1682  ;;  %v1617_v62 = vpop.permute.xlu0 %1616  ;;  %3136 = vmatpush3.bf16.msk.msra.mxu0 %vm4573_vm0, %v3132_v7  ;;  %vm4628_vm0 = vnez %v4518_v50  ;;  %v1756_v50 = vsel %vm4592_vm3, %v4099_v34, -inf }
 0x93b   :  { %v3138_v6 = vpack.c.bf16 %v1617_v62, %v1613_v31  ;;  %v1772_v45 = vmax.f32 %v1756_v50, %v3951_v46  ;;  %v2127_v31 = vld [vmem:[%s4638_s0 + $0x18] sm:$0xff]  ;;  %v2253_v50 = vld [vmem:[%s4645_s15] sm:$0xff] }
 0x93d   :  { %3139 = vmatpush3.bf16.msk.msra.mxu1 %vm4621_vm1, %v3138_v6 }
 0x93e   :  { %v1723_v43 = vpop.permute.xlu1 %1722  ;;  %v1687_v0 = vpop.permute.xlu0 %1686 }
 0x93f   :  { %v3141_v8 = vpack.c.bf16 %v1687_v0, %v1683_v37 }
 0x941   :  { %3142 = vmatprep.subr.msk.bf16.mxu1 %vm4622_vm2, %v3141_v8 }
 0x942   :  { %v1621_v49 = vpop.permute.xlu1 %1620  ;;  %v1727_v20 = vpop.permute.xlu0 %1726 }
 0x943   :  { %v3144_v11 = vpack.c.bf16 %v1727_v20, %v1723_v43 }
 0x945   :  { %3145 = vmatprep.subr.msk.bf16.mxu0 %vm4623_vm9, %v3144_v11 }
 0x946   :  { %v1691_v55 = vpop.permute.xlu1 %1690  ;;  %v1625_v27 = vpop.permute.xlu0 %1624  ;;  %3148 = vmatpush3.bf16.msk.msra.mxu0 %vm4623_vm9, %v3144_v11  ;;  %vm4640_vm9 = vcmask 31744  }
 0x947   :  { %v3150_v14 = vpack.c.bf16 %v1625_v27, %v1621_v49 }
 0x949   :  { %3151 = vmatpush3.bf16.msk.msra.mxu1 %vm4624_vm10, %v3150_v14  ;;  %vm4641_vm10 = vmmov %vm4640_vm9 }
 0x94a   :  { %v1731_v19 = vpop.permute.xlu1 %1730  ;;  %v1695_v13 = vpop.permute.xlu0 %1694 }
 0x94b   :  { %v3153_v17 = vpack.c.bf16 %v1695_v13, %v1691_v55 }
 0x94d   :  { %3154 = vmatprep.subr.msk.bf16.mxu1 %vm4625_vm14, %v3153_v17  ;;  %vm4642_vm14 = vmmov %vm4640_vm9 }
 0x94e   :  { %v1629_v61 = vpop.permute.xlu1 %1628  ;;  %v1735_v9 = vpop.permute.xlu0 %1734 }
 0x94f   :  { %v3156_v21 = vpack.c.bf16 %v1735_v9, %v1731_v19 }
 0x951   :  { %3157 = vmatprep.subr.msk.bf16.mxu0 %vm4626_vm5, %v3156_v21 }
 0x952   :  { %v1699_v5 = vpop.permute.xlu1 %1698  ;;  %v1633_v18 = vpop.permute.xlu0 %1632  ;;  %3160 = vmatpush3.bf16.msk.msra.mxu0 %vm4626_vm5, %v3156_v21  ;;  %vm4643_vm5 = vmmov %vm4640_vm9 }
 0x953   :  { %v3162_v1 = vpack.c.bf16 %v1633_v18, %v1629_v61 }
 0x955   :  { %3163 = vmatpush3.bf16.msk.msra.mxu1 %vm4627_vm13, %v3162_v1 }
 0x956   :  { %v1739_v42 = vpop.permute.xlu1 %1738  ;;  %v1703_v22 = vpop.permute.xlu0 %1702 }
 0x957   :  { %v3165_v56 = vpack.c.bf16 %v1703_v22, %v1699_v5 }
 0x959   :  { %3166 = vmatprep.subr.msk.bf16.mxu1 %vm4628_vm0, %v3165_v56 }
 0x95a   :  { %v1637_v12 = vpop.permute.xlu1 %1636  ;;  %v1743_v33 = vpop.permute.xlu0 %1742 }
 0x95b   :  { %v3168_v39 = vpack.c.bf16 %v1743_v33, %v1739_v42 }
 0x95d   :  { %3169 = vmatprep.subr.msk.bf16.mxu0 %vm3613_vm7, %v3168_v39 }
 0x95e   :  { %v1707_v28 = vpop.permute.xlu1 %1706  ;;  %v1641_v38 = vpop.permute.xlu0 %1640  ;;  %3172 = vmatpush3.bf16.msk.msra.mxu0 %vm3613_vm7, %v3168_v39  ;;  %vm4630_vm7 = vmmov %vm4592_vm3 }
 0x95f   :  { %2881 = vmatprep.subr.bf16.mxu0 %v3973_v4  ;;  %v3174_v44 = vpack.c.bf16 %v1641_v38, %v1637_v12  ;;  %v1757_v54 = vsel %vm4630_vm7, %v4101_v36, -inf }
 0x960   :  { %v1773_v34 = vmax.f32 %v1757_v54, %v3953_v47 }
 0x961   :  { %3175 = vmatpush3.bf16.msk.msra.mxu1 %vm4629_vm4, %v3174_v44  ;;  %v2027_v44 = vld [vmem:[%s4620_s22 + $0x18] sm:$0xff] }
 0x962   :  { %v1645_v2 = vpop.permute.xlu1 %1644  ;;  %v1711_v35 = vpop.permute.xlu0 %1710  ;;  %2883 = vmatpush3.bf16.msra.mxu0 %v3973_v4 }
 0x963   :  { %v3177_v24 = vpack.c.bf16 %v1711_v35, %v1707_v28  ;;  %v2251_v35 = vld [vmem:[%s4644_s26 + $0x10] sm:$0xff] }
 0x965   :  { %3178 = vmatprep.subr.msk.bf16.mxu1 %vm3592_vm8, %v3177_v24  ;;  %vm4632_vm8 = vmmov %vm4594_vm12 }
 0x966   :  { %v1763_v29 = vpop.permute.xlu1 %1762  ;;  %v1649_v30 = vpop.permute.xlu0 %1648  ;;  %vm4635_vm12 = vmmov %vm4616_vm6 }
 0x967   :  { %v1768_v57 = vsel %vm4631_vm15, %v1763_v29, -inf  ;;  %v3180_v4 = vpack.c.bf16 %v1649_v30, %v1645_v2  ;;  %vm4637_vm1 = vmmov %vm4635_vm12  ;;  %v2249_v2 = vld [vmem:[%s4644_s26] sm:$0xff]  ;;  %v2252_v29 = vld [vmem:[%s4644_s26 + $0x18] sm:$0xff] }
 0x968   :  { %v1776_v41 = vmax.f32 %v1772_v45, %v1768_v57  ;;  %vm4639_vm2 = vmmov %vm4637_vm1  ;;  %v2250_v45 = vld [vmem:[%s4644_s26 + $0x8] sm:$0xff] }
 0x969   :  { %3181 = vmatpush3.bf16.msk.msra.mxu1 %vm3598_vm11, %v3180_v4  ;;  %vm4634_vm11 = vcmask 1043456   ;;  %v2254_v30 = vld [vmem:[%s4645_s15 + $0x8] sm:$0xff] }
 0x96a   :  { %v1765_v40 = vpop.permute.xlu0 %1764  ;;  %vm4636_vm6 = vmmov %vm4634_vm11 }
 0x96b   :  { %v1769_v46 = vsel %vm4632_vm8, %v1765_v40, -inf }
 0x96c   :  { %v1777_v36 = vmax.f32 %v1773_v34, %v1769_v46  ;;  %1915 = vmatmul.mubr.f32.vlgmr.msra.gmra.mrb[16].mxu1 %v1782_v10 }
 0x96d   :  { %1919 = vmatprep.mubr.f32.mxu1 %v1786_v16 }
 0x96e   :  { %v2884_v47 = vpack.c.bf16 %v1777_v36, %v1776_v41 }
 0x970   :  { %2885 = vmatprep.subr.bf16.mxu0 %v2884_v47  ;;  %1920 = vmatmul.mubr.f32.gmra.mrb[18].mxu1 %v1785_v15 }
 0x971   :  { %2887 = vmatpush3.bf16.msra.mxu0 %v2884_v47  ;;  %1924 = vmatprep.mubr.f32.mxu1 %v1789_v51 }
 0x972   :  { %2700 = vmatprep.subr.msk.mxu0 %vm4634_vm11, %v2965_v52 }
 0x974   :  { %2695 = vmatmul.mubr.msk.f32.vlgmr.msra.gmra.mrb[14].mxu0 %vm4635_vm12, %v1787_v25  ;;  %1925 = vmatmul.mubr.f32.gmra.mrb[20].mxu1 %v1788_v53 }
 0x975   :  { %2701 = vmatpush3.msk.msra.mxu0 %vm4636_vm6, %v2965_v52  ;;  %2697 = vmatprep.mubr.msk.f32.mxu0 %vm4637_vm1, %v1790_v58 }
 0x976   :  { %1929 = vmatprep.mubr.f32.mxu1 %v1792_v23 }
 0x977   :  { %v2135_v9 = vpop.permute.xlu1 %2134 }
 0x978   :  { %2698 = vmatmul.mubr.msk.f32.gmra.mrb[16].mxu0 %vm4639_vm2, %v1793_v59  ;;  %1930 = vmatmul.mubr.f32.gmra.mrb[22].mxu1 %v1791_v63 }
 0x979   :  { %2702 = vmatprep.mubr.msk.f32.mxu0 %vm4640_vm9, %v2124_v26 }
 0x97b   :  { %v2140_v5 = vpop.permute.xlu0 %2139  ;;  %v2145_v33 = vpop.permute.xlu1 %2144 }
 0x97c   :  { %2703 = vmatmul.mubr.msk.f32.vlgmr.msra.gmra.mrb[18].mxu0 %vm4641_vm10, %v2125_v32 }
 0x97d   :  { %2705 = vmatprep.mubr.msk.f32.mxu0 %vm4642_vm14, %v2126_v48 }
 0x97f   :  { %v2150_v38 = vpop.permute.xlu0 %2149  ;;  %v4253_v24 = vpop.permute.xlu1 %2079 }
 0x980   :  { %2706 = vmatmul.mubr.msk.f32.gmra.mrb[20].mxu0 %vm4643_vm5, %v2127_v31 }
 0x983   :  { %v4255_v54 = vpop.permute.xlu1 %2089  ;;  %v4257_v57 = vpop.permute.xlu0 %2074 }
 0x987   :  { %v4259_v41 = vpop.permute.xlu1 %2098  ;;  %v4261_v34 = vpop.permute.xlu0 %2084 }
 0x98b   :  { %v4263_v40 = vpop.permute.xlu1 %2108  ;;  %v4265_v4 = vpop.permute.xlu0 %2103 }
 0xa3f   :  { %v2550_v3 = vpop.f32.mrb[16].mxu1 }
 0xa40   :  { %v2551_v60 = vpop.f32.mrb[17].mxu1 }
 0xa41   :  { %v2552_v37 = vadd.f32 %v2551_v60, %v2550_v3 }
 0xa43   :  { %v2553_v62 = vpop.f32.mrb[18].mxu1 }
 0xa44   :  { %v2554_v7 = vpop.f32.mrb[19].mxu1 }
 0xa45   :  { %v2555_v43 = vadd.f32 %v2554_v7, %v2553_v62 }
 0xa47   :  { %v2696_v0 = vpop.f32.mrb[14].mxu0  ;;  %v2556_v20 = vpop.f32.mrb[20].mxu1 }
 0xa48   :  { %v4220_v6 = vadd.f32 %v2696_v0, %v2555_v43  ;;  %v2001_v49 = vpop.f32.mrb[15].mxu0  ;;  %v2557_v55 = vpop.f32.mrb[21].mxu1 }
 0xa49   :  { %v4222_v8 = vadd.f32 %v2552_v37, %v2001_v49  ;;  %v2558_v27 = vadd.f32 %v2557_v55, %v2556_v20 }
 0xa4b   :  { %v2699_v11 = vpop.f32.mrb[16].mxu0  ;;  %v2559_v19 = vpop.f32.mrb[22].mxu1 }
 0xa4c   :  { %v2011_v13 = vpop.f32.mrb[17].mxu0  ;;  %v2560_v61 = vpop.f32.mrb[23].mxu1 }
 0xa4d   :  { %v4224_v14 = vadd.f32 %v2558_v27, %v2011_v13  ;;  %v2561_v17 = vadd.f32 %v2560_v61, %v2559_v19  ;;  %v2255_v19 = vld [vmem:[%s4645_s15 + $0x10] sm:$0xff]  ;;  %v2256_v13 = vld [vmem:[%s4645_s15 + $0x18] sm:$0xff] }
 0xa4f   :  { %v2704_v18 = vpop.f32.mrb[18].mxu0  ;;  %v4226_v21 = vadd.f32 %v2699_v11, %v2561_v17 }
 0xa50   :  { %v2236_v42 = vadd.f32 %v2704_v18, %v2140_v5  ;;  %v2230_v22 = vpop.f32.mrb[19].mxu0 }
 0xa51   :  { %v2231_v1 = vadd.f32 %v2230_v22, %v2135_v9 }
 0xa52   :  { %2259 = vadd.xlane.f32.xlu1 %v2236_v42 }
 0xa53   :  { %v2707_v12 = vpop.f32.mrb[20].mxu0  ;;  %2257 = vadd.xlane.f32.xlu0 %v2231_v1 }
 0xa54   :  { %v2240_v56 = vpop.f32.mrb[21].mxu0  ;;  %v2246_v39 = vadd.f32 %v2707_v12, %v2150_v38 }
 0xa55   :  { %v2241_v28 = vadd.f32 %v2240_v56, %v2145_v33 }
 0xa56   :  { %2028 = vadd.xlane.f32.xlu1 %v4222_v8 }
 0xa57   :  { %2261 = vadd.xlane.f32.xlu0 %v2241_v28 }
 0xa5a   :  { %2263 = vadd.xlane.f32.xlu1 %v2246_v39 }
 0xa5b   :  { %2030 = vadd.xlane.f32.xlu0 %v4220_v6 }
 0xa5e   :  { %2034 = vadd.xlane.f32.xlu1 %v4226_v21 }
 0xa5f   :  { %2032 = vadd.xlane.f32.xlu0 %v4224_v14 }
 0xa6f   :  { %2303 = vperm.xlu1 %2932, %v2249_v2  }
 0xa73   :  { %2313 = vperm.xlu1 %2932, %v2251_v35  }
 0xa75   :  { %2113 = vperm.xlu0 %2931, %v2027_v44  }
 0xa77   :  { %2327 = vperm.xlu1 %2932, %v2253_v50  }
 0xa79   :  { %2308 = vperm.xlu0 %2931, %v2250_v45  }
 0xa7d   :  { %2318 = vperm.xlu0 %2931, %v2252_v29  }
 0xa81   :  { %2332 = vperm.xlu0 %2931, %v2254_v30  }
 0xadf   :  { %v2260_v10 = vpop.xlane.xlu1 %2259 }
 0xae0   :  { %v2266_v46 = vmul.f32 0.0078125, %v2260_v10  ;;  %v2258_v16 = vpop.xlane.xlu0 %2257 }
 0xae1   :  { %v2265_v36 = vmul.f32 0.0078125, %v2258_v16 }
 0xae2   :  { %v4267_v47 = vsub.f32 %v2236_v42, %v2266_v46 }
 0xae3   :  { %v4269_v15 = vsub.f32 %v2231_v1, %v2265_v36  ;;  %v2029_v51 = vpop.xlane.xlu1 %2028 }
 0xae4   :  { %v2036_v25 = vmul.f32 0.0078125, %v2029_v51  ;;  %v2262_v52 = vpop.xlane.xlu0 %2261  ;;  %v2274_v53 = vmul.f32 %v4267_v47, %v4267_v47 }
 0xae5   :  { %v2267_v58 = vmul.f32 0.0078125, %v2262_v52  ;;  %v2273_v23 = vmul.f32 %v4269_v15, %v4269_v15 }
 0xae6   :  { %v4276_v59 = vsub.f32 %v4222_v8, %v2036_v25  ;;  %2279 = vadd.xlane.f32.xlu0 %v2274_v53 }
 0xae7   :  { %v2264_v63 = vpop.xlane.xlu1 %2263  ;;  %2277 = vadd.xlane.f32.xlu1 %v2273_v23  ;;  %v4278_v26 = vsub.f32 %v2241_v28, %v2267_v58 }
 0xae8   :  { %v2268_v32 = vmul.f32 0.0078125, %v2264_v63  ;;  %v2031_v48 = vpop.xlane.xlu0 %2030  ;;  %v2044_v31 = vmul.f32 %v4276_v59, %v4276_v59 }
 0xae9   :  { %v2037_v3 = vmul.f32 0.0078125, %v2031_v48  ;;  %v2275_v49 = vmul.f32 %v4278_v26, %v4278_v26 }
 0xaea   :  { %v4282_v60 = vsub.f32 %v2246_v39, %v2268_v32  ;;  %2048 = vadd.xlane.f32.xlu0 %v2044_v31 }
 0xaeb   :  { %v2035_v37 = vpop.xlane.xlu1 %2034  ;;  %v4285_v62 = vsub.f32 %v4220_v6, %v2037_v3 }
 0xaec   :  { %v2039_v7 = vmul.f32 0.0078125, %v2035_v37  ;;  %v2033_v43 = vpop.xlane.xlu0 %2032  ;;  %v2276_v0 = vmul.f32 %v4282_v60, %v4282_v60 }
 0xaed   :  { %v2038_v20 = vmul.f32 0.0078125, %v2033_v43  ;;  %v2045_v6 = vmul.f32 %v4285_v62, %v4285_v62 }
 0xaee   :  { %2283 = vadd.xlane.f32.xlu1 %v2276_v0  ;;  %2281 = vadd.xlane.f32.xlu0 %v2275_v49  ;;  %v4295_v55 = vsub.f32 %v4226_v21, %v2039_v7 }
 0xaef   :  { %v4292_v8 = vsub.f32 %v4224_v14, %v2038_v20  ;;  %v2304_v9 = vpop.permute.xlu1 %2303 }
 0xaf0   :  { %v2047_v11 = vmul.f32 %v4295_v55, %v4295_v55 }
 0xaf1   :  { %v2046_v27 = vmul.f32 %v4292_v8, %v4292_v8 }
 0xaf2   :  { %2050 = vadd.xlane.f32.xlu1 %v2045_v6 }
 0xaf3   :  { %2052 = vadd.xlane.f32.xlu0 %v2046_v27  ;;  %v2314_v5 = vpop.permute.xlu1 %2313 }
 0xaf4   :  { %v4309_v14 = vpop.permute.xlu0 %2113 }
 0xaf6   :  { %2054 = vadd.xlane.f32.xlu1 %v2047_v11 }
 0xaf7   :  { %v2328_v21 = vpop.permute.xlu1 %2327 }
 0xaf8   :  { %v2309_v61 = vpop.permute.xlu0 %2308 }
 0xafc   :  { %v4311_v17 = vpop.permute.xlu0 %2318 }
 0xb00   :  { %v4313_v18 = vpop.permute.xlu0 %2332 }
 0xb07   :  { %2337 = vperm.xlu1 %2932, %v2255_v19  }
 0xb09   :  { %2342 = vperm.xlu0 %2931, %v2256_v13  }
 0xb73   :  { %v2280_v42 = vpop.xlane.xlu0 %2279 }
 0xb74   :  { %v2278_v22 = vpop.xlane.xlu1 %2277  ;;  %v2286_v56 = vmul.f32 0.0078125, %v2280_v42 }
 0xb75   :  { %v2285_v1 = vmul.f32 0.0078125, %v2278_v22 }
 0xb76   :  { %v2290_v35 = vadd.f32 1e-05, %v2286_v56 }
 0xb77   :  { %v2289_v12 = vadd.f32 1e-05, %v2285_v1  ;;  %v2049_v33 = vpop.xlane.xlu0 %2048 }
 0xb78   :  { %v2056_v28 = vmul.f32 0.0078125, %v2049_v33 }
 0xb79   :  { %2949 = vrsqrt.f32 %v2289_v12 }
 0xb7a   :  { %v2060_v38 = vadd.f32 1e-05, %v2056_v28 }
 0xb7b   :  { %v2284_v39 = vpop.xlane.xlu1 %2283  ;;  %v2282_v2 = vpop.xlane.xlu0 %2281 }
 0xb7c   :  { %2951 = vrsqrt.f32 %v2060_v38  ;;  %v2288_v44 = vmul.f32 0.0078125, %v2284_v39  ;;  %v2287_v50 = vmul.f32 0.0078125, %v2282_v2 }
 0xb7d   :  { %2953 = vrsqrt.f32 %v2290_v35 }
 0xb7e   :  { %v2291_v45 = vadd.f32 1e-05, %v2287_v50  ;;  %v2292_v29 = vadd.f32 1e-05, %v2288_v44 }
 0xb7f   :  { %v2051_v30 = vpop.xlane.xlu1 %2050 }
 0xb80   :  { %v2057_v10 = vmul.f32 0.0078125, %v2051_v30  ;;  %v2053_v46 = vpop.xlane.xlu0 %2052  ;;  %2955 = vrsqrt.f32 %v2291_v45 }
 0xb81   :  { %v2058_v16 = vmul.f32 0.0078125, %v2053_v46  ;;  %2957 = vrsqrt.f32 %v2292_v29 }
 0xb82   :  { %v2061_v36 = vadd.f32 1e-05, %v2057_v10 }
 0xb83   :  { %v2950_v51 = vpop.eup %2949  ;;  %v2062_v25 = vadd.f32 1e-05, %v2058_v16  ;;  %v2055_v52 = vpop.xlane.xlu1 %2054 }
 0xb84   :  { %2959 = vrsqrt.f32 %v2061_v36  ;;  %v2059_v53 = vmul.f32 0.0078125, %v2055_v52  ;;  %v2297_v58 = vmul.f32 %v2950_v51, %v4269_v15 }
 0xb85   :  { %2961 = vrsqrt.f32 %v2062_v25 }
 0xb86   :  { %v2952_v23 = vpop.eup %2951  ;;  %v2063_v63 = vadd.f32 1e-05, %v2059_v53  ;;  %v2321_v48 = vmul.f32 %v2304_v9, %v2297_v58 }
 0xb87   :  { %v2068_v32 = vmul.f32 %v2952_v23, %v4276_v59  ;;  %v2954_v3 = vpop.eup %2953 }
 0xb88   :  { %2963 = vrsqrt.f32 %v2063_v63  ;;  %v2298_v0 = vmul.f32 %v2954_v3, %v4267_v47  ;;  %v2345_v49 = vadd.f32 %v2328_v21, %v2321_v48  ;;  %v2343_v56 = vpop.permute.xlu0 %2342 }
 0xb89   :  { %v2092_v31 = vmul.f32 %v4257_v57, %v2068_v32 }
 0xb8a   :  { %v2956_v37 = vpop.eup %2955  ;;  %v2322_v13 = vmul.f32 %v2309_v61, %v2298_v0  ;;  %v2338_v61 = vpop.permute.xlu1 %2337 }
 0xb8b   :  { %v2116_v7 = vadd.f32 %v4259_v41, %v2092_v31  ;;  %v2958_v43 = vpop.eup %2957  ;;  %v2299_v15 = vmul.f32 %v2956_v37, %v4278_v26 }
 0xb8c   :  { %v2300_v41 = vmul.f32 %v2958_v43, %v4282_v60 }
 0xb8d   :  { %v2120_v20 = vmax.f32 %v2116_v7, 0.0  ;;  %v2323_v21 = vmul.f32 %v2314_v5, %v2299_v15 }
 0xb8e   :  { %v2960_v6 = vpop.eup %2959  ;;  %v2324_v1 = vmul.f32 %v4311_v17, %v2300_v41 }
 0xb8f   :  { %v2962_v27 = vpop.eup %2961  ;;  %v2069_v11 = vmul.f32 %v2960_v6, %v4285_v62  ;;  %v2349_v59 = vadd.f32 %v2345_v49, %v2120_v20  ;;  %v2347_v5 = vadd.f32 %v2338_v61, %v2323_v21 }
 0xb90   :  { %v2070_v19 = vmul.f32 %v2962_v27, %v4292_v8  ;;  %v2346_v8 = vadd.f32 %v4313_v18, %v2322_v13 }
 0xb91   :  { %v2093_v57 = vmul.f32 %v4253_v24, %v2069_v11  ;;  %v2353_v9 = vmax.f32 %v2349_v59, 0.0 }
 0xb92   :  { %v2964_v42 = vpop.eup %2963  ;;  %v2094_v47 = vmul.f32 %v4261_v34, %v2070_v19 }
 0xb93   :  { %v2117_v22 = vadd.f32 %v4265_v4, %v2093_v57  ;;  %2357 = vst [vmem:[%s4646_s28] sm:$0xff] %v2353_v9  ;;  %v2071_v26 = vmul.f32 %v2964_v42, %v4295_v55  ;;  %v2348_v55 = vadd.f32 %v2343_v56, %v2324_v1 }
 0xb94   :  { %v2118_v62 = vadd.f32 %v4263_v40, %v2094_v47 }
 0xb95   :  { %v2121_v24 = vmax.f32 %v2117_v22, 0.0  ;;  %v2095_v60 = vmul.f32 %v4255_v54, %v2071_v26 }
 0xb96   :  { %v2122_v34 = vmax.f32 %v2118_v62, 0.0 }
 0xb97   :  { %v2350_v12 = vadd.f32 %v2346_v8, %v2121_v24  ;;  %v2119_v4 = vadd.f32 %v4309_v14, %v2095_v60 }
 0xb98   :  { %v2351_v33 = vadd.f32 %v2347_v5, %v2122_v34 }
 0xb99   :  { %v2354_v28 = vmax.f32 %v2350_v12, 0.0  ;;  %v2123_v38 = vmax.f32 %v2119_v4, 0.0 }
 0xb9a   :  { %v2355_v39 = vmax.f32 %v2351_v33, 0.0 }
 0xb9b   :  { %2358 = vst [vmem:[%s4646_s28 + $0x8] sm:$0xff] %v2354_v28  ;;  %v2352_v40 = vadd.f32 %v2348_v55, %v2123_v38 }
 0xb9c   :  { %2359 = vst [vmem:[%s4646_s28 + $0x10] sm:$0xff] %v2355_v39 }
 0xb9d   :  { %v2356_v54 = vmax.f32 %v2352_v40, 0.0 }
 0xb9f   :  { %2360 = vst [vmem:[%s4646_s28 + $0x18] sm:$0xff] %v2356_v54 }

</bundles_post_ra>
